<compile_context>
chip_gen: v5e
topology: v5e:2x2
jax: 0.10.0
libtpu: 0.0.40
codegen_flags: <defaults>
</compile_context>

<pallas_src>
import jax
import jax.numpy as jnp
from jax.experimental import pallas as pl
from jax.experimental.pallas import tpu as pltpu

# ----- hyper-parameters (mirror Goal_example_model.__init__ with a small config) -----
INPUT_FEAT = 2
OUTPUT_FEAT = 5            # LSTM hidden / encoded feature size
SEQ_LEN = 8
PRED_SEQ_LEN = 12
NON_LOCAL_LOOP = 3
ENC_PAST_SIZE = 32         # config['enc_past_size']        = [32]
NON_LOCAL_SIZE = 32        # config['non_local_*_size']     = [32]
OUT_HID1, OUT_HID2 = 64, 32  # out_mus/out_sigma/out_corr hidden sizes [64, 32]

LW = 512                   # lane width of the packed parameter buffer (4 gates x 128 lanes)


def _pad8(n):
    return -(-n // 8) * 8


# ------------------------- packed parameter buffer layout (static) -------------------------
_LAYOUT_ENTRIES = [
    # name, rows, cols (as stored inside the packed buffer)
    ("te_w1", INPUT_FEAT, ENC_PAST_SIZE),
    ("te_b1", 1, ENC_PAST_SIZE),
    ("te_w2", ENC_PAST_SIZE, OUTPUT_FEAT),
    ("te_b2", 1, OUTPUT_FEAT),
    ("ew_ih", OUTPUT_FEAT, LW),            # gate-padded: gate g at lanes [128g, 128g+F)
    ("ew_hh", OUTPUT_FEAT, LW),
    ("e_b", 1, LW),
    ("nl_w1", OUTPUT_FEAT, 3 * NON_LOCAL_SIZE),
    ("nl_b1", 1, 3 * NON_LOCAL_SIZE),
    ("nl_w2", 3 * NON_LOCAL_SIZE, 2 * 128 + OUTPUT_FEAT),   # theta@0, phi@128, g@256
    ("nl_b2", 1, 2 * 128 + OUTPUT_FEAT),
    ("dw_h", OUTPUT_FEAT, LW),             # dec W_ih rows for h_inp, gate-padded
    ("dw_a", 2, LW),                       # dec W_ih rows for a, gate-padded
    ("dw_hh", OUTPUT_FEAT, LW),
    ("d_b", 1, LW),
    ("o_w1", OUTPUT_FEAT, 3 * OUT_HID1),   # [mu | sigma | corr] hidden-1
    ("o_b1", 1, 3 * OUT_HID1),
    ("o_a1", 1, 3 * OUT_HID1),             # per-lane PReLU slope (layer 1)
    ("o_w2", 3 * OUT_HID1, 3 * OUT_HID2),  # block-diagonal
    ("o_b2", 1, 3 * OUT_HID2),
    ("o_a2", 1, 3 * OUT_HID2),             # per-lane PReLU slope (layer 2)
    ("o_w3", 3 * OUT_HID2, OUTPUT_FEAT),   # block-diag, output cols [mu(2)|sig(2)|corr(1)]
    ("o_b3", 1, OUTPUT_FEAT),
]

LAYOUT = {}
_off = 0
for _name, _r, _c in _LAYOUT_ENTRIES:
    LAYOUT[_name] = (_off, _r, _c)
    _off += _pad8(_r)
PACK_ROWS = _pad8(_off)


# ------------------------------------ the kernel ------------------------------------
def goal_example_kernel(v_ref, mask_ref, noise_ref, pbuf_ref, vpred_ref, apred_ref):
    F = OUTPUT_FEAT
    Bp = mask_ref.shape[0]                      # padded batch (multiple of 8)
    T = v_ref.shape[0] // Bp
    PRED = noise_ref.shape[0] // Bp

    def w(name):
        off, r, c = LAYOUT[name]
        return pbuf_ref[pl.ds(off, r), pl.ds(0, c)]

    def dot(x, y):
        return jnp.dot(x, y, preferred_element_type=jnp.float32)

    def lstm_step(gates, c):
        # torch gate order i, f, g, o; each gate lives at a 128-lane-aligned block.
        i_g = jax.nn.sigmoid(gates[:, 0:F])
        f_g = jax.nn.sigmoid(gates[:, 128:128 + F])
        g_g = jnp.tanh(gates[:, 256:256 + F])
        o_g = jax.nn.sigmoid(gates[:, 384:384 + F])
        c_new = f_g * c + i_g * g_g
        return o_g * jnp.tanh(c_new), c_new

    def prelu(x, a):                            # a is a per-lane slope row (1, lanes)
        return jnp.where(x >= 0.0, x, x * a)

    mask = mask_ref[...]                        # (Bp, Bp)
    a0 = v_ref[pl.ds((T - 1) * Bp, Bp), :]      # a_0 = v[:, -1, :2]   (Bp, 2)

    # ---------------- encoder: batched traj_enc + batched input-gate contribution ----------------
    x = v_ref[...]                                                # (T*Bp, 2)
    h1 = jnp.maximum(dot(x, w("te_w1")) + w("te_b1"), 0.0)        # (T*Bp, 32)
    x_enc = dot(h1, w("te_w2")) + w("te_b2")                      # (T*Bp, F)
    gx_all = dot(x_enc, w("ew_ih")) + w("e_b")                    # (T*Bp, 512), x@W_ih + b

    ew_hh = w("ew_hh")
    h = jnp.zeros((Bp, F), jnp.float32)                           # init_hidden -> zeros
    c = jnp.zeros((Bp, F), jnp.float32)
    for t in range(T):                                            # statically unrolled (T = 8)
        gates = gx_all[t * Bp:(t + 1) * Bp, :] + dot(h, ew_hh)
        h, c = lstm_step(gates, c)
    h_inp = h                                                     # final hidden state (Bp, F)

    # ---------------- non-local social pooling (fused theta/phi/g), 3 iterations ----------------
    nl_w1, nl_b1 = w("nl_w1"), w("nl_b1")
    nl_w2, nl_b2 = w("nl_w2"), w("nl_b2")
    for _ in range(NON_LOCAL_LOOP):
        z = jnp.maximum(dot(h_inp, nl_w1) + nl_b1, 0.0)           # (Bp, 96)
        tpg = dot(z, nl_w2) + nl_b2                               # (Bp, 261)
        theta_x = tpg[:, 0:F]                                     # lane offsets 0 / 128 / 256
        phi_x = tpg[:, 128:128 + F]
        g_x = tpg[:, 256:256 + F]
        f = jax.lax.dot_general(theta_x, phi_x, (((1,), (1,)), ((), ())),
                                preferred_element_type=jnp.float32)   # theta @ phi.T  (Bp, Bp)
        f = f - jnp.max(f, axis=-1, keepdims=True)                # softmax(dim=-1)
        e = jnp.exp(f)
        fw = e * pl.reciprocal(jnp.sum(e, axis=-1, keepdims=True), approx=True)
        fw = fw * mask
        # F.normalize(p=1, dim=1): per-row L1 normalize with eps clamp
        denom = jnp.maximum(jnp.sum(jnp.abs(fw), axis=1, keepdims=True), 1e-12)
        fw = fw * pl.reciprocal(denom, approx=True)
        h_inp = dot(fw, g_x) + h_inp

    # ---------------- autoregressive decoder (pred_seq_len steps) ----------------
    apred_ref[pl.ds(0, Bp), :] = a0                               # a_list[0] = a_0

    dw_a, dw_hh = w("dw_a"), w("dw_hh")
    gates_hinp = dot(h_inp, w("dw_h")) + w("d_b")                 # constant across the rollout

    o_w1, o_b1, o_a1 = w("o_w1"), w("o_b1"), w("o_a1")
    o_w2, o_b2, o_a2 = w("o_w2"), w("o_b2"), w("o_a2")
    o_w3, o_b3 = w("o_w3"), w("o_b3")

    col2 = jax.lax.broadcasted_iota(jnp.int32, (Bp, 2), 1)        # lane index helper

    h_t = jnp.zeros((Bp, F), jnp.float32)                         # init_hidden at i == 0
    c_t = jnp.zeros((Bp, F), jnp.float32)
    a = a0
    for i in range(PRED):                                         # statically unrolled (12)
        # dec_lstm step on inp = cat([h_inp, a], -1)
        gates = gates_hinp + dot(a, dw_a) + dot(h_t, dw_hh)
        h_t, c_t = lstm_step(gates, c_t)

        # fused out_mus / out_sigma / out_corr head -> (Bp, 5) = [mu(2)|log_sigma(2)|corr_raw(1)]
        y1 = prelu(dot(h_t, o_w1) + o_b1, o_a1)                   # (Bp, 192)
        y2 = prelu(dot(y1, o_w2) + o_b2, o_a2)                    # (Bp, 96)
        out5 = dot(y2, o_w3) + o_b3                               # (Bp, 5)

        vpred_ref[pl.ds(i * Bp, Bp), :] = out5                    # single store of V_pred[i]

        # GMM2D(log_pis=1, mus, log_sigmas, tanh(corr)).rsample()  -- single component
        mus = out5[:, 0:2]
        sigmas = jnp.exp(out5[:, 2:4])
        rho = jnp.tanh(out5[:, 4:5])
        omr = jnp.clip(1.0 - rho * rho, 1e-5, 1.0)
        eps = noise_ref[pl.ds(i * Bp, Bp), :]                     # (Bp, 2) ~ N(0, 1)
        e0 = eps[:, 0:1]
        e1 = eps[:, 1:2]
        zmix = jnp.where(col2 == 0, e0, rho * e0 + jnp.sqrt(omr) * e1)   # (Bp, 2)
        a = mus + sigmas * zmix
        apred_ref[pl.ds((i + 1) * Bp, Bp), :] = a                 # single store of a_list[i+1]


# ------------------------------------ parameters ------------------------------------
def init_params(key):
    """Deterministic synthetic weights (logical layout: W is (in, out), b is (1, out))."""
    keys = iter(jax.random.split(key, 64))

    def lin(fi, fo, wscale=0.2, bscale=0.05):
        wm = jax.random.normal(next(keys), (fi, fo), jnp.float32) * wscale
        bm = jax.random.normal(next(keys), (1, fo), jnp.float32) * bscale
        return wm, bm

    p = {}
    # traj_enc: MLP(2 -> 32 -> 5), relu
    p["te_w1"], p["te_b1"] = lin(INPUT_FEAT, ENC_PAST_SIZE)
    p["te_w2"], p["te_b2"] = lin(ENC_PAST_SIZE, OUTPUT_FEAT)
    # enc_lstm: LSTM(5, 5)  (bias_ih + bias_hh folded into one bias)
    wih, bih = lin(OUTPUT_FEAT, 4 * OUTPUT_FEAT)
    whh, bhh = lin(OUTPUT_FEAT, 4 * OUTPUT_FEAT)
    p["enc_wih"], p["enc_whh"], p["enc_b"] = wih, whh, bih + bhh
    # non_local_theta / phi / g: MLP(5 -> 32 -> 5), relu
    for nm in ("th", "ph", "gl"):
        p[nm + "_w1"], p[nm + "_b1"] = lin(OUTPUT_FEAT, NON_LOCAL_SIZE)
        p[nm + "_w2"], p[nm + "_b2"] = lin(NON_LOCAL_SIZE, OUTPUT_FEAT)
    # dec_lstm: LSTM(7, 5)
    wih, bih = lin(OUTPUT_FEAT + 2, 4 * OUTPUT_FEAT)
    whh, bhh = lin(OUTPUT_FEAT, 4 * OUTPUT_FEAT)
    p["dec_wih"], p["dec_whh"], p["dec_b"] = wih, whh, bih + bhh
    # out_mus / out_sigma / out_corr: MLP(5 -> 64 -> 32 -> {2,2,1}), prelu (single slope = 0.25)
    for nm, od in (("mu", 2), ("sg", 2), ("cr", 1)):
        p[nm + "_w1"], p[nm + "_b1"] = lin(OUTPUT_FEAT, OUT_HID1)
        p[nm + "_w2"], p[nm + "_b2"] = lin(OUT_HID1, OUT_HID2)
        p[nm + "_w3"], p[nm + "_b3"] = lin(OUT_HID2, od)
        p[nm + "_a"] = jnp.full((1, 1), 0.25, jnp.float32)        # nn.PReLU() default init
    return p


def pack_params(p):
    """Fuse + pad the logical weights and pack them into one (PACK_ROWS, 512) f32 buffer."""
    F = OUTPUT_FEAT
    H, H1, H2 = NON_LOCAL_SIZE, OUT_HID1, OUT_HID2

    def gate_pad(m):  # (rows, 4F) -> (rows, 512): gate g columns moved to lanes [128g, 128g+F)
        out = jnp.zeros((m.shape[0], LW), jnp.float32)
        for g in range(4):
            out = out.at[:, 128 * g:128 * g + F].set(m[:, F * g:F * (g + 1)])
        return out

    fused = {
        "te_w1": p["te_w1"], "te_b1": p["te_b1"],
        "te_w2": p["te_w2"], "te_b2": p["te_b2"],
        "ew_ih": gate_pad(p["enc_wih"]), "ew_hh": gate_pad(p["enc_whh"]), "e_b": gate_pad(p["enc_b"]),
        "nl_w1": jnp.concatenate([p["th_w1"], p["ph_w1"], p["gl_w1"]], axis=1),
        "nl_b1": jnp.concatenate([p["th_b1"], p["ph_b1"], p["gl_b1"]], axis=1),
        "dw_h": gate_pad(p["dec_wih"][0:F, :]),
        "dw_a": gate_pad(p["dec_wih"][F:F + 2, :]),
        "dw_hh": gate_pad(p["dec_whh"]), "d_b": gate_pad(p["dec_b"]),
        "o_w1": jnp.concatenate([p["mu_w1"], p["sg_w1"], p["cr_w1"]], axis=1),
        "o_b1": jnp.concatenate([p["mu_b1"], p["sg_b1"], p["cr_b1"]], axis=1),
        "o_b2": jnp.concatenate([p["mu_b2"], p["sg_b2"], p["cr_b2"]], axis=1),
        "o_b3": jnp.concatenate([p["mu_b3"], p["sg_b3"], p["cr_b3"]], axis=1),
        "o_a1": jnp.concatenate([jnp.broadcast_to(p["mu_a"], (1, H1)),
                                 jnp.broadcast_to(p["sg_a"], (1, H1)),
                                 jnp.broadcast_to(p["cr_a"], (1, H1))], axis=1),
        "o_a2": jnp.concatenate([jnp.broadcast_to(p["mu_a"], (1, H2)),
                                 jnp.broadcast_to(p["sg_a"], (1, H2)),
                                 jnp.broadcast_to(p["cr_a"], (1, H2))], axis=1),
    }

    nl_w2 = jnp.zeros((3 * H, 2 * 128 + F), jnp.float32)
    nl_w2 = nl_w2.at[0:H, 0:F].set(p["th_w2"])
    nl_w2 = nl_w2.at[H:2 * H, 128:128 + F].set(p["ph_w2"])
    nl_w2 = nl_w2.at[2 * H:3 * H, 256:256 + F].set(p["gl_w2"])
    nl_b2 = jnp.zeros((1, 2 * 128 + F), jnp.float32)
    nl_b2 = nl_b2.at[:, 0:F].set(p["th_b2"]).at[:, 128:128 + F].set(p["ph_b2"]) \
                 .at[:, 256:256 + F].set(p["gl_b2"])
    fused["nl_w2"], fused["nl_b2"] = nl_w2, nl_b2

    o_w2 = jnp.zeros((3 * H1, 3 * H2), jnp.float32)
    o_w2 = o_w2.at[0:H1, 0:H2].set(p["mu_w2"])
    o_w2 = o_w2.at[H1:2 * H1, H2:2 * H2].set(p["sg_w2"])
    o_w2 = o_w2.at[2 * H1:3 * H1, 2 * H2:3 * H2].set(p["cr_w2"])
    fused["o_w2"] = o_w2

    o_w3 = jnp.zeros((3 * H2, F), jnp.float32)
    o_w3 = o_w3.at[0:H2, 0:2].set(p["mu_w3"])
    o_w3 = o_w3.at[H2:2 * H2, 2:4].set(p["sg_w3"])
    o_w3 = o_w3.at[2 * H2:3 * H2, 4:5].set(p["cr_w3"])
    fused["o_w3"] = o_w3

    buf = jnp.zeros((PACK_ROWS, LW), jnp.float32)
    for name, (off, r, c) in LAYOUT.items():
        arr = fused[name].astype(jnp.float32)
        assert arr.shape == (r, c), (name, arr.shape, (r, c))
        buf = buf.at[off:off + r, 0:c].set(arr)
    return buf


# ------------------------------------ wrapper ------------------------------------
@jax.jit
def goal_example_forward(v, mask, noise, packed):
    """v: (B, T, 2) torch layout; mask: (B, B); noise: (pred_len, B, 2); packed: pack_params()."""
    B, T, _ = v.shape
    P = noise.shape[0]
    Bp = _pad8(B)
    pad = Bp - B

    # time-major, batch padded to a multiple of 8 sublanes (padded agents are exactly inert:
    # the mask zeroes their attention columns before the L1 re-normalization).
    v_tm = jnp.transpose(v.astype(jnp.float32), (1, 0, 2))                      # (T, B, 2)
    v_flat = jnp.pad(v_tm, ((0, 0), (0, pad), (0, 0))).reshape(T * Bp, 2)
    mask_p = jnp.pad(mask.astype(jnp.float32), ((0, pad), (0, pad)))
    noise_flat = jnp.pad(noise.astype(jnp.float32),
                         ((0, 0), (0, pad), (0, 0))).reshape(P * Bp, 2)

    # leading "scene" grid axis (size 1 here), marked parallel -> both TCs on v7x for S > 1.
    v_in, m_in, n_in = v_flat[None], mask_p[None], noise_flat[None]

    vpred, apred = pl.pallas_call(
        goal_example_kernel,
        grid=(1,),
        in_specs=[
            pl.BlockSpec((None, T * Bp, 2), lambda s: (s, 0, 0)),
            pl.BlockSpec((None, Bp, Bp), lambda s: (s, 0, 0)),
            pl.BlockSpec((None, P * Bp, 2), lambda s: (s, 0, 0)),
            pl.BlockSpec((PACK_ROWS, LW), lambda s: (0, 0)),       # one packed-parameter DMA
        ],
        out_specs=(
            pl.BlockSpec((None, P * Bp, OUTPUT_FEAT), lambda s: (s, 0, 0)),
            pl.BlockSpec((None, (P + 1) * Bp, 2), lambda s: (s, 0, 0)),
        ),
        out_shape=(
            jax.ShapeDtypeStruct((1, P * Bp, OUTPUT_FEAT), jnp.float32),
            jax.ShapeDtypeStruct((1, (P + 1) * Bp, 2), jnp.float32),
        ),
        compiler_params=pltpu.CompilerParams(dimension_semantics=("parallel",)),
    )(v_in, m_in, n_in, packed)

    vpred = vpred[0].reshape(P, Bp, OUTPUT_FEAT)[:, :B]        # drop batch padding
    V_pred = jnp.transpose(vpred, (1, 0, 2))                   # torch.stack(V_pred, dim=1)
    a_pred = apred[0].reshape(P + 1, Bp, 2)[:, :B][None]       # torch.stack(a_list, dim=1)
    return V_pred, a_pred


# ------------------------------------ demo ------------------------------------
if __name__ == "__main__":
    key = jax.random.PRNGKey(0)
    k_v, k_noise, k_params = jax.random.split(key, 3)

    B, T = 4, SEQ_LEN
    v = jax.random.normal(k_v, (B, T, INPUT_FEAT), jnp.float32)            # [batch, seq, feat]
    mask = jnp.ones((B, B), jnp.float32)                                    # [batch, batch]
    noise = jax.random.normal(k_noise, (PRED_SEQ_LEN, B, 2), jnp.float32)   # GMM rsample noise
    params = init_params(k_params)
    packed = pack_params(params)

    V_pred, a_pred = goal_example_forward(v, mask, noise, packed)
    jax.block_until_ready((V_pred, a_pred))

    assert V_pred.shape == (B, PRED_SEQ_LEN, OUTPUT_FEAT)
    assert a_pred.shape == (1, PRED_SEQ_LEN + 1, B, 2)
    assert bool(jnp.all(jnp.isfinite(V_pred))) and bool(jnp.all(jnp.isfinite(a_pred)))
    print("KERNEL_OK")
</pallas_src>

<mosaic_0001>
module attributes {stable_mosaic.version = 11 : i64} {
  func.func @goal_example_kernel(%arg0: i32, %arg1: memref<1x64x2xf32, #tpu.memory_space<vmem>>, %arg2: memref<1x8x8xf32, #tpu.memory_space<vmem>>, %arg3: memref<1x96x2xf32, #tpu.memory_space<vmem>>, %arg4: memref<568x512xf32, #tpu.memory_space<vmem>>, %arg5: memref<1x96x5xf32, #tpu.memory_space<vmem>>, %arg6: memref<1x104x2xf32, #tpu.memory_space<vmem>>) attributes {dimension_semantics = [#tpu.dimension_semantics<parallel>], iteration_bounds = array<i64: 1>, scalar_prefetch = 0 : i64, scratch_operands = 0 : i64, tpu.core_type = #tpu.core_type<tc>, window_params = [{transform_indices = @transform_0, window_bounds = array<i64: 1, 64, 2>}, {transform_indices = @transform_1, window_bounds = array<i64: 1, 8, 8>}, {transform_indices = @transform_2, window_bounds = array<i64: 1, 96, 2>}, {pipeline_mode = #tpu.pipeline_mode<synchronous>, transform_indices = @transform_3, window_bounds = array<i64: 568, 512>}, {transform_indices = @transform_4, window_bounds = array<i64: 1, 96, 5>}, {transform_indices = @transform_5, window_bounds = array<i64: 1, 104, 2>}]} {
    %c0 = arith.constant 0 : index
    %c0_0 = arith.constant 0 : index
    %c0_1 = arith.constant 0 : index
    %0 = vector.load %arg2[%c0, %c0_0, %c0_1] : memref<1x8x8xf32, #tpu.memory_space<vmem>>, vector<1x8x8xf32>
    %1 = vector.shape_cast %0 : vector<1x8x8xf32> to vector<8x8xf32>
    %c0_2 = arith.constant 0 : index
    %c56 = arith.constant 56 : index
    %c0_3 = arith.constant 0 : index
    %2 = vector.load %arg1[%c0_2, %c56, %c0_3] : memref<1x64x2xf32, #tpu.memory_space<vmem>>, vector<1x8x2xf32>
    %3 = vector.shape_cast %2 : vector<1x8x2xf32> to vector<8x2xf32>
    %c0_4 = arith.constant 0 : index
    %c0_5 = arith.constant 0 : index
    %c0_6 = arith.constant 0 : index
    %4 = vector.load %arg1[%c0_4, %c0_5, %c0_6] : memref<1x64x2xf32, #tpu.memory_space<vmem>>, vector<1x64x2xf32>
    %5 = vector.shape_cast %4 : vector<1x64x2xf32> to vector<64x2xf32>
    %c0_7 = arith.constant 0 : index
    %c0_8 = arith.constant 0 : index
    %6 = vector.load %arg4[%c0_7, %c0_8] : memref<568x512xf32, #tpu.memory_space<vmem>>, vector<2x32xf32>
    %cst = arith.constant dense<0.000000e+00> : vector<64x32xf32>
    %7 = tpu.matmul %5, %6, %cst {dimension_numbers = #tpu.dot_dimension_numbers<[1], [0], [0], [1], [0, 0, 1, 1], [], []>} : vector<64x2xf32>, vector<2x32xf32>, vector<64x32xf32> -> vector<64x32xf32>
    %c8 = arith.constant 8 : index
    %c0_9 = arith.constant 0 : index
    %8 = vector.load %arg4[%c8, %c0_9] : memref<568x512xf32, #tpu.memory_space<vmem>>, vector<1x32xf32>
    %9 = vector.broadcast %8 : vector<1x32xf32> to vector<64x32xf32>
    %10 = arith.addf %7, %9 : vector<64x32xf32>
    %cst_10 = arith.constant 0.000000e+00 : f32
    %11 = vector.broadcast %cst_10 : f32 to vector<64x32xf32>
    %12 = arith.maximumf %10, %11 : vector<64x32xf32>
    %c16 = arith.constant 16 : index
    %c0_11 = arith.constant 0 : index
    %13 = vector.load %arg4[%c16, %c0_11] : memref<568x512xf32, #tpu.memory_space<vmem>>, vector<32x5xf32>
    %cst_12 = arith.constant dense<0.000000e+00> : vector<64x5xf32>
    %14 = tpu.matmul %12, %13, %cst_12 {dimension_numbers = #tpu.dot_dimension_numbers<[1], [0], [0], [1], [0, 0, 1, 1], [], []>} : vector<64x32xf32>, vector<32x5xf32>, vector<64x5xf32> -> vector<64x5xf32>
    %c48 = arith.constant 48 : index
    %c0_13 = arith.constant 0 : index
    %15 = vector.load %arg4[%c48, %c0_13] : memref<568x512xf32, #tpu.memory_space<vmem>>, vector<1x5xf32>
    %16 = vector.broadcast %15 : vector<1x5xf32> to vector<64x5xf32>
    %17 = arith.addf %14, %16 : vector<64x5xf32>
    %c56_14 = arith.constant 56 : index
    %c0_15 = arith.constant 0 : index
    %18 = vector.load %arg4[%c56_14, %c0_15] : memref<568x512xf32, #tpu.memory_space<vmem>>, vector<5x512xf32>
    %cst_16 = arith.constant dense<0.000000e+00> : vector<64x512xf32>
    %19 = tpu.matmul %17, %18, %cst_16 {dimension_numbers = #tpu.dot_dimension_numbers<[1], [0], [0], [1], [0, 0, 1, 1], [], []>} : vector<64x5xf32>, vector<5x512xf32>, vector<64x512xf32> -> vector<64x512xf32>
    %c72 = arith.constant 72 : index
    %c0_17 = arith.constant 0 : index
    %20 = vector.load %arg4[%c72, %c0_17] : memref<568x512xf32, #tpu.memory_space<vmem>>, vector<1x512xf32>
    %21 = vector.broadcast %20 : vector<1x512xf32> to vector<64x512xf32>
    %22 = arith.addf %19, %21 : vector<64x512xf32>
    %c64 = arith.constant 64 : index
    %c0_18 = arith.constant 0 : index
    %23 = vector.load %arg4[%c64, %c0_18] : memref<568x512xf32, #tpu.memory_space<vmem>>, vector<5x512xf32>
    %cst_19 = arith.constant 0.000000e+00 : f32
    %24 = vector.broadcast %cst_19 : f32 to vector<8x5xf32>
    %cst_20 = arith.constant 0.000000e+00 : f32
    %25 = vector.broadcast %cst_20 : f32 to vector<8x5xf32>
    %26 = vector.extract_strided_slice %22 {offsets = [0, 0], sizes = [8, 512], strides = [1, 1]} : vector<64x512xf32> to vector<8x512xf32>
    %cst_21 = arith.constant dense<0.000000e+00> : vector<8x512xf32>
    %27 = tpu.matmul %24, %23, %cst_21 {dimension_numbers = #tpu.dot_dimension_numbers<[1], [0], [0], [1], [0, 0, 1, 1], [], []>} : vector<8x5xf32>, vector<5x512xf32>, vector<8x512xf32> -> vector<8x512xf32>
    %28 = arith.addf %26, %27 : vector<8x512xf32>
    %29 = vector.extract_strided_slice %28 {offsets = [0, 0], sizes = [8, 5], strides = [1, 1]} : vector<8x512xf32> to vector<8x5xf32>
    %30 = arith.negf %29 : vector<8x5xf32>
    %31 = math.exp %30 : vector<8x5xf32>
    %cst_22 = arith.constant 1.000000e+00 : f32
    %32 = vector.broadcast %cst_22 : f32 to vector<8x5xf32>
    %33 = arith.addf %32, %31 : vector<8x5xf32>
    %34 = arith.divf %32, %33 : vector<8x5xf32>
    %35 = vector.extract_strided_slice %28 {offsets = [0, 128], sizes = [8, 5], strides = [1, 1]} : vector<8x512xf32> to vector<8x5xf32>
    %36 = arith.negf %35 : vector<8x5xf32>
    %37 = math.exp %36 : vector<8x5xf32>
    %cst_23 = arith.constant 1.000000e+00 : f32
    %38 = vector.broadcast %cst_23 : f32 to vector<8x5xf32>
    %39 = arith.addf %38, %37 : vector<8x5xf32>
    %40 = arith.divf %38, %39 : vector<8x5xf32>
    %41 = vector.extract_strided_slice %28 {offsets = [0, 256], sizes = [8, 5], strides = [1, 1]} : vector<8x512xf32> to vector<8x5xf32>
    %42 = math.tanh %41 : vector<8x5xf32>
    %43 = vector.extract_strided_slice %28 {offsets = [0, 384], sizes = [8, 5], strides = [1, 1]} : vector<8x512xf32> to vector<8x5xf32>
    %44 = arith.negf %43 : vector<8x5xf32>
    %45 = math.exp %44 : vector<8x5xf32>
    %cst_24 = arith.constant 1.000000e+00 : f32
    %46 = vector.broadcast %cst_24 : f32 to vector<8x5xf32>
    %47 = arith.addf %46, %45 : vector<8x5xf32>
    %48 = arith.divf %46, %47 : vector<8x5xf32>
    %49 = arith.mulf %40, %25 : vector<8x5xf32>
    %50 = arith.mulf %34, %42 : vector<8x5xf32>
    %51 = arith.addf %49, %50 : vector<8x5xf32>
    %52 = math.tanh %51 : vector<8x5xf32>
    %53 = arith.mulf %48, %52 : vector<8x5xf32>
    %54 = vector.extract_strided_slice %22 {offsets = [8, 0], sizes = [8, 512], strides = [1, 1]} : vector<64x512xf32> to vector<8x512xf32>
    %cst_25 = arith.constant dense<0.000000e+00> : vector<8x512xf32>
    %55 = tpu.matmul %53, %23, %cst_25 {dimension_numbers = #tpu.dot_dimension_numbers<[1], [0], [0], [1], [0, 0, 1, 1], [], []>} : vector<8x5xf32>, vector<5x512xf32>, vector<8x512xf32> -> vector<8x512xf32>
    %56 = arith.addf %54, %55 : vector<8x512xf32>
    %57 = vector.extract_strided_slice %56 {offsets = [0, 0], sizes = [8, 5], strides = [1, 1]} : vector<8x512xf32> to vector<8x5xf32>
    %58 = arith.negf %57 : vector<8x5xf32>
    %59 = math.exp %58 : vector<8x5xf32>
    %cst_26 = arith.constant 1.000000e+00 : f32
    %60 = vector.broadcast %cst_26 : f32 to vector<8x5xf32>
    %61 = arith.addf %60, %59 : vector<8x5xf32>
    %62 = arith.divf %60, %61 : vector<8x5xf32>
    %63 = vector.extract_strided_slice %56 {offsets = [0, 128], sizes = [8, 5], strides = [1, 1]} : vector<8x512xf32> to vector<8x5xf32>
    %64 = arith.negf %63 : vector<8x5xf32>
    %65 = math.exp %64 : vector<8x5xf32>
    %cst_27 = arith.constant 1.000000e+00 : f32
    %66 = vector.broadcast %cst_27 : f32 to vector<8x5xf32>
    %67 = arith.addf %66, %65 : vector<8x5xf32>
    %68 = arith.divf %66, %67 : vector<8x5xf32>
    %69 = vector.extract_strided_slice %56 {offsets = [0, 256], sizes = [8, 5], strides = [1, 1]} : vector<8x512xf32> to vector<8x5xf32>
    %70 = math.tanh %69 : vector<8x5xf32>
    %71 = vector.extract_strided_slice %56 {offsets = [0, 384], sizes = [8, 5], strides = [1, 1]} : vector<8x512xf32> to vector<8x5xf32>
    %72 = arith.negf %71 : vector<8x5xf32>
    %73 = math.exp %72 : vector<8x5xf32>
    %cst_28 = arith.constant 1.000000e+00 : f32
    %74 = vector.broadcast %cst_28 : f32 to vector<8x5xf32>
    %75 = arith.addf %74, %73 : vector<8x5xf32>
    %76 = arith.divf %74, %75 : vector<8x5xf32>
    %77 = arith.mulf %68, %51 : vector<8x5xf32>
    %78 = arith.mulf %62, %70 : vector<8x5xf32>
    %79 = arith.addf %77, %78 : vector<8x5xf32>
    %80 = math.tanh %79 : vector<8x5xf32>
    %81 = arith.mulf %76, %80 : vector<8x5xf32>
    %82 = vector.extract_strided_slice %22 {offsets = [16, 0], sizes = [8, 512], strides = [1, 1]} : vector<64x512xf32> to vector<8x512xf32>
    %cst_29 = arith.constant dense<0.000000e+00> : vector<8x512xf32>
    %83 = tpu.matmul %81, %23, %cst_29 {dimension_numbers = #tpu.dot_dimension_numbers<[1], [0], [0], [1], [0, 0, 1, 1], [], []>} : vector<8x5xf32>, vector<5x512xf32>, vector<8x512xf32> -> vector<8x512xf32>
    %84 = arith.addf %82, %83 : vector<8x512xf32>
    %85 = vector.extract_strided_slice %84 {offsets = [0, 0], sizes = [8, 5], strides = [1, 1]} : vector<8x512xf32> to vector<8x5xf32>
    %86 = arith.negf %85 : vector<8x5xf32>
    %87 = math.exp %86 : vector<8x5xf32>
    %cst_30 = arith.constant 1.000000e+00 : f32
    %88 = vector.broadcast %cst_30 : f32 to vector<8x5xf32>
    %89 = arith.addf %88, %87 : vector<8x5xf32>
    %90 = arith.divf %88, %89 : vector<8x5xf32>
    %91 = vector.extract_strided_slice %84 {offsets = [0, 128], sizes = [8, 5], strides = [1, 1]} : vector<8x512xf32> to vector<8x5xf32>
    %92 = arith.negf %91 : vector<8x5xf32>
    %93 = math.exp %92 : vector<8x5xf32>
    %cst_31 = arith.constant 1.000000e+00 : f32
    %94 = vector.broadcast %cst_31 : f32 to vector<8x5xf32>
    %95 = arith.addf %94, %93 : vector<8x5xf32>
    %96 = arith.divf %94, %95 : vector<8x5xf32>
    %97 = vector.extract_strided_slice %84 {offsets = [0, 256], sizes = [8, 5], strides = [1, 1]} : vector<8x512xf32> to vector<8x5xf32>
    %98 = math.tanh %97 : vector<8x5xf32>
    %99 = vector.extract_strided_slice %84 {offsets = [0, 384], sizes = [8, 5], strides = [1, 1]} : vector<8x512xf32> to vector<8x5xf32>
    %100 = arith.negf %99 : vector<8x5xf32>
    %101 = math.exp %100 : vector<8x5xf32>
    %cst_32 = arith.constant 1.000000e+00 : f32
    %102 = vector.broadcast %cst_32 : f32 to vector<8x5xf32>
    %103 = arith.addf %102, %101 : vector<8x5xf32>
    %104 = arith.divf %102, %103 : vector<8x5xf32>
    %105 = arith.mulf %96, %79 : vector<8x5xf32>
    %106 = arith.mulf %90, %98 : vector<8x5xf32>
    %107 = arith.addf %105, %106 : vector<8x5xf32>
    %108 = math.tanh %107 : vector<8x5xf32>
    %109 = arith.mulf %104, %108 : vector<8x5xf32>
    %110 = vector.extract_strided_slice %22 {offsets = [24, 0], sizes = [8, 512], strides = [1, 1]} : vector<64x512xf32> to vector<8x512xf32>
    %cst_33 = arith.constant dense<0.000000e+00> : vector<8x512xf32>
    %111 = tpu.matmul %109, %23, %cst_33 {dimension_numbers = #tpu.dot_dimension_numbers<[1], [0], [0], [1], [0, 0, 1, 1], [], []>} : vector<8x5xf32>, vector<5x512xf32>, vector<8x512xf32> -> vector<8x512xf32>
    %112 = arith.addf %110, %111 : vector<8x512xf32>
    %113 = vector.extract_strided_slice %112 {offsets = [0, 0], sizes = [8, 5], strides = [1, 1]} : vector<8x512xf32> to vector<8x5xf32>
    %114 = arith.negf %113 : vector<8x5xf32>
    %115 = math.exp %114 : vector<8x5xf32>
    %cst_34 = arith.constant 1.000000e+00 : f32
    %116 = vector.broadcast %cst_34 : f32 to vector<8x5xf32>
    %117 = arith.addf %116, %115 : vector<8x5xf32>
    %118 = arith.divf %116, %117 : vector<8x5xf32>
    %119 = vector.extract_strided_slice %112 {offsets = [0, 128], sizes = [8, 5], strides = [1, 1]} : vector<8x512xf32> to vector<8x5xf32>
    %120 = arith.negf %119 : vector<8x5xf32>
    %121 = math.exp %120 : vector<8x5xf32>
    %cst_35 = arith.constant 1.000000e+00 : f32
    %122 = vector.broadcast %cst_35 : f32 to vector<8x5xf32>
    %123 = arith.addf %122, %121 : vector<8x5xf32>
    %124 = arith.divf %122, %123 : vector<8x5xf32>
    %125 = vector.extract_strided_slice %112 {offsets = [0, 256], sizes = [8, 5], strides = [1, 1]} : vector<8x512xf32> to vector<8x5xf32>
    %126 = math.tanh %125 : vector<8x5xf32>
    %127 = vector.extract_strided_slice %112 {offsets = [0, 384], sizes = [8, 5], strides = [1, 1]} : vector<8x512xf32> to vector<8x5xf32>
    %128 = arith.negf %127 : vector<8x5xf32>
    %129 = math.exp %128 : vector<8x5xf32>
    %cst_36 = arith.constant 1.000000e+00 : f32
    %130 = vector.broadcast %cst_36 : f32 to vector<8x5xf32>
    %131 = arith.addf %130, %129 : vector<8x5xf32>
    %132 = arith.divf %130, %131 : vector<8x5xf32>
    %133 = arith.mulf %124, %107 : vector<8x5xf32>
    %134 = arith.mulf %118, %126 : vector<8x5xf32>
    %135 = arith.addf %133, %134 : vector<8x5xf32>
    %136 = math.tanh %135 : vector<8x5xf32>
    %137 = arith.mulf %132, %136 : vector<8x5xf32>
    %138 = vector.extract_strided_slice %22 {offsets = [32, 0], sizes = [8, 512], strides = [1, 1]} : vector<64x512xf32> to vector<8x512xf32>
    %cst_37 = arith.constant dense<0.000000e+00> : vector<8x512xf32>
    %139 = tpu.matmul %137, %23, %cst_37 {dimension_numbers = #tpu.dot_dimension_numbers<[1], [0], [0], [1], [0, 0, 1, 1], [], []>} : vector<8x5xf32>, vector<5x512xf32>, vector<8x512xf32> -> vector<8x512xf32>
    %140 = arith.addf %138, %139 : vector<8x512xf32>
    %141 = vector.extract_strided_slice %140 {offsets = [0, 0], sizes = [8, 5], strides = [1, 1]} : vector<8x512xf32> to vector<8x5xf32>
    %142 = arith.negf %141 : vector<8x5xf32>
    %143 = math.exp %142 : vector<8x5xf32>
    %cst_38 = arith.constant 1.000000e+00 : f32
    %144 = vector.broadcast %cst_38 : f32 to vector<8x5xf32>
    %145 = arith.addf %144, %143 : vector<8x5xf32>
    %146 = arith.divf %144, %145 : vector<8x5xf32>
    %147 = vector.extract_strided_slice %140 {offsets = [0, 128], sizes = [8, 5], strides = [1, 1]} : vector<8x512xf32> to vector<8x5xf32>
    %148 = arith.negf %147 : vector<8x5xf32>
    %149 = math.exp %148 : vector<8x5xf32>
    %cst_39 = arith.constant 1.000000e+00 : f32
    %150 = vector.broadcast %cst_39 : f32 to vector<8x5xf32>
    %151 = arith.addf %150, %149 : vector<8x5xf32>
    %152 = arith.divf %150, %151 : vector<8x5xf32>
    %153 = vector.extract_strided_slice %140 {offsets = [0, 256], sizes = [8, 5], strides = [1, 1]} : vector<8x512xf32> to vector<8x5xf32>
    %154 = math.tanh %153 : vector<8x5xf32>
    %155 = vector.extract_strided_slice %140 {offsets = [0, 384], sizes = [8, 5], strides = [1, 1]} : vector<8x512xf32> to vector<8x5xf32>
    %156 = arith.negf %155 : vector<8x5xf32>
    %157 = math.exp %156 : vector<8x5xf32>
    %cst_40 = arith.constant 1.000000e+00 : f32
    %158 = vector.broadcast %cst_40 : f32 to vector<8x5xf32>
    %159 = arith.addf %158, %157 : vector<8x5xf32>
    %160 = arith.divf %158, %159 : vector<8x5xf32>
    %161 = arith.mulf %152, %135 : vector<8x5xf32>
    %162 = arith.mulf %146, %154 : vector<8x5xf32>
    %163 = arith.addf %161, %162 : vector<8x5xf32>
    %164 = math.tanh %163 : vector<8x5xf32>
    %165 = arith.mulf %160, %164 : vector<8x5xf32>
    %166 = vector.extract_strided_slice %22 {offsets = [40, 0], sizes = [8, 512], strides = [1, 1]} : vector<64x512xf32> to vector<8x512xf32>
    %cst_41 = arith.constant dense<0.000000e+00> : vector<8x512xf32>
    %167 = tpu.matmul %165, %23, %cst_41 {dimension_numbers = #tpu.dot_dimension_numbers<[1], [0], [0], [1], [0, 0, 1, 1], [], []>} : vector<8x5xf32>, vector<5x512xf32>, vector<8x512xf32> -> vector<8x512xf32>
    %168 = arith.addf %166, %167 : vector<8x512xf32>
    %169 = vector.extract_strided_slice %168 {offsets = [0, 0], sizes = [8, 5], strides = [1, 1]} : vector<8x512xf32> to vector<8x5xf32>
    %170 = arith.negf %169 : vector<8x5xf32>
    %171 = math.exp %170 : vector<8x5xf32>
    %cst_42 = arith.constant 1.000000e+00 : f32
    %172 = vector.broadcast %cst_42 : f32 to vector<8x5xf32>
    %173 = arith.addf %172, %171 : vector<8x5xf32>
    %174 = arith.divf %172, %173 : vector<8x5xf32>
    %175 = vector.extract_strided_slice %168 {offsets = [0, 128], sizes = [8, 5], strides = [1, 1]} : vector<8x512xf32> to vector<8x5xf32>
    %176 = arith.negf %175 : vector<8x5xf32>
    %177 = math.exp %176 : vector<8x5xf32>
    %cst_43 = arith.constant 1.000000e+00 : f32
    %178 = vector.broadcast %cst_43 : f32 to vector<8x5xf32>
    %179 = arith.addf %178, %177 : vector<8x5xf32>
    %180 = arith.divf %178, %179 : vector<8x5xf32>
    %181 = vector.extract_strided_slice %168 {offsets = [0, 256], sizes = [8, 5], strides = [1, 1]} : vector<8x512xf32> to vector<8x5xf32>
    %182 = math.tanh %181 : vector<8x5xf32>
    %183 = vector.extract_strided_slice %168 {offsets = [0, 384], sizes = [8, 5], strides = [1, 1]} : vector<8x512xf32> to vector<8x5xf32>
    %184 = arith.negf %183 : vector<8x5xf32>
    %185 = math.exp %184 : vector<8x5xf32>
    %cst_44 = arith.constant 1.000000e+00 : f32
    %186 = vector.broadcast %cst_44 : f32 to vector<8x5xf32>
    %187 = arith.addf %186, %185 : vector<8x5xf32>
    %188 = arith.divf %186, %187 : vector<8x5xf32>
    %189 = arith.mulf %180, %163 : vector<8x5xf32>
    %190 = arith.mulf %174, %182 : vector<8x5xf32>
    %191 = arith.addf %189, %190 : vector<8x5xf32>
    %192 = math.tanh %191 : vector<8x5xf32>
    %193 = arith.mulf %188, %192 : vector<8x5xf32>
    %194 = vector.extract_strided_slice %22 {offsets = [48, 0], sizes = [8, 512], strides = [1, 1]} : vector<64x512xf32> to vector<8x512xf32>
    %cst_45 = arith.constant dense<0.000000e+00> : vector<8x512xf32>
    %195 = tpu.matmul %193, %23, %cst_45 {dimension_numbers = #tpu.dot_dimension_numbers<[1], [0], [0], [1], [0, 0, 1, 1], [], []>} : vector<8x5xf32>, vector<5x512xf32>, vector<8x512xf32> -> vector<8x512xf32>
    %196 = arith.addf %194, %195 : vector<8x512xf32>
    %197 = vector.extract_strided_slice %196 {offsets = [0, 0], sizes = [8, 5], strides = [1, 1]} : vector<8x512xf32> to vector<8x5xf32>
    %198 = arith.negf %197 : vector<8x5xf32>
    %199 = math.exp %198 : vector<8x5xf32>
    %cst_46 = arith.constant 1.000000e+00 : f32
    %200 = vector.broadcast %cst_46 : f32 to vector<8x5xf32>
    %201 = arith.addf %200, %199 : vector<8x5xf32>
    %202 = arith.divf %200, %201 : vector<8x5xf32>
    %203 = vector.extract_strided_slice %196 {offsets = [0, 128], sizes = [8, 5], strides = [1, 1]} : vector<8x512xf32> to vector<8x5xf32>
    %204 = arith.negf %203 : vector<8x5xf32>
    %205 = math.exp %204 : vector<8x5xf32>
    %cst_47 = arith.constant 1.000000e+00 : f32
    %206 = vector.broadcast %cst_47 : f32 to vector<8x5xf32>
    %207 = arith.addf %206, %205 : vector<8x5xf32>
    %208 = arith.divf %206, %207 : vector<8x5xf32>
    %209 = vector.extract_strided_slice %196 {offsets = [0, 256], sizes = [8, 5], strides = [1, 1]} : vector<8x512xf32> to vector<8x5xf32>
    %210 = math.tanh %209 : vector<8x5xf32>
    %211 = vector.extract_strided_slice %196 {offsets = [0, 384], sizes = [8, 5], strides = [1, 1]} : vector<8x512xf32> to vector<8x5xf32>
    %212 = arith.negf %211 : vector<8x5xf32>
    %213 = math.exp %212 : vector<8x5xf32>
    %cst_48 = arith.constant 1.000000e+00 : f32
    %214 = vector.broadcast %cst_48 : f32 to vector<8x5xf32>
    %215 = arith.addf %214, %213 : vector<8x5xf32>
    %216 = arith.divf %214, %215 : vector<8x5xf32>
    %217 = arith.mulf %208, %191 : vector<8x5xf32>
    %218 = arith.mulf %202, %210 : vector<8x5xf32>
    %219 = arith.addf %217, %218 : vector<8x5xf32>
    %220 = math.tanh %219 : vector<8x5xf32>
    %221 = arith.mulf %216, %220 : vector<8x5xf32>
    %222 = vector.extract_strided_slice %22 {offsets = [56, 0], sizes = [8, 512], strides = [1, 1]} : vector<64x512xf32> to vector<8x512xf32>
    %cst_49 = arith.constant dense<0.000000e+00> : vector<8x512xf32>
    %223 = tpu.matmul %221, %23, %cst_49 {dimension_numbers = #tpu.dot_dimension_numbers<[1], [0], [0], [1], [0, 0, 1, 1], [], []>} : vector<8x5xf32>, vector<5x512xf32>, vector<8x512xf32> -> vector<8x512xf32>
    %224 = arith.addf %222, %223 : vector<8x512xf32>
    %225 = vector.extract_strided_slice %224 {offsets = [0, 0], sizes = [8, 5], strides = [1, 1]} : vector<8x512xf32> to vector<8x5xf32>
    %226 = arith.negf %225 : vector<8x5xf32>
    %227 = math.exp %226 : vector<8x5xf32>
    %cst_50 = arith.constant 1.000000e+00 : f32
    %228 = vector.broadcast %cst_50 : f32 to vector<8x5xf32>
    %229 = arith.addf %228, %227 : vector<8x5xf32>
    %230 = arith.divf %228, %229 : vector<8x5xf32>
    %231 = vector.extract_strided_slice %224 {offsets = [0, 128], sizes = [8, 5], strides = [1, 1]} : vector<8x512xf32> to vector<8x5xf32>
    %232 = arith.negf %231 : vector<8x5xf32>
    %233 = math.exp %232 : vector<8x5xf32>
    %cst_51 = arith.constant 1.000000e+00 : f32
    %234 = vector.broadcast %cst_51 : f32 to vector<8x5xf32>
    %235 = arith.addf %234, %233 : vector<8x5xf32>
    %236 = arith.divf %234, %235 : vector<8x5xf32>
    %237 = vector.extract_strided_slice %224 {offsets = [0, 256], sizes = [8, 5], strides = [1, 1]} : vector<8x512xf32> to vector<8x5xf32>
    %238 = math.tanh %237 : vector<8x5xf32>
    %239 = vector.extract_strided_slice %224 {offsets = [0, 384], sizes = [8, 5], strides = [1, 1]} : vector<8x512xf32> to vector<8x5xf32>
    %240 = arith.negf %239 : vector<8x5xf32>
    %241 = math.exp %240 : vector<8x5xf32>
    %cst_52 = arith.constant 1.000000e+00 : f32
    %242 = vector.broadcast %cst_52 : f32 to vector<8x5xf32>
    %243 = arith.addf %242, %241 : vector<8x5xf32>
    %244 = arith.divf %242, %243 : vector<8x5xf32>
    %245 = arith.mulf %236, %219 : vector<8x5xf32>
    %246 = arith.mulf %230, %238 : vector<8x5xf32>
    %247 = arith.addf %245, %246 : vector<8x5xf32>
    %248 = math.tanh %247 : vector<8x5xf32>
    %249 = arith.mulf %244, %248 : vector<8x5xf32>
    %c80 = arith.constant 80 : index
    %c0_53 = arith.constant 0 : index
    %250 = vector.load %arg4[%c80, %c0_53] : memref<568x512xf32, #tpu.memory_space<vmem>>, vector<5x96xf32>
    %c88 = arith.constant 88 : index
    %c0_54 = arith.constant 0 : index
    %251 = vector.load %arg4[%c88, %c0_54] : memref<568x512xf32, #tpu.memory_space<vmem>>, vector<1x96xf32>
    %c96 = arith.constant 96 : index
    %c0_55 = arith.constant 0 : index
    %252 = vector.load %arg4[%c96, %c0_55] : memref<568x512xf32, #tpu.memory_space<vmem>>, vector<96x261xf32>
    %c192 = arith.constant 192 : index
    %c0_56 = arith.constant 0 : index
    %253 = vector.load %arg4[%c192, %c0_56] : memref<568x512xf32, #tpu.memory_space<vmem>>, vector<1x261xf32>
    %cst_57 = arith.constant dense<0.000000e+00> : vector<8x96xf32>
    %254 = tpu.matmul %249, %250, %cst_57 {dimension_numbers = #tpu.dot_dimension_numbers<[1], [0], [0], [1], [0, 0, 1, 1], [], []>} : vector<8x5xf32>, vector<5x96xf32>, vector<8x96xf32> -> vector<8x96xf32>
    %255 = vector.broadcast %251 : vector<1x96xf32> to vector<8x96xf32>
    %256 = arith.addf %254, %255 : vector<8x96xf32>
    %cst_58 = arith.constant 0.000000e+00 : f32
    %257 = vector.broadcast %cst_58 : f32 to vector<8x96xf32>
    %258 = arith.maximumf %256, %257 : vector<8x96xf32>
    %cst_59 = arith.constant dense<0.000000e+00> : vector<8x261xf32>
    %259 = tpu.matmul %258, %252, %cst_59 {dimension_numbers = #tpu.dot_dimension_numbers<[1], [0], [0], [1], [0, 0, 1, 1], [], []>} : vector<8x96xf32>, vector<96x261xf32>, vector<8x261xf32> -> vector<8x261xf32>
    %260 = vector.broadcast %253 : vector<1x261xf32> to vector<8x261xf32>
    %261 = arith.addf %259, %260 : vector<8x261xf32>
    %262 = vector.extract_strided_slice %261 {offsets = [0, 0], sizes = [8, 5], strides = [1, 1]} : vector<8x261xf32> to vector<8x5xf32>
    %263 = vector.extract_strided_slice %261 {offsets = [0, 128], sizes = [8, 5], strides = [1, 1]} : vector<8x261xf32> to vector<8x5xf32>
    %264 = vector.extract_strided_slice %261 {offsets = [0, 256], sizes = [8, 5], strides = [1, 1]} : vector<8x261xf32> to vector<8x5xf32>
    %cst_60 = arith.constant dense<0.000000e+00> : vector<8x8xf32>
    %265 = tpu.matmul %262, %263, %cst_60 {dimension_numbers = #tpu.dot_dimension_numbers<[1], [1], [0], [0], [0, 0, 1, 0], [], []>} : vector<8x5xf32>, vector<8x5xf32>, vector<8x8xf32> -> vector<8x8xf32>
    %cst_61 = arith.constant dense<0xFF800000> : vector<8xf32>
    %266 = vector.multi_reduction <maximumf>, %265, %cst_61 [1] : vector<8x8xf32> to vector<8xf32>
    %267 = vector.shape_cast %266 : vector<8xf32> to vector<8x1xf32>
    %268 = vector.broadcast %267 : vector<8x1xf32> to vector<8x8xf32>
    %269 = arith.subf %265, %268 : vector<8x8xf32>
    %270 = math.exp %269 : vector<8x8xf32>
    %cst_62 = arith.constant dense<0.000000e+00> : vector<8xf32>
    %271 = vector.multi_reduction <add>, %270, %cst_62 [1] : vector<8x8xf32> to vector<8xf32>
    %272 = vector.shape_cast %271 : vector<8xf32> to vector<8x1xf32>
    %273 = tpu.reciprocal %272 {approx = true} : vector<8x1xf32> -> vector<8x1xf32>
    %274 = vector.broadcast %273 : vector<8x1xf32> to vector<8x8xf32>
    %275 = arith.mulf %270, %274 : vector<8x8xf32>
    %276 = arith.mulf %275, %1 : vector<8x8xf32>
    %277 = math.absf %276 : vector<8x8xf32>
    %cst_63 = arith.constant dense<0.000000e+00> : vector<8xf32>
    %278 = vector.multi_reduction <add>, %277, %cst_63 [1] : vector<8x8xf32> to vector<8xf32>
    %279 = vector.shape_cast %278 : vector<8xf32> to vector<8x1xf32>
    %cst_64 = arith.constant 9.99999996E-13 : f32
    %280 = vector.broadcast %cst_64 : f32 to vector<8x1xf32>
    %281 = arith.maximumf %279, %280 : vector<8x1xf32>
    %282 = tpu.reciprocal %281 {approx = true} : vector<8x1xf32> -> vector<8x1xf32>
    %283 = vector.broadcast %282 : vector<8x1xf32> to vector<8x8xf32>
    %284 = arith.mulf %276, %283 : vector<8x8xf32>
    %cst_65 = arith.constant dense<0.000000e+00> : vector<8x5xf32>
    %285 = tpu.matmul %284, %264, %cst_65 {dimension_numbers = #tpu.dot_dimension_numbers<[1], [0], [0], [1], [0, 0, 1, 1], [], []>} : vector<8x8xf32>, vector<8x5xf32>, vector<8x5xf32> -> vector<8x5xf32>
    %286 = arith.addf %285, %249 : vector<8x5xf32>
    %cst_66 = arith.constant dense<0.000000e+00> : vector<8x96xf32>
    %287 = tpu.matmul %286, %250, %cst_66 {dimension_numbers = #tpu.dot_dimension_numbers<[1], [0], [0], [1], [0, 0, 1, 1], [], []>} : vector<8x5xf32>, vector<5x96xf32>, vector<8x96xf32> -> vector<8x96xf32>
    %288 = vector.broadcast %251 : vector<1x96xf32> to vector<8x96xf32>
    %289 = arith.addf %287, %288 : vector<8x96xf32>
    %cst_67 = arith.constant 0.000000e+00 : f32
    %290 = vector.broadcast %cst_67 : f32 to vector<8x96xf32>
    %291 = arith.maximumf %289, %290 : vector<8x96xf32>
    %cst_68 = arith.constant dense<0.000000e+00> : vector<8x261xf32>
    %292 = tpu.matmul %291, %252, %cst_68 {dimension_numbers = #tpu.dot_dimension_numbers<[1], [0], [0], [1], [0, 0, 1, 1], [], []>} : vector<8x96xf32>, vector<96x261xf32>, vector<8x261xf32> -> vector<8x261xf32>
    %293 = vector.broadcast %253 : vector<1x261xf32> to vector<8x261xf32>
    %294 = arith.addf %292, %293 : vector<8x261xf32>
    %295 = vector.extract_strided_slice %294 {offsets = [0, 0], sizes = [8, 5], strides = [1, 1]} : vector<8x261xf32> to vector<8x5xf32>
    %296 = vector.extract_strided_slice %294 {offsets = [0, 128], sizes = [8, 5], strides = [1, 1]} : vector<8x261xf32> to vector<8x5xf32>
    %297 = vector.extract_strided_slice %294 {offsets = [0, 256], sizes = [8, 5], strides = [1, 1]} : vector<8x261xf32> to vector<8x5xf32>
    %cst_69 = arith.constant dense<0.000000e+00> : vector<8x8xf32>
    %298 = tpu.matmul %295, %296, %cst_69 {dimension_numbers = #tpu.dot_dimension_numbers<[1], [1], [0], [0], [0, 0, 1, 0], [], []>} : vector<8x5xf32>, vector<8x5xf32>, vector<8x8xf32> -> vector<8x8xf32>
    %cst_70 = arith.constant dense<0xFF800000> : vector<8xf32>
    %299 = vector.multi_reduction <maximumf>, %298, %cst_70 [1] : vector<8x8xf32> to vector<8xf32>
    %300 = vector.shape_cast %299 : vector<8xf32> to vector<8x1xf32>
    %301 = vector.broadcast %300 : vector<8x1xf32> to vector<8x8xf32>
    %302 = arith.subf %298, %301 : vector<8x8xf32>
    %303 = math.exp %302 : vector<8x8xf32>
    %cst_71 = arith.constant dense<0.000000e+00> : vector<8xf32>
    %304 = vector.multi_reduction <add>, %303, %cst_71 [1] : vector<8x8xf32> to vector<8xf32>
    %305 = vector.shape_cast %304 : vector<8xf32> to vector<8x1xf32>
    %306 = tpu.reciprocal %305 {approx = true} : vector<8x1xf32> -> vector<8x1xf32>
    %307 = vector.broadcast %306 : vector<8x1xf32> to vector<8x8xf32>
    %308 = arith.mulf %303, %307 : vector<8x8xf32>
    %309 = arith.mulf %308, %1 : vector<8x8xf32>
    %310 = math.absf %309 : vector<8x8xf32>
    %cst_72 = arith.constant dense<0.000000e+00> : vector<8xf32>
    %311 = vector.multi_reduction <add>, %310, %cst_72 [1] : vector<8x8xf32> to vector<8xf32>
    %312 = vector.shape_cast %311 : vector<8xf32> to vector<8x1xf32>
    %cst_73 = arith.constant 9.99999996E-13 : f32
    %313 = vector.broadcast %cst_73 : f32 to vector<8x1xf32>
    %314 = arith.maximumf %312, %313 : vector<8x1xf32>
    %315 = tpu.reciprocal %314 {approx = true} : vector<8x1xf32> -> vector<8x1xf32>
    %316 = vector.broadcast %315 : vector<8x1xf32> to vector<8x8xf32>
    %317 = arith.mulf %309, %316 : vector<8x8xf32>
    %cst_74 = arith.constant dense<0.000000e+00> : vector<8x5xf32>
    %318 = tpu.matmul %317, %297, %cst_74 {dimension_numbers = #tpu.dot_dimension_numbers<[1], [0], [0], [1], [0, 0, 1, 1], [], []>} : vector<8x8xf32>, vector<8x5xf32>, vector<8x5xf32> -> vector<8x5xf32>
    %319 = arith.addf %318, %286 : vector<8x5xf32>
    %cst_75 = arith.constant dense<0.000000e+00> : vector<8x96xf32>
    %320 = tpu.matmul %319, %250, %cst_75 {dimension_numbers = #tpu.dot_dimension_numbers<[1], [0], [0], [1], [0, 0, 1, 1], [], []>} : vector<8x5xf32>, vector<5x96xf32>, vector<8x96xf32> -> vector<8x96xf32>
    %321 = vector.broadcast %251 : vector<1x96xf32> to vector<8x96xf32>
    %322 = arith.addf %320, %321 : vector<8x96xf32>
    %cst_76 = arith.constant 0.000000e+00 : f32
    %323 = vector.broadcast %cst_76 : f32 to vector<8x96xf32>
    %324 = arith.maximumf %322, %323 : vector<8x96xf32>
    %cst_77 = arith.constant dense<0.000000e+00> : vector<8x261xf32>
    %325 = tpu.matmul %324, %252, %cst_77 {dimension_numbers = #tpu.dot_dimension_numbers<[1], [0], [0], [1], [0, 0, 1, 1], [], []>} : vector<8x96xf32>, vector<96x261xf32>, vector<8x261xf32> -> vector<8x261xf32>
    %326 = vector.broadcast %253 : vector<1x261xf32> to vector<8x261xf32>
    %327 = arith.addf %325, %326 : vector<8x261xf32>
    %328 = vector.extract_strided_slice %327 {offsets = [0, 0], sizes = [8, 5], strides = [1, 1]} : vector<8x261xf32> to vector<8x5xf32>
    %329 = vector.extract_strided_slice %327 {offsets = [0, 128], sizes = [8, 5], strides = [1, 1]} : vector<8x261xf32> to vector<8x5xf32>
    %330 = vector.extract_strided_slice %327 {offsets = [0, 256], sizes = [8, 5], strides = [1, 1]} : vector<8x261xf32> to vector<8x5xf32>
    %cst_78 = arith.constant dense<0.000000e+00> : vector<8x8xf32>
    %331 = tpu.matmul %328, %329, %cst_78 {dimension_numbers = #tpu.dot_dimension_numbers<[1], [1], [0], [0], [0, 0, 1, 0], [], []>} : vector<8x5xf32>, vector<8x5xf32>, vector<8x8xf32> -> vector<8x8xf32>
    %cst_79 = arith.constant dense<0xFF800000> : vector<8xf32>
    %332 = vector.multi_reduction <maximumf>, %331, %cst_79 [1] : vector<8x8xf32> to vector<8xf32>
    %333 = vector.shape_cast %332 : vector<8xf32> to vector<8x1xf32>
    %334 = vector.broadcast %333 : vector<8x1xf32> to vector<8x8xf32>
    %335 = arith.subf %331, %334 : vector<8x8xf32>
    %336 = math.exp %335 : vector<8x8xf32>
    %cst_80 = arith.constant dense<0.000000e+00> : vector<8xf32>
    %337 = vector.multi_reduction <add>, %336, %cst_80 [1] : vector<8x8xf32> to vector<8xf32>
    %338 = vector.shape_cast %337 : vector<8xf32> to vector<8x1xf32>
    %339 = tpu.reciprocal %338 {approx = true} : vector<8x1xf32> -> vector<8x1xf32>
    %340 = vector.broadcast %339 : vector<8x1xf32> to vector<8x8xf32>
    %341 = arith.mulf %336, %340 : vector<8x8xf32>
    %342 = arith.mulf %341, %1 : vector<8x8xf32>
    %343 = math.absf %342 : vector<8x8xf32>
    %cst_81 = arith.constant dense<0.000000e+00> : vector<8xf32>
    %344 = vector.multi_reduction <add>, %343, %cst_81 [1] : vector<8x8xf32> to vector<8xf32>
    %345 = vector.shape_cast %344 : vector<8xf32> to vector<8x1xf32>
    %cst_82 = arith.constant 9.99999996E-13 : f32
    %346 = vector.broadcast %cst_82 : f32 to vector<8x1xf32>
    %347 = arith.maximumf %345, %346 : vector<8x1xf32>
    %348 = tpu.reciprocal %347 {approx = true} : vector<8x1xf32> -> vector<8x1xf32>
    %349 = vector.broadcast %348 : vector<8x1xf32> to vector<8x8xf32>
    %350 = arith.mulf %342, %349 : vector<8x8xf32>
    %cst_83 = arith.constant dense<0.000000e+00> : vector<8x5xf32>
    %351 = tpu.matmul %350, %330, %cst_83 {dimension_numbers = #tpu.dot_dimension_numbers<[1], [0], [0], [1], [0, 0, 1, 1], [], []>} : vector<8x8xf32>, vector<8x5xf32>, vector<8x5xf32> -> vector<8x5xf32>
    %352 = arith.addf %351, %319 : vector<8x5xf32>
    %c0_84 = arith.constant 0 : index
    %c0_85 = arith.constant 0 : index
    %c0_86 = arith.constant 0 : index
    %353 = vector.load %arg6[%c0_84, %c0_85, %c0_86] : memref<1x104x2xf32, #tpu.memory_space<vmem>>, vector<1x8x2xf32>
    %354 = vector.shape_cast %353 : vector<1x8x2xf32> to vector<8x2xf32>
    %355 = vector.shape_cast %3 : vector<8x2xf32> to vector<1x8x2xf32>
    tpu.vector_store %arg6[%c0_84, %c0_85, %c0_86], %355 {strides = array<i32>} : memref<1x104x2xf32, #tpu.memory_space<vmem>>, vector<1x8x2xf32>,
    %c208 = arith.constant 208 : index
    %c0_87 = arith.constant 0 : index
    %356 = vector.load %arg4[%c208, %c0_87] : memref<568x512xf32, #tpu.memory_space<vmem>>, vector<2x512xf32>
    %c216 = arith.constant 216 : index
    %c0_88 = arith.constant 0 : index
    %357 = vector.load %arg4[%c216, %c0_88] : memref<568x512xf32, #tpu.memory_space<vmem>>, vector<5x512xf32>
    %c200 = arith.constant 200 : index
    %c0_89 = arith.constant 0 : index
    %358 = vector.load %arg4[%c200, %c0_89] : memref<568x512xf32, #tpu.memory_space<vmem>>, vector<5x512xf32>
    %cst_90 = arith.constant dense<0.000000e+00> : vector<8x512xf32>
    %359 = tpu.matmul %352, %358, %cst_90 {dimension_numbers = #tpu.dot_dimension_numbers<[1], [0], [0], [1], [0, 0, 1, 1], [], []>} : vector<8x5xf32>, vector<5x512xf32>, vector<8x512xf32> -> vector<8x512xf32>
    %c224 = arith.constant 224 : index
    %c0_91 = arith.constant 0 : index
    %360 = vector.load %arg4[%c224, %c0_91] : memref<568x512xf32, #tpu.memory_space<vmem>>, vector<1x512xf32>
    %361 = vector.broadcast %360 : vector<1x512xf32> to vector<8x512xf32>
    %362 = arith.addf %359, %361 : vector<8x512xf32>
    %c232 = arith.constant 232 : index
    %c0_92 = arith.constant 0 : index
    %363 = vector.load %arg4[%c232, %c0_92] : memref<568x512xf32, #tpu.memory_space<vmem>>, vector<5x192xf32>
    %c240 = arith.constant 240 : index
    %c0_93 = arith.constant 0 : index
    %364 = vector.load %arg4[%c240, %c0_93] : memref<568x512xf32, #tpu.memory_space<vmem>>, vector<1x192xf32>
    %c248 = arith.constant 248 : index
    %c0_94 = arith.constant 0 : index
    %365 = vector.load %arg4[%c248, %c0_94] : memref<568x512xf32, #tpu.memory_space<vmem>>, vector<1x192xf32>
    %c256 = arith.constant 256 : index
    %c0_95 = arith.constant 0 : index
    %366 = vector.load %arg4[%c256, %c0_95] : memref<568x512xf32, #tpu.memory_space<vmem>>, vector<192x96xf32>
    %c448 = arith.constant 448 : index
    %c0_96 = arith.constant 0 : index
    %367 = vector.load %arg4[%c448, %c0_96] : memref<568x512xf32, #tpu.memory_space<vmem>>, vector<1x96xf32>
    %c456 = arith.constant 456 : index
    %c0_97 = arith.constant 0 : index
    %368 = vector.load %arg4[%c456, %c0_97] : memref<568x512xf32, #tpu.memory_space<vmem>>, vector<1x96xf32>
    %c464 = arith.constant 464 : index
    %c0_98 = arith.constant 0 : index
    %369 = vector.load %arg4[%c464, %c0_98] : memref<568x512xf32, #tpu.memory_space<vmem>>, vector<96x5xf32>
    %c560 = arith.constant 560 : index
    %c0_99 = arith.constant 0 : index
    %370 = vector.load %arg4[%c560, %c0_99] : memref<568x512xf32, #tpu.memory_space<vmem>>, vector<1x5xf32>
    %371 = tpu.iota {dimensions = array<i32: 1>} : vector<8x2xi32>
    %cst_100 = arith.constant 0.000000e+00 : f32
    %372 = vector.broadcast %cst_100 : f32 to vector<8x5xf32>
    %cst_101 = arith.constant 0.000000e+00 : f32
    %373 = vector.broadcast %cst_101 : f32 to vector<8x5xf32>
    %cst_102 = arith.constant dense<0.000000e+00> : vector<8x512xf32>
    %374 = tpu.matmul %3, %356, %cst_102 {dimension_numbers = #tpu.dot_dimension_numbers<[1], [0], [0], [1], [0, 0, 1, 1], [], []>} : vector<8x2xf32>, vector<2x512xf32>, vector<8x512xf32> -> vector<8x512xf32>
    %375 = arith.addf %362, %374 : vector<8x512xf32>
    %cst_103 = arith.constant dense<0.000000e+00> : vector<8x512xf32>
    %376 = tpu.matmul %372, %357, %cst_103 {dimension_numbers = #tpu.dot_dimension_numbers<[1], [0], [0], [1], [0, 0, 1, 1], [], []>} : vector<8x5xf32>, vector<5x512xf32>, vector<8x512xf32> -> vector<8x512xf32>
    %377 = arith.addf %375, %376 : vector<8x512xf32>
    %378 = vector.extract_strided_slice %377 {offsets = [0, 0], sizes = [8, 5], strides = [1, 1]} : vector<8x512xf32> to vector<8x5xf32>
    %379 = arith.negf %378 : vector<8x5xf32>
    %380 = math.exp %379 : vector<8x5xf32>
    %cst_104 = arith.constant 1.000000e+00 : f32
    %381 = vector.broadcast %cst_104 : f32 to vector<8x5xf32>
    %382 = arith.addf %381, %380 : vector<8x5xf32>
    %383 = arith.divf %381, %382 : vector<8x5xf32>
    %384 = vector.extract_strided_slice %377 {offsets = [0, 128], sizes = [8, 5], strides = [1, 1]} : vector<8x512xf32> to vector<8x5xf32>
    %385 = arith.negf %384 : vector<8x5xf32>
    %386 = math.exp %385 : vector<8x5xf32>
    %cst_105 = arith.constant 1.000000e+00 : f32
    %387 = vector.broadcast %cst_105 : f32 to vector<8x5xf32>
    %388 = arith.addf %387, %386 : vector<8x5xf32>
    %389 = arith.divf %387, %388 : vector<8x5xf32>
    %390 = vector.extract_strided_slice %377 {offsets = [0, 256], sizes = [8, 5], strides = [1, 1]} : vector<8x512xf32> to vector<8x5xf32>
    %391 = math.tanh %390 : vector<8x5xf32>
    %392 = vector.extract_strided_slice %377 {offsets = [0, 384], sizes = [8, 5], strides = [1, 1]} : vector<8x512xf32> to vector<8x5xf32>
    %393 = arith.negf %392 : vector<8x5xf32>
    %394 = math.exp %393 : vector<8x5xf32>
    %cst_106 = arith.constant 1.000000e+00 : f32
    %395 = vector.broadcast %cst_106 : f32 to vector<8x5xf32>
    %396 = arith.addf %395, %394 : vector<8x5xf32>
    %397 = arith.divf %395, %396 : vector<8x5xf32>
    %398 = arith.mulf %389, %373 : vector<8x5xf32>
    %399 = arith.mulf %383, %391 : vector<8x5xf32>
    %400 = arith.addf %398, %399 : vector<8x5xf32>
    %401 = math.tanh %400 : vector<8x5xf32>
    %402 = arith.mulf %397, %401 : vector<8x5xf32>
    %cst_107 = arith.constant dense<0.000000e+00> : vector<8x192xf32>
    %403 = tpu.matmul %402, %363, %cst_107 {dimension_numbers = #tpu.dot_dimension_numbers<[1], [0], [0], [1], [0, 0, 1, 1], [], []>} : vector<8x5xf32>, vector<5x192xf32>, vector<8x192xf32> -> vector<8x192xf32>
    %404 = vector.broadcast %364 : vector<1x192xf32> to vector<8x192xf32>
    %405 = arith.addf %403, %404 : vector<8x192xf32>
    %cst_108 = arith.constant 0.000000e+00 : f32
    %406 = vector.broadcast %cst_108 : f32 to vector<8x192xf32>
    %407 = arith.cmpf oge, %405, %406 : vector<8x192xf32>
    %408 = vector.broadcast %365 : vector<1x192xf32> to vector<8x192xf32>
    %409 = arith.mulf %405, %408 : vector<8x192xf32>
    %410 = arith.select %407, %405, %409 : vector<8x192xi1>, vector<8x192xf32>
    %cst_109 = arith.constant dense<0.000000e+00> : vector<8x96xf32>
    %411 = tpu.matmul %410, %366, %cst_109 {dimension_numbers = #tpu.dot_dimension_numbers<[1], [0], [0], [1], [0, 0, 1, 1], [], []>} : vector<8x192xf32>, vector<192x96xf32>, vector<8x96xf32> -> vector<8x96xf32>
    %412 = vector.broadcast %367 : vector<1x96xf32> to vector<8x96xf32>
    %413 = arith.addf %411, %412 : vector<8x96xf32>
    %cst_110 = arith.constant 0.000000e+00 : f32
    %414 = vector.broadcast %cst_110 : f32 to vector<8x96xf32>
    %415 = arith.cmpf oge, %413, %414 : vector<8x96xf32>
    %416 = vector.broadcast %368 : vector<1x96xf32> to vector<8x96xf32>
    %417 = arith.mulf %413, %416 : vector<8x96xf32>
    %418 = arith.select %415, %413, %417 : vector<8x96xi1>, vector<8x96xf32>
    %cst_111 = arith.constant dense<0.000000e+00> : vector<8x5xf32>
    %419 = tpu.matmul %418, %369, %cst_111 {dimension_numbers = #tpu.dot_dimension_numbers<[1], [0], [0], [1], [0, 0, 1, 1], [], []>} : vector<8x96xf32>, vector<96x5xf32>, vector<8x5xf32> -> vector<8x5xf32>
    %420 = vector.broadcast %370 : vector<1x5xf32> to vector<8x5xf32>
    %421 = arith.addf %419, %420 : vector<8x5xf32>
    %c0_112 = arith.constant 0 : index
    %c0_113 = arith.constant 0 : index
    %c0_114 = arith.constant 0 : index
    %422 = vector.load %arg5[%c0_112, %c0_113, %c0_114] : memref<1x96x5xf32, #tpu.memory_space<vmem>>, vector<1x8x5xf32>
    %423 = vector.shape_cast %422 : vector<1x8x5xf32> to vector<8x5xf32>
    %424 = vector.shape_cast %421 : vector<8x5xf32> to vector<1x8x5xf32>
    tpu.vector_store %arg5[%c0_112, %c0_113, %c0_114], %424 {strides = array<i32>} : memref<1x96x5xf32, #tpu.memory_space<vmem>>, vector<1x8x5xf32>,
    %425 = vector.extract_strided_slice %421 {offsets = [0, 0], sizes = [8, 2], strides = [1, 1]} : vector<8x5xf32> to vector<8x2xf32>
    %426 = vector.extract_strided_slice %421 {offsets = [0, 2], sizes = [8, 2], strides = [1, 1]} : vector<8x5xf32> to vector<8x2xf32>
    %427 = math.exp %426 : vector<8x2xf32>
    %428 = vector.extract_strided_slice %421 {offsets = [0, 4], sizes = [8, 1], strides = [1, 1]} : vector<8x5xf32> to vector<8x1xf32>
    %429 = math.tanh %428 : vector<8x1xf32>
    %430 = arith.mulf %429, %429 : vector<8x1xf32>
    %cst_115 = arith.constant 1.000000e+00 : f32
    %431 = vector.broadcast %cst_115 : f32 to vector<8x1xf32>
    %432 = arith.subf %431, %430 : vector<8x1xf32>
    %cst_116 = arith.constant 9.99999974E-6 : f32
    %cst_117 = arith.constant 1.000000e+00 : f32
    %433 = vector.broadcast %cst_116 : f32 to vector<8x1xf32>
    %434 = arith.maximumf %433, %432 : vector<8x1xf32>
    %435 = vector.broadcast %cst_117 : f32 to vector<8x1xf32>
    %436 = arith.minimumf %435, %434 : vector<8x1xf32>
    %c0_118 = arith.constant 0 : index
    %c0_119 = arith.constant 0 : index
    %c0_120 = arith.constant 0 : index
    %437 = vector.load %arg3[%c0_118, %c0_119, %c0_120] : memref<1x96x2xf32, #tpu.memory_space<vmem>>, vector<1x8x2xf32>
    %438 = vector.shape_cast %437 : vector<1x8x2xf32> to vector<8x2xf32>
    %439 = vector.extract_strided_slice %438 {offsets = [0, 0], sizes = [8, 1], strides = [1, 1]} : vector<8x2xf32> to vector<8x1xf32>
    %440 = vector.extract_strided_slice %438 {offsets = [0, 1], sizes = [8, 1], strides = [1, 1]} : vector<8x2xf32> to vector<8x1xf32>
    %c0_i32 = arith.constant 0 : i32
    %441 = vector.broadcast %c0_i32 : i32 to vector<8x2xi32>
    %442 = arith.cmpi eq, %371, %441 : vector<8x2xi32>
    %443 = arith.mulf %429, %439 : vector<8x1xf32>
    %444 = math.sqrt %436 : vector<8x1xf32>
    %445 = arith.mulf %444, %440 : vector<8x1xf32>
    %446 = arith.addf %443, %445 : vector<8x1xf32>
    %447 = vector.shape_cast %439 : vector<8x1xf32> to vector<8x1xf32>
    %448 = vector.broadcast %447 : vector<8x1xf32> to vector<8x2xf32>
    %449 = vector.shape_cast %446 : vector<8x1xf32> to vector<8x1xf32>
    %450 = vector.broadcast %449 : vector<8x1xf32> to vector<8x2xf32>
    %451 = arith.select %442, %448, %450 : vector<8x2xi1>, vector<8x2xf32>
    %452 = arith.mulf %427, %451 : vector<8x2xf32>
    %453 = arith.addf %425, %452 : vector<8x2xf32>
    %c0_121 = arith.constant 0 : index
    %c8_122 = arith.constant 8 : index
    %c0_123 = arith.constant 0 : index
    %454 = vector.load %arg6[%c0_121, %c8_122, %c0_123] : memref<1x104x2xf32, #tpu.memory_space<vmem>>, vector<1x8x2xf32>
    %455 = vector.shape_cast %454 : vector<1x8x2xf32> to vector<8x2xf32>
    %456 = vector.shape_cast %453 : vector<8x2xf32> to vector<1x8x2xf32>
    tpu.vector_store %arg6[%c0_121, %c8_122, %c0_123], %456 {strides = array<i32>} : memref<1x104x2xf32, #tpu.memory_space<vmem>>, vector<1x8x2xf32>,
    %cst_124 = arith.constant dense<0.000000e+00> : vector<8x512xf32>
    %457 = tpu.matmul %453, %356, %cst_124 {dimension_numbers = #tpu.dot_dimension_numbers<[1], [0], [0], [1], [0, 0, 1, 1], [], []>} : vector<8x2xf32>, vector<2x512xf32>, vector<8x512xf32> -> vector<8x512xf32>
    %458 = arith.addf %362, %457 : vector<8x512xf32>
    %cst_125 = arith.constant dense<0.000000e+00> : vector<8x512xf32>
    %459 = tpu.matmul %402, %357, %cst_125 {dimension_numbers = #tpu.dot_dimension_numbers<[1], [0], [0], [1], [0, 0, 1, 1], [], []>} : vector<8x5xf32>, vector<5x512xf32>, vector<8x512xf32> -> vector<8x512xf32>
    %460 = arith.addf %458, %459 : vector<8x512xf32>
    %461 = vector.extract_strided_slice %460 {offsets = [0, 0], sizes = [8, 5], strides = [1, 1]} : vector<8x512xf32> to vector<8x5xf32>
    %462 = arith.negf %461 : vector<8x5xf32>
    %463 = math.exp %462 : vector<8x5xf32>
    %cst_126 = arith.constant 1.000000e+00 : f32
    %464 = vector.broadcast %cst_126 : f32 to vector<8x5xf32>
    %465 = arith.addf %464, %463 : vector<8x5xf32>
    %466 = arith.divf %464, %465 : vector<8x5xf32>
    %467 = vector.extract_strided_slice %460 {offsets = [0, 128], sizes = [8, 5], strides = [1, 1]} : vector<8x512xf32> to vector<8x5xf32>
    %468 = arith.negf %467 : vector<8x5xf32>
    %469 = math.exp %468 : vector<8x5xf32>
    %cst_127 = arith.constant 1.000000e+00 : f32
    %470 = vector.broadcast %cst_127 : f32 to vector<8x5xf32>
    %471 = arith.addf %470, %469 : vector<8x5xf32>
    %472 = arith.divf %470, %471 : vector<8x5xf32>
    %473 = vector.extract_strided_slice %460 {offsets = [0, 256], sizes = [8, 5], strides = [1, 1]} : vector<8x512xf32> to vector<8x5xf32>
    %474 = math.tanh %473 : vector<8x5xf32>
    %475 = vector.extract_strided_slice %460 {offsets = [0, 384], sizes = [8, 5], strides = [1, 1]} : vector<8x512xf32> to vector<8x5xf32>
    %476 = arith.negf %475 : vector<8x5xf32>
    %477 = math.exp %476 : vector<8x5xf32>
    %cst_128 = arith.constant 1.000000e+00 : f32
    %478 = vector.broadcast %cst_128 : f32 to vector<8x5xf32>
    %479 = arith.addf %478, %477 : vector<8x5xf32>
    %480 = arith.divf %478, %479 : vector<8x5xf32>
    %481 = arith.mulf %472, %400 : vector<8x5xf32>
    %482 = arith.mulf %466, %474 : vector<8x5xf32>
    %483 = arith.addf %481, %482 : vector<8x5xf32>
    %484 = math.tanh %483 : vector<8x5xf32>
    %485 = arith.mulf %480, %484 : vector<8x5xf32>
    %cst_129 = arith.constant dense<0.000000e+00> : vector<8x192xf32>
    %486 = tpu.matmul %485, %363, %cst_129 {dimension_numbers = #tpu.dot_dimension_numbers<[1], [0], [0], [1], [0, 0, 1, 1], [], []>} : vector<8x5xf32>, vector<5x192xf32>, vector<8x192xf32> -> vector<8x192xf32>
    %487 = vector.broadcast %364 : vector<1x192xf32> to vector<8x192xf32>
    %488 = arith.addf %486, %487 : vector<8x192xf32>
    %cst_130 = arith.constant 0.000000e+00 : f32
    %489 = vector.broadcast %cst_130 : f32 to vector<8x192xf32>
    %490 = arith.cmpf oge, %488, %489 : vector<8x192xf32>
    %491 = vector.broadcast %365 : vector<1x192xf32> to vector<8x192xf32>
    %492 = arith.mulf %488, %491 : vector<8x192xf32>
    %493 = arith.select %490, %488, %492 : vector<8x192xi1>, vector<8x192xf32>
    %cst_131 = arith.constant dense<0.000000e+00> : vector<8x96xf32>
    %494 = tpu.matmul %493, %366, %cst_131 {dimension_numbers = #tpu.dot_dimension_numbers<[1], [0], [0], [1], [0, 0, 1, 1], [], []>} : vector<8x192xf32>, vector<192x96xf32>, vector<8x96xf32> -> vector<8x96xf32>
    %495 = vector.broadcast %367 : vector<1x96xf32> to vector<8x96xf32>
    %496 = arith.addf %494, %495 : vector<8x96xf32>
    %cst_132 = arith.constant 0.000000e+00 : f32
    %497 = vector.broadcast %cst_132 : f32 to vector<8x96xf32>
    %498 = arith.cmpf oge, %496, %497 : vector<8x96xf32>
    %499 = vector.broadcast %368 : vector<1x96xf32> to vector<8x96xf32>
    %500 = arith.mulf %496, %499 : vector<8x96xf32>
    %501 = arith.select %498, %496, %500 : vector<8x96xi1>, vector<8x96xf32>
    %cst_133 = arith.constant dense<0.000000e+00> : vector<8x5xf32>
    %502 = tpu.matmul %501, %369, %cst_133 {dimension_numbers = #tpu.dot_dimension_numbers<[1], [0], [0], [1], [0, 0, 1, 1], [], []>} : vector<8x96xf32>, vector<96x5xf32>, vector<8x5xf32> -> vector<8x5xf32>
    %503 = vector.broadcast %370 : vector<1x5xf32> to vector<8x5xf32>
    %504 = arith.addf %502, %503 : vector<8x5xf32>
    %c0_134 = arith.constant 0 : index
    %c8_135 = arith.constant 8 : index
    %c0_136 = arith.constant 0 : index
    %505 = vector.load %arg5[%c0_134, %c8_135, %c0_136] : memref<1x96x5xf32, #tpu.memory_space<vmem>>, vector<1x8x5xf32>
    %506 = vector.shape_cast %505 : vector<1x8x5xf32> to vector<8x5xf32>
    %507 = vector.shape_cast %504 : vector<8x5xf32> to vector<1x8x5xf32>
    tpu.vector_store %arg5[%c0_134, %c8_135, %c0_136], %507 {strides = array<i32>} : memref<1x96x5xf32, #tpu.memory_space<vmem>>, vector<1x8x5xf32>,
    %508 = vector.extract_strided_slice %504 {offsets = [0, 0], sizes = [8, 2], strides = [1, 1]} : vector<8x5xf32> to vector<8x2xf32>
    %509 = vector.extract_strided_slice %504 {offsets = [0, 2], sizes = [8, 2], strides = [1, 1]} : vector<8x5xf32> to vector<8x2xf32>
    %510 = math.exp %509 : vector<8x2xf32>
    %511 = vector.extract_strided_slice %504 {offsets = [0, 4], sizes = [8, 1], strides = [1, 1]} : vector<8x5xf32> to vector<8x1xf32>
    %512 = math.tanh %511 : vector<8x1xf32>
    %513 = arith.mulf %512, %512 : vector<8x1xf32>
    %cst_137 = arith.constant 1.000000e+00 : f32
    %514 = vector.broadcast %cst_137 : f32 to vector<8x1xf32>
    %515 = arith.subf %514, %513 : vector<8x1xf32>
    %cst_138 = arith.constant 9.99999974E-6 : f32
    %cst_139 = arith.constant 1.000000e+00 : f32
    %516 = vector.broadcast %cst_138 : f32 to vector<8x1xf32>
    %517 = arith.maximumf %516, %515 : vector<8x1xf32>
    %518 = vector.broadcast %cst_139 : f32 to vector<8x1xf32>
    %519 = arith.minimumf %518, %517 : vector<8x1xf32>
    %c0_140 = arith.constant 0 : index
    %c8_141 = arith.constant 8 : index
    %c0_142 = arith.constant 0 : index
    %520 = vector.load %arg3[%c0_140, %c8_141, %c0_142] : memref<1x96x2xf32, #tpu.memory_space<vmem>>, vector<1x8x2xf32>
    %521 = vector.shape_cast %520 : vector<1x8x2xf32> to vector<8x2xf32>
    %522 = vector.extract_strided_slice %521 {offsets = [0, 0], sizes = [8, 1], strides = [1, 1]} : vector<8x2xf32> to vector<8x1xf32>
    %523 = vector.extract_strided_slice %521 {offsets = [0, 1], sizes = [8, 1], strides = [1, 1]} : vector<8x2xf32> to vector<8x1xf32>
    %c0_i32_143 = arith.constant 0 : i32
    %524 = vector.broadcast %c0_i32_143 : i32 to vector<8x2xi32>
    %525 = arith.cmpi eq, %371, %524 : vector<8x2xi32>
    %526 = arith.mulf %512, %522 : vector<8x1xf32>
    %527 = math.sqrt %519 : vector<8x1xf32>
    %528 = arith.mulf %527, %523 : vector<8x1xf32>
    %529 = arith.addf %526, %528 : vector<8x1xf32>
    %530 = vector.shape_cast %522 : vector<8x1xf32> to vector<8x1xf32>
    %531 = vector.broadcast %530 : vector<8x1xf32> to vector<8x2xf32>
    %532 = vector.shape_cast %529 : vector<8x1xf32> to vector<8x1xf32>
    %533 = vector.broadcast %532 : vector<8x1xf32> to vector<8x2xf32>
    %534 = arith.select %525, %531, %533 : vector<8x2xi1>, vector<8x2xf32>
    %535 = arith.mulf %510, %534 : vector<8x2xf32>
    %536 = arith.addf %508, %535 : vector<8x2xf32>
    %c0_144 = arith.constant 0 : index
    %c16_145 = arith.constant 16 : index
    %c0_146 = arith.constant 0 : index
    %537 = vector.load %arg6[%c0_144, %c16_145, %c0_146] : memref<1x104x2xf32, #tpu.memory_space<vmem>>, vector<1x8x2xf32>
    %538 = vector.shape_cast %537 : vector<1x8x2xf32> to vector<8x2xf32>
    %539 = vector.shape_cast %536 : vector<8x2xf32> to vector<1x8x2xf32>
    tpu.vector_store %arg6[%c0_144, %c16_145, %c0_146], %539 {strides = array<i32>} : memref<1x104x2xf32, #tpu.memory_space<vmem>>, vector<1x8x2xf32>,
    %cst_147 = arith.constant dense<0.000000e+00> : vector<8x512xf32>
    %540 = tpu.matmul %536, %356, %cst_147 {dimension_numbers = #tpu.dot_dimension_numbers<[1], [0], [0], [1], [0, 0, 1, 1], [], []>} : vector<8x2xf32>, vector<2x512xf32>, vector<8x512xf32> -> vector<8x512xf32>
    %541 = arith.addf %362, %540 : vector<8x512xf32>
    %cst_148 = arith.constant dense<0.000000e+00> : vector<8x512xf32>
    %542 = tpu.matmul %485, %357, %cst_148 {dimension_numbers = #tpu.dot_dimension_numbers<[1], [0], [0], [1], [0, 0, 1, 1], [], []>} : vector<8x5xf32>, vector<5x512xf32>, vector<8x512xf32> -> vector<8x512xf32>
    %543 = arith.addf %541, %542 : vector<8x512xf32>
    %544 = vector.extract_strided_slice %543 {offsets = [0, 0], sizes = [8, 5], strides = [1, 1]} : vector<8x512xf32> to vector<8x5xf32>
    %545 = arith.negf %544 : vector<8x5xf32>
    %546 = math.exp %545 : vector<8x5xf32>
    %cst_149 = arith.constant 1.000000e+00 : f32
    %547 = vector.broadcast %cst_149 : f32 to vector<8x5xf32>
    %548 = arith.addf %547, %546 : vector<8x5xf32>
    %549 = arith.divf %547, %548 : vector<8x5xf32>
    %550 = vector.extract_strided_slice %543 {offsets = [0, 128], sizes = [8, 5], strides = [1, 1]} : vector<8x512xf32> to vector<8x5xf32>
    %551 = arith.negf %550 : vector<8x5xf32>
    %552 = math.exp %551 : vector<8x5xf32>
    %cst_150 = arith.constant 1.000000e+00 : f32
    %553 = vector.broadcast %cst_150 : f32 to vector<8x5xf32>
    %554 = arith.addf %553, %552 : vector<8x5xf32>
    %555 = arith.divf %553, %554 : vector<8x5xf32>
    %556 = vector.extract_strided_slice %543 {offsets = [0, 256], sizes = [8, 5], strides = [1, 1]} : vector<8x512xf32> to vector<8x5xf32>
    %557 = math.tanh %556 : vector<8x5xf32>
    %558 = vector.extract_strided_slice %543 {offsets = [0, 384], sizes = [8, 5], strides = [1, 1]} : vector<8x512xf32> to vector<8x5xf32>
    %559 = arith.negf %558 : vector<8x5xf32>
    %560 = math.exp %559 : vector<8x5xf32>
    %cst_151 = arith.constant 1.000000e+00 : f32
    %561 = vector.broadcast %cst_151 : f32 to vector<8x5xf32>
    %562 = arith.addf %561, %560 : vector<8x5xf32>
    %563 = arith.divf %561, %562 : vector<8x5xf32>
    %564 = arith.mulf %555, %483 : vector<8x5xf32>
    %565 = arith.mulf %549, %557 : vector<8x5xf32>
    %566 = arith.addf %564, %565 : vector<8x5xf32>
    %567 = math.tanh %566 : vector<8x5xf32>
    %568 = arith.mulf %563, %567 : vector<8x5xf32>
    %cst_152 = arith.constant dense<0.000000e+00> : vector<8x192xf32>
    %569 = tpu.matmul %568, %363, %cst_152 {dimension_numbers = #tpu.dot_dimension_numbers<[1], [0], [0], [1], [0, 0, 1, 1], [], []>} : vector<8x5xf32>, vector<5x192xf32>, vector<8x192xf32> -> vector<8x192xf32>
    %570 = vector.broadcast %364 : vector<1x192xf32> to vector<8x192xf32>
    %571 = arith.addf %569, %570 : vector<8x192xf32>
    %cst_153 = arith.constant 0.000000e+00 : f32
    %572 = vector.broadcast %cst_153 : f32 to vector<8x192xf32>
    %573 = arith.cmpf oge, %571, %572 : vector<8x192xf32>
    %574 = vector.broadcast %365 : vector<1x192xf32> to vector<8x192xf32>
    %575 = arith.mulf %571, %574 : vector<8x192xf32>
    %576 = arith.select %573, %571, %575 : vector<8x192xi1>, vector<8x192xf32>
    %cst_154 = arith.constant dense<0.000000e+00> : vector<8x96xf32>
    %577 = tpu.matmul %576, %366, %cst_154 {dimension_numbers = #tpu.dot_dimension_numbers<[1], [0], [0], [1], [0, 0, 1, 1], [], []>} : vector<8x192xf32>, vector<192x96xf32>, vector<8x96xf32> -> vector<8x96xf32>
    %578 = vector.broadcast %367 : vector<1x96xf32> to vector<8x96xf32>
    %579 = arith.addf %577, %578 : vector<8x96xf32>
    %cst_155 = arith.constant 0.000000e+00 : f32
    %580 = vector.broadcast %cst_155 : f32 to vector<8x96xf32>
    %581 = arith.cmpf oge, %579, %580 : vector<8x96xf32>
    %582 = vector.broadcast %368 : vector<1x96xf32> to vector<8x96xf32>
    %583 = arith.mulf %579, %582 : vector<8x96xf32>
    %584 = arith.select %581, %579, %583 : vector<8x96xi1>, vector<8x96xf32>
    %cst_156 = arith.constant dense<0.000000e+00> : vector<8x5xf32>
    %585 = tpu.matmul %584, %369, %cst_156 {dimension_numbers = #tpu.dot_dimension_numbers<[1], [0], [0], [1], [0, 0, 1, 1], [], []>} : vector<8x96xf32>, vector<96x5xf32>, vector<8x5xf32> -> vector<8x5xf32>
    %586 = vector.broadcast %370 : vector<1x5xf32> to vector<8x5xf32>
    %587 = arith.addf %585, %586 : vector<8x5xf32>
    %c0_157 = arith.constant 0 : index
    %c16_158 = arith.constant 16 : index
    %c0_159 = arith.constant 0 : index
    %588 = vector.load %arg5[%c0_157, %c16_158, %c0_159] : memref<1x96x5xf32, #tpu.memory_space<vmem>>, vector<1x8x5xf32>
    %589 = vector.shape_cast %588 : vector<1x8x5xf32> to vector<8x5xf32>
    %590 = vector.shape_cast %587 : vector<8x5xf32> to vector<1x8x5xf32>
    tpu.vector_store %arg5[%c0_157, %c16_158, %c0_159], %590 {strides = array<i32>} : memref<1x96x5xf32, #tpu.memory_space<vmem>>, vector<1x8x5xf32>,
    %591 = vector.extract_strided_slice %587 {offsets = [0, 0], sizes = [8, 2], strides = [1, 1]} : vector<8x5xf32> to vector<8x2xf32>
    %592 = vector.extract_strided_slice %587 {offsets = [0, 2], sizes = [8, 2], strides = [1, 1]} : vector<8x5xf32> to vector<8x2xf32>
    %593 = math.exp %592 : vector<8x2xf32>
    %594 = vector.extract_strided_slice %587 {offsets = [0, 4], sizes = [8, 1], strides = [1, 1]} : vector<8x5xf32> to vector<8x1xf32>
    %595 = math.tanh %594 : vector<8x1xf32>
    %596 = arith.mulf %595, %595 : vector<8x1xf32>
    %cst_160 = arith.constant 1.000000e+00 : f32
    %597 = vector.broadcast %cst_160 : f32 to vector<8x1xf32>
    %598 = arith.subf %597, %596 : vector<8x1xf32>
    %cst_161 = arith.constant 9.99999974E-6 : f32
    %cst_162 = arith.constant 1.000000e+00 : f32
    %599 = vector.broadcast %cst_161 : f32 to vector<8x1xf32>
    %600 = arith.maximumf %599, %598 : vector<8x1xf32>
    %601 = vector.broadcast %cst_162 : f32 to vector<8x1xf32>
    %602 = arith.minimumf %601, %600 : vector<8x1xf32>
    %c0_163 = arith.constant 0 : index
    %c16_164 = arith.constant 16 : index
    %c0_165 = arith.constant 0 : index
    %603 = vector.load %arg3[%c0_163, %c16_164, %c0_165] : memref<1x96x2xf32, #tpu.memory_space<vmem>>, vector<1x8x2xf32>
    %604 = vector.shape_cast %603 : vector<1x8x2xf32> to vector<8x2xf32>
    %605 = vector.extract_strided_slice %604 {offsets = [0, 0], sizes = [8, 1], strides = [1, 1]} : vector<8x2xf32> to vector<8x1xf32>
    %606 = vector.extract_strided_slice %604 {offsets = [0, 1], sizes = [8, 1], strides = [1, 1]} : vector<8x2xf32> to vector<8x1xf32>
    %c0_i32_166 = arith.constant 0 : i32
    %607 = vector.broadcast %c0_i32_166 : i32 to vector<8x2xi32>
    %608 = arith.cmpi eq, %371, %607 : vector<8x2xi32>
    %609 = arith.mulf %595, %605 : vector<8x1xf32>
    %610 = math.sqrt %602 : vector<8x1xf32>
    %611 = arith.mulf %610, %606 : vector<8x1xf32>
    %612 = arith.addf %609, %611 : vector<8x1xf32>
    %613 = vector.shape_cast %605 : vector<8x1xf32> to vector<8x1xf32>
    %614 = vector.broadcast %613 : vector<8x1xf32> to vector<8x2xf32>
    %615 = vector.shape_cast %612 : vector<8x1xf32> to vector<8x1xf32>
    %616 = vector.broadcast %615 : vector<8x1xf32> to vector<8x2xf32>
    %617 = arith.select %608, %614, %616 : vector<8x2xi1>, vector<8x2xf32>
    %618 = arith.mulf %593, %617 : vector<8x2xf32>
    %619 = arith.addf %591, %618 : vector<8x2xf32>
    %c0_167 = arith.constant 0 : index
    %c24 = arith.constant 24 : index
    %c0_168 = arith.constant 0 : index
    %620 = vector.load %arg6[%c0_167, %c24, %c0_168] : memref<1x104x2xf32, #tpu.memory_space<vmem>>, vector<1x8x2xf32>
    %621 = vector.shape_cast %620 : vector<1x8x2xf32> to vector<8x2xf32>
    %622 = vector.shape_cast %619 : vector<8x2xf32> to vector<1x8x2xf32>
    tpu.vector_store %arg6[%c0_167, %c24, %c0_168], %622 {strides = array<i32>} : memref<1x104x2xf32, #tpu.memory_space<vmem>>, vector<1x8x2xf32>,
    %cst_169 = arith.constant dense<0.000000e+00> : vector<8x512xf32>
    %623 = tpu.matmul %619, %356, %cst_169 {dimension_numbers = #tpu.dot_dimension_numbers<[1], [0], [0], [1], [0, 0, 1, 1], [], []>} : vector<8x2xf32>, vector<2x512xf32>, vector<8x512xf32> -> vector<8x512xf32>
    %624 = arith.addf %362, %623 : vector<8x512xf32>
    %cst_170 = arith.constant dense<0.000000e+00> : vector<8x512xf32>
    %625 = tpu.matmul %568, %357, %cst_170 {dimension_numbers = #tpu.dot_dimension_numbers<[1], [0], [0], [1], [0, 0, 1, 1], [], []>} : vector<8x5xf32>, vector<5x512xf32>, vector<8x512xf32> -> vector<8x512xf32>
    %626 = arith.addf %624, %625 : vector<8x512xf32>
    %627 = vector.extract_strided_slice %626 {offsets = [0, 0], sizes = [8, 5], strides = [1, 1]} : vector<8x512xf32> to vector<8x5xf32>
    %628 = arith.negf %627 : vector<8x5xf32>
    %629 = math.exp %628 : vector<8x5xf32>
    %cst_171 = arith.constant 1.000000e+00 : f32
    %630 = vector.broadcast %cst_171 : f32 to vector<8x5xf32>
    %631 = arith.addf %630, %629 : vector<8x5xf32>
    %632 = arith.divf %630, %631 : vector<8x5xf32>
    %633 = vector.extract_strided_slice %626 {offsets = [0, 128], sizes = [8, 5], strides = [1, 1]} : vector<8x512xf32> to vector<8x5xf32>
    %634 = arith.negf %633 : vector<8x5xf32>
    %635 = math.exp %634 : vector<8x5xf32>
    %cst_172 = arith.constant 1.000000e+00 : f32
    %636 = vector.broadcast %cst_172 : f32 to vector<8x5xf32>
    %637 = arith.addf %636, %635 : vector<8x5xf32>
    %638 = arith.divf %636, %637 : vector<8x5xf32>
    %639 = vector.extract_strided_slice %626 {offsets = [0, 256], sizes = [8, 5], strides = [1, 1]} : vector<8x512xf32> to vector<8x5xf32>
    %640 = math.tanh %639 : vector<8x5xf32>
    %641 = vector.extract_strided_slice %626 {offsets = [0, 384], sizes = [8, 5], strides = [1, 1]} : vector<8x512xf32> to vector<8x5xf32>
    %642 = arith.negf %641 : vector<8x5xf32>
    %643 = math.exp %642 : vector<8x5xf32>
    %cst_173 = arith.constant 1.000000e+00 : f32
    %644 = vector.broadcast %cst_173 : f32 to vector<8x5xf32>
    %645 = arith.addf %644, %643 : vector<8x5xf32>
    %646 = arith.divf %644, %645 : vector<8x5xf32>
    %647 = arith.mulf %638, %566 : vector<8x5xf32>
    %648 = arith.mulf %632, %640 : vector<8x5xf32>
    %649 = arith.addf %647, %648 : vector<8x5xf32>
    %650 = math.tanh %649 : vector<8x5xf32>
    %651 = arith.mulf %646, %650 : vector<8x5xf32>
    %cst_174 = arith.constant dense<0.000000e+00> : vector<8x192xf32>
    %652 = tpu.matmul %651, %363, %cst_174 {dimension_numbers = #tpu.dot_dimension_numbers<[1], [0], [0], [1], [0, 0, 1, 1], [], []>} : vector<8x5xf32>, vector<5x192xf32>, vector<8x192xf32> -> vector<8x192xf32>
    %653 = vector.broadcast %364 : vector<1x192xf32> to vector<8x192xf32>
    %654 = arith.addf %652, %653 : vector<8x192xf32>
    %cst_175 = arith.constant 0.000000e+00 : f32
    %655 = vector.broadcast %cst_175 : f32 to vector<8x192xf32>
    %656 = arith.cmpf oge, %654, %655 : vector<8x192xf32>
    %657 = vector.broadcast %365 : vector<1x192xf32> to vector<8x192xf32>
    %658 = arith.mulf %654, %657 : vector<8x192xf32>
    %659 = arith.select %656, %654, %658 : vector<8x192xi1>, vector<8x192xf32>
    %cst_176 = arith.constant dense<0.000000e+00> : vector<8x96xf32>
    %660 = tpu.matmul %659, %366, %cst_176 {dimension_numbers = #tpu.dot_dimension_numbers<[1], [0], [0], [1], [0, 0, 1, 1], [], []>} : vector<8x192xf32>, vector<192x96xf32>, vector<8x96xf32> -> vector<8x96xf32>
    %661 = vector.broadcast %367 : vector<1x96xf32> to vector<8x96xf32>
    %662 = arith.addf %660, %661 : vector<8x96xf32>
    %cst_177 = arith.constant 0.000000e+00 : f32
    %663 = vector.broadcast %cst_177 : f32 to vector<8x96xf32>
    %664 = arith.cmpf oge, %662, %663 : vector<8x96xf32>
    %665 = vector.broadcast %368 : vector<1x96xf32> to vector<8x96xf32>
    %666 = arith.mulf %662, %665 : vector<8x96xf32>
    %667 = arith.select %664, %662, %666 : vector<8x96xi1>, vector<8x96xf32>
    %cst_178 = arith.constant dense<0.000000e+00> : vector<8x5xf32>
    %668 = tpu.matmul %667, %369, %cst_178 {dimension_numbers = #tpu.dot_dimension_numbers<[1], [0], [0], [1], [0, 0, 1, 1], [], []>} : vector<8x96xf32>, vector<96x5xf32>, vector<8x5xf32> -> vector<8x5xf32>
    %669 = vector.broadcast %370 : vector<1x5xf32> to vector<8x5xf32>
    %670 = arith.addf %668, %669 : vector<8x5xf32>
    %c0_179 = arith.constant 0 : index
    %c24_180 = arith.constant 24 : index
    %c0_181 = arith.constant 0 : index
    %671 = vector.load %arg5[%c0_179, %c24_180, %c0_181] : memref<1x96x5xf32, #tpu.memory_space<vmem>>, vector<1x8x5xf32>
    %672 = vector.shape_cast %671 : vector<1x8x5xf32> to vector<8x5xf32>
    %673 = vector.shape_cast %670 : vector<8x5xf32> to vector<1x8x5xf32>
    tpu.vector_store %arg5[%c0_179, %c24_180, %c0_181], %673 {strides = array<i32>} : memref<1x96x5xf32, #tpu.memory_space<vmem>>, vector<1x8x5xf32>,
    %674 = vector.extract_strided_slice %670 {offsets = [0, 0], sizes = [8, 2], strides = [1, 1]} : vector<8x5xf32> to vector<8x2xf32>
    %675 = vector.extract_strided_slice %670 {offsets = [0, 2], sizes = [8, 2], strides = [1, 1]} : vector<8x5xf32> to vector<8x2xf32>
    %676 = math.exp %675 : vector<8x2xf32>
    %677 = vector.extract_strided_slice %670 {offsets = [0, 4], sizes = [8, 1], strides = [1, 1]} : vector<8x5xf32> to vector<8x1xf32>
    %678 = math.tanh %677 : vector<8x1xf32>
    %679 = arith.mulf %678, %678 : vector<8x1xf32>
    %cst_182 = arith.constant 1.000000e+00 : f32
    %680 = vector.broadcast %cst_182 : f32 to vector<8x1xf32>
    %681 = arith.subf %680, %679 : vector<8x1xf32>
    %cst_183 = arith.constant 9.99999974E-6 : f32
    %cst_184 = arith.constant 1.000000e+00 : f32
    %682 = vector.broadcast %cst_183 : f32 to vector<8x1xf32>
    %683 = arith.maximumf %682, %681 : vector<8x1xf32>
    %684 = vector.broadcast %cst_184 : f32 to vector<8x1xf32>
    %685 = arith.minimumf %684, %683 : vector<8x1xf32>
    %c0_185 = arith.constant 0 : index
    %c24_186 = arith.constant 24 : index
    %c0_187 = arith.constant 0 : index
    %686 = vector.load %arg3[%c0_185, %c24_186, %c0_187] : memref<1x96x2xf32, #tpu.memory_space<vmem>>, vector<1x8x2xf32>
    %687 = vector.shape_cast %686 : vector<1x8x2xf32> to vector<8x2xf32>
    %688 = vector.extract_strided_slice %687 {offsets = [0, 0], sizes = [8, 1], strides = [1, 1]} : vector<8x2xf32> to vector<8x1xf32>
    %689 = vector.extract_strided_slice %687 {offsets = [0, 1], sizes = [8, 1], strides = [1, 1]} : vector<8x2xf32> to vector<8x1xf32>
    %c0_i32_188 = arith.constant 0 : i32
    %690 = vector.broadcast %c0_i32_188 : i32 to vector<8x2xi32>
    %691 = arith.cmpi eq, %371, %690 : vector<8x2xi32>
    %692 = arith.mulf %678, %688 : vector<8x1xf32>
    %693 = math.sqrt %685 : vector<8x1xf32>
    %694 = arith.mulf %693, %689 : vector<8x1xf32>
    %695 = arith.addf %692, %694 : vector<8x1xf32>
    %696 = vector.shape_cast %688 : vector<8x1xf32> to vector<8x1xf32>
    %697 = vector.broadcast %696 : vector<8x1xf32> to vector<8x2xf32>
    %698 = vector.shape_cast %695 : vector<8x1xf32> to vector<8x1xf32>
    %699 = vector.broadcast %698 : vector<8x1xf32> to vector<8x2xf32>
    %700 = arith.select %691, %697, %699 : vector<8x2xi1>, vector<8x2xf32>
    %701 = arith.mulf %676, %700 : vector<8x2xf32>
    %702 = arith.addf %674, %701 : vector<8x2xf32>
    %c0_189 = arith.constant 0 : index
    %c32 = arith.constant 32 : index
    %c0_190 = arith.constant 0 : index
    %703 = vector.load %arg6[%c0_189, %c32, %c0_190] : memref<1x104x2xf32, #tpu.memory_space<vmem>>, vector<1x8x2xf32>
    %704 = vector.shape_cast %703 : vector<1x8x2xf32> to vector<8x2xf32>
    %705 = vector.shape_cast %702 : vector<8x2xf32> to vector<1x8x2xf32>
    tpu.vector_store %arg6[%c0_189, %c32, %c0_190], %705 {strides = array<i32>} : memref<1x104x2xf32, #tpu.memory_space<vmem>>, vector<1x8x2xf32>,
    %cst_191 = arith.constant dense<0.000000e+00> : vector<8x512xf32>
    %706 = tpu.matmul %702, %356, %cst_191 {dimension_numbers = #tpu.dot_dimension_numbers<[1], [0], [0], [1], [0, 0, 1, 1], [], []>} : vector<8x2xf32>, vector<2x512xf32>, vector<8x512xf32> -> vector<8x512xf32>
    %707 = arith.addf %362, %706 : vector<8x512xf32>
    %cst_192 = arith.constant dense<0.000000e+00> : vector<8x512xf32>
    %708 = tpu.matmul %651, %357, %cst_192 {dimension_numbers = #tpu.dot_dimension_numbers<[1], [0], [0], [1], [0, 0, 1, 1], [], []>} : vector<8x5xf32>, vector<5x512xf32>, vector<8x512xf32> -> vector<8x512xf32>
    %709 = arith.addf %707, %708 : vector<8x512xf32>
    %710 = vector.extract_strided_slice %709 {offsets = [0, 0], sizes = [8, 5], strides = [1, 1]} : vector<8x512xf32> to vector<8x5xf32>
    %711 = arith.negf %710 : vector<8x5xf32>
    %712 = math.exp %711 : vector<8x5xf32>
    %cst_193 = arith.constant 1.000000e+00 : f32
    %713 = vector.broadcast %cst_193 : f32 to vector<8x5xf32>
    %714 = arith.addf %713, %712 : vector<8x5xf32>
    %715 = arith.divf %713, %714 : vector<8x5xf32>
    %716 = vector.extract_strided_slice %709 {offsets = [0, 128], sizes = [8, 5], strides = [1, 1]} : vector<8x512xf32> to vector<8x5xf32>
    %717 = arith.negf %716 : vector<8x5xf32>
    %718 = math.exp %717 : vector<8x5xf32>
    %cst_194 = arith.constant 1.000000e+00 : f32
    %719 = vector.broadcast %cst_194 : f32 to vector<8x5xf32>
    %720 = arith.addf %719, %718 : vector<8x5xf32>
    %721 = arith.divf %719, %720 : vector<8x5xf32>
    %722 = vector.extract_strided_slice %709 {offsets = [0, 256], sizes = [8, 5], strides = [1, 1]} : vector<8x512xf32> to vector<8x5xf32>
    %723 = math.tanh %722 : vector<8x5xf32>
    %724 = vector.extract_strided_slice %709 {offsets = [0, 384], sizes = [8, 5], strides = [1, 1]} : vector<8x512xf32> to vector<8x5xf32>
    %725 = arith.negf %724 : vector<8x5xf32>
    %726 = math.exp %725 : vector<8x5xf32>
    %cst_195 = arith.constant 1.000000e+00 : f32
    %727 = vector.broadcast %cst_195 : f32 to vector<8x5xf32>
    %728 = arith.addf %727, %726 : vector<8x5xf32>
    %729 = arith.divf %727, %728 : vector<8x5xf32>
    %730 = arith.mulf %721, %649 : vector<8x5xf32>
    %731 = arith.mulf %715, %723 : vector<8x5xf32>
    %732 = arith.addf %730, %731 : vector<8x5xf32>
    %733 = math.tanh %732 : vector<8x5xf32>
    %734 = arith.mulf %729, %733 : vector<8x5xf32>
    %cst_196 = arith.constant dense<0.000000e+00> : vector<8x192xf32>
    %735 = tpu.matmul %734, %363, %cst_196 {dimension_numbers = #tpu.dot_dimension_numbers<[1], [0], [0], [1], [0, 0, 1, 1], [], []>} : vector<8x5xf32>, vector<5x192xf32>, vector<8x192xf32> -> vector<8x192xf32>
    %736 = vector.broadcast %364 : vector<1x192xf32> to vector<8x192xf32>
    %737 = arith.addf %735, %736 : vector<8x192xf32>
    %cst_197 = arith.constant 0.000000e+00 : f32
    %738 = vector.broadcast %cst_197 : f32 to vector<8x192xf32>
    %739 = arith.cmpf oge, %737, %738 : vector<8x192xf32>
    %740 = vector.broadcast %365 : vector<1x192xf32> to vector<8x192xf32>
    %741 = arith.mulf %737, %740 : vector<8x192xf32>
    %742 = arith.select %739, %737, %741 : vector<8x192xi1>, vector<8x192xf32>
    %cst_198 = arith.constant dense<0.000000e+00> : vector<8x96xf32>
    %743 = tpu.matmul %742, %366, %cst_198 {dimension_numbers = #tpu.dot_dimension_numbers<[1], [0], [0], [1], [0, 0, 1, 1], [], []>} : vector<8x192xf32>, vector<192x96xf32>, vector<8x96xf32> -> vector<8x96xf32>
    %744 = vector.broadcast %367 : vector<1x96xf32> to vector<8x96xf32>
    %745 = arith.addf %743, %744 : vector<8x96xf32>
    %cst_199 = arith.constant 0.000000e+00 : f32
    %746 = vector.broadcast %cst_199 : f32 to vector<8x96xf32>
    %747 = arith.cmpf oge, %745, %746 : vector<8x96xf32>
    %748 = vector.broadcast %368 : vector<1x96xf32> to vector<8x96xf32>
    %749 = arith.mulf %745, %748 : vector<8x96xf32>
    %750 = arith.select %747, %745, %749 : vector<8x96xi1>, vector<8x96xf32>
    %cst_200 = arith.constant dense<0.000000e+00> : vector<8x5xf32>
    %751 = tpu.matmul %750, %369, %cst_200 {dimension_numbers = #tpu.dot_dimension_numbers<[1], [0], [0], [1], [0, 0, 1, 1], [], []>} : vector<8x96xf32>, vector<96x5xf32>, vector<8x5xf32> -> vector<8x5xf32>
    %752 = vector.broadcast %370 : vector<1x5xf32> to vector<8x5xf32>
    %753 = arith.addf %751, %752 : vector<8x5xf32>
    %c0_201 = arith.constant 0 : index
    %c32_202 = arith.constant 32 : index
    %c0_203 = arith.constant 0 : index
    %754 = vector.load %arg5[%c0_201, %c32_202, %c0_203] : memref<1x96x5xf32, #tpu.memory_space<vmem>>, vector<1x8x5xf32>
    %755 = vector.shape_cast %754 : vector<1x8x5xf32> to vector<8x5xf32>
    %756 = vector.shape_cast %753 : vector<8x5xf32> to vector<1x8x5xf32>
    tpu.vector_store %arg5[%c0_201, %c32_202, %c0_203], %756 {strides = array<i32>} : memref<1x96x5xf32, #tpu.memory_space<vmem>>, vector<1x8x5xf32>,
    %757 = vector.extract_strided_slice %753 {offsets = [0, 0], sizes = [8, 2], strides = [1, 1]} : vector<8x5xf32> to vector<8x2xf32>
    %758 = vector.extract_strided_slice %753 {offsets = [0, 2], sizes = [8, 2], strides = [1, 1]} : vector<8x5xf32> to vector<8x2xf32>
    %759 = math.exp %758 : vector<8x2xf32>
    %760 = vector.extract_strided_slice %753 {offsets = [0, 4], sizes = [8, 1], strides = [1, 1]} : vector<8x5xf32> to vector<8x1xf32>
    %761 = math.tanh %760 : vector<8x1xf32>
    %762 = arith.mulf %761, %761 : vector<8x1xf32>
    %cst_204 = arith.constant 1.000000e+00 : f32
    %763 = vector.broadcast %cst_204 : f32 to vector<8x1xf32>
    %764 = arith.subf %763, %762 : vector<8x1xf32>
    %cst_205 = arith.constant 9.99999974E-6 : f32
    %cst_206 = arith.constant 1.000000e+00 : f32
    %765 = vector.broadcast %cst_205 : f32 to vector<8x1xf32>
    %766 = arith.maximumf %765, %764 : vector<8x1xf32>
    %767 = vector.broadcast %cst_206 : f32 to vector<8x1xf32>
    %768 = arith.minimumf %767, %766 : vector<8x1xf32>
    %c0_207 = arith.constant 0 : index
    %c32_208 = arith.constant 32 : index
    %c0_209 = arith.constant 0 : index
    %769 = vector.load %arg3[%c0_207, %c32_208, %c0_209] : memref<1x96x2xf32, #tpu.memory_space<vmem>>, vector<1x8x2xf32>
    %770 = vector.shape_cast %769 : vector<1x8x2xf32> to vector<8x2xf32>
    %771 = vector.extract_strided_slice %770 {offsets = [0, 0], sizes = [8, 1], strides = [1, 1]} : vector<8x2xf32> to vector<8x1xf32>
    %772 = vector.extract_strided_slice %770 {offsets = [0, 1], sizes = [8, 1], strides = [1, 1]} : vector<8x2xf32> to vector<8x1xf32>
    %c0_i32_210 = arith.constant 0 : i32
    %773 = vector.broadcast %c0_i32_210 : i32 to vector<8x2xi32>
    %774 = arith.cmpi eq, %371, %773 : vector<8x2xi32>
    %775 = arith.mulf %761, %771 : vector<8x1xf32>
    %776 = math.sqrt %768 : vector<8x1xf32>
    %777 = arith.mulf %776, %772 : vector<8x1xf32>
    %778 = arith.addf %775, %777 : vector<8x1xf32>
    %779 = vector.shape_cast %771 : vector<8x1xf32> to vector<8x1xf32>
    %780 = vector.broadcast %779 : vector<8x1xf32> to vector<8x2xf32>
    %781 = vector.shape_cast %778 : vector<8x1xf32> to vector<8x1xf32>
    %782 = vector.broadcast %781 : vector<8x1xf32> to vector<8x2xf32>
    %783 = arith.select %774, %780, %782 : vector<8x2xi1>, vector<8x2xf32>
    %784 = arith.mulf %759, %783 : vector<8x2xf32>
    %785 = arith.addf %757, %784 : vector<8x2xf32>
    %c0_211 = arith.constant 0 : index
    %c40 = arith.constant 40 : index
    %c0_212 = arith.constant 0 : index
    %786 = vector.load %arg6[%c0_211, %c40, %c0_212] : memref<1x104x2xf32, #tpu.memory_space<vmem>>, vector<1x8x2xf32>
    %787 = vector.shape_cast %786 : vector<1x8x2xf32> to vector<8x2xf32>
    %788 = vector.shape_cast %785 : vector<8x2xf32> to vector<1x8x2xf32>
    tpu.vector_store %arg6[%c0_211, %c40, %c0_212], %788 {strides = array<i32>} : memref<1x104x2xf32, #tpu.memory_space<vmem>>, vector<1x8x2xf32>,
    %cst_213 = arith.constant dense<0.000000e+00> : vector<8x512xf32>
    %789 = tpu.matmul %785, %356, %cst_213 {dimension_numbers = #tpu.dot_dimension_numbers<[1], [0], [0], [1], [0, 0, 1, 1], [], []>} : vector<8x2xf32>, vector<2x512xf32>, vector<8x512xf32> -> vector<8x512xf32>
    %790 = arith.addf %362, %789 : vector<8x512xf32>
    %cst_214 = arith.constant dense<0.000000e+00> : vector<8x512xf32>
    %791 = tpu.matmul %734, %357, %cst_214 {dimension_numbers = #tpu.dot_dimension_numbers<[1], [0], [0], [1], [0, 0, 1, 1], [], []>} : vector<8x5xf32>, vector<5x512xf32>, vector<8x512xf32> -> vector<8x512xf32>
    %792 = arith.addf %790, %791 : vector<8x512xf32>
    %793 = vector.extract_strided_slice %792 {offsets = [0, 0], sizes = [8, 5], strides = [1, 1]} : vector<8x512xf32> to vector<8x5xf32>
    %794 = arith.negf %793 : vector<8x5xf32>
    %795 = math.exp %794 : vector<8x5xf32>
    %cst_215 = arith.constant 1.000000e+00 : f32
    %796 = vector.broadcast %cst_215 : f32 to vector<8x5xf32>
    %797 = arith.addf %796, %795 : vector<8x5xf32>
    %798 = arith.divf %796, %797 : vector<8x5xf32>
    %799 = vector.extract_strided_slice %792 {offsets = [0, 128], sizes = [8, 5], strides = [1, 1]} : vector<8x512xf32> to vector<8x5xf32>
    %800 = arith.negf %799 : vector<8x5xf32>
    %801 = math.exp %800 : vector<8x5xf32>
    %cst_216 = arith.constant 1.000000e+00 : f32
    %802 = vector.broadcast %cst_216 : f32 to vector<8x5xf32>
    %803 = arith.addf %802, %801 : vector<8x5xf32>
    %804 = arith.divf %802, %803 : vector<8x5xf32>
    %805 = vector.extract_strided_slice %792 {offsets = [0, 256], sizes = [8, 5], strides = [1, 1]} : vector<8x512xf32> to vector<8x5xf32>
    %806 = math.tanh %805 : vector<8x5xf32>
    %807 = vector.extract_strided_slice %792 {offsets = [0, 384], sizes = [8, 5], strides = [1, 1]} : vector<8x512xf32> to vector<8x5xf32>
    %808 = arith.negf %807 : vector<8x5xf32>
    %809 = math.exp %808 : vector<8x5xf32>
    %cst_217 = arith.constant 1.000000e+00 : f32
    %810 = vector.broadcast %cst_217 : f32 to vector<8x5xf32>
    %811 = arith.addf %810, %809 : vector<8x5xf32>
    %812 = arith.divf %810, %811 : vector<8x5xf32>
    %813 = arith.mulf %804, %732 : vector<8x5xf32>
    %814 = arith.mulf %798, %806 : vector<8x5xf32>
    %815 = arith.addf %813, %814 : vector<8x5xf32>
    %816 = math.tanh %815 : vector<8x5xf32>
    %817 = arith.mulf %812, %816 : vector<8x5xf32>
    %cst_218 = arith.constant dense<0.000000e+00> : vector<8x192xf32>
    %818 = tpu.matmul %817, %363, %cst_218 {dimension_numbers = #tpu.dot_dimension_numbers<[1], [0], [0], [1], [0, 0, 1, 1], [], []>} : vector<8x5xf32>, vector<5x192xf32>, vector<8x192xf32> -> vector<8x192xf32>
    %819 = vector.broadcast %364 : vector<1x192xf32> to vector<8x192xf32>
    %820 = arith.addf %818, %819 : vector<8x192xf32>
    %cst_219 = arith.constant 0.000000e+00 : f32
    %821 = vector.broadcast %cst_219 : f32 to vector<8x192xf32>
    %822 = arith.cmpf oge, %820, %821 : vector<8x192xf32>
    %823 = vector.broadcast %365 : vector<1x192xf32> to vector<8x192xf32>
    %824 = arith.mulf %820, %823 : vector<8x192xf32>
    %825 = arith.select %822, %820, %824 : vector<8x192xi1>, vector<8x192xf32>
    %cst_220 = arith.constant dense<0.000000e+00> : vector<8x96xf32>
    %826 = tpu.matmul %825, %366, %cst_220 {dimension_numbers = #tpu.dot_dimension_numbers<[1], [0], [0], [1], [0, 0, 1, 1], [], []>} : vector<8x192xf32>, vector<192x96xf32>, vector<8x96xf32> -> vector<8x96xf32>
    %827 = vector.broadcast %367 : vector<1x96xf32> to vector<8x96xf32>
    %828 = arith.addf %826, %827 : vector<8x96xf32>
    %cst_221 = arith.constant 0.000000e+00 : f32
    %829 = vector.broadcast %cst_221 : f32 to vector<8x96xf32>
    %830 = arith.cmpf oge, %828, %829 : vector<8x96xf32>
    %831 = vector.broadcast %368 : vector<1x96xf32> to vector<8x96xf32>
    %832 = arith.mulf %828, %831 : vector<8x96xf32>
    %833 = arith.select %830, %828, %832 : vector<8x96xi1>, vector<8x96xf32>
    %cst_222 = arith.constant dense<0.000000e+00> : vector<8x5xf32>
    %834 = tpu.matmul %833, %369, %cst_222 {dimension_numbers = #tpu.dot_dimension_numbers<[1], [0], [0], [1], [0, 0, 1, 1], [], []>} : vector<8x96xf32>, vector<96x5xf32>, vector<8x5xf32> -> vector<8x5xf32>
    %835 = vector.broadcast %370 : vector<1x5xf32> to vector<8x5xf32>
    %836 = arith.addf %834, %835 : vector<8x5xf32>
    %c0_223 = arith.constant 0 : index
    %c40_224 = arith.constant 40 : index
    %c0_225 = arith.constant 0 : index
    %837 = vector.load %arg5[%c0_223, %c40_224, %c0_225] : memref<1x96x5xf32, #tpu.memory_space<vmem>>, vector<1x8x5xf32>
    %838 = vector.shape_cast %837 : vector<1x8x5xf32> to vector<8x5xf32>
    %839 = vector.shape_cast %836 : vector<8x5xf32> to vector<1x8x5xf32>
    tpu.vector_store %arg5[%c0_223, %c40_224, %c0_225], %839 {strides = array<i32>} : memref<1x96x5xf32, #tpu.memory_space<vmem>>, vector<1x8x5xf32>,
    %840 = vector.extract_strided_slice %836 {offsets = [0, 0], sizes = [8, 2], strides = [1, 1]} : vector<8x5xf32> to vector<8x2xf32>
    %841 = vector.extract_strided_slice %836 {offsets = [0, 2], sizes = [8, 2], strides = [1, 1]} : vector<8x5xf32> to vector<8x2xf32>
    %842 = math.exp %841 : vector<8x2xf32>
    %843 = vector.extract_strided_slice %836 {offsets = [0, 4], sizes = [8, 1], strides = [1, 1]} : vector<8x5xf32> to vector<8x1xf32>
    %844 = math.tanh %843 : vector<8x1xf32>
    %845 = arith.mulf %844, %844 : vector<8x1xf32>
    %cst_226 = arith.constant 1.000000e+00 : f32
    %846 = vector.broadcast %cst_226 : f32 to vector<8x1xf32>
    %847 = arith.subf %846, %845 : vector<8x1xf32>
    %cst_227 = arith.constant 9.99999974E-6 : f32
    %cst_228 = arith.constant 1.000000e+00 : f32
    %848 = vector.broadcast %cst_227 : f32 to vector<8x1xf32>
    %849 = arith.maximumf %848, %847 : vector<8x1xf32>
    %850 = vector.broadcast %cst_228 : f32 to vector<8x1xf32>
    %851 = arith.minimumf %850, %849 : vector<8x1xf32>
    %c0_229 = arith.constant 0 : index
    %c40_230 = arith.constant 40 : index
    %c0_231 = arith.constant 0 : index
    %852 = vector.load %arg3[%c0_229, %c40_230, %c0_231] : memref<1x96x2xf32, #tpu.memory_space<vmem>>, vector<1x8x2xf32>
    %853 = vector.shape_cast %852 : vector<1x8x2xf32> to vector<8x2xf32>
    %854 = vector.extract_strided_slice %853 {offsets = [0, 0], sizes = [8, 1], strides = [1, 1]} : vector<8x2xf32> to vector<8x1xf32>
    %855 = vector.extract_strided_slice %853 {offsets = [0, 1], sizes = [8, 1], strides = [1, 1]} : vector<8x2xf32> to vector<8x1xf32>
    %c0_i32_232 = arith.constant 0 : i32
    %856 = vector.broadcast %c0_i32_232 : i32 to vector<8x2xi32>
    %857 = arith.cmpi eq, %371, %856 : vector<8x2xi32>
    %858 = arith.mulf %844, %854 : vector<8x1xf32>
    %859 = math.sqrt %851 : vector<8x1xf32>
    %860 = arith.mulf %859, %855 : vector<8x1xf32>
    %861 = arith.addf %858, %860 : vector<8x1xf32>
    %862 = vector.shape_cast %854 : vector<8x1xf32> to vector<8x1xf32>
    %863 = vector.broadcast %862 : vector<8x1xf32> to vector<8x2xf32>
    %864 = vector.shape_cast %861 : vector<8x1xf32> to vector<8x1xf32>
    %865 = vector.broadcast %864 : vector<8x1xf32> to vector<8x2xf32>
    %866 = arith.select %857, %863, %865 : vector<8x2xi1>, vector<8x2xf32>
    %867 = arith.mulf %842, %866 : vector<8x2xf32>
    %868 = arith.addf %840, %867 : vector<8x2xf32>
    %c0_233 = arith.constant 0 : index
    %c48_234 = arith.constant 48 : index
    %c0_235 = arith.constant 0 : index
    %869 = vector.load %arg6[%c0_233, %c48_234, %c0_235] : memref<1x104x2xf32, #tpu.memory_space<vmem>>, vector<1x8x2xf32>
    %870 = vector.shape_cast %869 : vector<1x8x2xf32> to vector<8x2xf32>
    %871 = vector.shape_cast %868 : vector<8x2xf32> to vector<1x8x2xf32>
    tpu.vector_store %arg6[%c0_233, %c48_234, %c0_235], %871 {strides = array<i32>} : memref<1x104x2xf32, #tpu.memory_space<vmem>>, vector<1x8x2xf32>,
    %cst_236 = arith.constant dense<0.000000e+00> : vector<8x512xf32>
    %872 = tpu.matmul %868, %356, %cst_236 {dimension_numbers = #tpu.dot_dimension_numbers<[1], [0], [0], [1], [0, 0, 1, 1], [], []>} : vector<8x2xf32>, vector<2x512xf32>, vector<8x512xf32> -> vector<8x512xf32>
    %873 = arith.addf %362, %872 : vector<8x512xf32>
    %cst_237 = arith.constant dense<0.000000e+00> : vector<8x512xf32>
    %874 = tpu.matmul %817, %357, %cst_237 {dimension_numbers = #tpu.dot_dimension_numbers<[1], [0], [0], [1], [0, 0, 1, 1], [], []>} : vector<8x5xf32>, vector<5x512xf32>, vector<8x512xf32> -> vector<8x512xf32>
    %875 = arith.addf %873, %874 : vector<8x512xf32>
    %876 = vector.extract_strided_slice %875 {offsets = [0, 0], sizes = [8, 5], strides = [1, 1]} : vector<8x512xf32> to vector<8x5xf32>
    %877 = arith.negf %876 : vector<8x5xf32>
    %878 = math.exp %877 : vector<8x5xf32>
    %cst_238 = arith.constant 1.000000e+00 : f32
    %879 = vector.broadcast %cst_238 : f32 to vector<8x5xf32>
    %880 = arith.addf %879, %878 : vector<8x5xf32>
    %881 = arith.divf %879, %880 : vector<8x5xf32>
    %882 = vector.extract_strided_slice %875 {offsets = [0, 128], sizes = [8, 5], strides = [1, 1]} : vector<8x512xf32> to vector<8x5xf32>
    %883 = arith.negf %882 : vector<8x5xf32>
    %884 = math.exp %883 : vector<8x5xf32>
    %cst_239 = arith.constant 1.000000e+00 : f32
    %885 = vector.broadcast %cst_239 : f32 to vector<8x5xf32>
    %886 = arith.addf %885, %884 : vector<8x5xf32>
    %887 = arith.divf %885, %886 : vector<8x5xf32>
    %888 = vector.extract_strided_slice %875 {offsets = [0, 256], sizes = [8, 5], strides = [1, 1]} : vector<8x512xf32> to vector<8x5xf32>
    %889 = math.tanh %888 : vector<8x5xf32>
    %890 = vector.extract_strided_slice %875 {offsets = [0, 384], sizes = [8, 5], strides = [1, 1]} : vector<8x512xf32> to vector<8x5xf32>
    %891 = arith.negf %890 : vector<8x5xf32>
    %892 = math.exp %891 : vector<8x5xf32>
    %cst_240 = arith.constant 1.000000e+00 : f32
    %893 = vector.broadcast %cst_240 : f32 to vector<8x5xf32>
    %894 = arith.addf %893, %892 : vector<8x5xf32>
    %895 = arith.divf %893, %894 : vector<8x5xf32>
    %896 = arith.mulf %887, %815 : vector<8x5xf32>
    %897 = arith.mulf %881, %889 : vector<8x5xf32>
    %898 = arith.addf %896, %897 : vector<8x5xf32>
    %899 = math.tanh %898 : vector<8x5xf32>
    %900 = arith.mulf %895, %899 : vector<8x5xf32>
    %cst_241 = arith.constant dense<0.000000e+00> : vector<8x192xf32>
    %901 = tpu.matmul %900, %363, %cst_241 {dimension_numbers = #tpu.dot_dimension_numbers<[1], [0], [0], [1], [0, 0, 1, 1], [], []>} : vector<8x5xf32>, vector<5x192xf32>, vector<8x192xf32> -> vector<8x192xf32>
    %902 = vector.broadcast %364 : vector<1x192xf32> to vector<8x192xf32>
    %903 = arith.addf %901, %902 : vector<8x192xf32>
    %cst_242 = arith.constant 0.000000e+00 : f32
    %904 = vector.broadcast %cst_242 : f32 to vector<8x192xf32>
    %905 = arith.cmpf oge, %903, %904 : vector<8x192xf32>
    %906 = vector.broadcast %365 : vector<1x192xf32> to vector<8x192xf32>
    %907 = arith.mulf %903, %906 : vector<8x192xf32>
    %908 = arith.select %905, %903, %907 : vector<8x192xi1>, vector<8x192xf32>
    %cst_243 = arith.constant dense<0.000000e+00> : vector<8x96xf32>
    %909 = tpu.matmul %908, %366, %cst_243 {dimension_numbers = #tpu.dot_dimension_numbers<[1], [0], [0], [1], [0, 0, 1, 1], [], []>} : vector<8x192xf32>, vector<192x96xf32>, vector<8x96xf32> -> vector<8x96xf32>
    %910 = vector.broadcast %367 : vector<1x96xf32> to vector<8x96xf32>
    %911 = arith.addf %909, %910 : vector<8x96xf32>
    %cst_244 = arith.constant 0.000000e+00 : f32
    %912 = vector.broadcast %cst_244 : f32 to vector<8x96xf32>
    %913 = arith.cmpf oge, %911, %912 : vector<8x96xf32>
    %914 = vector.broadcast %368 : vector<1x96xf32> to vector<8x96xf32>
    %915 = arith.mulf %911, %914 : vector<8x96xf32>
    %916 = arith.select %913, %911, %915 : vector<8x96xi1>, vector<8x96xf32>
    %cst_245 = arith.constant dense<0.000000e+00> : vector<8x5xf32>
    %917 = tpu.matmul %916, %369, %cst_245 {dimension_numbers = #tpu.dot_dimension_numbers<[1], [0], [0], [1], [0, 0, 1, 1], [], []>} : vector<8x96xf32>, vector<96x5xf32>, vector<8x5xf32> -> vector<8x5xf32>
    %918 = vector.broadcast %370 : vector<1x5xf32> to vector<8x5xf32>
    %919 = arith.addf %917, %918 : vector<8x5xf32>
    %c0_246 = arith.constant 0 : index
    %c48_247 = arith.constant 48 : index
    %c0_248 = arith.constant 0 : index
    %920 = vector.load %arg5[%c0_246, %c48_247, %c0_248] : memref<1x96x5xf32, #tpu.memory_space<vmem>>, vector<1x8x5xf32>
    %921 = vector.shape_cast %920 : vector<1x8x5xf32> to vector<8x5xf32>
    %922 = vector.shape_cast %919 : vector<8x5xf32> to vector<1x8x5xf32>
    tpu.vector_store %arg5[%c0_246, %c48_247, %c0_248], %922 {strides = array<i32>} : memref<1x96x5xf32, #tpu.memory_space<vmem>>, vector<1x8x5xf32>,
    %923 = vector.extract_strided_slice %919 {offsets = [0, 0], sizes = [8, 2], strides = [1, 1]} : vector<8x5xf32> to vector<8x2xf32>
    %924 = vector.extract_strided_slice %919 {offsets = [0, 2], sizes = [8, 2], strides = [1, 1]} : vector<8x5xf32> to vector<8x2xf32>
    %925 = math.exp %924 : vector<8x2xf32>
    %926 = vector.extract_strided_slice %919 {offsets = [0, 4], sizes = [8, 1], strides = [1, 1]} : vector<8x5xf32> to vector<8x1xf32>
    %927 = math.tanh %926 : vector<8x1xf32>
    %928 = arith.mulf %927, %927 : vector<8x1xf32>
    %cst_249 = arith.constant 1.000000e+00 : f32
    %929 = vector.broadcast %cst_249 : f32 to vector<8x1xf32>
    %930 = arith.subf %929, %928 : vector<8x1xf32>
    %cst_250 = arith.constant 9.99999974E-6 : f32
    %cst_251 = arith.constant 1.000000e+00 : f32
    %931 = vector.broadcast %cst_250 : f32 to vector<8x1xf32>
    %932 = arith.maximumf %931, %930 : vector<8x1xf32>
    %933 = vector.broadcast %cst_251 : f32 to vector<8x1xf32>
    %934 = arith.minimumf %933, %932 : vector<8x1xf32>
    %c0_252 = arith.constant 0 : index
    %c48_253 = arith.constant 48 : index
    %c0_254 = arith.constant 0 : index
    %935 = vector.load %arg3[%c0_252, %c48_253, %c0_254] : memref<1x96x2xf32, #tpu.memory_space<vmem>>, vector<1x8x2xf32>
    %936 = vector.shape_cast %935 : vector<1x8x2xf32> to vector<8x2xf32>
    %937 = vector.extract_strided_slice %936 {offsets = [0, 0], sizes = [8, 1], strides = [1, 1]} : vector<8x2xf32> to vector<8x1xf32>
    %938 = vector.extract_strided_slice %936 {offsets = [0, 1], sizes = [8, 1], strides = [1, 1]} : vector<8x2xf32> to vector<8x1xf32>
    %c0_i32_255 = arith.constant 0 : i32
    %939 = vector.broadcast %c0_i32_255 : i32 to vector<8x2xi32>
    %940 = arith.cmpi eq, %371, %939 : vector<8x2xi32>
    %941 = arith.mulf %927, %937 : vector<8x1xf32>
    %942 = math.sqrt %934 : vector<8x1xf32>
    %943 = arith.mulf %942, %938 : vector<8x1xf32>
    %944 = arith.addf %941, %943 : vector<8x1xf32>
    %945 = vector.shape_cast %937 : vector<8x1xf32> to vector<8x1xf32>
    %946 = vector.broadcast %945 : vector<8x1xf32> to vector<8x2xf32>
    %947 = vector.shape_cast %944 : vector<8x1xf32> to vector<8x1xf32>
    %948 = vector.broadcast %947 : vector<8x1xf32> to vector<8x2xf32>
    %949 = arith.select %940, %946, %948 : vector<8x2xi1>, vector<8x2xf32>
    %950 = arith.mulf %925, %949 : vector<8x2xf32>
    %951 = arith.addf %923, %950 : vector<8x2xf32>
    %c0_256 = arith.constant 0 : index
    %c56_257 = arith.constant 56 : index
    %c0_258 = arith.constant 0 : index
    %952 = vector.load %arg6[%c0_256, %c56_257, %c0_258] : memref<1x104x2xf32, #tpu.memory_space<vmem>>, vector<1x8x2xf32>
    %953 = vector.shape_cast %952 : vector<1x8x2xf32> to vector<8x2xf32>
    %954 = vector.shape_cast %951 : vector<8x2xf32> to vector<1x8x2xf32>
    tpu.vector_store %arg6[%c0_256, %c56_257, %c0_258], %954 {strides = array<i32>} : memref<1x104x2xf32, #tpu.memory_space<vmem>>, vector<1x8x2xf32>,
    %cst_259 = arith.constant dense<0.000000e+00> : vector<8x512xf32>
    %955 = tpu.matmul %951, %356, %cst_259 {dimension_numbers = #tpu.dot_dimension_numbers<[1], [0], [0], [1], [0, 0, 1, 1], [], []>} : vector<8x2xf32>, vector<2x512xf32>, vector<8x512xf32> -> vector<8x512xf32>
    %956 = arith.addf %362, %955 : vector<8x512xf32>
    %cst_260 = arith.constant dense<0.000000e+00> : vector<8x512xf32>
    %957 = tpu.matmul %900, %357, %cst_260 {dimension_numbers = #tpu.dot_dimension_numbers<[1], [0], [0], [1], [0, 0, 1, 1], [], []>} : vector<8x5xf32>, vector<5x512xf32>, vector<8x512xf32> -> vector<8x512xf32>
    %958 = arith.addf %956, %957 : vector<8x512xf32>
    %959 = vector.extract_strided_slice %958 {offsets = [0, 0], sizes = [8, 5], strides = [1, 1]} : vector<8x512xf32> to vector<8x5xf32>
    %960 = arith.negf %959 : vector<8x5xf32>
    %961 = math.exp %960 : vector<8x5xf32>
    %cst_261 = arith.constant 1.000000e+00 : f32
    %962 = vector.broadcast %cst_261 : f32 to vector<8x5xf32>
    %963 = arith.addf %962, %961 : vector<8x5xf32>
    %964 = arith.divf %962, %963 : vector<8x5xf32>
    %965 = vector.extract_strided_slice %958 {offsets = [0, 128], sizes = [8, 5], strides = [1, 1]} : vector<8x512xf32> to vector<8x5xf32>
    %966 = arith.negf %965 : vector<8x5xf32>
    %967 = math.exp %966 : vector<8x5xf32>
    %cst_262 = arith.constant 1.000000e+00 : f32
    %968 = vector.broadcast %cst_262 : f32 to vector<8x5xf32>
    %969 = arith.addf %968, %967 : vector<8x5xf32>
    %970 = arith.divf %968, %969 : vector<8x5xf32>
    %971 = vector.extract_strided_slice %958 {offsets = [0, 256], sizes = [8, 5], strides = [1, 1]} : vector<8x512xf32> to vector<8x5xf32>
    %972 = math.tanh %971 : vector<8x5xf32>
    %973 = vector.extract_strided_slice %958 {offsets = [0, 384], sizes = [8, 5], strides = [1, 1]} : vector<8x512xf32> to vector<8x5xf32>
    %974 = arith.negf %973 : vector<8x5xf32>
    %975 = math.exp %974 : vector<8x5xf32>
    %cst_263 = arith.constant 1.000000e+00 : f32
    %976 = vector.broadcast %cst_263 : f32 to vector<8x5xf32>
    %977 = arith.addf %976, %975 : vector<8x5xf32>
    %978 = arith.divf %976, %977 : vector<8x5xf32>
    %979 = arith.mulf %970, %898 : vector<8x5xf32>
    %980 = arith.mulf %964, %972 : vector<8x5xf32>
    %981 = arith.addf %979, %980 : vector<8x5xf32>
    %982 = math.tanh %981 : vector<8x5xf32>
    %983 = arith.mulf %978, %982 : vector<8x5xf32>
    %cst_264 = arith.constant dense<0.000000e+00> : vector<8x192xf32>
    %984 = tpu.matmul %983, %363, %cst_264 {dimension_numbers = #tpu.dot_dimension_numbers<[1], [0], [0], [1], [0, 0, 1, 1], [], []>} : vector<8x5xf32>, vector<5x192xf32>, vector<8x192xf32> -> vector<8x192xf32>
    %985 = vector.broadcast %364 : vector<1x192xf32> to vector<8x192xf32>
    %986 = arith.addf %984, %985 : vector<8x192xf32>
    %cst_265 = arith.constant 0.000000e+00 : f32
    %987 = vector.broadcast %cst_265 : f32 to vector<8x192xf32>
    %988 = arith.cmpf oge, %986, %987 : vector<8x192xf32>
    %989 = vector.broadcast %365 : vector<1x192xf32> to vector<8x192xf32>
    %990 = arith.mulf %986, %989 : vector<8x192xf32>
    %991 = arith.select %988, %986, %990 : vector<8x192xi1>, vector<8x192xf32>
    %cst_266 = arith.constant dense<0.000000e+00> : vector<8x96xf32>
    %992 = tpu.matmul %991, %366, %cst_266 {dimension_numbers = #tpu.dot_dimension_numbers<[1], [0], [0], [1], [0, 0, 1, 1], [], []>} : vector<8x192xf32>, vector<192x96xf32>, vector<8x96xf32> -> vector<8x96xf32>
    %993 = vector.broadcast %367 : vector<1x96xf32> to vector<8x96xf32>
    %994 = arith.addf %992, %993 : vector<8x96xf32>
    %cst_267 = arith.constant 0.000000e+00 : f32
    %995 = vector.broadcast %cst_267 : f32 to vector<8x96xf32>
    %996 = arith.cmpf oge, %994, %995 : vector<8x96xf32>
    %997 = vector.broadcast %368 : vector<1x96xf32> to vector<8x96xf32>
    %998 = arith.mulf %994, %997 : vector<8x96xf32>
    %999 = arith.select %996, %994, %998 : vector<8x96xi1>, vector<8x96xf32>
    %cst_268 = arith.constant dense<0.000000e+00> : vector<8x5xf32>
    %1000 = tpu.matmul %999, %369, %cst_268 {dimension_numbers = #tpu.dot_dimension_numbers<[1], [0], [0], [1], [0, 0, 1, 1], [], []>} : vector<8x96xf32>, vector<96x5xf32>, vector<8x5xf32> -> vector<8x5xf32>
    %1001 = vector.broadcast %370 : vector<1x5xf32> to vector<8x5xf32>
    %1002 = arith.addf %1000, %1001 : vector<8x5xf32>
    %c0_269 = arith.constant 0 : index
    %c56_270 = arith.constant 56 : index
    %c0_271 = arith.constant 0 : index
    %1003 = vector.load %arg5[%c0_269, %c56_270, %c0_271] : memref<1x96x5xf32, #tpu.memory_space<vmem>>, vector<1x8x5xf32>
    %1004 = vector.shape_cast %1003 : vector<1x8x5xf32> to vector<8x5xf32>
    %1005 = vector.shape_cast %1002 : vector<8x5xf32> to vector<1x8x5xf32>
    tpu.vector_store %arg5[%c0_269, %c56_270, %c0_271], %1005 {strides = array<i32>} : memref<1x96x5xf32, #tpu.memory_space<vmem>>, vector<1x8x5xf32>,
    %1006 = vector.extract_strided_slice %1002 {offsets = [0, 0], sizes = [8, 2], strides = [1, 1]} : vector<8x5xf32> to vector<8x2xf32>
    %1007 = vector.extract_strided_slice %1002 {offsets = [0, 2], sizes = [8, 2], strides = [1, 1]} : vector<8x5xf32> to vector<8x2xf32>
    %1008 = math.exp %1007 : vector<8x2xf32>
    %1009 = vector.extract_strided_slice %1002 {offsets = [0, 4], sizes = [8, 1], strides = [1, 1]} : vector<8x5xf32> to vector<8x1xf32>
    %1010 = math.tanh %1009 : vector<8x1xf32>
    %1011 = arith.mulf %1010, %1010 : vector<8x1xf32>
    %cst_272 = arith.constant 1.000000e+00 : f32
    %1012 = vector.broadcast %cst_272 : f32 to vector<8x1xf32>
    %1013 = arith.subf %1012, %1011 : vector<8x1xf32>
    %cst_273 = arith.constant 9.99999974E-6 : f32
    %cst_274 = arith.constant 1.000000e+00 : f32
    %1014 = vector.broadcast %cst_273 : f32 to vector<8x1xf32>
    %1015 = arith.maximumf %1014, %1013 : vector<8x1xf32>
    %1016 = vector.broadcast %cst_274 : f32 to vector<8x1xf32>
    %1017 = arith.minimumf %1016, %1015 : vector<8x1xf32>
    %c0_275 = arith.constant 0 : index
    %c56_276 = arith.constant 56 : index
    %c0_277 = arith.constant 0 : index
    %1018 = vector.load %arg3[%c0_275, %c56_276, %c0_277] : memref<1x96x2xf32, #tpu.memory_space<vmem>>, vector<1x8x2xf32>
    %1019 = vector.shape_cast %1018 : vector<1x8x2xf32> to vector<8x2xf32>
    %1020 = vector.extract_strided_slice %1019 {offsets = [0, 0], sizes = [8, 1], strides = [1, 1]} : vector<8x2xf32> to vector<8x1xf32>
    %1021 = vector.extract_strided_slice %1019 {offsets = [0, 1], sizes = [8, 1], strides = [1, 1]} : vector<8x2xf32> to vector<8x1xf32>
    %c0_i32_278 = arith.constant 0 : i32
    %1022 = vector.broadcast %c0_i32_278 : i32 to vector<8x2xi32>
    %1023 = arith.cmpi eq, %371, %1022 : vector<8x2xi32>
    %1024 = arith.mulf %1010, %1020 : vector<8x1xf32>
    %1025 = math.sqrt %1017 : vector<8x1xf32>
    %1026 = arith.mulf %1025, %1021 : vector<8x1xf32>
    %1027 = arith.addf %1024, %1026 : vector<8x1xf32>
    %1028 = vector.shape_cast %1020 : vector<8x1xf32> to vector<8x1xf32>
    %1029 = vector.broadcast %1028 : vector<8x1xf32> to vector<8x2xf32>
    %1030 = vector.shape_cast %1027 : vector<8x1xf32> to vector<8x1xf32>
    %1031 = vector.broadcast %1030 : vector<8x1xf32> to vector<8x2xf32>
    %1032 = arith.select %1023, %1029, %1031 : vector<8x2xi1>, vector<8x2xf32>
    %1033 = arith.mulf %1008, %1032 : vector<8x2xf32>
    %1034 = arith.addf %1006, %1033 : vector<8x2xf32>
    %c0_279 = arith.constant 0 : index
    %c64_280 = arith.constant 64 : index
    %c0_281 = arith.constant 0 : index
    %1035 = vector.load %arg6[%c0_279, %c64_280, %c0_281] : memref<1x104x2xf32, #tpu.memory_space<vmem>>, vector<1x8x2xf32>
    %1036 = vector.shape_cast %1035 : vector<1x8x2xf32> to vector<8x2xf32>
    %1037 = vector.shape_cast %1034 : vector<8x2xf32> to vector<1x8x2xf32>
    tpu.vector_store %arg6[%c0_279, %c64_280, %c0_281], %1037 {strides = array<i32>} : memref<1x104x2xf32, #tpu.memory_space<vmem>>, vector<1x8x2xf32>,
    %cst_282 = arith.constant dense<0.000000e+00> : vector<8x512xf32>
    %1038 = tpu.matmul %1034, %356, %cst_282 {dimension_numbers = #tpu.dot_dimension_numbers<[1], [0], [0], [1], [0, 0, 1, 1], [], []>} : vector<8x2xf32>, vector<2x512xf32>, vector<8x512xf32> -> vector<8x512xf32>
    %1039 = arith.addf %362, %1038 : vector<8x512xf32>
    %cst_283 = arith.constant dense<0.000000e+00> : vector<8x512xf32>
    %1040 = tpu.matmul %983, %357, %cst_283 {dimension_numbers = #tpu.dot_dimension_numbers<[1], [0], [0], [1], [0, 0, 1, 1], [], []>} : vector<8x5xf32>, vector<5x512xf32>, vector<8x512xf32> -> vector<8x512xf32>
    %1041 = arith.addf %1039, %1040 : vector<8x512xf32>
    %1042 = vector.extract_strided_slice %1041 {offsets = [0, 0], sizes = [8, 5], strides = [1, 1]} : vector<8x512xf32> to vector<8x5xf32>
    %1043 = arith.negf %1042 : vector<8x5xf32>
    %1044 = math.exp %1043 : vector<8x5xf32>
    %cst_284 = arith.constant 1.000000e+00 : f32
    %1045 = vector.broadcast %cst_284 : f32 to vector<8x5xf32>
    %1046 = arith.addf %1045, %1044 : vector<8x5xf32>
    %1047 = arith.divf %1045, %1046 : vector<8x5xf32>
    %1048 = vector.extract_strided_slice %1041 {offsets = [0, 128], sizes = [8, 5], strides = [1, 1]} : vector<8x512xf32> to vector<8x5xf32>
    %1049 = arith.negf %1048 : vector<8x5xf32>
    %1050 = math.exp %1049 : vector<8x5xf32>
    %cst_285 = arith.constant 1.000000e+00 : f32
    %1051 = vector.broadcast %cst_285 : f32 to vector<8x5xf32>
    %1052 = arith.addf %1051, %1050 : vector<8x5xf32>
    %1053 = arith.divf %1051, %1052 : vector<8x5xf32>
    %1054 = vector.extract_strided_slice %1041 {offsets = [0, 256], sizes = [8, 5], strides = [1, 1]} : vector<8x512xf32> to vector<8x5xf32>
    %1055 = math.tanh %1054 : vector<8x5xf32>
    %1056 = vector.extract_strided_slice %1041 {offsets = [0, 384], sizes = [8, 5], strides = [1, 1]} : vector<8x512xf32> to vector<8x5xf32>
    %1057 = arith.negf %1056 : vector<8x5xf32>
    %1058 = math.exp %1057 : vector<8x5xf32>
    %cst_286 = arith.constant 1.000000e+00 : f32
    %1059 = vector.broadcast %cst_286 : f32 to vector<8x5xf32>
    %1060 = arith.addf %1059, %1058 : vector<8x5xf32>
    %1061 = arith.divf %1059, %1060 : vector<8x5xf32>
    %1062 = arith.mulf %1053, %981 : vector<8x5xf32>
    %1063 = arith.mulf %1047, %1055 : vector<8x5xf32>
    %1064 = arith.addf %1062, %1063 : vector<8x5xf32>
    %1065 = math.tanh %1064 : vector<8x5xf32>
    %1066 = arith.mulf %1061, %1065 : vector<8x5xf32>
    %cst_287 = arith.constant dense<0.000000e+00> : vector<8x192xf32>
    %1067 = tpu.matmul %1066, %363, %cst_287 {dimension_numbers = #tpu.dot_dimension_numbers<[1], [0], [0], [1], [0, 0, 1, 1], [], []>} : vector<8x5xf32>, vector<5x192xf32>, vector<8x192xf32> -> vector<8x192xf32>
    %1068 = vector.broadcast %364 : vector<1x192xf32> to vector<8x192xf32>
    %1069 = arith.addf %1067, %1068 : vector<8x192xf32>
    %cst_288 = arith.constant 0.000000e+00 : f32
    %1070 = vector.broadcast %cst_288 : f32 to vector<8x192xf32>
    %1071 = arith.cmpf oge, %1069, %1070 : vector<8x192xf32>
    %1072 = vector.broadcast %365 : vector<1x192xf32> to vector<8x192xf32>
    %1073 = arith.mulf %1069, %1072 : vector<8x192xf32>
    %1074 = arith.select %1071, %1069, %1073 : vector<8x192xi1>, vector<8x192xf32>
    %cst_289 = arith.constant dense<0.000000e+00> : vector<8x96xf32>
    %1075 = tpu.matmul %1074, %366, %cst_289 {dimension_numbers = #tpu.dot_dimension_numbers<[1], [0], [0], [1], [0, 0, 1, 1], [], []>} : vector<8x192xf32>, vector<192x96xf32>, vector<8x96xf32> -> vector<8x96xf32>
    %1076 = vector.broadcast %367 : vector<1x96xf32> to vector<8x96xf32>
    %1077 = arith.addf %1075, %1076 : vector<8x96xf32>
    %cst_290 = arith.constant 0.000000e+00 : f32
    %1078 = vector.broadcast %cst_290 : f32 to vector<8x96xf32>
    %1079 = arith.cmpf oge, %1077, %1078 : vector<8x96xf32>
    %1080 = vector.broadcast %368 : vector<1x96xf32> to vector<8x96xf32>
    %1081 = arith.mulf %1077, %1080 : vector<8x96xf32>
    %1082 = arith.select %1079, %1077, %1081 : vector<8x96xi1>, vector<8x96xf32>
    %cst_291 = arith.constant dense<0.000000e+00> : vector<8x5xf32>
    %1083 = tpu.matmul %1082, %369, %cst_291 {dimension_numbers = #tpu.dot_dimension_numbers<[1], [0], [0], [1], [0, 0, 1, 1], [], []>} : vector<8x96xf32>, vector<96x5xf32>, vector<8x5xf32> -> vector<8x5xf32>
    %1084 = vector.broadcast %370 : vector<1x5xf32> to vector<8x5xf32>
    %1085 = arith.addf %1083, %1084 : vector<8x5xf32>
    %c0_292 = arith.constant 0 : index
    %c64_293 = arith.constant 64 : index
    %c0_294 = arith.constant 0 : index
    %1086 = vector.load %arg5[%c0_292, %c64_293, %c0_294] : memref<1x96x5xf32, #tpu.memory_space<vmem>>, vector<1x8x5xf32>
    %1087 = vector.shape_cast %1086 : vector<1x8x5xf32> to vector<8x5xf32>
    %1088 = vector.shape_cast %1085 : vector<8x5xf32> to vector<1x8x5xf32>
    tpu.vector_store %arg5[%c0_292, %c64_293, %c0_294], %1088 {strides = array<i32>} : memref<1x96x5xf32, #tpu.memory_space<vmem>>, vector<1x8x5xf32>,
    %1089 = vector.extract_strided_slice %1085 {offsets = [0, 0], sizes = [8, 2], strides = [1, 1]} : vector<8x5xf32> to vector<8x2xf32>
    %1090 = vector.extract_strided_slice %1085 {offsets = [0, 2], sizes = [8, 2], strides = [1, 1]} : vector<8x5xf32> to vector<8x2xf32>
    %1091 = math.exp %1090 : vector<8x2xf32>
    %1092 = vector.extract_strided_slice %1085 {offsets = [0, 4], sizes = [8, 1], strides = [1, 1]} : vector<8x5xf32> to vector<8x1xf32>
    %1093 = math.tanh %1092 : vector<8x1xf32>
    %1094 = arith.mulf %1093, %1093 : vector<8x1xf32>
    %cst_295 = arith.constant 1.000000e+00 : f32
    %1095 = vector.broadcast %cst_295 : f32 to vector<8x1xf32>
    %1096 = arith.subf %1095, %1094 : vector<8x1xf32>
    %cst_296 = arith.constant 9.99999974E-6 : f32
    %cst_297 = arith.constant 1.000000e+00 : f32
    %1097 = vector.broadcast %cst_296 : f32 to vector<8x1xf32>
    %1098 = arith.maximumf %1097, %1096 : vector<8x1xf32>
    %1099 = vector.broadcast %cst_297 : f32 to vector<8x1xf32>
    %1100 = arith.minimumf %1099, %1098 : vector<8x1xf32>
    %c0_298 = arith.constant 0 : index
    %c64_299 = arith.constant 64 : index
    %c0_300 = arith.constant 0 : index
    %1101 = vector.load %arg3[%c0_298, %c64_299, %c0_300] : memref<1x96x2xf32, #tpu.memory_space<vmem>>, vector<1x8x2xf32>
    %1102 = vector.shape_cast %1101 : vector<1x8x2xf32> to vector<8x2xf32>
    %1103 = vector.extract_strided_slice %1102 {offsets = [0, 0], sizes = [8, 1], strides = [1, 1]} : vector<8x2xf32> to vector<8x1xf32>
    %1104 = vector.extract_strided_slice %1102 {offsets = [0, 1], sizes = [8, 1], strides = [1, 1]} : vector<8x2xf32> to vector<8x1xf32>
    %c0_i32_301 = arith.constant 0 : i32
    %1105 = vector.broadcast %c0_i32_301 : i32 to vector<8x2xi32>
    %1106 = arith.cmpi eq, %371, %1105 : vector<8x2xi32>
    %1107 = arith.mulf %1093, %1103 : vector<8x1xf32>
    %1108 = math.sqrt %1100 : vector<8x1xf32>
    %1109 = arith.mulf %1108, %1104 : vector<8x1xf32>
    %1110 = arith.addf %1107, %1109 : vector<8x1xf32>
    %1111 = vector.shape_cast %1103 : vector<8x1xf32> to vector<8x1xf32>
    %1112 = vector.broadcast %1111 : vector<8x1xf32> to vector<8x2xf32>
    %1113 = vector.shape_cast %1110 : vector<8x1xf32> to vector<8x1xf32>
    %1114 = vector.broadcast %1113 : vector<8x1xf32> to vector<8x2xf32>
    %1115 = arith.select %1106, %1112, %1114 : vector<8x2xi1>, vector<8x2xf32>
    %1116 = arith.mulf %1091, %1115 : vector<8x2xf32>
    %1117 = arith.addf %1089, %1116 : vector<8x2xf32>
    %c0_302 = arith.constant 0 : index
    %c72_303 = arith.constant 72 : index
    %c0_304 = arith.constant 0 : index
    %1118 = vector.load %arg6[%c0_302, %c72_303, %c0_304] : memref<1x104x2xf32, #tpu.memory_space<vmem>>, vector<1x8x2xf32>
    %1119 = vector.shape_cast %1118 : vector<1x8x2xf32> to vector<8x2xf32>
    %1120 = vector.shape_cast %1117 : vector<8x2xf32> to vector<1x8x2xf32>
    tpu.vector_store %arg6[%c0_302, %c72_303, %c0_304], %1120 {strides = array<i32>} : memref<1x104x2xf32, #tpu.memory_space<vmem>>, vector<1x8x2xf32>,
    %cst_305 = arith.constant dense<0.000000e+00> : vector<8x512xf32>
    %1121 = tpu.matmul %1117, %356, %cst_305 {dimension_numbers = #tpu.dot_dimension_numbers<[1], [0], [0], [1], [0, 0, 1, 1], [], []>} : vector<8x2xf32>, vector<2x512xf32>, vector<8x512xf32> -> vector<8x512xf32>
    %1122 = arith.addf %362, %1121 : vector<8x512xf32>
    %cst_306 = arith.constant dense<0.000000e+00> : vector<8x512xf32>
    %1123 = tpu.matmul %1066, %357, %cst_306 {dimension_numbers = #tpu.dot_dimension_numbers<[1], [0], [0], [1], [0, 0, 1, 1], [], []>} : vector<8x5xf32>, vector<5x512xf32>, vector<8x512xf32> -> vector<8x512xf32>
    %1124 = arith.addf %1122, %1123 : vector<8x512xf32>
    %1125 = vector.extract_strided_slice %1124 {offsets = [0, 0], sizes = [8, 5], strides = [1, 1]} : vector<8x512xf32> to vector<8x5xf32>
    %1126 = arith.negf %1125 : vector<8x5xf32>
    %1127 = math.exp %1126 : vector<8x5xf32>
    %cst_307 = arith.constant 1.000000e+00 : f32
    %1128 = vector.broadcast %cst_307 : f32 to vector<8x5xf32>
    %1129 = arith.addf %1128, %1127 : vector<8x5xf32>
    %1130 = arith.divf %1128, %1129 : vector<8x5xf32>
    %1131 = vector.extract_strided_slice %1124 {offsets = [0, 128], sizes = [8, 5], strides = [1, 1]} : vector<8x512xf32> to vector<8x5xf32>
    %1132 = arith.negf %1131 : vector<8x5xf32>
    %1133 = math.exp %1132 : vector<8x5xf32>
    %cst_308 = arith.constant 1.000000e+00 : f32
    %1134 = vector.broadcast %cst_308 : f32 to vector<8x5xf32>
    %1135 = arith.addf %1134, %1133 : vector<8x5xf32>
    %1136 = arith.divf %1134, %1135 : vector<8x5xf32>
    %1137 = vector.extract_strided_slice %1124 {offsets = [0, 256], sizes = [8, 5], strides = [1, 1]} : vector<8x512xf32> to vector<8x5xf32>
    %1138 = math.tanh %1137 : vector<8x5xf32>
    %1139 = vector.extract_strided_slice %1124 {offsets = [0, 384], sizes = [8, 5], strides = [1, 1]} : vector<8x512xf32> to vector<8x5xf32>
    %1140 = arith.negf %1139 : vector<8x5xf32>
    %1141 = math.exp %1140 : vector<8x5xf32>
    %cst_309 = arith.constant 1.000000e+00 : f32
    %1142 = vector.broadcast %cst_309 : f32 to vector<8x5xf32>
    %1143 = arith.addf %1142, %1141 : vector<8x5xf32>
    %1144 = arith.divf %1142, %1143 : vector<8x5xf32>
    %1145 = arith.mulf %1136, %1064 : vector<8x5xf32>
    %1146 = arith.mulf %1130, %1138 : vector<8x5xf32>
    %1147 = arith.addf %1145, %1146 : vector<8x5xf32>
    %1148 = math.tanh %1147 : vector<8x5xf32>
    %1149 = arith.mulf %1144, %1148 : vector<8x5xf32>
    %cst_310 = arith.constant dense<0.000000e+00> : vector<8x192xf32>
    %1150 = tpu.matmul %1149, %363, %cst_310 {dimension_numbers = #tpu.dot_dimension_numbers<[1], [0], [0], [1], [0, 0, 1, 1], [], []>} : vector<8x5xf32>, vector<5x192xf32>, vector<8x192xf32> -> vector<8x192xf32>
    %1151 = vector.broadcast %364 : vector<1x192xf32> to vector<8x192xf32>
    %1152 = arith.addf %1150, %1151 : vector<8x192xf32>
    %cst_311 = arith.constant 0.000000e+00 : f32
    %1153 = vector.broadcast %cst_311 : f32 to vector<8x192xf32>
    %1154 = arith.cmpf oge, %1152, %1153 : vector<8x192xf32>
    %1155 = vector.broadcast %365 : vector<1x192xf32> to vector<8x192xf32>
    %1156 = arith.mulf %1152, %1155 : vector<8x192xf32>
    %1157 = arith.select %1154, %1152, %1156 : vector<8x192xi1>, vector<8x192xf32>
    %cst_312 = arith.constant dense<0.000000e+00> : vector<8x96xf32>
    %1158 = tpu.matmul %1157, %366, %cst_312 {dimension_numbers = #tpu.dot_dimension_numbers<[1], [0], [0], [1], [0, 0, 1, 1], [], []>} : vector<8x192xf32>, vector<192x96xf32>, vector<8x96xf32> -> vector<8x96xf32>
    %1159 = vector.broadcast %367 : vector<1x96xf32> to vector<8x96xf32>
    %1160 = arith.addf %1158, %1159 : vector<8x96xf32>
    %cst_313 = arith.constant 0.000000e+00 : f32
    %1161 = vector.broadcast %cst_313 : f32 to vector<8x96xf32>
    %1162 = arith.cmpf oge, %1160, %1161 : vector<8x96xf32>
    %1163 = vector.broadcast %368 : vector<1x96xf32> to vector<8x96xf32>
    %1164 = arith.mulf %1160, %1163 : vector<8x96xf32>
    %1165 = arith.select %1162, %1160, %1164 : vector<8x96xi1>, vector<8x96xf32>
    %cst_314 = arith.constant dense<0.000000e+00> : vector<8x5xf32>
    %1166 = tpu.matmul %1165, %369, %cst_314 {dimension_numbers = #tpu.dot_dimension_numbers<[1], [0], [0], [1], [0, 0, 1, 1], [], []>} : vector<8x96xf32>, vector<96x5xf32>, vector<8x5xf32> -> vector<8x5xf32>
    %1167 = vector.broadcast %370 : vector<1x5xf32> to vector<8x5xf32>
    %1168 = arith.addf %1166, %1167 : vector<8x5xf32>
    %c0_315 = arith.constant 0 : index
    %c72_316 = arith.constant 72 : index
    %c0_317 = arith.constant 0 : index
    %1169 = vector.load %arg5[%c0_315, %c72_316, %c0_317] : memref<1x96x5xf32, #tpu.memory_space<vmem>>, vector<1x8x5xf32>
    %1170 = vector.shape_cast %1169 : vector<1x8x5xf32> to vector<8x5xf32>
    %1171 = vector.shape_cast %1168 : vector<8x5xf32> to vector<1x8x5xf32>
    tpu.vector_store %arg5[%c0_315, %c72_316, %c0_317], %1171 {strides = array<i32>} : memref<1x96x5xf32, #tpu.memory_space<vmem>>, vector<1x8x5xf32>,
    %1172 = vector.extract_strided_slice %1168 {offsets = [0, 0], sizes = [8, 2], strides = [1, 1]} : vector<8x5xf32> to vector<8x2xf32>
    %1173 = vector.extract_strided_slice %1168 {offsets = [0, 2], sizes = [8, 2], strides = [1, 1]} : vector<8x5xf32> to vector<8x2xf32>
    %1174 = math.exp %1173 : vector<8x2xf32>
    %1175 = vector.extract_strided_slice %1168 {offsets = [0, 4], sizes = [8, 1], strides = [1, 1]} : vector<8x5xf32> to vector<8x1xf32>
    %1176 = math.tanh %1175 : vector<8x1xf32>
    %1177 = arith.mulf %1176, %1176 : vector<8x1xf32>
    %cst_318 = arith.constant 1.000000e+00 : f32
    %1178 = vector.broadcast %cst_318 : f32 to vector<8x1xf32>
    %1179 = arith.subf %1178, %1177 : vector<8x1xf32>
    %cst_319 = arith.constant 9.99999974E-6 : f32
    %cst_320 = arith.constant 1.000000e+00 : f32
    %1180 = vector.broadcast %cst_319 : f32 to vector<8x1xf32>
    %1181 = arith.maximumf %1180, %1179 : vector<8x1xf32>
    %1182 = vector.broadcast %cst_320 : f32 to vector<8x1xf32>
    %1183 = arith.minimumf %1182, %1181 : vector<8x1xf32>
    %c0_321 = arith.constant 0 : index
    %c72_322 = arith.constant 72 : index
    %c0_323 = arith.constant 0 : index
    %1184 = vector.load %arg3[%c0_321, %c72_322, %c0_323] : memref<1x96x2xf32, #tpu.memory_space<vmem>>, vector<1x8x2xf32>
    %1185 = vector.shape_cast %1184 : vector<1x8x2xf32> to vector<8x2xf32>
    %1186 = vector.extract_strided_slice %1185 {offsets = [0, 0], sizes = [8, 1], strides = [1, 1]} : vector<8x2xf32> to vector<8x1xf32>
    %1187 = vector.extract_strided_slice %1185 {offsets = [0, 1], sizes = [8, 1], strides = [1, 1]} : vector<8x2xf32> to vector<8x1xf32>
    %c0_i32_324 = arith.constant 0 : i32
    %1188 = vector.broadcast %c0_i32_324 : i32 to vector<8x2xi32>
    %1189 = arith.cmpi eq, %371, %1188 : vector<8x2xi32>
    %1190 = arith.mulf %1176, %1186 : vector<8x1xf32>
    %1191 = math.sqrt %1183 : vector<8x1xf32>
    %1192 = arith.mulf %1191, %1187 : vector<8x1xf32>
    %1193 = arith.addf %1190, %1192 : vector<8x1xf32>
    %1194 = vector.shape_cast %1186 : vector<8x1xf32> to vector<8x1xf32>
    %1195 = vector.broadcast %1194 : vector<8x1xf32> to vector<8x2xf32>
    %1196 = vector.shape_cast %1193 : vector<8x1xf32> to vector<8x1xf32>
    %1197 = vector.broadcast %1196 : vector<8x1xf32> to vector<8x2xf32>
    %1198 = arith.select %1189, %1195, %1197 : vector<8x2xi1>, vector<8x2xf32>
    %1199 = arith.mulf %1174, %1198 : vector<8x2xf32>
    %1200 = arith.addf %1172, %1199 : vector<8x2xf32>
    %c0_325 = arith.constant 0 : index
    %c80_326 = arith.constant 80 : index
    %c0_327 = arith.constant 0 : index
    %1201 = vector.load %arg6[%c0_325, %c80_326, %c0_327] : memref<1x104x2xf32, #tpu.memory_space<vmem>>, vector<1x8x2xf32>
    %1202 = vector.shape_cast %1201 : vector<1x8x2xf32> to vector<8x2xf32>
    %1203 = vector.shape_cast %1200 : vector<8x2xf32> to vector<1x8x2xf32>
    tpu.vector_store %arg6[%c0_325, %c80_326, %c0_327], %1203 {strides = array<i32>} : memref<1x104x2xf32, #tpu.memory_space<vmem>>, vector<1x8x2xf32>,
    %cst_328 = arith.constant dense<0.000000e+00> : vector<8x512xf32>
    %1204 = tpu.matmul %1200, %356, %cst_328 {dimension_numbers = #tpu.dot_dimension_numbers<[1], [0], [0], [1], [0, 0, 1, 1], [], []>} : vector<8x2xf32>, vector<2x512xf32>, vector<8x512xf32> -> vector<8x512xf32>
    %1205 = arith.addf %362, %1204 : vector<8x512xf32>
    %cst_329 = arith.constant dense<0.000000e+00> : vector<8x512xf32>
    %1206 = tpu.matmul %1149, %357, %cst_329 {dimension_numbers = #tpu.dot_dimension_numbers<[1], [0], [0], [1], [0, 0, 1, 1], [], []>} : vector<8x5xf32>, vector<5x512xf32>, vector<8x512xf32> -> vector<8x512xf32>
    %1207 = arith.addf %1205, %1206 : vector<8x512xf32>
    %1208 = vector.extract_strided_slice %1207 {offsets = [0, 0], sizes = [8, 5], strides = [1, 1]} : vector<8x512xf32> to vector<8x5xf32>
    %1209 = arith.negf %1208 : vector<8x5xf32>
    %1210 = math.exp %1209 : vector<8x5xf32>
    %cst_330 = arith.constant 1.000000e+00 : f32
    %1211 = vector.broadcast %cst_330 : f32 to vector<8x5xf32>
    %1212 = arith.addf %1211, %1210 : vector<8x5xf32>
    %1213 = arith.divf %1211, %1212 : vector<8x5xf32>
    %1214 = vector.extract_strided_slice %1207 {offsets = [0, 128], sizes = [8, 5], strides = [1, 1]} : vector<8x512xf32> to vector<8x5xf32>
    %1215 = arith.negf %1214 : vector<8x5xf32>
    %1216 = math.exp %1215 : vector<8x5xf32>
    %cst_331 = arith.constant 1.000000e+00 : f32
    %1217 = vector.broadcast %cst_331 : f32 to vector<8x5xf32>
    %1218 = arith.addf %1217, %1216 : vector<8x5xf32>
    %1219 = arith.divf %1217, %1218 : vector<8x5xf32>
    %1220 = vector.extract_strided_slice %1207 {offsets = [0, 256], sizes = [8, 5], strides = [1, 1]} : vector<8x512xf32> to vector<8x5xf32>
    %1221 = math.tanh %1220 : vector<8x5xf32>
    %1222 = vector.extract_strided_slice %1207 {offsets = [0, 384], sizes = [8, 5], strides = [1, 1]} : vector<8x512xf32> to vector<8x5xf32>
    %1223 = arith.negf %1222 : vector<8x5xf32>
    %1224 = math.exp %1223 : vector<8x5xf32>
    %cst_332 = arith.constant 1.000000e+00 : f32
    %1225 = vector.broadcast %cst_332 : f32 to vector<8x5xf32>
    %1226 = arith.addf %1225, %1224 : vector<8x5xf32>
    %1227 = arith.divf %1225, %1226 : vector<8x5xf32>
    %1228 = arith.mulf %1219, %1147 : vector<8x5xf32>
    %1229 = arith.mulf %1213, %1221 : vector<8x5xf32>
    %1230 = arith.addf %1228, %1229 : vector<8x5xf32>
    %1231 = math.tanh %1230 : vector<8x5xf32>
    %1232 = arith.mulf %1227, %1231 : vector<8x5xf32>
    %cst_333 = arith.constant dense<0.000000e+00> : vector<8x192xf32>
    %1233 = tpu.matmul %1232, %363, %cst_333 {dimension_numbers = #tpu.dot_dimension_numbers<[1], [0], [0], [1], [0, 0, 1, 1], [], []>} : vector<8x5xf32>, vector<5x192xf32>, vector<8x192xf32> -> vector<8x192xf32>
    %1234 = vector.broadcast %364 : vector<1x192xf32> to vector<8x192xf32>
    %1235 = arith.addf %1233, %1234 : vector<8x192xf32>
    %cst_334 = arith.constant 0.000000e+00 : f32
    %1236 = vector.broadcast %cst_334 : f32 to vector<8x192xf32>
    %1237 = arith.cmpf oge, %1235, %1236 : vector<8x192xf32>
    %1238 = vector.broadcast %365 : vector<1x192xf32> to vector<8x192xf32>
    %1239 = arith.mulf %1235, %1238 : vector<8x192xf32>
    %1240 = arith.select %1237, %1235, %1239 : vector<8x192xi1>, vector<8x192xf32>
    %cst_335 = arith.constant dense<0.000000e+00> : vector<8x96xf32>
    %1241 = tpu.matmul %1240, %366, %cst_335 {dimension_numbers = #tpu.dot_dimension_numbers<[1], [0], [0], [1], [0, 0, 1, 1], [], []>} : vector<8x192xf32>, vector<192x96xf32>, vector<8x96xf32> -> vector<8x96xf32>
    %1242 = vector.broadcast %367 : vector<1x96xf32> to vector<8x96xf32>
    %1243 = arith.addf %1241, %1242 : vector<8x96xf32>
    %cst_336 = arith.constant 0.000000e+00 : f32
    %1244 = vector.broadcast %cst_336 : f32 to vector<8x96xf32>
    %1245 = arith.cmpf oge, %1243, %1244 : vector<8x96xf32>
    %1246 = vector.broadcast %368 : vector<1x96xf32> to vector<8x96xf32>
    %1247 = arith.mulf %1243, %1246 : vector<8x96xf32>
    %1248 = arith.select %1245, %1243, %1247 : vector<8x96xi1>, vector<8x96xf32>
    %cst_337 = arith.constant dense<0.000000e+00> : vector<8x5xf32>
    %1249 = tpu.matmul %1248, %369, %cst_337 {dimension_numbers = #tpu.dot_dimension_numbers<[1], [0], [0], [1], [0, 0, 1, 1], [], []>} : vector<8x96xf32>, vector<96x5xf32>, vector<8x5xf32> -> vector<8x5xf32>
    %1250 = vector.broadcast %370 : vector<1x5xf32> to vector<8x5xf32>
    %1251 = arith.addf %1249, %1250 : vector<8x5xf32>
    %c0_338 = arith.constant 0 : index
    %c80_339 = arith.constant 80 : index
    %c0_340 = arith.constant 0 : index
    %1252 = vector.load %arg5[%c0_338, %c80_339, %c0_340] : memref<1x96x5xf32, #tpu.memory_space<vmem>>, vector<1x8x5xf32>
    %1253 = vector.shape_cast %1252 : vector<1x8x5xf32> to vector<8x5xf32>
    %1254 = vector.shape_cast %1251 : vector<8x5xf32> to vector<1x8x5xf32>
    tpu.vector_store %arg5[%c0_338, %c80_339, %c0_340], %1254 {strides = array<i32>} : memref<1x96x5xf32, #tpu.memory_space<vmem>>, vector<1x8x5xf32>,
    %1255 = vector.extract_strided_slice %1251 {offsets = [0, 0], sizes = [8, 2], strides = [1, 1]} : vector<8x5xf32> to vector<8x2xf32>
    %1256 = vector.extract_strided_slice %1251 {offsets = [0, 2], sizes = [8, 2], strides = [1, 1]} : vector<8x5xf32> to vector<8x2xf32>
    %1257 = math.exp %1256 : vector<8x2xf32>
    %1258 = vector.extract_strided_slice %1251 {offsets = [0, 4], sizes = [8, 1], strides = [1, 1]} : vector<8x5xf32> to vector<8x1xf32>
    %1259 = math.tanh %1258 : vector<8x1xf32>
    %1260 = arith.mulf %1259, %1259 : vector<8x1xf32>
    %cst_341 = arith.constant 1.000000e+00 : f32
    %1261 = vector.broadcast %cst_341 : f32 to vector<8x1xf32>
    %1262 = arith.subf %1261, %1260 : vector<8x1xf32>
    %cst_342 = arith.constant 9.99999974E-6 : f32
    %cst_343 = arith.constant 1.000000e+00 : f32
    %1263 = vector.broadcast %cst_342 : f32 to vector<8x1xf32>
    %1264 = arith.maximumf %1263, %1262 : vector<8x1xf32>
    %1265 = vector.broadcast %cst_343 : f32 to vector<8x1xf32>
    %1266 = arith.minimumf %1265, %1264 : vector<8x1xf32>
    %c0_344 = arith.constant 0 : index
    %c80_345 = arith.constant 80 : index
    %c0_346 = arith.constant 0 : index
    %1267 = vector.load %arg3[%c0_344, %c80_345, %c0_346] : memref<1x96x2xf32, #tpu.memory_space<vmem>>, vector<1x8x2xf32>
    %1268 = vector.shape_cast %1267 : vector<1x8x2xf32> to vector<8x2xf32>
    %1269 = vector.extract_strided_slice %1268 {offsets = [0, 0], sizes = [8, 1], strides = [1, 1]} : vector<8x2xf32> to vector<8x1xf32>
    %1270 = vector.extract_strided_slice %1268 {offsets = [0, 1], sizes = [8, 1], strides = [1, 1]} : vector<8x2xf32> to vector<8x1xf32>
    %c0_i32_347 = arith.constant 0 : i32
    %1271 = vector.broadcast %c0_i32_347 : i32 to vector<8x2xi32>
    %1272 = arith.cmpi eq, %371, %1271 : vector<8x2xi32>
    %1273 = arith.mulf %1259, %1269 : vector<8x1xf32>
    %1274 = math.sqrt %1266 : vector<8x1xf32>
    %1275 = arith.mulf %1274, %1270 : vector<8x1xf32>
    %1276 = arith.addf %1273, %1275 : vector<8x1xf32>
    %1277 = vector.shape_cast %1269 : vector<8x1xf32> to vector<8x1xf32>
    %1278 = vector.broadcast %1277 : vector<8x1xf32> to vector<8x2xf32>
    %1279 = vector.shape_cast %1276 : vector<8x1xf32> to vector<8x1xf32>
    %1280 = vector.broadcast %1279 : vector<8x1xf32> to vector<8x2xf32>
    %1281 = arith.select %1272, %1278, %1280 : vector<8x2xi1>, vector<8x2xf32>
    %1282 = arith.mulf %1257, %1281 : vector<8x2xf32>
    %1283 = arith.addf %1255, %1282 : vector<8x2xf32>
    %c0_348 = arith.constant 0 : index
    %c88_349 = arith.constant 88 : index
    %c0_350 = arith.constant 0 : index
    %1284 = vector.load %arg6[%c0_348, %c88_349, %c0_350] : memref<1x104x2xf32, #tpu.memory_space<vmem>>, vector<1x8x2xf32>
    %1285 = vector.shape_cast %1284 : vector<1x8x2xf32> to vector<8x2xf32>
    %1286 = vector.shape_cast %1283 : vector<8x2xf32> to vector<1x8x2xf32>
    tpu.vector_store %arg6[%c0_348, %c88_349, %c0_350], %1286 {strides = array<i32>} : memref<1x104x2xf32, #tpu.memory_space<vmem>>, vector<1x8x2xf32>,
    %cst_351 = arith.constant dense<0.000000e+00> : vector<8x512xf32>
    %1287 = tpu.matmul %1283, %356, %cst_351 {dimension_numbers = #tpu.dot_dimension_numbers<[1], [0], [0], [1], [0, 0, 1, 1], [], []>} : vector<8x2xf32>, vector<2x512xf32>, vector<8x512xf32> -> vector<8x512xf32>
    %1288 = arith.addf %362, %1287 : vector<8x512xf32>
    %cst_352 = arith.constant dense<0.000000e+00> : vector<8x512xf32>
    %1289 = tpu.matmul %1232, %357, %cst_352 {dimension_numbers = #tpu.dot_dimension_numbers<[1], [0], [0], [1], [0, 0, 1, 1], [], []>} : vector<8x5xf32>, vector<5x512xf32>, vector<8x512xf32> -> vector<8x512xf32>
    %1290 = arith.addf %1288, %1289 : vector<8x512xf32>
    %1291 = vector.extract_strided_slice %1290 {offsets = [0, 0], sizes = [8, 5], strides = [1, 1]} : vector<8x512xf32> to vector<8x5xf32>
    %1292 = arith.negf %1291 : vector<8x5xf32>
    %1293 = math.exp %1292 : vector<8x5xf32>
    %cst_353 = arith.constant 1.000000e+00 : f32
    %1294 = vector.broadcast %cst_353 : f32 to vector<8x5xf32>
    %1295 = arith.addf %1294, %1293 : vector<8x5xf32>
    %1296 = arith.divf %1294, %1295 : vector<8x5xf32>
    %1297 = vector.extract_strided_slice %1290 {offsets = [0, 128], sizes = [8, 5], strides = [1, 1]} : vector<8x512xf32> to vector<8x5xf32>
    %1298 = arith.negf %1297 : vector<8x5xf32>
    %1299 = math.exp %1298 : vector<8x5xf32>
    %cst_354 = arith.constant 1.000000e+00 : f32
    %1300 = vector.broadcast %cst_354 : f32 to vector<8x5xf32>
    %1301 = arith.addf %1300, %1299 : vector<8x5xf32>
    %1302 = arith.divf %1300, %1301 : vector<8x5xf32>
    %1303 = vector.extract_strided_slice %1290 {offsets = [0, 256], sizes = [8, 5], strides = [1, 1]} : vector<8x512xf32> to vector<8x5xf32>
    %1304 = math.tanh %1303 : vector<8x5xf32>
    %1305 = vector.extract_strided_slice %1290 {offsets = [0, 384], sizes = [8, 5], strides = [1, 1]} : vector<8x512xf32> to vector<8x5xf32>
    %1306 = arith.negf %1305 : vector<8x5xf32>
    %1307 = math.exp %1306 : vector<8x5xf32>
    %cst_355 = arith.constant 1.000000e+00 : f32
    %1308 = vector.broadcast %cst_355 : f32 to vector<8x5xf32>
    %1309 = arith.addf %1308, %1307 : vector<8x5xf32>
    %1310 = arith.divf %1308, %1309 : vector<8x5xf32>
    %1311 = arith.mulf %1302, %1230 : vector<8x5xf32>
    %1312 = arith.mulf %1296, %1304 : vector<8x5xf32>
    %1313 = arith.addf %1311, %1312 : vector<8x5xf32>
    %1314 = math.tanh %1313 : vector<8x5xf32>
    %1315 = arith.mulf %1310, %1314 : vector<8x5xf32>
    %cst_356 = arith.constant dense<0.000000e+00> : vector<8x192xf32>
    %1316 = tpu.matmul %1315, %363, %cst_356 {dimension_numbers = #tpu.dot_dimension_numbers<[1], [0], [0], [1], [0, 0, 1, 1], [], []>} : vector<8x5xf32>, vector<5x192xf32>, vector<8x192xf32> -> vector<8x192xf32>
    %1317 = vector.broadcast %364 : vector<1x192xf32> to vector<8x192xf32>
    %1318 = arith.addf %1316, %1317 : vector<8x192xf32>
    %cst_357 = arith.constant 0.000000e+00 : f32
    %1319 = vector.broadcast %cst_357 : f32 to vector<8x192xf32>
    %1320 = arith.cmpf oge, %1318, %1319 : vector<8x192xf32>
    %1321 = vector.broadcast %365 : vector<1x192xf32> to vector<8x192xf32>
    %1322 = arith.mulf %1318, %1321 : vector<8x192xf32>
    %1323 = arith.select %1320, %1318, %1322 : vector<8x192xi1>, vector<8x192xf32>
    %cst_358 = arith.constant dense<0.000000e+00> : vector<8x96xf32>
    %1324 = tpu.matmul %1323, %366, %cst_358 {dimension_numbers = #tpu.dot_dimension_numbers<[1], [0], [0], [1], [0, 0, 1, 1], [], []>} : vector<8x192xf32>, vector<192x96xf32>, vector<8x96xf32> -> vector<8x96xf32>
    %1325 = vector.broadcast %367 : vector<1x96xf32> to vector<8x96xf32>
    %1326 = arith.addf %1324, %1325 : vector<8x96xf32>
    %cst_359 = arith.constant 0.000000e+00 : f32
    %1327 = vector.broadcast %cst_359 : f32 to vector<8x96xf32>
    %1328 = arith.cmpf oge, %1326, %1327 : vector<8x96xf32>
    %1329 = vector.broadcast %368 : vector<1x96xf32> to vector<8x96xf32>
    %1330 = arith.mulf %1326, %1329 : vector<8x96xf32>
    %1331 = arith.select %1328, %1326, %1330 : vector<8x96xi1>, vector<8x96xf32>
    %cst_360 = arith.constant dense<0.000000e+00> : vector<8x5xf32>
    %1332 = tpu.matmul %1331, %369, %cst_360 {dimension_numbers = #tpu.dot_dimension_numbers<[1], [0], [0], [1], [0, 0, 1, 1], [], []>} : vector<8x96xf32>, vector<96x5xf32>, vector<8x5xf32> -> vector<8x5xf32>
    %1333 = vector.broadcast %370 : vector<1x5xf32> to vector<8x5xf32>
    %1334 = arith.addf %1332, %1333 : vector<8x5xf32>
    %c0_361 = arith.constant 0 : index
    %c88_362 = arith.constant 88 : index
    %c0_363 = arith.constant 0 : index
    %1335 = vector.load %arg5[%c0_361, %c88_362, %c0_363] : memref<1x96x5xf32, #tpu.memory_space<vmem>>, vector<1x8x5xf32>
    %1336 = vector.shape_cast %1335 : vector<1x8x5xf32> to vector<8x5xf32>
    %1337 = vector.shape_cast %1334 : vector<8x5xf32> to vector<1x8x5xf32>
    tpu.vector_store %arg5[%c0_361, %c88_362, %c0_363], %1337 {strides = array<i32>} : memref<1x96x5xf32, #tpu.memory_space<vmem>>, vector<1x8x5xf32>,
    %1338 = vector.extract_strided_slice %1334 {offsets = [0, 0], sizes = [8, 2], strides = [1, 1]} : vector<8x5xf32> to vector<8x2xf32>
    %1339 = vector.extract_strided_slice %1334 {offsets = [0, 2], sizes = [8, 2], strides = [1, 1]} : vector<8x5xf32> to vector<8x2xf32>
    %1340 = math.exp %1339 : vector<8x2xf32>
    %1341 = vector.extract_strided_slice %1334 {offsets = [0, 4], sizes = [8, 1], strides = [1, 1]} : vector<8x5xf32> to vector<8x1xf32>
    %1342 = math.tanh %1341 : vector<8x1xf32>
    %1343 = arith.mulf %1342, %1342 : vector<8x1xf32>
    %cst_364 = arith.constant 1.000000e+00 : f32
    %1344 = vector.broadcast %cst_364 : f32 to vector<8x1xf32>
    %1345 = arith.subf %1344, %1343 : vector<8x1xf32>
    %cst_365 = arith.constant 9.99999974E-6 : f32
    %cst_366 = arith.constant 1.000000e+00 : f32
    %1346 = vector.broadcast %cst_365 : f32 to vector<8x1xf32>
    %1347 = arith.maximumf %1346, %1345 : vector<8x1xf32>
    %1348 = vector.broadcast %cst_366 : f32 to vector<8x1xf32>
    %1349 = arith.minimumf %1348, %1347 : vector<8x1xf32>
    %c0_367 = arith.constant 0 : index
    %c88_368 = arith.constant 88 : index
    %c0_369 = arith.constant 0 : index
    %1350 = vector.load %arg3[%c0_367, %c88_368, %c0_369] : memref<1x96x2xf32, #tpu.memory_space<vmem>>, vector<1x8x2xf32>
    %1351 = vector.shape_cast %1350 : vector<1x8x2xf32> to vector<8x2xf32>
    %1352 = vector.extract_strided_slice %1351 {offsets = [0, 0], sizes = [8, 1], strides = [1, 1]} : vector<8x2xf32> to vector<8x1xf32>
    %1353 = vector.extract_strided_slice %1351 {offsets = [0, 1], sizes = [8, 1], strides = [1, 1]} : vector<8x2xf32> to vector<8x1xf32>
    %c0_i32_370 = arith.constant 0 : i32
    %1354 = vector.broadcast %c0_i32_370 : i32 to vector<8x2xi32>
    %1355 = arith.cmpi eq, %371, %1354 : vector<8x2xi32>
    %1356 = arith.mulf %1342, %1352 : vector<8x1xf32>
    %1357 = math.sqrt %1349 : vector<8x1xf32>
    %1358 = arith.mulf %1357, %1353 : vector<8x1xf32>
    %1359 = arith.addf %1356, %1358 : vector<8x1xf32>
    %1360 = vector.shape_cast %1352 : vector<8x1xf32> to vector<8x1xf32>
    %1361 = vector.broadcast %1360 : vector<8x1xf32> to vector<8x2xf32>
    %1362 = vector.shape_cast %1359 : vector<8x1xf32> to vector<8x1xf32>
    %1363 = vector.broadcast %1362 : vector<8x1xf32> to vector<8x2xf32>
    %1364 = arith.select %1355, %1361, %1363 : vector<8x2xi1>, vector<8x2xf32>
    %1365 = arith.mulf %1340, %1364 : vector<8x2xf32>
    %1366 = arith.addf %1338, %1365 : vector<8x2xf32>
    %c0_371 = arith.constant 0 : index
    %c96_372 = arith.constant 96 : index
    %c0_373 = arith.constant 0 : index
    %1367 = vector.load %arg6[%c0_371, %c96_372, %c0_373] : memref<1x104x2xf32, #tpu.memory_space<vmem>>, vector<1x8x2xf32>
    %1368 = vector.shape_cast %1367 : vector<1x8x2xf32> to vector<8x2xf32>
    %1369 = vector.shape_cast %1366 : vector<8x2xf32> to vector<1x8x2xf32>
    tpu.vector_store %arg6[%c0_371, %c96_372, %c0_373], %1369 {strides = array<i32>} : memref<1x104x2xf32, #tpu.memory_space<vmem>>, vector<1x8x2xf32>,
    return
  }
  func.func @transform_0(%arg0: i32) -> (i32, i32, i32) {
    %c0_i32 = arith.constant 0 : i32
    %c0_i32_0 = arith.constant 0 : i32
    %c0_i32_1 = arith.constant 0 : i32
    return %arg0, %c0_i32, %c0_i32_0 : i32, i32, i32
  }
  func.func @transform_1(%arg0: i32) -> (i32, i32, i32) {
    %c0_i32 = arith.constant 0 : i32
    %c0_i32_0 = arith.constant 0 : i32
    %c0_i32_1 = arith.constant 0 : i32
    return %arg0, %c0_i32, %c0_i32_0 : i32, i32, i32
  }
  func.func @transform_2(%arg0: i32) -> (i32, i32, i32) {
    %c0_i32 = arith.constant 0 : i32
    %c0_i32_0 = arith.constant 0 : i32
    %c0_i32_1 = arith.constant 0 : i32
    return %arg0, %c0_i32, %c0_i32_0 : i32, i32, i32
  }
  func.func @transform_3(%arg0: i32) -> (i32, i32) {
    %c0_i32 = arith.constant 0 : i32
    %c0_i32_0 = arith.constant 0 : i32
    %c0_i32_1 = arith.constant 0 : i32
    return %c0_i32, %c0_i32_0 : i32, i32
  }
  func.func @transform_4(%arg0: i32) -> (i32, i32, i32) {
    %c0_i32 = arith.constant 0 : i32
    %c0_i32_0 = arith.constant 0 : i32
    %c0_i32_1 = arith.constant 0 : i32
    return %arg0, %c0_i32, %c0_i32_0 : i32, i32, i32
  }
  func.func @transform_5(%arg0: i32) -> (i32, i32, i32) {
    %c0_i32 = arith.constant 0 : i32
    %c0_i32_0 = arith.constant 0 : i32
    %c0_i32_1 = arith.constant 0 : i32
    return %arg0, %c0_i32, %c0_i32_0 : i32, i32, i32
  }
}

</mosaic_0001>

<bundles_post_ra>
// kernel: goal_example_forward.1
= control target key start
LH: loop header
LB: loop body
LE: loop exit
PB: predicated region body
PF: predicated region fallthrough
CT: control target
= control target key end

     0   :  { %11 = vsyncpa [#allocation3], 0  ;;  %s8274_s21 = smov [#allocation2]   ;;  %s8275_s23 = smov 512   ;;  %s10643_s0 = inlined_call_operand.vmem [shape: f32[1,64,2], index: 0, kind: input, shape index: {}]   ;;  %s10644_s1 = inlined_call_operand.vmem [shape: f32[1,8,8], index: 1, kind: input, shape index: {}]   ;;  %s10645_s2 = inlined_call_operand.vmem [shape: f32[1,96,2], index: 2, kind: input, shape index: {}]   ;;  %s10646_s3 = inlined_call_operand.hbm [shape: f32[568,512], index: 3, kind: input, shape index: {}]   ;;  %s10647_s4 = inlined_call_operand.vmem [shape: f32[1,96,5], index: 4, kind: output, shape index: {0}]   ;;  %s10648_s5 = inlined_call_operand.vmem [shape: f32[1,104,2], index: 5, kind: output, shape index: {1}]  }
   0x1   :  { %s22_s20 = sshll.u32 %s10646_s3, 4  ;;  %s24_s22 = sshll.u32 %s8274_s21, 4  ;;  %s23_s20 = int_to_ptr.hbm [resolvable:$true] %s22_s20  ;;  %s25_s22 = int_to_ptr.vmem [resolvable:$true] %s24_s22 }
   0x2   :  { %s8276_s24 = smov 32  }
   0x3   :  { %30 = dma.hbm_to_vmem [thread:$0]  %s23_s20, 36352, %s25_s22, [#allocation3], %s8275_s23, %s8275_s23, %s8276_s24  }
   0x4   :  { %8272 = dma.done.wait [#allocation3], 36352  }
   0x5   :  { %8273 = vsyncadd [#allocation3], 4294930944  ;;  %vm71_vm0 = vcmask 1041408   ;;  %vm46_vm1 = vcmask 15360   ;;  %v44_v0 = vld [vmem:[#allocation2] sm:$0x3] }
   0x6   :  { %v37_v1 = vld [vmem:[%s10643_s0] sm:$0xff]  ;;  %7207 = vmatpush.msk.msra.mxu0 %vm71_vm0, %v44_v0  ;;  %v38_v2 = vld [vmem:[%s10643_s0 + $0x8] sm:$0xff]  ;;  %v39_v3 = vld [vmem:[%s10643_s0 + $0x10] sm:$0xff]  ;;  %vm129_vm2 = vcmask 261120   ;;  %vm235_vm3 = vcmask 1044480   ;;  %v8277_v43 = vmov 0.0  }
   0x7   :  { %7208 = vmatmul.msk.f32.vlgmr.msra.gmra.mxu0 %vm46_vm1, %v37_v1  ;;  %v8333_v4 = vld [vmem:[%s10643_s0 + $0x38] sm:$0xff]  ;;  %v127_v6 = vld [vmem:[#allocation2 + $0xa0] sm:$0xff]  ;;  %v42_v8 = vld [vmem:[%s10643_s0 + $0x28] sm:$0xff]  ;;  %vm210_vm4 = vcmask 39936   ;;  %s8278_s19 = smov 4   ;;  %s8279_s20 = smov 3  }
   0x8   :  { %2145 = vst.msk [vmem:[%s10648_s5] sm:$0xff] %vm46_vm1, %v8333_v4  ;;  %v40_v5 = vld [vmem:[%s10643_s0 + $0x18] sm:$0xff]  ;;  %166 = vmatpush.msra.mxu1 %v127_v6  ;;  %v41_v7 = vld [vmem:[%s10643_s0 + $0x20] sm:$0xff]  ;;  %v43_v9 = vld [vmem:[%s10643_s0 + $0x30] sm:$0xff]  ;;  %s8282_s23 = smov 2   ;;  %s8283_s24 = smov 126  }
   0x9   :  { %v126_v10 = vld [vmem:[#allocation2 + $0x80] sm:$0xff]  ;;  %v196_v39 = vld [vmem:[#allocation2 + $0xe8] sm:$0x1f]  ;;  %v197_v40 = vld [vmem:[#allocation2 + $0xf0] sm:$0x1f] }
   0xa   :  { %167 = vmatpush.msra.mxu1 %v126_v10  ;;  %v125_v11 = vld [vmem:[#allocation2 + $0x60] sm:$0xff]  ;;  %7233 = vmatpush.msk.msra.mxu3 %vm235_vm3, %v196_v39  ;;  %v8371_v42 = vld [vmem:[#allocation2 + $0x108] sm:$0x1f]  ;;  %v198_v44 = vld [vmem:[#allocation2 + $0xf8] sm:$0x1f] }
   0xb   :  { %v124_v12 = vld [vmem:[#allocation2 + $0x40] sm:$0xff]  ;;  %7242 = vmatpush.msk.msrb.mxu0 %vm235_vm3, %v197_v40  ;;  %v8399_v56 = vld [vmem:[#allocation2 + $0x110] sm:$0x1f]  ;;  %v8401_v57 = vld [vmem:[#allocation2 + $0x118] sm:$0x1f] }
   0xc   :  { %168 = vmatpush.msra.mxu1 %v125_v11  ;;  %v45_v13 = vld [vmem:[#allocation2 + $0x20] ss:$0 sm:$0xff] }
   0xd   :  { %v195_v38 = vld [vmem:[#allocation2 + $0xe0] sm:$0x1f] }
   0xe   :  { %169 = vmatpush.msra.mxu1 %v124_v12  ;;  %7224 = vmatpush.msk.msra.mxu2 %vm235_vm3, %v195_v38  ;;  %v8369_v41 = vld [vmem:[#allocation2 + $0x100] sm:$0x1f] }
   0xf   :  { %7209 = vmatmul.msk.f32.gmra.mxu0 %vm46_vm1, %v38_v2  ;;  %7260 = vmatpush.msk.msrb.mxu3 %vm235_vm3, %v8369_v41  ;;  %v128_v45 = vld [vmem:[#allocation2 + $0xc0] ss:$0 sm:$0xff] }
  0x10   :  { %7261 = vmatpush.msk.msrb.mxu1 %vm235_vm3, %v8371_v42  ;;  %7300 = vmatpush.msk.msra.mxu0 %vm235_vm3, %v8369_v41  ;;  %v200_v11 = vld [vmem:[#allocation2 + $0x120] ss:$8 sm:$0xf] }
  0x11   :  { %7251 = vmatpush.msk.msrb.mxu2 %vm235_vm3, %v198_v44  ;;  %v8454_v12 = vperm.slane %v200_v11, 1 }
  0x17   :  { %7210 = vmatmul.msk.f32.gmra.mxu0 %vm46_vm1, %v39_v3 }
  0x1f   :  { %7211 = vmatmul.msk.f32.gmra.mxu0 %vm46_vm1, %v40_v5 }
  0x27   :  { %7212 = vmatmul.msk.f32.gmra.mxu0 %vm46_vm1, %v41_v7 }
  0x2f   :  { %7213 = vmatmul.msk.f32.gmra.mxu0 %vm46_vm1, %v42_v8 }
  0x37   :  { %7214 = vmatmul.msk.f32.gmra.mxu0 %vm46_vm1, %v43_v9 }
  0x3f   :  { %7215 = vmatmul.msk.f32.gmra.mxu0 %vm46_vm1, %v8333_v4 }
  0x84   :  { %v92_v14 = vpop.f32.mrf.mxu0 }
  0x85   :  { %v93_v15 = vadd.f32 %v92_v14, %v45_v13 }
  0x87   :  { %v116_v16 = vmax.f32 %v93_v15, 0.0 }
  0x89   :  { %7216 = vmatmul.msk.f32.vlgmr.msra.gmra.mxu1 %vm129_vm2, %v116_v16 }
  0x8a   :  { %7263 = vmatpush.msk.msra.mxu1 %vm235_vm3, %v8401_v57 }
  0x8c   :  { %v95_v17 = vpop.f32.mrf.mxu0 }
  0x8d   :  { %v96_v18 = vadd.f32 %v95_v17, %v45_v13 }
  0x8f   :  { %v117_v19 = vmax.f32 %v96_v18, 0.0 }
  0x91   :  { %7217 = vmatmul.msk.f32.gmra.mxu1 %vm129_vm2, %v117_v19 }
  0x94   :  { %v98_v20 = vpop.f32.mrf.mxu0 }
  0x95   :  { %v99_v21 = vadd.f32 %v98_v20, %v45_v13 }
  0x97   :  { %v118_v22 = vmax.f32 %v99_v21, 0.0 }
  0x99   :  { %7218 = vmatmul.msk.f32.gmra.mxu1 %vm129_vm2, %v118_v22 }
  0x9c   :  { %v101_v23 = vpop.f32.mrf.mxu0 }
  0x9d   :  { %v102_v24 = vadd.f32 %v101_v23, %v45_v13 }
  0x9f   :  { %v119_v25 = vmax.f32 %v102_v24, 0.0  ;;  %v8469_v24 = vperm.slane %v200_v11, 0 }
  0xa1   :  { %7219 = vmatmul.msk.f32.gmra.mxu1 %vm129_vm2, %v119_v25 }
  0xa4   :  { %v104_v26 = vpop.f32.mrf.mxu0 }
  0xa5   :  { %v105_v27 = vadd.f32 %v104_v26, %v45_v13  ;;  %v8471_v26 = vperm.slane %v200_v11, 3 }
  0xa7   :  { %v120_v28 = vmax.f32 %v105_v27, 0.0 }
  0xa9   :  { %7220 = vmatmul.msk.f32.gmra.mxu1 %vm129_vm2, %v120_v28 }
  0xac   :  { %v107_v29 = vpop.f32.mrf.mxu0 }
  0xad   :  { %v108_v30 = vadd.f32 %v107_v29, %v45_v13 }
  0xaf   :  { %v121_v31 = vmax.f32 %v108_v30, 0.0 }
  0xb1   :  { %7221 = vmatmul.msk.f32.gmra.mxu1 %vm129_vm2, %v121_v31 }
  0xb4   :  { %v110_v32 = vpop.f32.mrf.mxu0 }
  0xb5   :  { %v111_v33 = vadd.f32 %v110_v32, %v45_v13 }
  0xb7   :  { %v122_v34 = vmax.f32 %v111_v33, 0.0 }
  0xb9   :  { %7222 = vmatmul.msk.f32.gmra.mxu1 %vm129_vm2, %v122_v34 }
  0xbc   :  { %v113_v35 = vpop.f32.mrf.mxu0 }
  0xbd   :  { %v114_v36 = vadd.f32 %v113_v35, %v45_v13 }
  0xbf   :  { %v123_v37 = vmax.f32 %v114_v36, 0.0 }
  0xc1   :  { %7223 = vmatmul.msk.f32.gmra.mxu1 %vm129_vm2, %v123_v37 }
  0xc9   :  { %467 = vmatmul.f32.vlgmr.msrb.gmra.mxu1 %v8277_v43 }
  0xca   :  { %7269 = vmatpush.msk.msrb.mxu1 %vm235_vm3, %v8371_v42 }
  0xd1   :  { %507 = vmatmul.f32.vlgmr.msra.gmra.mxu1 %v8277_v43 }
  0xd2   :  { %7273 = vmatpush.msk.msra.mxu1 %vm235_vm3, %v8401_v57 }
 0x106   :  { %v171_v46 = vpop.f32.mrf.mxu1 }
 0x107   :  { %v172_v47 = vadd.f32 %v171_v46, %v128_v45 }
 0x109   :  { %7225 = vmatmul.msk.f32.vlgmr.msra.gmra.mxu2 %vm210_vm4, %v172_v47  ;;  %7234 = vmatmul.msk.f32.vlgmr.msra.gmra.mxu3 %vm210_vm4, %v172_v47 }
 0x10a   :  { %7243 = vmatmul.msk.f32.vlgmr.msrb.gmra.mxu0 %vm210_vm4, %v172_v47  ;;  %7313 = vmatpush.msk.msra.mxu2 %vm235_vm3, %v8371_v42 }
 0x10b   :  { %7311 = vmatpush.msk.msrb.mxu0 %vm235_vm3, %v8369_v41  ;;  %7262 = vmatpush.msk.msra.mxu3 %vm235_vm3, %v8399_v56 }
 0x10e   :  { %v174_v48 = vpop.f32.mrf.mxu1 }
 0x10f   :  { %v175_v49 = vadd.f32 %v174_v48, %v128_v45 }
 0x111   :  { %7226 = vmatmul.msk.f32.gmra.mxu2 %vm210_vm4, %v175_v49  ;;  %7235 = vmatmul.msk.f32.gmra.mxu3 %vm210_vm4, %v175_v49 }
 0x112   :  { %7244 = vmatmul.msk.f32.gmra.mxu0 %vm210_vm4, %v175_v49 }
 0x116   :  { %v177_v50 = vpop.f32.mrf.mxu1 }
 0x117   :  { %v178_v51 = vadd.f32 %v177_v50, %v128_v45 }
 0x119   :  { %7227 = vmatmul.msk.f32.gmra.mxu2 %vm210_vm4, %v178_v51  ;;  %7236 = vmatmul.msk.f32.gmra.mxu3 %vm210_vm4, %v178_v51 }
 0x11a   :  { %7245 = vmatmul.msk.f32.gmra.mxu0 %vm210_vm4, %v178_v51 }
 0x11e   :  { %v180_v52 = vpop.f32.mrf.mxu1 }
 0x11f   :  { %v181_v53 = vadd.f32 %v180_v52, %v128_v45 }
 0x121   :  { %7228 = vmatmul.msk.f32.gmra.mxu2 %vm210_vm4, %v181_v53  ;;  %7237 = vmatmul.msk.f32.gmra.mxu3 %vm210_vm4, %v181_v53 }
 0x122   :  { %7246 = vmatmul.msk.f32.gmra.mxu0 %vm210_vm4, %v181_v53 }
 0x126   :  { %v183_v54 = vpop.f32.mrf.mxu1 }
 0x127   :  { %v184_v55 = vadd.f32 %v183_v54, %v128_v45 }
 0x129   :  { %7229 = vmatmul.msk.f32.gmra.mxu2 %vm210_vm4, %v184_v55  ;;  %7238 = vmatmul.msk.f32.gmra.mxu3 %vm210_vm4, %v184_v55 }
 0x12a   :  { %7247 = vmatmul.msk.f32.gmra.mxu0 %vm210_vm4, %v184_v55 }
 0x12e   :  { %v186_v58 = vpop.f32.mrf.mxu1 }
 0x12f   :  { %v187_v59 = vadd.f32 %v186_v58, %v128_v45 }
 0x131   :  { %7230 = vmatmul.msk.f32.gmra.mxu2 %vm210_vm4, %v187_v59  ;;  %7239 = vmatmul.msk.f32.gmra.mxu3 %vm210_vm4, %v187_v59 }
 0x132   :  { %7248 = vmatmul.msk.f32.gmra.mxu0 %vm210_vm4, %v187_v59 }
 0x136   :  { %v189_v60 = vpop.f32.mrf.mxu1 }
 0x137   :  { %v190_v61 = vadd.f32 %v189_v60, %v128_v45 }
 0x139   :  { %7231 = vmatmul.msk.f32.gmra.mxu2 %vm210_vm4, %v190_v61  ;;  %7240 = vmatmul.msk.f32.gmra.mxu3 %vm210_vm4, %v190_v61 }
 0x13a   :  { %7249 = vmatmul.msk.f32.gmra.mxu0 %vm210_vm4, %v190_v61 }
 0x13e   :  { %v192_v62 = vpop.f32.mrf.mxu1 }
 0x13f   :  { %v193_v63 = vadd.f32 %v192_v62, %v128_v45  ;;  %v8475_v45 = vperm.slane %v200_v11, 2 }
 0x141   :  { %7232 = vmatmul.msk.f32.gmra.mxu2 %vm210_vm4, %v193_v63  ;;  %7241 = vmatmul.msk.f32.gmra.mxu3 %vm210_vm4, %v193_v63 }
 0x142   :  { %7250 = vmatmul.msk.f32.gmra.mxu0 %vm210_vm4, %v193_v63 }
 0x146   :  { %v468_v14 = vpop.f32.mrf.mxu1 }
 0x149   :  { %7252 = vmatmul.msk.f32.vlgmr.msrb.gmra.mxu2 %vm210_vm4, %v172_v47  ;;  %447 = vmatmul.f32.vlgmr.msrb.gmra.mxu3 %v8277_v43 }
 0x14a   :  { %7267 = vmatpush.msk.msrb.mxu3 %vm235_vm3, %v8369_v41  ;;  %7324 = vmatpush.msk.msrb.mxu2 %vm235_vm3, %v8371_v42 }
 0x14e   :  { %v508_v28 = vpop.f32.mrf.mxu1 }
 0x151   :  { %7253 = vmatmul.msk.f32.gmra.mxu2 %vm210_vm4, %v175_v49  ;;  %487 = vmatmul.f32.vlgmr.msra.gmra.mxu3 %v8277_v43 }
 0x152   :  { %7271 = vmatpush.msk.msra.mxu3 %vm235_vm3, %v8399_v56 }
 0x159   :  { %7254 = vmatmul.msk.f32.gmra.mxu2 %vm210_vm4, %v178_v51 }
 0x161   :  { %7255 = vmatmul.msk.f32.gmra.mxu2 %vm210_vm4, %v181_v53 }
 0x169   :  { %7256 = vmatmul.msk.f32.gmra.mxu2 %vm210_vm4, %v184_v55 }
 0x171   :  { %7257 = vmatmul.msk.f32.gmra.mxu2 %vm210_vm4, %v187_v59 }
 0x179   :  { %7258 = vmatmul.msk.f32.gmra.mxu2 %vm210_vm4, %v190_v61 }
 0x181   :  { %7259 = vmatmul.msk.f32.gmra.mxu2 %vm210_vm4, %v193_v63 }
 0x187   :  { %v347_v47 = vpop.f32.mrf.mxu0 }
 0x188   :  { %v348_v50 = vadd.f32 %v347_v47, %v8475_v45 }
 0x18c   :  { %v265_v0 = vpop.f32.mrf.mxu2  ;;  %v306_v1 = vpop.f32.mrf.mxu3 }
 0x18d   :  { %v307_v13 = vadd.f32 %v306_v1, %v8454_v12  ;;  %v266_v27 = vadd.f32 %v265_v0, %v8469_v24 }
 0x18f   :  { %v512_v17 = vadd.f32 %v468_v14, %v307_v13 }
 0x191   :  { %v7265_v18 = vmul.f32 -1.442695, %v512_v17 }
 0x193   :  { %7689 = vpow2.f32 %v7265_v18 }
 0x194   :  { %v8438_v2 = vpop.f32.mrf.mxu2  ;;  %v8440_v3 = vpop.f32.mrf.mxu3 }
 0x199   :  { %v7690_v23 = vpop.eup %7689 }
 0x19a   :  { %v537_v25 = vadd.f32 1.0, %v7690_v23 }
 0x19c   :  { %v8442_v5 = vpop.f32.mrf.mxu2  ;;  %v8444_v6 = vpop.f32.mrf.mxu3  ;;  %7691 = vrcp.f32 %v537_v25  ;;  %v549_v58 = vand.u32 2147483648, %v537_v25  ;;  %vm543_vm6 = vweird.f32 %v537_v25  ;;  %v547_v61 = vand.u32 2147483647, %v537_v25 }
 0x19e   :  { %v550_v11 = vor.u32 1.1754944e-38, %v549_v58  ;;  %vm548_vm10 = vcmp.eq.f32.partialorder %v547_v61, 8.507059e+37 }
 0x1a2   :  { %v7692_v36 = vpop.eup %7691 }
 0x1a3   :  { %v539_v37 = vmul.f32 %v7692_v36, %v537_v25  ;;  %vm544_vm5 = vweird.f32 %v7692_v36 }
 0x1a4   :  { %v8446_v7 = vpop.f32.mrf.mxu2  ;;  %v8448_v8 = vpop.f32.mrf.mxu3  ;;  %vm545_vm7 = vmor %vm543_vm6, %vm544_vm5 }
 0x1a5   :  { %v540_v44 = vsub.f32 1.0, %v539_v37 }
 0x1a7   :  { %v541_v48 = vmul.f32 %v7692_v36, %v540_v44 }
 0x1a9   :  { %v542_v54 = vadd.f32 %v7692_v36, %v541_v48 }
 0x1ab   :  { %v546_v1 = vsel %vm545_vm7, %v7692_v36, %v542_v54 }
 0x1ac   :  { %v8450_v9 = vpop.f32.mrf.mxu2  ;;  %v8452_v10 = vpop.f32.mrf.mxu3  ;;  %v551_v18 = vsel %vm548_vm10, %v550_v11, %v546_v1 }
 0x1b4   :  { %v8457_v15 = vpop.f32.mrf.mxu2  ;;  %v8459_v16 = vpop.f32.mrf.mxu3 }
 0x1bc   :  { %v8461_v19 = vpop.f32.mrf.mxu2  ;;  %v8463_v20 = vpop.f32.mrf.mxu3 }
 0x1c4   :  { %v8465_v21 = vpop.f32.mrf.mxu2  ;;  %v8467_v22 = vpop.f32.mrf.mxu3 }
 0x1cc   :  { %v388_v29 = vpop.f32.mrf.mxu2  ;;  %v448_v30 = vpop.f32.mrf.mxu3 }
 0x1cd   :  { %v389_v31 = vadd.f32 %v388_v29, %v8471_v26  ;;  %v511_v32 = vadd.f32 %v448_v30, %v266_v27  ;;  %v573_v29 = vmul.f32 0.0, %v551_v18 }
 0x1cf   :  { %v7264_v33 = vmul.f32 -1.442695, %v511_v32  ;;  %v514_v34 = vadd.f32 %v508_v28, %v389_v31 }
 0x1d1   :  { %7693 = vpow2.f32 %v7264_v33  ;;  %v7266_v35 = vmul.f32 -1.442695, %v514_v34 }
 0x1d3   :  { %7695 = vpow2.f32 %v7266_v35 }
 0x1d4   :  { %v488_v49 = vpop.f32.mrf.mxu3  ;;  %v391_v48 = vpop.f32.mrf.mxu2 }
 0x1d5   :  { %v513_v52 = vadd.f32 %v488_v49, %v348_v50  ;;  %v269_v49 = vadd.f32 %v8438_v2, %v8469_v24 }
 0x1d7   :  { %v7694_v38 = vpop.eup %7693 }
 0x1d8   :  { %v518_v39 = vadd.f32 1.0, %v7694_v38 }
 0x1d9   :  { %v7696_v40 = vpop.eup %7695 }
 0x1da   :  { %7697 = vrcp.f32 %v518_v39  ;;  %v557_v46 = vadd.f32 1.0, %v7696_v40  ;;  %v530_v62 = vand.u32 2147483648, %v518_v39  ;;  %v528_v0 = vand.u32 2147483647, %v518_v39 }
 0x1db   :  { %vm524_vm9 = vweird.f32 %v518_v39  ;;  %v310_v40 = vadd.f32 %v8440_v3, %v8454_v12 }
 0x1dc   :  { %7699 = vrcp.f32 %v557_v46  ;;  %v531_v17 = vor.u32 1.1754944e-38, %v530_v62  ;;  %vm529_vm12 = vcmp.eq.f32.partialorder %v528_v0, 8.507059e+37  ;;  %v569_v33 = vand.u32 2147483648, %v557_v46  ;;  %v350_v0 = vpop.f32.mrf.mxu0 }
 0x1dd   :  { %7701 = vtanh.f32 %v513_v52  ;;  %vm563_vm14 = vweird.f32 %v557_v46  ;;  %v567_v34 = vand.u32 2147483647, %v557_v46 }
 0x1de   :  { %v570_v36 = vor.u32 1.1754944e-38, %v569_v33 }
 0x1df   :  { %vm568_vm2 = vcmp.eq.f32.partialorder %v567_v34, 8.507059e+37 }
 0x1e0   :  { %v7698_v51 = vpop.eup %7697 }
 0x1e1   :  { %v520_v53 = vmul.f32 %v7698_v51, %v518_v39  ;;  %vm525_vm8 = vweird.f32 %v7698_v51 }
 0x1e2   :  { %v7700_v55 = vpop.eup %7699  ;;  %vm526_vm11 = vmor %vm524_vm9, %vm525_vm8 }
 0x1e3   :  { %v521_v59 = vsub.f32 1.0, %v520_v53  ;;  %v559_v60 = vmul.f32 %v7700_v55, %v557_v46  ;;  %v7702_v27 = vpop.eup %7701  ;;  %vm564_vm13 = vweird.f32 %v7700_v55 }
 0x1e4   :  { %vm565_vm15 = vmor %vm563_vm14, %vm564_vm13 }
 0x1e5   :  { %v522_v63 = vmul.f32 %v7698_v51, %v521_v59  ;;  %v560_v13 = vsub.f32 1.0, %v559_v60 }
 0x1e7   :  { %v523_v14 = vadd.f32 %v7698_v51, %v522_v63  ;;  %v561_v28 = vmul.f32 %v7700_v55, %v560_v13 }
 0x1e9   :  { %v527_v23 = vsel %vm526_vm11, %v7698_v51, %v523_v14  ;;  %v562_v32 = vadd.f32 %v7700_v55, %v561_v28  ;;  %v392_v51 = vadd.f32 %v391_v48, %v8471_v26  ;;  %v351_v14 = vadd.f32 %v350_v0, %v8475_v45 }
 0x1ea   :  { %v532_v25 = vsel %vm529_vm12, %v531_v17, %v527_v23 }
 0x1eb   :  { %v574_v30 = vmul.f32 %v7702_v27, %v532_v25  ;;  %v566_v35 = vsel %vm565_vm15, %v7700_v55, %v562_v32 }
 0x1ec   :  { %v571_v38 = vsel %vm568_vm2, %v570_v36, %v566_v35 }
 0x1ed   :  { %v8478_v31 = vadd.f32 %v574_v30, %v573_v29 }
 0x1ef   :  { %7703 = vtanh.f32 %v8478_v31 }
 0x1f5   :  { %v7704_v37 = vpop.eup %7703 }
 0x1f6   :  { %v577_v39 = vmul.f32 %v7704_v37, %v571_v38 }
 0x1f8   :  { %7268 = vmatmul.msk.f32.vlgmr.msrb.gmra.mxu3 %vm210_vm4, %v577_v39  ;;  %7270 = vmatmul.msk.f32.vlgmr.msrb.gmra.mxu1 %vm210_vm4, %v577_v39 }
 0x1f9   :  { %7278 = vmatpush.msk.msrb.mxu3 %vm235_vm3, %v8369_v41  ;;  %7280 = vmatpush.msk.msrb.mxu1 %vm235_vm3, %v8371_v42 }
 0x200   :  { %7272 = vmatmul.msk.f32.vlgmr.msra.gmra.mxu3 %vm210_vm4, %v577_v39  ;;  %7274 = vmatmul.msk.f32.vlgmr.msra.gmra.mxu1 %vm210_vm4, %v577_v39 }
 0x201   :  { %7282 = vmatpush.msk.msra.mxu3 %vm235_vm3, %v8399_v56  ;;  %7284 = vmatpush.msk.msra.mxu1 %vm235_vm3, %v8401_v57 }
 0x275   :  { %v618_v44 = vpop.f32.mrf.mxu1 }
 0x276   :  { %v662_v46 = vadd.f32 %v618_v44, %v310_v40 }
 0x278   :  { %v7276_v47 = vmul.f32 -1.442695, %v662_v46 }
 0x27a   :  { %7705 = vpow2.f32 %v7276_v47 }
 0x27b   :  { %v598_v50 = vpop.f32.mrf.mxu3 }
 0x27c   :  { %v661_v52 = vadd.f32 %v598_v50, %v269_v49 }
 0x27d   :  { %v658_v53 = vpop.f32.mrf.mxu1 }
 0x27e   :  { %v7275_v54 = vmul.f32 -1.442695, %v661_v52  ;;  %v664_v55 = vadd.f32 %v658_v53, %v392_v51 }
 0x280   :  { %v7706_v58 = vpop.eup %7705  ;;  %7707 = vpow2.f32 %v7275_v54  ;;  %v7277_v59 = vmul.f32 -1.442695, %v664_v55 }
 0x281   :  { %v687_v60 = vadd.f32 1.0, %v7706_v58 }
 0x282   :  { %7709 = vpow2.f32 %v7277_v59 }
 0x283   :  { %7711 = vrcp.f32 %v687_v60  ;;  %v638_v13 = vpop.f32.mrf.mxu3  ;;  %v699_v29 = vand.u32 2147483648, %v687_v60  ;;  %vm693_vm6 = vweird.f32 %v687_v60  ;;  %v697_v33 = vand.u32 2147483647, %v687_v60 }
 0x284   :  { %v663_v23 = vadd.f32 %v638_v13, %v351_v14 }
 0x285   :  { %v700_v38 = vor.u32 1.1754944e-38, %v699_v29  ;;  %vm698_vm10 = vcmp.eq.f32.partialorder %v697_v33, 8.507059e+37 }
 0x286   :  { %v7708_v3 = vpop.eup %7707 }
 0x287   :  { %v668_v61 = vadd.f32 1.0, %v7708_v3 }
 0x288   :  { %v7710_v62 = vpop.eup %7709 }
 0x289   :  { %v7712_v63 = vpop.eup %7711  ;;  %7713 = vrcp.f32 %v668_v61  ;;  %v707_v2 = vadd.f32 1.0, %v7710_v62  ;;  %v680_v34 = vand.u32 2147483648, %v668_v61  ;;  %v678_v36 = vand.u32 2147483647, %v668_v61 }
 0x28a   :  { %v689_v1 = vmul.f32 %v7712_v63, %v687_v60  ;;  %vm694_vm5 = vweird.f32 %v7712_v63  ;;  %vm674_vm9 = vweird.f32 %v668_v61 }
 0x28b   :  { %7715 = vrcp.f32 %v707_v2  ;;  %vm695_vm7 = vmor %vm693_vm6, %vm694_vm5  ;;  %v681_v44 = vor.u32 1.1754944e-38, %v680_v34  ;;  %vm679_vm12 = vcmp.eq.f32.partialorder %v678_v36, 8.507059e+37  ;;  %v719_v55 = vand.u32 2147483648, %v707_v2  ;;  %v353_v34 = vpop.f32.mrf.mxu0 }
 0x28c   :  { %v690_v11 = vsub.f32 1.0, %v689_v1  ;;  %7717 = vtanh.f32 %v663_v23  ;;  %vm713_vm14 = vweird.f32 %v707_v2  ;;  %v717_v58 = vand.u32 2147483647, %v707_v2  ;;  %v394_v1 = vpop.f32.mrf.mxu2 }
 0x28d   :  { %v720_v60 = vor.u32 1.1754944e-38, %v719_v55  ;;  %v395_v14 = vadd.f32 %v394_v1, %v8471_v26 }
 0x28e   :  { %v691_v17 = vmul.f32 %v7712_v63, %v690_v11  ;;  %vm718_vm2 = vcmp.eq.f32.partialorder %v717_v58, 8.507059e+37  ;;  %v272_v11 = vadd.f32 %v8442_v5, %v8469_v24 }
 0x28f   :  { %v7714_v18 = vpop.eup %7713 }
 0x290   :  { %v670_v27 = vmul.f32 %v7714_v18, %v668_v61  ;;  %v692_v28 = vadd.f32 %v7712_v63, %v691_v17  ;;  %vm675_vm8 = vweird.f32 %v7714_v18 }
 0x291   :  { %v7716_v25 = vpop.eup %7715  ;;  %vm676_vm11 = vmor %vm674_vm9, %vm675_vm8 }
 0x292   :  { %v671_v30 = vsub.f32 1.0, %v670_v27  ;;  %v709_v32 = vmul.f32 %v7716_v25, %v707_v2  ;;  %v696_v37 = vsel %vm695_vm7, %v7712_v63, %v692_v28  ;;  %v7718_v48 = vpop.eup %7717  ;;  %vm714_vm13 = vweird.f32 %v7716_v25 }
 0x293   :  { %v701_v46 = vsel %vm698_vm10, %v700_v38, %v696_v37  ;;  %vm715_vm15 = vmor %vm713_vm14, %vm714_vm13  ;;  %v354_v38 = vadd.f32 %v353_v34, %v8475_v45 }
 0x294   :  { %v672_v35 = vmul.f32 %v7714_v18, %v671_v30  ;;  %v710_v39 = vsub.f32 1.0, %v709_v32  ;;  %v723_v51 = vmul.f32 %v701_v46, %v8478_v31  ;;  %v313_v31 = vadd.f32 %v8444_v6, %v8454_v12 }
 0x296   :  { %v673_v40 = vadd.f32 %v7714_v18, %v672_v35  ;;  %v711_v49 = vmul.f32 %v7716_v25, %v710_v39 }
 0x298   :  { %v677_v47 = vsel %vm676_vm11, %v7714_v18, %v673_v40  ;;  %v712_v54 = vadd.f32 %v7716_v25, %v711_v49 }
 0x299   :  { %v682_v50 = vsel %vm679_vm12, %v681_v44, %v677_v47 }
 0x29a   :  { %v724_v52 = vmul.f32 %v7718_v48, %v682_v50  ;;  %v716_v59 = vsel %vm715_vm15, %v7716_v25, %v712_v54 }
 0x29b   :  { %v721_v61 = vsel %vm718_vm2, %v720_v60, %v716_v59 }
 0x29c   :  { %v8500_v53 = vadd.f32 %v724_v52, %v723_v51 }
 0x29e   :  { %7719 = vtanh.f32 %v8500_v53 }
 0x2a4   :  { %v7720_v3 = vpop.eup %7719 }
 0x2a5   :  { %v727_v62 = vmul.f32 %v7720_v3, %v721_v61 }
 0x2a7   :  { %7279 = vmatmul.msk.f32.vlgmr.msrb.gmra.mxu3 %vm210_vm4, %v727_v62  ;;  %7281 = vmatmul.msk.f32.vlgmr.msrb.gmra.mxu1 %vm210_vm4, %v727_v62 }
 0x2a8   :  { %7289 = vmatpush.msk.msrb.mxu3 %vm235_vm3, %v8369_v41  ;;  %7291 = vmatpush.msk.msrb.mxu1 %vm235_vm3, %v8371_v42 }
 0x2af   :  { %7283 = vmatmul.msk.f32.vlgmr.msra.gmra.mxu3 %vm210_vm4, %v727_v62  ;;  %7285 = vmatmul.msk.f32.vlgmr.msra.gmra.mxu1 %vm210_vm4, %v727_v62 }
 0x2b0   :  { %7293 = vmatpush.msk.msra.mxu3 %vm235_vm3, %v8399_v56  ;;  %7295 = vmatpush.msk.msra.mxu1 %vm235_vm3, %v8401_v57 }
 0x324   :  { %v768_v63 = vpop.f32.mrf.mxu1 }
 0x325   :  { %v812_v2 = vadd.f32 %v768_v63, %v313_v31 }
 0x327   :  { %v7287_v0 = vmul.f32 -1.442695, %v812_v2 }
 0x329   :  { %7721 = vpow2.f32 %v7287_v0 }
 0x32a   :  { %v748_v13 = vpop.f32.mrf.mxu3 }
 0x32b   :  { %v811_v17 = vadd.f32 %v748_v13, %v272_v11 }
 0x32c   :  { %v808_v18 = vpop.f32.mrf.mxu1 }
 0x32d   :  { %v7286_v23 = vmul.f32 -1.442695, %v811_v17  ;;  %v814_v27 = vadd.f32 %v808_v18, %v395_v14 }
 0x32f   :  { %v7722_v28 = vpop.eup %7721  ;;  %7723 = vpow2.f32 %v7286_v23  ;;  %v7288_v25 = vmul.f32 -1.442695, %v814_v27 }
 0x330   :  { %v837_v29 = vadd.f32 1.0, %v7722_v28 }
 0x331   :  { %7725 = vpow2.f32 %v7288_v25 }
 0x332   :  { %7727 = vrcp.f32 %v837_v29  ;;  %v788_v37 = vpop.f32.mrf.mxu3  ;;  %v849_v49 = vand.u32 2147483648, %v837_v29  ;;  %vm843_vm6 = vweird.f32 %v837_v29  ;;  %v847_v52 = vand.u32 2147483647, %v837_v29 }
 0x333   :  { %v813_v44 = vadd.f32 %v788_v37, %v354_v38 }
 0x334   :  { %v850_v60 = vor.u32 1.1754944e-38, %v849_v49  ;;  %vm848_vm10 = vcmp.eq.f32.partialorder %v847_v52, 8.507059e+37 }
 0x335   :  { %v7724_v6 = vpop.eup %7723 }
 0x336   :  { %v818_v30 = vadd.f32 1.0, %v7724_v6 }
 0x337   :  { %v7726_v32 = vpop.eup %7725 }
 0x338   :  { %v7728_v33 = vpop.eup %7727  ;;  %7729 = vrcp.f32 %v818_v30  ;;  %v857_v5 = vadd.f32 1.0, %v7726_v32  ;;  %v830_v54 = vand.u32 2147483648, %v818_v30  ;;  %v828_v58 = vand.u32 2147483647, %v818_v30 }
 0x339   :  { %v839_v35 = vmul.f32 %v7728_v33, %v837_v29  ;;  %vm844_vm5 = vweird.f32 %v7728_v33  ;;  %vm824_vm9 = vweird.f32 %v818_v30 }
 0x33a   :  { %7731 = vrcp.f32 %v857_v5  ;;  %vm845_vm7 = vmor %vm843_vm6, %vm844_vm5  ;;  %v831_v62 = vor.u32 1.1754944e-38, %v830_v54  ;;  %vm829_vm12 = vcmp.eq.f32.partialorder %v828_v58, 8.507059e+37  ;;  %v869_v18 = vand.u32 2147483648, %v857_v5 }
 0x33b   :  { %v840_v36 = vsub.f32 1.0, %v839_v35  ;;  %7733 = vtanh.f32 %v813_v44  ;;  %vm863_vm14 = vweird.f32 %v857_v5  ;;  %v867_v23 = vand.u32 2147483647, %v857_v5 }
 0x33c   :  { %v870_v28 = vor.u32 1.1754944e-38, %v869_v18 }
 0x33d   :  { %v841_v39 = vmul.f32 %v7728_v33, %v840_v36  ;;  %vm868_vm2 = vcmp.eq.f32.partialorder %v867_v23, 8.507059e+37 }
 0x33e   :  { %v7730_v40 = vpop.eup %7729 }
 0x33f   :  { %v820_v46 = vmul.f32 %v7730_v40, %v818_v30  ;;  %v842_v47 = vadd.f32 %v7728_v33, %v841_v39  ;;  %vm825_vm8 = vweird.f32 %v7730_v40 }
 0x340   :  { %v7732_v48 = vpop.eup %7731  ;;  %vm826_vm11 = vmor %vm824_vm9, %vm825_vm8 }
 0x341   :  { %v821_v50 = vsub.f32 1.0, %v820_v46  ;;  %v859_v51 = vmul.f32 %v7732_v48, %v857_v5  ;;  %v846_v59 = vsel %vm845_vm7, %v7728_v33, %v842_v47  ;;  %v7734_v2 = vpop.eup %7733  ;;  %vm864_vm13 = vweird.f32 %v7732_v48 }
 0x342   :  { %v851_v31 = vsel %vm848_vm10, %v850_v60, %v846_v59  ;;  %vm865_vm15 = vmor %vm863_vm14, %vm864_vm13  ;;  %v275_v5 = vadd.f32 %v8446_v7, %v8469_v24 }
 0x343   :  { %v822_v55 = vmul.f32 %v7730_v40, %v821_v50  ;;  %v860_v3 = vsub.f32 1.0, %v859_v51  ;;  %v873_v11 = vmul.f32 %v851_v31, %v8500_v53  ;;  %v316_v53 = vadd.f32 %v8448_v8, %v8454_v12  ;;  %v356_v50 = vpop.f32.mrf.mxu0 }
 0x345   :  { %v823_v61 = vadd.f32 %v7730_v40, %v822_v55  ;;  %v861_v0 = vmul.f32 %v7732_v48, %v860_v3  ;;  %v357_v55 = vadd.f32 %v356_v50, %v8475_v45 }
 0x347   :  { %v827_v63 = vsel %vm826_vm11, %v7730_v40, %v823_v61  ;;  %v862_v17 = vadd.f32 %v7732_v48, %v861_v0 }
 0x348   :  { %v832_v1 = vsel %vm829_vm12, %v831_v62, %v827_v63 }
 0x349   :  { %v874_v13 = vmul.f32 %v7734_v2, %v832_v1  ;;  %v866_v27 = vsel %vm865_vm15, %v7732_v48, %v862_v17 }
 0x34a   :  { %v871_v29 = vsel %vm868_vm2, %v870_v28, %v866_v27 }
 0x34b   :  { %v8522_v14 = vadd.f32 %v874_v13, %v873_v11 }
 0x34d   :  { %7735 = vtanh.f32 %v8522_v14 }
 0x353   :  { %v7736_v25 = vpop.eup %7735 }
 0x354   :  { %v877_v6 = vmul.f32 %v7736_v25, %v871_v29 }
 0x356   :  { %7290 = vmatmul.msk.f32.vlgmr.msrb.gmra.mxu3 %vm210_vm4, %v877_v6  ;;  %7292 = vmatmul.msk.f32.vlgmr.msrb.gmra.mxu1 %vm210_vm4, %v877_v6 }
 0x357   :  { %7302 = vmatpush.msk.msrb.mxu1 %vm235_vm3, %v8371_v42  ;;  %7304 = vmatpush.msk.msrb.mxu3 %vm235_vm3, %v8399_v56  ;;  %v397_v42 = vpop.f32.mrf.mxu2 }
 0x358   :  { %v398_v35 = vadd.f32 %v397_v42, %v8471_v26 }
 0x35e   :  { %7294 = vmatmul.msk.f32.vlgmr.msra.gmra.mxu3 %vm210_vm4, %v877_v6  ;;  %7296 = vmatmul.msk.f32.vlgmr.msra.gmra.mxu1 %vm210_vm4, %v877_v6 }
 0x35f   :  { %7306 = vmatpush.msk.msra.mxu1 %vm235_vm3, %v8401_v57  ;;  %7315 = vmatpush.msk.msra.mxu3 %vm235_vm3, %v8399_v56 }
 0x3d3   :  { %v918_v30 = vpop.f32.mrf.mxu1 }
 0x3d4   :  { %v962_v32 = vadd.f32 %v918_v30, %v316_v53 }
 0x3d6   :  { %v7298_v33 = vmul.f32 -1.442695, %v962_v32 }
 0x3d8   :  { %7737 = vpow2.f32 %v7298_v33 }
 0x3d9   :  { %v898_v34 = vpop.f32.mrf.mxu3 }
 0x3da   :  { %v961_v36 = vadd.f32 %v898_v34, %v275_v5 }
 0x3db   :  { %v958_v37 = vpop.f32.mrf.mxu1 }
 0x3dc   :  { %v7297_v38 = vmul.f32 -1.442695, %v961_v36  ;;  %v964_v39 = vadd.f32 %v958_v37, %v398_v35 }
 0x3de   :  { %v7738_v40 = vpop.eup %7737  ;;  %7739 = vpow2.f32 %v7297_v38  ;;  %v7299_v44 = vmul.f32 -1.442695, %v964_v39 }
 0x3df   :  { %v987_v46 = vadd.f32 1.0, %v7738_v40 }
 0x3e0   :  { %7741 = vpow2.f32 %v7299_v44 }
 0x3e1   :  { %7743 = vrcp.f32 %v987_v46  ;;  %v938_v54 = vpop.f32.mrf.mxu3  ;;  %v999_v31 = vand.u32 2147483648, %v987_v46  ;;  %vm993_vm6 = vweird.f32 %v987_v46  ;;  %v997_v0 = vand.u32 2147483647, %v987_v46 }
 0x3e2   :  { %v963_v60 = vadd.f32 %v938_v54, %v357_v55  ;;  %v400_v54 = vpop.f32.mrf.mxu2 }
 0x3e3   :  { %v1000_v18 = vor.u32 1.1754944e-38, %v999_v31  ;;  %vm998_vm10 = vcmp.eq.f32.partialorder %v997_v0, 8.507059e+37  ;;  %v401_v55 = vadd.f32 %v400_v54, %v8471_v26 }
 0x3e4   :  { %v7740_v8 = vpop.eup %7739 }
 0x3e5   :  { %v968_v47 = vadd.f32 1.0, %v7740_v8 }
 0x3e6   :  { %v7742_v48 = vpop.eup %7741 }
 0x3e7   :  { %v7744_v49 = vpop.eup %7743  ;;  %7745 = vrcp.f32 %v968_v47  ;;  %v1007_v7 = vadd.f32 1.0, %v7742_v48  ;;  %v980_v1 = vand.u32 2147483648, %v968_v47  ;;  %v978_v13 = vand.u32 2147483647, %v968_v47 }
 0x3e8   :  { %v989_v51 = vmul.f32 %v7744_v49, %v987_v46  ;;  %vm994_vm5 = vweird.f32 %v7744_v49  ;;  %vm974_vm9 = vweird.f32 %v968_v47 }
 0x3e9   :  { %7747 = vrcp.f32 %v1007_v7  ;;  %vm995_vm7 = vmor %vm993_vm6, %vm994_vm5  ;;  %v981_v28 = vor.u32 1.1754944e-38, %v980_v1  ;;  %vm979_vm12 = vcmp.eq.f32.partialorder %v978_v13, 8.507059e+37  ;;  %v1019_v34 = vand.u32 2147483648, %v1007_v7 }
 0x3ea   :  { %v990_v52 = vsub.f32 1.0, %v989_v51  ;;  %7749 = vtanh.f32 %v963_v60  ;;  %vm1013_vm14 = vweird.f32 %v1007_v7  ;;  %v1017_v35 = vand.u32 2147483647, %v1007_v7 }
 0x3eb   :  { %v1020_v37 = vor.u32 1.1754944e-38, %v1019_v34 }
 0x3ec   :  { %v991_v58 = vmul.f32 %v7744_v49, %v990_v52  ;;  %vm1018_vm2 = vcmp.eq.f32.partialorder %v1017_v35, 8.507059e+37 }
 0x3ed   :  { %v7746_v59 = vpop.eup %7745 }
 0x3ee   :  { %v970_v3 = vmul.f32 %v7746_v59, %v968_v47  ;;  %v992_v61 = vadd.f32 %v7744_v49, %v991_v58  ;;  %vm975_vm8 = vweird.f32 %v7746_v59  ;;  %v278_v47 = vadd.f32 %v8450_v9, %v8469_v24 }
 0x3ef   :  { %v7748_v62 = vpop.eup %7747  ;;  %vm976_vm11 = vmor %vm974_vm9, %vm975_vm8 }
 0x3f0   :  { %v971_v63 = vsub.f32 1.0, %v970_v3  ;;  %v1009_v2 = vmul.f32 %v7748_v62, %v1007_v7  ;;  %v996_v17 = vsel %vm995_vm7, %v7744_v49, %v992_v61  ;;  %v7750_v6 = vpop.eup %7749  ;;  %vm1014_vm13 = vweird.f32 %v7748_v62 }
 0x3f1   :  { %v1001_v25 = vsel %vm998_vm10, %v1000_v18, %v996_v17  ;;  %vm1015_vm15 = vmor %vm1013_vm14, %vm1014_vm13 }
 0x3f2   :  { %v972_v11 = vmul.f32 %v7746_v59, %v971_v63  ;;  %v1010_v23 = vsub.f32 1.0, %v1009_v2  ;;  %v1023_v32 = vmul.f32 %v1001_v25, %v8522_v14  ;;  %v359_v14 = vpop.f32.mrf.mxu0 }
 0x3f3   :  { %v360_v31 = vadd.f32 %v359_v14, %v8475_v45 }
 0x3f4   :  { %v973_v27 = vadd.f32 %v7746_v59, %v972_v11  ;;  %v1011_v53 = vmul.f32 %v7748_v62, %v1010_v23 }
 0x3f6   :  { %v977_v29 = vsel %vm976_vm11, %v7746_v59, %v973_v27  ;;  %v1012_v5 = vadd.f32 %v7748_v62, %v1011_v53 }
 0x3f7   :  { %v982_v30 = vsel %vm979_vm12, %v981_v28, %v977_v29 }
 0x3f8   :  { %v1024_v33 = vmul.f32 %v7750_v6, %v982_v30  ;;  %v1016_v36 = vsel %vm1015_vm15, %v7748_v62, %v1012_v5 }
 0x3f9   :  { %v1021_v39 = vsel %vm1018_vm2, %v1020_v37, %v1016_v36 }
 0x3fa   :  { %v8544_v42 = vadd.f32 %v1024_v33, %v1023_v32  ;;  %v8559_v44 = vpop.f32.mrf.mxu0 }
 0x3fc   :  { %7751 = vtanh.f32 %v8544_v42 }
 0x402   :  { %v7752_v38 = vpop.eup %7751  ;;  %v8561_v46 = vpop.f32.mrf.mxu0 }
 0x403   :  { %v1027_v40 = vmul.f32 %v7752_v38, %v1021_v39 }
 0x405   :  { %7301 = vmatmul.msk.f32.vlgmr.msra.gmra.mxu0 %vm210_vm4, %v1027_v40  ;;  %7303 = vmatmul.msk.f32.vlgmr.msrb.gmra.mxu1 %vm210_vm4, %v1027_v40 }
 0x406   :  { %7305 = vmatmul.msk.f32.vlgmr.msrb.gmra.mxu3 %vm210_vm4, %v1027_v40  ;;  %7317 = vmatpush.msk.msrb.mxu1 %vm235_vm3, %v8401_v57 }
 0x407   :  { %7322 = vmatpush.msk.msra.mxu0 %vm235_vm3, %v8369_v41  ;;  %7326 = vmatpush.msk.msrb.mxu3 %vm235_vm3, %v8399_v56  ;;  %v319_v41 = vadd.f32 %v8452_v10, %v8454_v12 }
 0x40a   :  { %v8563_v8 = vpop.f32.mrf.mxu0 }
 0x40d   :  { %7307 = vmatmul.msk.f32.vlgmr.msra.gmra.mxu1 %vm210_vm4, %v1027_v40 }
 0x40e   :  { %7328 = vmatpush.msk.msra.mxu1 %vm235_vm3, %v8401_v57 }
 0x482   :  { %v1048_v48 = vpop.f32.mrf.mxu0  ;;  %v1068_v49 = vpop.f32.mrf.mxu1 }
 0x483   :  { %v1111_v7 = vadd.f32 %v1048_v48, %v278_v47  ;;  %v1112_v50 = vadd.f32 %v1068_v49, %v319_v41 }
 0x485   :  { %v7308_v51 = vmul.f32 -1.442695, %v1111_v7  ;;  %v7309_v52 = vmul.f32 -1.442695, %v1112_v50 }
 0x487   :  { %7753 = vpow2.f32 %v7308_v51 }
 0x488   :  { %7755 = vpow2.f32 %v7309_v52 }
 0x489   :  { %v1088_v10 = vpop.f32.mrf.mxu3 }
 0x48a   :  { %v1108_v58 = vpop.f32.mrf.mxu1  ;;  %v1113_v0 = vadd.f32 %v1088_v10, %v360_v31 }
 0x48b   :  { %v1114_v59 = vadd.f32 %v1108_v58, %v401_v55 }
 0x48d   :  { %v7754_v60 = vpop.eup %7753  ;;  %v7310_v3 = vmul.f32 -1.442695, %v1114_v59 }
 0x48e   :  { %v7756_v61 = vpop.eup %7755  ;;  %v1118_v9 = vadd.f32 1.0, %v7754_v60  ;;  %v8100_v60 = vld [vmem:[#allocation2 + $0x100] sm:$0x1f] }
 0x48f   :  { %v1137_v62 = vadd.f32 1.0, %v7756_v61  ;;  %7757 = vpow2.f32 %v7310_v3  ;;  %v403_v3 = vpop.f32.mrf.mxu2 }
 0x490   :  { %7759 = vrcp.f32 %v1118_v9  ;;  %v1130_v27 = vand.u32 2147483648, %v1118_v9  ;;  %v1128_v29 = vand.u32 2147483647, %v1118_v9  ;;  %vm1124_vm7 = vweird.f32 %v1118_v9 }
 0x491   :  { %7761 = vrcp.f32 %v1137_v62  ;;  %v1149_v28 = vand.u32 2147483648, %v1137_v62  ;;  %v1147_v53 = vand.u32 2147483647, %v1137_v62  ;;  %vm1143_vm8 = vweird.f32 %v1137_v62 }
 0x492   :  { %v1131_v33 = vor.u32 1.1754944e-38, %v1130_v27  ;;  %vm1129_vm11 = vcmp.eq.f32.partialorder %v1128_v29, 8.507059e+37  ;;  %v404_v10 = vadd.f32 %v403_v3, %v8471_v26  ;;  %v363_v29 = vadd.f32 %v8559_v44, %v8475_v45 }
 0x493   :  { %v1150_v34 = vor.u32 1.1754944e-38, %v1149_v28  ;;  %vm1148_vm12 = vcmp.eq.f32.partialorder %v1147_v53, 8.507059e+37 }
 0x495   :  { %v7758_v63 = vpop.eup %7757 }
 0x496   :  { %v7760_v2 = vpop.eup %7759  ;;  %v1157_v1 = vadd.f32 1.0, %v7758_v63 }
 0x497   :  { %v7762_v11 = vpop.eup %7761  ;;  %v1120_v13 = vmul.f32 %v7760_v2, %v1118_v9  ;;  %vm1125_vm5 = vweird.f32 %v7760_v2  ;;  %v8585_v61 = vpop.f32.mrf.mxu2 }
 0x498   :  { %v1139_v17 = vmul.f32 %v7762_v11, %v1137_v62  ;;  %7763 = vrcp.f32 %v1157_v1  ;;  %vm1144_vm6 = vweird.f32 %v7762_v11  ;;  %vm1126_vm9 = vmor %vm1124_vm7, %vm1125_vm5  ;;  %v1169_v50 = vand.u32 2147483648, %v1157_v1 }
 0x499   :  { %v1121_v18 = vsub.f32 1.0, %v1120_v13  ;;  %7765 = vtanh.f32 %v1113_v0  ;;  %vm1145_vm10 = vmor %vm1143_vm8, %vm1144_vm6  ;;  %vm1163_vm14 = vweird.f32 %v1157_v1  ;;  %v1167_v51 = vand.u32 2147483647, %v1157_v1 }
 0x49a   :  { %v1140_v23 = vsub.f32 1.0, %v1139_v17  ;;  %v1170_v54 = vor.u32 1.1754944e-38, %v1169_v50  ;;  %v281_v62 = vadd.f32 %v8457_v15, %v8469_v24 }
 0x49b   :  { %v1122_v25 = vmul.f32 %v7760_v2, %v1121_v18  ;;  %vm1168_vm2 = vcmp.eq.f32.partialorder %v1167_v51, 8.507059e+37 }
 0x49c   :  { %v1141_v6 = vmul.f32 %v7762_v11, %v1140_v23 }
 0x49d   :  { %v1123_v30 = vadd.f32 %v7760_v2, %v1122_v25 }
 0x49e   :  { %v7764_v32 = vpop.eup %7763  ;;  %v1142_v5 = vadd.f32 %v7762_v11, %v1141_v6 }
 0x49f   :  { %v1127_v35 = vsel %vm1126_vm9, %v7760_v2, %v1123_v30  ;;  %v1159_v36 = vmul.f32 %v7764_v32, %v1157_v1  ;;  %v7766_v37 = vpop.eup %7765  ;;  %vm1164_vm13 = vweird.f32 %v7764_v32  ;;  %v8587_v9 = vpop.f32.mrf.mxu2 }
 0x4a0   :  { %v1132_v38 = vsel %vm1129_vm11, %v1131_v33, %v1127_v35  ;;  %v1146_v39 = vsel %vm1145_vm10, %v7762_v11, %v1142_v5  ;;  %vm1165_vm15 = vmor %vm1163_vm14, %vm1164_vm13 }
 0x4a1   :  { %v1151_v40 = vsel %vm1148_vm12, %v1150_v34, %v1146_v39  ;;  %v1174_v14 = vmul.f32 %v7766_v37, %v1132_v38  ;;  %v1160_v47 = vsub.f32 1.0, %v1159_v36 }
 0x4a2   :  { %v1173_v41 = vmul.f32 %v1151_v40, %v8544_v42  ;;  %v8099_v42 = vld [vmem:[#allocation2 + $0x108] sm:$0x1f] }
 0x4a3   :  { %v1161_v48 = vmul.f32 %v7764_v32, %v1160_v47 }
 0x4a4   :  { %v8572_v49 = vadd.f32 %v1174_v14, %v1173_v41 }
 0x4a5   :  { %v1162_v7 = vadd.f32 %v7764_v32, %v1161_v48 }
 0x4a6   :  { %7767 = vtanh.f32 %v8572_v49 }
 0x4a7   :  { %v1166_v52 = vsel %vm1165_vm15, %v7764_v32, %v1162_v7 }
 0x4a8   :  { %v1171_v58 = vsel %vm1168_vm2, %v1170_v54, %v1166_v52 }
 0x4ac   :  { %v7768_v55 = vpop.eup %7767 }
 0x4ad   :  { %v1177_v59 = vmul.f32 %v7768_v55, %v1171_v58 }
 0x4af   :  { %7312 = vmatmul.msk.f32.vlgmr.msrb.gmra.mxu0 %vm210_vm4, %v1177_v59  ;;  %7314 = vmatmul.msk.f32.vlgmr.msra.gmra.mxu2 %vm210_vm4, %v1177_v59 }
 0x4b0   :  { %7316 = vmatmul.msk.f32.vlgmr.msra.gmra.mxu3 %vm210_vm4, %v1177_v59  ;;  %7318 = vmatmul.msk.f32.vlgmr.msrb.gmra.mxu1 %vm210_vm4, %v1177_v59 }
 0x4b1   :  { %7335 = vmatpush.msk.msra.mxu2 %vm235_vm3, %v8099_v42  ;;  %7333 = vmatpush.msk.msrb.mxu0 %vm235_vm3, %v8100_v60 }
 0x4b2   :  { %7337 = vmatpush.msk.msra.mxu3 %vm235_vm3, %v8399_v56  ;;  %7339 = vmatpush.msk.msrb.mxu1 %vm235_vm3, %v8401_v57  ;;  %v322_v56 = vadd.f32 %v8459_v16, %v8454_v12 }
 0x52c   :  { %v1198_v31 = vpop.f32.mrf.mxu0 }
 0x52d   :  { %v1261_v63 = vadd.f32 %v1198_v31, %v281_v62  ;;  %v1258_v2 = vpop.f32.mrf.mxu1 }
 0x52e   :  { %v1264_v0 = vadd.f32 %v1258_v2, %v404_v10 }
 0x52f   :  { %v7319_v1 = vmul.f32 -1.442695, %v1261_v63 }
 0x530   :  { %v7321_v11 = vmul.f32 -1.442695, %v1264_v0 }
 0x531   :  { %7769 = vpow2.f32 %v7319_v1 }
 0x532   :  { %7771 = vpow2.f32 %v7321_v11  ;;  %v1218_v57 = vpop.f32.mrf.mxu2 }
 0x533   :  { %v1262_v13 = vadd.f32 %v1218_v57, %v322_v56  ;;  %v1238_v25 = vpop.f32.mrf.mxu3  ;;  %v407_v56 = vadd.f32 %v8585_v61, %v8471_v26 }
 0x534   :  { %v1263_v16 = vadd.f32 %v1238_v25, %v363_v29 }
 0x535   :  { %v7320_v17 = vmul.f32 -1.442695, %v1262_v13 }
 0x537   :  { %v7770_v18 = vpop.eup %7769  ;;  %7773 = vpow2.f32 %v7320_v17 }
 0x538   :  { %v7772_v23 = vpop.eup %7771  ;;  %v1268_v15 = vadd.f32 1.0, %v7770_v18 }
 0x539   :  { %v1307_v27 = vadd.f32 1.0, %v7772_v23 }
 0x53a   :  { %7775 = vrcp.f32 %v1268_v15  ;;  %v1280_v33 = vand.u32 2147483648, %v1268_v15  ;;  %v1278_v35 = vand.u32 2147483647, %v1268_v15  ;;  %vm1274_vm6 = vweird.f32 %v1268_v15 }
 0x53b   :  { %7777 = vrcp.f32 %v1307_v27  ;;  %v1319_v10 = vand.u32 2147483648, %v1307_v27  ;;  %vm1313_vm14 = vweird.f32 %v1307_v27  ;;  %v1317_v31 = vand.u32 2147483647, %v1307_v27 }
 0x53c   :  { %v1281_v44 = vor.u32 1.1754944e-38, %v1280_v33  ;;  %vm1279_vm8 = vcmp.eq.f32.partialorder %v1278_v35, 8.507059e+37 }
 0x53d   :  { %v7774_v28 = vpop.eup %7773  ;;  %v1320_v2 = vor.u32 1.1754944e-38, %v1319_v10  ;;  %vm1318_vm2 = vcmp.eq.f32.partialorder %v1317_v31, 8.507059e+37 }
 0x53e   :  { %v1287_v6 = vadd.f32 1.0, %v7774_v28 }
 0x540   :  { %v7776_v53 = vpop.eup %7775  ;;  %7779 = vrcp.f32 %v1287_v6  ;;  %v1299_v41 = vand.u32 2147483648, %v1287_v6  ;;  %v1297_v50 = vand.u32 2147483647, %v1287_v6  ;;  %vm1293_vm10 = vweird.f32 %v1287_v6 }
 0x541   :  { %v1270_v30 = vmul.f32 %v7776_v53, %v1268_v15  ;;  %7781 = vtanh.f32 %v1263_v16  ;;  %v7778_v5 = vpop.eup %7777  ;;  %vm1275_vm5 = vweird.f32 %v7776_v53 }
 0x542   :  { %v1309_v39 = vmul.f32 %v7778_v5, %v1307_v27  ;;  %vm1276_vm7 = vmor %vm1274_vm6, %vm1275_vm5  ;;  %v1300_v55 = vor.u32 1.1754944e-38, %v1299_v41  ;;  %vm1298_vm12 = vcmp.eq.f32.partialorder %v1297_v50, 8.507059e+37  ;;  %vm1314_vm13 = vweird.f32 %v7778_v5 }
 0x543   :  { %v1271_v32 = vsub.f32 1.0, %v1270_v30  ;;  %vm1315_vm15 = vmor %vm1313_vm14, %vm1314_vm13  ;;  %v325_v27 = vadd.f32 %v8463_v20, %v8454_v12 }
 0x544   :  { %v1310_v52 = vsub.f32 1.0, %v1309_v39 }
 0x545   :  { %v1272_v34 = vmul.f32 %v7776_v53, %v1271_v32  ;;  %v366_v32 = vadd.f32 %v8561_v46, %v8475_v45 }
 0x546   :  { %v7780_v36 = vpop.eup %7779  ;;  %v1311_v59 = vmul.f32 %v7778_v5, %v1310_v52 }
 0x547   :  { %v1289_v37 = vmul.f32 %v7780_v36, %v1287_v6  ;;  %v1273_v38 = vadd.f32 %v7776_v53, %v1272_v34  ;;  %v7782_v47 = vpop.eup %7781  ;;  %vm1294_vm9 = vweird.f32 %v7780_v36 }
 0x548   :  { %vm1295_vm11 = vmor %vm1293_vm10, %vm1294_vm9  ;;  %v1312_v62 = vadd.f32 %v7778_v5, %v1311_v59 }
 0x549   :  { %v1290_v40 = vsub.f32 1.0, %v1289_v37  ;;  %v1277_v14 = vsel %vm1276_vm7, %v7776_v53, %v1273_v38 }
 0x54a   :  { %v1282_v48 = vsel %vm1279_vm8, %v1281_v44, %v1277_v14  ;;  %v1316_v63 = vsel %vm1315_vm15, %v7778_v5, %v1312_v62 }
 0x54b   :  { %v1291_v7 = vmul.f32 %v7780_v36, %v1290_v40  ;;  %v1324_v51 = vmul.f32 %v7782_v47, %v1282_v48  ;;  %v1321_v1 = vsel %vm1318_vm2, %v1320_v2, %v1316_v63 }
 0x54d   :  { %v1292_v54 = vadd.f32 %v7780_v36, %v1291_v7 }
 0x54f   :  { %v1296_v58 = vsel %vm1295_vm11, %v7780_v36, %v1292_v54 }
 0x550   :  { %v1301_v42 = vsel %vm1298_vm12, %v1300_v55, %v1296_v58 }
 0x551   :  { %v1323_v60 = vmul.f32 %v1301_v42, %v8572_v49  ;;  %v284_v49 = vadd.f32 %v8461_v19, %v8469_v24 }
 0x553   :  { %v8597_v3 = vadd.f32 %v1324_v51, %v1323_v60 }
 0x555   :  { %7783 = vtanh.f32 %v8597_v3 }
 0x55b   :  { %v7784_v0 = vpop.eup %7783 }
 0x55c   :  { %v1327_v11 = vmul.f32 %v7784_v0, %v1321_v1 }
 0x55e   :  { %7323 = vmatmul.msk.f32.vlgmr.msra.gmra.mxu0 %vm210_vm4, %v1327_v11  ;;  %7325 = vmatmul.msk.f32.vlgmr.msrb.gmra.mxu2 %vm210_vm4, %v1327_v11 }
 0x55f   :  { %7327 = vmatmul.msk.f32.vlgmr.msrb.gmra.mxu3 %vm210_vm4, %v1327_v11  ;;  %7329 = vmatmul.msk.f32.vlgmr.msra.gmra.mxu1 %vm210_vm4, %v1327_v11 }
 0x5db   :  { %v1348_v57 = vpop.f32.mrf.mxu0 }
 0x5dc   :  { %v1411_v13 = vadd.f32 %v1348_v57, %v284_v49  ;;  %v1408_v17 = vpop.f32.mrf.mxu1 }
 0x5dd   :  { %v1414_v18 = vadd.f32 %v1408_v17, %v407_v56  ;;  %v410_v17 = vadd.f32 %v8587_v9, %v8471_v26 }
 0x5de   :  { %v7330_v23 = vmul.f32 -1.442695, %v1411_v13 }
 0x5df   :  { %v7332_v15 = vmul.f32 -1.442695, %v1414_v18 }
 0x5e0   :  { %7785 = vpow2.f32 %v7330_v23 }
 0x5e1   :  { %7787 = vpow2.f32 %v7332_v15  ;;  %v1368_v28 = vpop.f32.mrf.mxu2 }
 0x5e2   :  { %v1412_v25 = vadd.f32 %v1368_v28, %v325_v27  ;;  %v1388_v30 = vpop.f32.mrf.mxu3 }
 0x5e3   :  { %v1413_v20 = vadd.f32 %v1388_v30, %v366_v32  ;;  %v8639_v32 = vld [vmem:[#allocation2 + $0x2e0] sm:$0xff] }
 0x5e4   :  { %v7331_v29 = vmul.f32 -1.442695, %v1412_v25  ;;  %1710 = vmatpush.msrb.mxu2 %v8639_v32 }
 0x5e6   :  { %v7786_v6 = vpop.eup %7785  ;;  %7789 = vpow2.f32 %v7331_v29  ;;  %v328_v29 = vadd.f32 %v8467_v22, %v8454_v12 }
 0x5e7   :  { %v7788_v19 = vpop.eup %7787  ;;  %v1418_v53 = vadd.f32 1.0, %v7786_v6 }
 0x5e8   :  { %v1457_v61 = vadd.f32 1.0, %v7788_v19 }
 0x5e9   :  { %7791 = vrcp.f32 %v1418_v53  ;;  %v1430_v36 = vand.u32 2147483648, %v1418_v53  ;;  %v1428_v39 = vand.u32 2147483647, %v1418_v53  ;;  %vm1424_vm6 = vweird.f32 %v1418_v53 }
 0x5ea   :  { %7793 = vrcp.f32 %v1457_v61  ;;  %v1469_v0 = vand.u32 2147483648, %v1457_v61  ;;  %vm1463_vm14 = vweird.f32 %v1457_v61  ;;  %v1467_v1 = vand.u32 2147483647, %v1457_v61 }
 0x5eb   :  { %v1431_v46 = vor.u32 1.1754944e-38, %v1430_v36  ;;  %vm1429_vm8 = vcmp.eq.f32.partialorder %v1428_v39, 8.507059e+37  ;;  %v8656_v36 = vld [vmem:[#allocation2 + $0x2a0] sm:$0xff]  ;;  %v8663_v39 = vld [vmem:[#allocation2 + $0x2b0] sm:$0xff] }
 0x5ec   :  { %v7790_v16 = vpop.eup %7789  ;;  %v1470_v49 = vor.u32 1.1754944e-38, %v1469_v0  ;;  %vm1468_vm2 = vcmp.eq.f32.partialorder %v1467_v1, 8.507059e+37 }
 0x5ed   :  { %v1437_v33 = vadd.f32 1.0, %v7790_v16  ;;  %v369_v16 = vadd.f32 %v8563_v8, %v8475_v45 }
 0x5ef   :  { %v7792_v5 = vpop.eup %7791  ;;  %7795 = vrcp.f32 %v1437_v33  ;;  %v1449_v50 = vand.u32 2147483648, %v1437_v33  ;;  %v1447_v54 = vand.u32 2147483647, %v1437_v33  ;;  %vm1443_vm10 = vweird.f32 %v1437_v33 }
 0x5f0   :  { %v1420_v34 = vmul.f32 %v7792_v5, %v1418_v53  ;;  %7797 = vtanh.f32 %v1413_v20  ;;  %v7794_v37 = vpop.eup %7793  ;;  %vm1425_vm5 = vweird.f32 %v7792_v5  ;;  %v8648_v20 = vld [vmem:[#allocation2 + $0x2c0] sm:$0xff] }
 0x5f1   :  { %v1459_v47 = vmul.f32 %v7794_v37, %v1457_v61  ;;  %vm1426_vm7 = vmor %vm1424_vm6, %vm1425_vm5  ;;  %v1450_v42 = vor.u32 1.1754944e-38, %v1449_v50  ;;  %vm1448_vm12 = vcmp.eq.f32.partialorder %v1447_v54, 8.507059e+37  ;;  %vm1464_vm13 = vweird.f32 %v7794_v37  ;;  %v8626_v61 = vld [vmem:[#allocation2 + $0x140] sm:$0x1f]  ;;  %1711 = vmatpush.msrb.mxu2 %v8648_v20 }
 0x5f2   :  { %v1421_v35 = vsub.f32 1.0, %v1420_v34  ;;  %vm1465_vm15 = vmor %vm1463_vm14, %vm1464_vm13  ;;  %7344 = vmatpush.msk.msra.mxu0 %vm235_vm3, %v8626_v61  ;;  %v8650_v34 = vld [vmem:[#allocation2 + $0x2c8] sm:$0xff] }
 0x5f3   :  { %v1460_v58 = vsub.f32 1.0, %v1459_v47  ;;  %1712 = vmatpush.msrb.mxu2 %v8656_v36  ;;  %v8672_v47 = vld [vmem:[#allocation2 + $0x290] sm:$0xff] }
 0x5f4   :  { %v1422_v38 = vmul.f32 %v7792_v5, %v1421_v35  ;;  %v8652_v35 = vld [vmem:[#allocation2 + $0x2d0] sm:$0xff] }
 0x5f5   :  { %v7796_v44 = vpop.eup %7795  ;;  %v1461_v62 = vmul.f32 %v7794_v37, %v1460_v58  ;;  %v8690_v58 = vld [vmem:[#allocation2 + $0x248] sm:$0xff] }
 0x5f6   :  { %v1439_v40 = vmul.f32 %v7796_v44, %v1437_v33  ;;  %v1423_v14 = vadd.f32 %v7792_v5, %v1422_v38  ;;  %v7798_v7 = vpop.eup %7797  ;;  %vm1444_vm9 = vweird.f32 %v7796_v44  ;;  %v8641_v33 = vld [vmem:[#allocation2 + $0x2e8] sm:$0xff] }
 0x5f7   :  { %vm1445_vm11 = vmor %vm1443_vm10, %vm1444_vm9  ;;  %v1462_v2 = vadd.f32 %v7794_v37, %v1461_v62  ;;  %1730 = vmatpush.msrb.mxu3 %v8641_v33 }
 0x5f8   :  { %v1440_v41 = vsub.f32 1.0, %v1439_v40  ;;  %v1427_v48 = vsel %vm1426_vm7, %v7792_v5, %v1423_v14  ;;  %v8643_v5 = vld [vmem:[#allocation2 + $0x2f0] sm:$0xff]  ;;  %v8668_v40 = vld [vmem:[#allocation2 + $0x288] sm:$0xff] }
 0x5f9   :  { %v1432_v51 = vsel %vm1429_vm8, %v1431_v46, %v1427_v48  ;;  %v1466_v11 = vsel %vm1465_vm15, %v7794_v37, %v1462_v2  ;;  %1750 = vmatpush.msra.mxu1 %v8643_v5  ;;  %v8658_v37 = vld [vmem:[#allocation2 + $0x2a8] sm:$0xff]  ;;  %1731 = vmatpush.msrb.mxu3 %v8650_v34 }
 0x5fa   :  { %v1441_v52 = vmul.f32 %v7796_v44, %v1440_v41  ;;  %v1474_v55 = vmul.f32 %v7798_v7, %v1432_v51  ;;  %v1471_v57 = vsel %vm1468_vm2, %v1470_v49, %v1466_v11  ;;  %v8676_v41 = vld [vmem:[#allocation2 + $0x260] sm:$0xff]  ;;  %v8678_v48 = vld [vmem:[#allocation2 + $0x268] sm:$0xff]  ;;  %v8708_v11 = vld [vmem:[#allocation2 + $0x230] sm:$0xff] }
 0x5fb   :  { %1751 = vmatpush.msra.mxu1 %v8652_v35  ;;  %1732 = vmatpush.msrb.mxu3 %v8658_v37  ;;  %v8704_v2 = vld [vmem:[#allocation2 + $0x228] sm:$0xff] }
 0x5fc   :  { %v1442_v59 = vadd.f32 %v7796_v44, %v1441_v52  ;;  %v8685_v52 = vld [vmem:[#allocation2 + $0x270] sm:$0xff] }
 0x5fd   :  { %1752 = vmatpush.msra.mxu1 %v8663_v39  ;;  %1733 = vmatpush.msrb.mxu3 %v8668_v40 }
 0x5fe   :  { %v1446_v60 = vsel %vm1445_vm11, %v7796_v44, %v1442_v59  ;;  %v8666_v44 = vld [vmem:[#allocation2 + $0x280] sm:$0xff] }
 0x5ff   :  { %v1451_v10 = vsel %vm1448_vm12, %v1450_v42, %v1446_v60  ;;  %1713 = vmatpush.msrb.mxu2 %v8666_v44  ;;  %1753 = vmatpush.msra.mxu1 %v8672_v47  ;;  %v8696_v60 = vld [vmem:[#allocation2 + $0x250] sm:$0xff] }
 0x600   :  { %v1473_v31 = vmul.f32 %v1451_v10, %v8597_v3  ;;  %v287_v3 = vadd.f32 %v8465_v21, %v8469_v24  ;;  %1734 = vmatpush.msrb.mxu3 %v8678_v48 }
 0x601   :  { %1714 = vmatpush.msrb.mxu2 %v8676_v41  ;;  %1754 = vmatpush.msra.mxu1 %v8685_v52 }
 0x602   :  { %v8613_v63 = vadd.f32 %v1474_v55, %v1473_v31  ;;  %v8688_v55 = vld [vmem:[#allocation2 + $0x240] sm:$0xff]  ;;  %1735 = vmatpush.msrb.mxu3 %v8690_v58 }
 0x603   :  { %v8702_v31 = vld [vmem:[#allocation2 + $0x220] sm:$0xff]  ;;  %1715 = vmatpush.msrb.mxu2 %v8688_v55  ;;  %1755 = vmatpush.msra.mxu1 %v8696_v60 }
 0x604   :  { %7799 = vtanh.f32 %v8613_v63  ;;  %1736 = vmatpush.msrb.mxu3 %v8704_v2 }
 0x605   :  { %1716 = vmatpush.msrb.mxu2 %v8702_v31  ;;  %1756 = vmatpush.msra.mxu1 %v8708_v11 }
 0x60a   :  { %v7800_v56 = vpop.eup %7799 }
 0x60b   :  { %v1477_v13 = vmul.f32 %v7800_v56, %v1471_v57 }
 0x60d   :  { %7334 = vmatmul.msk.f32.vlgmr.msrb.gmra.mxu0 %vm210_vm4, %v1477_v13  ;;  %7336 = vmatmul.msk.f32.vlgmr.msra.gmra.mxu2 %vm210_vm4, %v1477_v13 }
 0x60e   :  { %7338 = vmatmul.msk.f32.vlgmr.msra.gmra.mxu3 %vm210_vm4, %v1477_v13  ;;  %7340 = vmatmul.msk.f32.vlgmr.msrb.gmra.mxu1 %vm210_vm4, %v1477_v13  ;;  %v8712_v13 = vld [vmem:[#allocation2 + $0x200] sm:$0xff] }
 0x60f   :  { %1717 = vmatpush.msrb.mxu2 %v8712_v13 }
 0x68a   :  { %v1498_v18 = vpop.f32.mrf.mxu0 }
 0x68b   :  { %v1561_v23 = vadd.f32 %v1498_v18, %v287_v3  ;;  %v1558_v15 = vpop.f32.mrf.mxu1  ;;  %v8714_v3 = vld [vmem:[#allocation2 + $0x208] sm:$0xff] }
 0x68c   :  { %v1564_v27 = vadd.f32 %v1558_v15, %v410_v17  ;;  %v8719_v15 = vld [vmem:[#allocation2 + $0x210] sm:$0xff]  ;;  %1737 = vmatpush.msrb.mxu3 %v8714_v3 }
 0x68d   :  { %v7341_v28 = vmul.f32 -1.442695, %v1561_v23  ;;  %1757 = vmatpush.msra.mxu1 %v8719_v15 }
 0x68e   :  { %v7343_v25 = vmul.f32 -1.442695, %v1564_v27 }
 0x68f   :  { %7801 = vpow2.f32 %v7341_v28  ;;  %v8722_v28 = vld [vmem:[#allocation2 + $0x1e0] sm:$0xff] }
 0x690   :  { %7803 = vpow2.f32 %v7343_v25  ;;  %v1518_v6 = vpop.f32.mrf.mxu2  ;;  %v8724_v25 = vld [vmem:[#allocation2 + $0x1e8] sm:$0xff]  ;;  %1718 = vmatpush.msrb.mxu2 %v8722_v28 }
 0x691   :  { %v1562_v19 = vadd.f32 %v1518_v6, %v328_v29  ;;  %v1538_v22 = vpop.f32.mrf.mxu3  ;;  %v8729_v6 = vld [vmem:[#allocation2 + $0x1f0] sm:$0xff]  ;;  %1738 = vmatpush.msrb.mxu3 %v8724_v25 }
 0x692   :  { %v1563_v8 = vadd.f32 %v1538_v22, %v369_v16  ;;  %1758 = vmatpush.msra.mxu1 %v8729_v6 }
 0x693   :  { %v7342_v53 = vmul.f32 -1.442695, %v1562_v19 }
 0x695   :  { %v7802_v21 = vpop.eup %7801  ;;  %7805 = vpow2.f32 %v7342_v53 }
 0x696   :  { %v7804_v24 = vpop.eup %7803  ;;  %v8630_v26 = vadd.f32 1.0, %v7802_v21 }
 0x697   :  { %v8633_v9 = vadd.f32 1.0, %v7804_v24 }
 0x698   :  { %7807 = vrcp.f32 %v8630_v26  ;;  %v1580_v46 = vand.u32 2147483648, %v8630_v26  ;;  %v1578_v51 = vand.u32 2147483647, %v8630_v26  ;;  %vm1574_vm6 = vweird.f32 %v8630_v26 }
 0x699   :  { %7809 = vrcp.f32 %v8633_v9  ;;  %v1619_v16 = vand.u32 2147483648, %v8633_v9  ;;  %vm1613_vm14 = vweird.f32 %v8633_v9 }
 0x69a   :  { %v1581_v10 = vor.u32 1.1754944e-38, %v1580_v46  ;;  %vm1579_vm8 = vcmp.eq.f32.partialorder %v1578_v51, 8.507059e+37  ;;  %v8748_v46 = vld [vmem:[#allocation2 + $0x1c0] sm:$0xff]  ;;  %v8752_v51 = vld [vmem:[#allocation2 + $0x1d0] sm:$0xff] }
 0x69b   :  { %v7806_v12 = vpop.eup %7805  ;;  %1719 = vmatpush.msrb.mxu2 %v8748_v46  ;;  %1759 = vmatpush.msra.mxu1 %v8752_v51 }
 0x69c   :  { %v8637_v30 = vadd.f32 1.0, %v7806_v12 }
 0x69e   :  { %v7808_v45 = vpop.eup %7807  ;;  %7811 = vrcp.f32 %v8637_v30  ;;  %v1599_v56 = vand.u32 2147483648, %v8637_v30  ;;  %v1597_v18 = vand.u32 2147483647, %v8637_v30  ;;  %vm1593_vm10 = vweird.f32 %v8637_v30 }
 0x69f   :  { %v1570_v38 = vmul.f32 %v7808_v45, %v8630_v26  ;;  %7813 = vtanh.f32 %v1563_v8  ;;  %v8680_v7 = vpop.eup %7809  ;;  %vm1575_vm5 = vweird.f32 %v7808_v45  ;;  %v1620_v8 = vor.u32 1.1754944e-38, %v1619_v16 }
 0x6a0   :  { %v1609_v62 = vmul.f32 %v8680_v7, %v8633_v9  ;;  %vm1576_vm7 = vmor %vm1574_vm6, %vm1575_vm5  ;;  %v1600_v19 = vor.u32 1.1754944e-38, %v1599_v56  ;;  %vm1598_vm12 = vcmp.eq.f32.partialorder %v1597_v18, 8.507059e+37  ;;  %vm1614_vm13 = vweird.f32 %v8680_v7 }
 0x6a1   :  { %v1571_v14 = vsub.f32 1.0, %v1570_v38  ;;  %vm1615_vm15 = vmor %vm1613_vm14, %vm1614_vm13  ;;  %vm1702_vm5 = vcmask 785408   ;;  %vm1792_vm6 = vcmask 64512  }
 0x6a2   :  { %v1610_v27 = vsub.f32 1.0, %v1609_v62  ;;  %v8769_v62 = vld [vmem:[#allocation2 + $0x190] sm:$0xff] }
 0x6a3   :  { %v1572_v50 = vmul.f32 %v7808_v45, %v1571_v14 }
 0x6a4   :  { %v7812_v54 = vpop.eup %7811  ;;  %v1611_v21 = vmul.f32 %v8680_v7, %v1610_v27 }
 0x6a5   :  { %v1589_v59 = vmul.f32 %v7812_v54, %v8637_v30  ;;  %v1573_v42 = vadd.f32 %v7808_v45, %v1572_v50  ;;  %v7814_v49 = vpop.eup %7813  ;;  %vm1594_vm9 = vweird.f32 %v7812_v54  ;;  %v1617_v30 = vand.u32 2147483647, %v8633_v9  ;;  %v8750_v50 = vld [vmem:[#allocation2 + $0x1c8] sm:$0xff]  ;;  %v8757_v9 = vld [vmem:[#allocation2 + $0x1a0] sm:$0xff] }
 0x6a6   :  { %vm1595_vm11 = vmor %vm1593_vm10, %vm1594_vm9  ;;  %v1612_v22 = vadd.f32 %v8680_v7, %v1611_v21  ;;  %1739 = vmatpush.msrb.mxu3 %v8750_v50  ;;  %1720 = vmatpush.msrb.mxu2 %v8757_v9 }
 0x6a7   :  { %v1590_v0 = vsub.f32 1.0, %v1589_v59  ;;  %v1577_v1 = vsel %vm1576_vm7, %v7808_v45, %v1573_v42  ;;  %vm1618_vm2 = vcmp.eq.f32.partialorder %v1617_v30, 8.507059e+37  ;;  %v8765_v59 = vld [vmem:[#allocation2 + $0x180] sm:$0xff]  ;;  %v8767_v42 = vld [vmem:[#allocation2 + $0x188] sm:$0xff] }
 0x6a8   :  { %v1582_v57 = vsel %vm1579_vm8, %v1581_v10, %v1577_v1  ;;  %v1616_v45 = vsel %vm1615_vm15, %v8680_v7, %v1612_v22  ;;  %v8759_v7 = vld [vmem:[#allocation2 + $0x1a8] sm:$0xff]  ;;  %1721 = vmatpush.msrb.mxu2 %v8765_v59  ;;  %v8811_v10 = vld [vmem:[#allocation2 + $0x160] ss:$0 sm:$0xff] }
 0x6a9   :  { %v1591_v17 = vmul.f32 %v7812_v54, %v1590_v0  ;;  %v1624_v23 = vmul.f32 %v7814_v49, %v1582_v57  ;;  %v1621_v14 = vsel %vm1618_vm2, %v1620_v8, %v1616_v45  ;;  %1740 = vmatpush.msrb.mxu3 %v8759_v7 }
 0x6aa   :  { %1866 = vmatpush.msra.mxu2 %v8639_v32 }
 0x6ab   :  { %v1592_v29 = vadd.f32 %v7812_v54, %v1591_v17  ;;  %1741 = vmatpush.msrb.mxu3 %v8767_v42 }
 0x6ac   :  { %1867 = vmatpush.msra.mxu2 %v8648_v20 }
 0x6ad   :  { %v1596_v53 = vsel %vm1595_vm11, %v7812_v54, %v1592_v29  ;;  %v8761_v54 = vld [vmem:[#allocation2 + $0x1b0] sm:$0xff]  ;;  %1886 = vmatpush.msra.mxu3 %v8641_v33 }
 0x6ae   :  { %v1601_v24 = vsel %vm1598_vm12, %v1600_v19, %v1596_v53  ;;  %1760 = vmatpush.msra.mxu1 %v8761_v54  ;;  %1868 = vmatpush.msra.mxu2 %v8656_v36 }
 0x6af   :  { %v1623_v26 = vmul.f32 %v1601_v24, %v8613_v63  ;;  %1887 = vmatpush.msra.mxu3 %v8650_v34 }
 0x6b0   :  { %1761 = vmatpush.msra.mxu1 %v8769_v62  ;;  %1869 = vmatpush.msra.mxu2 %v8666_v44 }
 0x6b1   :  { %v1625_v12 = vadd.f32 %v1624_v23, %v1623_v26  ;;  %1888 = vmatpush.msra.mxu3 %v8658_v37 }
 0x6b2   :  { %1906 = vmatpush.msrb.mxu1 %v8643_v5  ;;  %1870 = vmatpush.msra.mxu2 %v8676_v41 }
 0x6b3   :  { %7815 = vtanh.f32 %v1625_v12  ;;  %1889 = vmatpush.msra.mxu3 %v8668_v40 }
 0x6b4   :  { %1907 = vmatpush.msrb.mxu1 %v8652_v35  ;;  %1871 = vmatpush.msra.mxu2 %v8688_v55 }
 0x6b5   :  { %1890 = vmatpush.msra.mxu3 %v8678_v48 }
 0x6b6   :  { %1908 = vmatpush.msrb.mxu1 %v8663_v39  ;;  %1872 = vmatpush.msra.mxu2 %v8702_v31 }
 0x6b7   :  { %1891 = vmatpush.msra.mxu3 %v8690_v58 }
 0x6b8   :  { %1909 = vmatpush.msrb.mxu1 %v8672_v47  ;;  %1873 = vmatpush.msra.mxu2 %v8712_v13 }
 0x6b9   :  { %v7816_v38 = vpop.eup %7815  ;;  %1892 = vmatpush.msra.mxu3 %v8704_v2 }
 0x6ba   :  { %v8744_v63 = vmul.f32 %v7816_v38, %v1621_v14  ;;  %1910 = vmatpush.msrb.mxu1 %v8685_v52  ;;  %1874 = vmatpush.msra.mxu2 %v8722_v28 }
 0x6bb   :  { %1893 = vmatpush.msra.mxu3 %v8714_v3 }
 0x6bc   :  { %7345 = vmatmul.msk.f32.vlgmr.msra.gmra.mxu0 %vm210_vm4, %v8744_v63  ;;  %1911 = vmatpush.msrb.mxu1 %v8696_v60 }
 0x6bd   :  { %1894 = vmatpush.msra.mxu3 %v8724_v25  ;;  %1875 = vmatpush.msra.mxu2 %v8748_v46 }
 0x6be   :  { %1912 = vmatpush.msrb.mxu1 %v8708_v11 }
 0x6bf   :  { %1895 = vmatpush.msra.mxu3 %v8750_v50  ;;  %1876 = vmatpush.msra.mxu2 %v8757_v9 }
 0x6c0   :  { %1913 = vmatpush.msrb.mxu1 %v8719_v15 }
 0x6c1   :  { %1896 = vmatpush.msra.mxu3 %v8759_v7  ;;  %1877 = vmatpush.msra.mxu2 %v8765_v59 }
 0x6c2   :  { %1914 = vmatpush.msrb.mxu1 %v8729_v6 }
 0x6c3   :  { %1897 = vmatpush.msra.mxu3 %v8767_v42 }
 0x6c4   :  { %1915 = vmatpush.msrb.mxu1 %v8752_v51 }
 0x6c6   :  { %1916 = vmatpush.msrb.mxu1 %v8761_v54 }
 0x6c8   :  { %1917 = vmatpush.msrb.mxu1 %v8769_v62 }
 0x739   :  { %v1691_v0 = vpop.f32.mrf.mxu0 }
 0x73a   :  { %v1692_v1 = vadd.f32 %v1691_v0, %v8811_v10 }
 0x73c   :  { %v1694_v49 = vmax.f32 %v1692_v1, 0.0 }
 0x73e   :  { %7346 = vmatmul.msk.f32.vlgmr.msrb.gmra.mxu2 %vm1702_vm5, %v1694_v49  ;;  %7347 = vmatmul.msk.f32.vlgmr.msrb.gmra.mxu3 %vm1702_vm5, %v1694_v49 }
 0x73f   :  { %7348 = vmatmul.msk.f32.vlgmr.msra.gmra.mxu1 %vm1702_vm5, %v1694_v49  ;;  %2021 = vmatpush.msrb.mxu2 %v8639_v32  ;;  %v1667_v32 = vld [vmem:[#allocation2 + $0x300] ss:$8 sm:$0x7] }
 0x740   :  { %2041 = vmatpush.msrb.mxu3 %v8641_v33  ;;  %2061 = vmatpush.msra.mxu1 %v8643_v5  ;;  %v8853_v33 = vperm.slane %v1667_v32, 1  ;;  %v8855_v5 = vperm.slane %v1667_v32, 2 }
 0x741   :  { %2022 = vmatpush.msrb.mxu2 %v8648_v20 }
 0x742   :  { %2042 = vmatpush.msrb.mxu3 %v8650_v34  ;;  %2062 = vmatpush.msra.mxu1 %v8652_v35  ;;  %v8857_v34 = vperm.slane %v1667_v32, 0 }
 0x743   :  { %2023 = vmatpush.msrb.mxu2 %v8656_v36 }
 0x744   :  { %2043 = vmatpush.msrb.mxu3 %v8658_v37  ;;  %2063 = vmatpush.msra.mxu1 %v8663_v39 }
 0x745   :  { %2024 = vmatpush.msrb.mxu2 %v8666_v44 }
 0x746   :  { %2044 = vmatpush.msrb.mxu3 %v8668_v40  ;;  %2064 = vmatpush.msra.mxu1 %v8672_v47 }
 0x747   :  { %2025 = vmatpush.msrb.mxu2 %v8676_v41 }
 0x748   :  { %2045 = vmatpush.msrb.mxu3 %v8678_v48  ;;  %2065 = vmatpush.msra.mxu1 %v8685_v52 }
 0x749   :  { %2026 = vmatpush.msrb.mxu2 %v8688_v55 }
 0x74a   :  { %2046 = vmatpush.msrb.mxu3 %v8690_v58  ;;  %2066 = vmatpush.msra.mxu1 %v8696_v60 }
 0x74b   :  { %2027 = vmatpush.msrb.mxu2 %v8702_v31 }
 0x74c   :  { %2047 = vmatpush.msrb.mxu3 %v8704_v2  ;;  %2067 = vmatpush.msra.mxu1 %v8708_v11  ;;  %v8871_v2 = vld [vmem:[%s10644_s1] sm:$0xff] }
 0x74d   :  { %2028 = vmatpush.msrb.mxu2 %v8712_v13 }
 0x74e   :  { %2048 = vmatpush.msrb.mxu3 %v8714_v3  ;;  %2068 = vmatpush.msra.mxu1 %v8719_v15 }
 0x74f   :  { %2029 = vmatpush.msrb.mxu2 %v8722_v28 }
 0x750   :  { %2049 = vmatpush.msrb.mxu3 %v8724_v25  ;;  %2069 = vmatpush.msra.mxu1 %v8729_v6 }
 0x751   :  { %2030 = vmatpush.msrb.mxu2 %v8748_v46 }
 0x752   :  { %2050 = vmatpush.msrb.mxu3 %v8750_v50  ;;  %2070 = vmatpush.msra.mxu1 %v8752_v51 }
 0x753   :  { %2031 = vmatpush.msrb.mxu2 %v8757_v9 }
 0x754   :  { %2051 = vmatpush.msrb.mxu3 %v8759_v7  ;;  %2071 = vmatpush.msra.mxu1 %v8761_v54 }
 0x755   :  { %2032 = vmatpush.msrb.mxu2 %v8765_v59 }
 0x756   :  { %2052 = vmatpush.msrb.mxu3 %v8767_v42  ;;  %2072 = vmatpush.msra.mxu1 %v8769_v62 }
 0x7bc   :  { %v1763_v20 = vpop.f32.mrf.mxu1 }
 0x7bd   :  { %v1764_v39 = vadd.f32 %v1763_v20, %v8855_v5 }
 0x7c1   :  { %v1743_v35 = vpop.f32.mrf.mxu3  ;;  %v1723_v36 = vpop.f32.mrf.mxu2 }
 0x7c2   :  { %v1744_v37 = vadd.f32 %v1743_v35, %v8853_v33  ;;  %v1724_v44 = vadd.f32 %v1723_v36, %v8857_v34 }
 0x7c4   :  { %7349 = vmatpush.xpose.msk.msrb.mxu0 %vm210_vm4, %v1744_v37 }
 0x7c7   :  { %7350 = vmatmul.msk.f32.vlgmr.msrb.gmra.mxu0 %vm210_vm4, %v1724_v44 }
 0x7c8   :  { %1830 = vmatpush.msra.mxu0 %v1764_v39 }
 0x7ca   :  { %7352 = vmatpush.msk.msrb.mxu0 %vm235_vm3, %v8626_v61 }
 0x844   :  { %v1789_v40 = vpop.f32.mrf.mxu0 }
 0x845   :  { %v1793_v47 = vsel %vm1792_vm6, %v1789_v40, -inf }
 0x846   :  { %1794 = vmax.xlane.f32.xlu0 %v1793_v47 }
 0x8b9   :  { %v1795_v41 = vpop.xlane.xlu0 %1794 }
 0x8ba   :  { %v1796_v48 = vsub.f32 %v1789_v40, %v1795_v41 }
 0x8bc   :  { %v1797_v52 = vmul.f32 1.442695, %v1796_v48 }
 0x8be   :  { %7817 = vpow2.f32 %v1797_v52 }
 0x8c4   :  { %v7818_v55 = vpop.eup %7817 }
 0x8c5   :  { %v1799_v58 = vsel %vm1792_vm6, %v7818_v55, 0.0 }
 0x8c6   :  { %1800 = vadd.xlane.f32.xlu0 %v1799_v58 }
 0x939   :  { %v1801_v60 = vpop.xlane.xlu0 %1800 }
 0x93a   :  { %7819 = vrcp.f32 %v1801_v60 }
 0x940   :  { %v7820_v31 = vpop.eup %7819 }
 0x941   :  { %v1803_v11 = vmul.f32 %v7820_v31, %v7818_v55 }
 0x943   :  { %v1804_v56 = vmul.f32 %v1803_v11, %v8871_v2 }
 0x945   :  { %v1805_v57 = vand.u32 2147483647, %v1804_v56 }
 0x947   :  { %v1806_v13 = vsel %vm1792_vm6, %v1805_v57, 0.0 }
 0x948   :  { %1807 = vadd.xlane.f32.xlu1 %v1806_v13  ;;  %v2155_v13 = vld [vmem:[#allocation2 + $0x328] sm:$0x1f] }
 0x9bb   :  { %v1808_v3 = vpop.xlane.xlu1 %1807 }
 0x9bc   :  { %v1809_v17 = vmax.f32 %v1808_v3, 1e-12  ;;  %v2154_v3 = vld [vmem:[#allocation2 + $0x320] sm:$0x1f] }
 0x9be   :  { %7821 = vrcp.f32 %v1809_v17  ;;  %v2156_v17 = vld [vmem:[#allocation2 + $0x330] sm:$0x1f] }
 0x9c4   :  { %v7822_v18 = vpop.eup %7821 }
 0x9c5   :  { %v1811_v23 = vmul.f32 %v7822_v18, %v1804_v56  ;;  %v2157_v18 = vld [vmem:[#allocation2 + $0x338] sm:$0x1f] }
 0x9c7   :  { %7351 = vmatmul.msk.f32.vlgmr.msra.gmra.mxu0 %vm1792_vm6, %v1811_v23  ;;  %v8915_v23 = vld [vmem:[#allocation2 + $0x340] sm:$0x3] }
 0x9c8   :  { %10765 = vst [vmem:[#allocation5_spill] sm:$0xff] %v8915_v23 }
 0xa44   :  { %v1832_v15 = vpop.f32.mrf.mxu0 }
 0xa45   :  { %v1833_v27 = vadd.f32 %v1832_v15, %v8744_v63  ;;  %v8917_v15 = vld [vmem:[#allocation2 + $0x350] sm:$0x3] }
 0xa46   :  { %10766 = vst [vmem:[#allocation6_spill] sm:$0xff] %v8917_v15 }
 0xa47   :  { %7353 = vmatmul.msk.f32.vlgmr.msrb.gmra.mxu0 %vm210_vm4, %v1833_v27 }
 0xac4   :  { %v1855_v28 = vpop.f32.mrf.mxu0 }
 0xac5   :  { %v1856_v25 = vadd.f32 %v1855_v28, %v8811_v10 }
 0xac7   :  { %v1858_v29 = vmax.f32 %v1856_v25, 0.0 }
 0xac9   :  { %7354 = vmatmul.msk.f32.vlgmr.msra.gmra.mxu2 %vm1702_vm5, %v1858_v29  ;;  %7355 = vmatmul.msk.f32.vlgmr.msra.gmra.mxu3 %vm1702_vm5, %v1858_v29 }
 0xaca   :  { %7356 = vmatmul.msk.f32.vlgmr.msrb.gmra.mxu1 %vm1702_vm5, %v1858_v29  ;;  %7370 = vmatpush.msk.msra.mxu2 %vm235_vm3, %v2155_v13  ;;  %v8929_v29 = vld [vmem:[#allocation2 + $0x368] sm:$0x1f] }
 0xacb   :  { %7372 = vmatpush.msk.msra.mxu3 %vm235_vm3, %v2156_v17  ;;  %7374 = vmatpush.msk.msrb.mxu1 %vm235_vm3, %v2157_v18 }
 0xb47   :  { %v1919_v6 = vpop.f32.mrf.mxu1 }
 0xb48   :  { %v1920_v24 = vadd.f32 %v1919_v6, %v8855_v5  ;;  %v8931_v6 = vld [vmem:[#allocation2 + $0x360] sm:$0x1f] }
 0xb49   :  { %10767 = vst [vmem:[#allocation7_spill] sm:$0xff] %v8931_v6 }
 0xb4c   :  { %v1899_v19 = vpop.f32.mrf.mxu3  ;;  %v1879_v53 = vpop.f32.mrf.mxu2 }
 0xb4d   :  { %v1900_v21 = vadd.f32 %v1899_v19, %v8853_v33  ;;  %v1880_v26 = vadd.f32 %v1879_v53, %v8857_v34  ;;  %v8935_v19 = vld [vmem:[#allocation2 + $0x370] sm:$0x1f]  ;;  %v8937_v53 = vld [vmem:[#allocation2 + $0x378] sm:$0x1f] }
 0xb4f   :  { %7357 = vmatpush.xpose.msk.msra.mxu0 %vm210_vm4, %v1900_v21 }
 0xb52   :  { %7358 = vmatmul.msk.f32.vlgmr.msra.gmra.mxu0 %vm210_vm4, %v1880_v26  ;;  %v2159_v26 = vld [vmem:[#allocation2 + $0x380] ss:$8 sm:$0xf] }
 0xb53   :  { %1985 = vmatpush.msrb.mxu0 %v1920_v24 }
 0xb55   :  { %7360 = vmatpush.msk.msra.mxu0 %vm235_vm3, %v8626_v61 }
 0xbcf   :  { %v1945_v12 = vpop.f32.mrf.mxu0 }
 0xbd0   :  { %v1948_v22 = vsel %vm1792_vm6, %v1945_v12, -inf }
 0xbd1   :  { %1949 = vmax.xlane.f32.xlu1 %v1948_v22 }
 0xc44   :  { %v1950_v16 = vpop.xlane.xlu1 %1949 }
 0xc45   :  { %v1951_v30 = vsub.f32 %v1945_v12, %v1950_v16 }
 0xc47   :  { %v1952_v45 = vmul.f32 1.442695, %v1951_v30  ;;  %v2164_v30 = vperm.slane %v2159_v26, 3 }
 0xc49   :  { %7823 = vpow2.f32 %v1952_v45 }
 0xc4f   :  { %v7824_v8 = vpop.eup %7823 }
 0xc50   :  { %v1954_v38 = vsel %vm1792_vm6, %v7824_v8, 0.0 }
 0xc51   :  { %1955 = vadd.xlane.f32.xlu2 %v1954_v38 }
 0xcc4   :  { %v1956_v14 = vpop.xlane.xlu2 %1955 }
 0xcc5   :  { %7825 = vrcp.f32 %v1956_v14  ;;  %v2162_v14 = vperm.slane %v2159_v26, 1 }
 0xccb   :  { %v7826_v63 = vpop.eup %7825 }
 0xccc   :  { %v1958_v46 = vmul.f32 %v7826_v63, %v7824_v8 }
 0xcce   :  { %v1959_v50 = vmul.f32 %v1958_v46, %v8871_v2 }
 0xcd0   :  { %v1960_v51 = vand.u32 2147483647, %v1959_v50 }
 0xcd2   :  { %v1961_v61 = vsel %vm1792_vm6, %v1960_v51, 0.0 }
 0xcd3   :  { %1962 = vadd.xlane.f32.xlu2 %v1961_v61 }
 0xd46   :  { %v1963_v9 = vpop.xlane.xlu2 %1962 }
 0xd47   :  { %v1964_v7 = vmax.f32 %v1963_v9, 1e-12 }
 0xd49   :  { %7827 = vrcp.f32 %v1964_v7 }
 0xd4f   :  { %v7828_v54 = vpop.eup %7827 }
 0xd50   :  { %v1966_v59 = vmul.f32 %v7828_v54, %v1959_v50 }
 0xd52   :  { %7359 = vmatmul.msk.f32.vlgmr.msrb.gmra.mxu0 %vm1792_vm6, %v1966_v59 }
 0xdcf   :  { %v1987_v42 = vpop.f32.mrf.mxu0 }
 0xdd0   :  { %v1988_v62 = vadd.f32 %v1987_v42, %v1833_v27  ;;  %v8923_v27 = vld [vmem:[#allocation2 + $0x358] sm:$0x3] }
 0xdd2   :  { %7361 = vmatmul.msk.f32.vlgmr.msra.gmra.mxu0 %vm210_vm4, %v1988_v62 }
 0xe4f   :  { %v2010_v0 = vpop.f32.mrf.mxu0 }
 0xe50   :  { %v2011_v1 = vadd.f32 %v2010_v0, %v8811_v10 }
 0xe52   :  { %v2013_v49 = vmax.f32 %v2011_v1, 0.0 }
 0xe54   :  { %7362 = vmatmul.msk.f32.vlgmr.msrb.gmra.mxu2 %vm1702_vm5, %v2013_v49  ;;  %7363 = vmatmul.msk.f32.vlgmr.msrb.gmra.mxu3 %vm1702_vm5, %v2013_v49 }
 0xe55   :  { %7364 = vmatmul.msk.f32.vlgmr.msra.gmra.mxu1 %vm1702_vm5, %v2013_v49  ;;  %7380 = vmatpush.msk.msrb.mxu3 %vm71_vm0, %v8917_v15  ;;  %v8974_v49 = vld [vmem:[#allocation2 + $0x3a0] sm:$0x1f] }
 0xe56   :  { %7382 = vmatpush.msk.msra.mxu1 %vm71_vm0, %v8923_v27 }
 0xed2   :  { %v2074_v32 = vpop.f32.mrf.mxu1 }
 0xed3   :  { %v2075_v37 = vadd.f32 %v2074_v32, %v8855_v5  ;;  %v8976_v32 = vld [vmem:[#allocation2 + $0x3a8] sm:$0x1f] }
 0xed4   :  { %10771 = vst [vmem:[#allocation11_spill] sm:$0xff] %v8976_v32 }
 0xed7   :  { %v2054_v20 = vpop.f32.mrf.mxu3  ;;  %v2034_v35 = vpop.f32.mrf.mxu2 }
 0xed8   :  { %v2055_v36 = vadd.f32 %v2054_v20, %v8853_v33  ;;  %v2035_v39 = vadd.f32 %v2034_v35, %v8857_v34 }
 0xeda   :  { %7365 = vmatpush.xpose.msk.msrb.mxu0 %vm210_vm4, %v2055_v36 }
 0xedd   :  { %7366 = vmatmul.msk.f32.vlgmr.msrb.gmra.mxu0 %vm210_vm4, %v2035_v39 }
 0xede   :  { %2140 = vmatpush.msra.mxu0 %v2075_v37 }
 0xee0   :  { %7368 = vmatpush.msk.msrb.mxu0 %vm235_vm3, %v2154_v3  ;;  %v9006_v3 = vld [vmem:[#allocation2 + $0x540] sm:$0xff] }
 0xf5a   :  { %v2100_v10 = vpop.f32.mrf.mxu0 }
 0xf5b   :  { %v2103_v44 = vsel %vm1792_vm6, %v2100_v10, -inf }
 0xf5c   :  { %2104 = vmax.xlane.f32.xlu0 %v2103_v44  ;;  %v2163_v44 = vperm.slane %v2159_v26, 2 }
 0xfcf   :  { %v2105_v40 = vpop.xlane.xlu0 %2104 }
 0xfd0   :  { %v2106_v47 = vsub.f32 %v2100_v10, %v2105_v40 }
 0xfd2   :  { %v2107_v41 = vmul.f32 1.442695, %v2106_v47  ;;  %v8986_v47 = vld [vmem:[#allocation2 + $0x5e0] sm:$0xff] }
 0xfd4   :  { %7829 = vpow2.f32 %v2107_v41  ;;  %v8988_v41 = vld [vmem:[#allocation2 + $0x5c0] sm:$0xff] }
 0xfda   :  { %v7830_v48 = vpop.eup %7829 }
 0xfdb   :  { %v2109_v33 = vsel %vm1792_vm6, %v7830_v48, 0.0 }
 0xfdc   :  { %2110 = vadd.xlane.f32.xlu1 %v2109_v33  ;;  %v8992_v33 = vld [vmem:[#allocation2 + $0x5a0] sm:$0xff] }
0x104f   :  { %v2111_v5 = vpop.xlane.xlu1 %2110 }
0x1050   :  { %7831 = vrcp.f32 %v2111_v5 }
0x1056   :  { %v7832_v52 = vpop.eup %7831 }
0x1057   :  { %v2113_v55 = vmul.f32 %v7832_v52, %v7830_v48 }
0x1059   :  { %v2114_v34 = vmul.f32 %v2113_v55, %v8871_v2  ;;  %v8913_v2 = vld [vmem:[#allocation2 + $0x348] sm:$0x3]  ;;  %v8997_v55 = vld [vmem:[#allocation2 + $0x580] sm:$0xff] }
0x105a   :  { %7378 = vmatpush.msk.msrb.mxu2 %vm71_vm0, %v8913_v2 }
0x105b   :  { %v2115_v58 = vand.u32 2147483647, %v2114_v34 }
0x105d   :  { %v2116_v60 = vsel %vm1792_vm6, %v2115_v58, 0.0 }
0x105e   :  { %2117 = vadd.xlane.f32.xlu2 %v2116_v60 }
0x10d1   :  { %v2118_v31 = vpop.xlane.xlu2 %2117 }
0x10d2   :  { %v2119_v11 = vmax.f32 %v2118_v31, 1e-12  ;;  %v9001_v31 = vld [vmem:[#allocation2 + $0x560] sm:$0xff] }
0x10d4   :  { %7833 = vrcp.f32 %v2119_v11 }
0x10da   :  { %v7834_v56 = vpop.eup %7833 }
0x10db   :  { %v2121_v57 = vmul.f32 %v7834_v56, %v2114_v34 }
0x10dd   :  { %7367 = vmatmul.msk.f32.vlgmr.msra.gmra.mxu0 %vm1792_vm6, %v2121_v57 }
0x10de   :  { %7376 = vmatpush.msk.msra.mxu0 %vm71_vm0, %v8915_v23 }
0x115a   :  { %v2142_v28 = vpop.f32.mrf.mxu0 }
0x115b   :  { %v2143_v25 = vadd.f32 %v2142_v28, %v1988_v62 }
0x115d   :  { %7369 = vmatmul.msk.f32.vlgmr.msrb.gmra.mxu0 %vm210_vm4, %v2143_v25  ;;  %7371 = vmatmul.msk.f32.vlgmr.msra.gmra.mxu2 %vm210_vm4, %v2143_v25 }
0x115e   :  { %7373 = vmatmul.msk.f32.vlgmr.msra.gmra.mxu3 %vm210_vm4, %v2143_v25  ;;  %7375 = vmatmul.msk.f32.vlgmr.msrb.gmra.mxu1 %vm210_vm4, %v2143_v25 }
0x115f   :  { %7385 = vmatpush.msk.msra.mxu2 %vm235_vm3, %v8929_v29  ;;  %7384 = vmatpush.msk.msrb.mxu0 %vm235_vm3, %v8931_v6 }
0x1160   :  { %7386 = vmatpush.msk.msra.mxu3 %vm235_vm3, %v8935_v19  ;;  %7387 = vmatpush.msk.msrb.mxu1 %vm235_vm3, %v8937_v53 }
0x1165   :  { %7377 = vmatmul.msk.f32.vlgmr.msra.gmra.mxu0 %vm46_vm1, %v8333_v4  ;;  %7379 = vmatmul.msk.f32.vlgmr.msrb.gmra.mxu2 %vm46_vm1, %v8333_v4 }
0x1166   :  { %7381 = vmatmul.msk.f32.vlgmr.msrb.gmra.mxu3 %vm46_vm1, %v8333_v4  ;;  %7383 = vmatmul.msk.f32.vlgmr.msra.gmra.mxu1 %vm46_vm1, %v8333_v4  ;;  %v2161_v4 = vperm.slane %v2159_v26, 0 }
0x1167   :  { %7401 = vmatpush.msk.msra.mxu1 %vm71_vm0, %v8917_v15  ;;  %7391 = vmatpush.msk.msra.mxu0 %vm235_vm3, %v8974_v49 }
0x1168   :  { %7393 = vmatpush.msk.msrb.mxu2 %vm235_vm3, %v8976_v32  ;;  %2635 = vmatpush.msrb.mxu3 %v8986_v47 }
0x116a   :  { %2636 = vmatpush.msrb.mxu3 %v8988_v41 }
0x116c   :  { %2637 = vmatpush.msrb.mxu3 %v8992_v33 }
0x116d   :  { %2435 = vmatmul.f32.vlgmr.msrb.gmra.mxu0 %v8277_v43  ;;  %2455 = vmatmul.f32.vlgmr.msra.gmra.mxu2 %v8277_v43 }
0x116e   :  { %2475 = vmatmul.f32.vlgmr.msra.gmra.mxu3 %v8277_v43  ;;  %2495 = vmatmul.f32.vlgmr.msrb.gmra.mxu1 %v8277_v43 }
0x116f   :  { %7405 = vmatpush.msk.msrb.mxu1 %vm235_vm3, %v8931_v6  ;;  %7397 = vmatpush.msk.msra.mxu2 %vm71_vm0, %v8915_v23  ;;  %v10787_v6 = vmov 0  }
0x1170   :  { %2638 = vmatpush.msrb.mxu3 %v8997_v55 }
0x1172   :  { %2639 = vmatpush.msrb.mxu3 %v9001_v31 }
0x1174   :  { %2640 = vmatpush.msrb.mxu3 %v9006_v3 }
0x11da   :  { %v2201_v21 = vpop.f32.mrf.mxu0 }
0x11db   :  { %v2261_v24 = vpop.f32.mrf.mxu1  ;;  %v8965_v45 = vadd.f32 %v2201_v21, %v2161_v4  ;;  %v9011_v21 = vld [vmem:[#allocation2 + $0x520] sm:$0xff] }
0x11dc   :  { %v8967_v8 = vadd.f32 %v2261_v24, %v2164_v30  ;;  %v9018_v4 = vld [vmem:[#allocation2 + $0x500] sm:$0xff]  ;;  %2641 = vmatpush.msrb.mxu3 %v9011_v21 }
0x11dd   :  { %10768 = vst [vmem:[#allocation8_spill] sm:$0xff] %v8965_v45 }
0x11de   :  { %10769 = vst [vmem:[#allocation9_spill] sm:$0xff] %v8967_v8  ;;  %2642 = vmatpush.msrb.mxu3 %v9018_v4 }
0x11e0   :  { %v2221_v12 = vpop.f32.mrf.mxu2 }
0x11e1   :  { %v8971_v9 = vadd.f32 %v2221_v12, %v2162_v14  ;;  %v2241_v7 = vpop.f32.mrf.mxu3 }
0x11e2   :  { %v2340_v22 = vpop.f32.mrf.mxu0  ;;  %v8995_v52 = vadd.f32 %v2241_v7, %v2163_v44 }
0x11e3   :  { %v2400_v16 = vpop.f32.mrf.mxu1  ;;  %v2403_v63 = vadd.f32 %v2340_v22, %v8965_v45  ;;  %10770 = vst [vmem:[#allocation10_spill] sm:$0xff] %v8971_v9  ;;  %v9095_v22 = vld [vmem:[#allocation2 + $0x860] sm:$0xff] }
0x11e4   :  { %v2406_v43 = vadd.f32 %v2400_v16, %v8967_v8  ;;  %10772 = vst [vmem:[#allocation12_spill] sm:$0xff] %v8995_v52 }
0x11e8   :  { %v2360_v38 = vpop.f32.mrf.mxu2 }
0x11e9   :  { %v2404_v42 = vadd.f32 %v2360_v38, %v8971_v9  ;;  %v2380_v37 = vpop.f32.mrf.mxu3 }
0x11ea   :  { %v2436_v46 = vpop.f32.mrf.mxu0  ;;  %v2405_v60 = vadd.f32 %v2380_v37, %v8995_v52  ;;  %v9040_v37 = vld [vmem:[#allocation2 + $0x460] sm:$0xff] }
0x11eb   :  { %v2499_v50 = vadd.f32 %v2436_v46, %v2403_v63  ;;  %v2496_v51 = vpop.f32.mrf.mxu1 }
0x11ec   :  { %v2502_v61 = vadd.f32 %v2496_v51, %v2406_v43  ;;  %v9023_v43 = vld [vmem:[#allocation2 + $0x4e0] sm:$0xff] }
0x11ed   :  { %v7388_v54 = vmul.f32 -1.442695, %v2499_v50  ;;  %2643 = vmatpush.msrb.mxu3 %v9023_v43 }
0x11ee   :  { %v7390_v59 = vmul.f32 -1.442695, %v2502_v61  ;;  %v9026_v61 = vld [vmem:[#allocation2 + $0x4c0] sm:$0xff] }
0x11ef   :  { %7835 = vpow2.f32 %v7388_v54  ;;  %2644 = vmatpush.msrb.mxu3 %v9026_v61 }
0x11f0   :  { %7837 = vpow2.f32 %v7390_v59  ;;  %v2456_v62 = vpop.f32.mrf.mxu2 }
0x11f1   :  { %v2500_v0 = vadd.f32 %v2456_v62, %v2404_v42  ;;  %v2476_v58 = vpop.f32.mrf.mxu3  ;;  %v9030_v62 = vld [vmem:[#allocation2 + $0x4a0] sm:$0xff] }
0x11f2   :  { %v2501_v13 = vadd.f32 %v2476_v58, %v2405_v60  ;;  %2645 = vmatpush.msrb.mxu3 %v9030_v62  ;;  %v9054_v58 = vld [vmem:[#allocation2 + $0x400] sm:$0xff] }
0x11f3   :  { %v7389_v1 = vmul.f32 -1.442695, %v2500_v0 }
0x11f5   :  { %v7836_v20 = vpop.eup %7835  ;;  %7839 = vpow2.f32 %v7389_v1 }
0x11f6   :  { %v7838_v35 = vpop.eup %7837  ;;  %v2506_v36 = vadd.f32 1.0, %v7836_v20  ;;  %v9033_v20 = vld [vmem:[#allocation2 + $0x480] sm:$0xff] }
0x11f7   :  { %v8984_v39 = vadd.f32 1.0, %v7838_v35  ;;  %2646 = vmatpush.msrb.mxu3 %v9033_v20 }
0x11f8   :  { %7841 = vrcp.f32 %v2506_v36  ;;  %v2518_v25 = vand.u32 2147483648, %v2506_v36  ;;  %vm2512_vm8 = vweird.f32 %v2506_v36  ;;  %v2516_v26 = vand.u32 2147483647, %v2506_v36 }
0x11f9   :  { %7843 = vrcp.f32 %v8984_v39  ;;  %vm2551_vm2 = vweird.f32 %v8984_v39  ;;  %v2555_v44 = vand.u32 2147483647, %v8984_v39  ;;  %2647 = vmatpush.msrb.mxu3 %v9040_v37 }
0x11fa   :  { %v2519_v63 = vor.u32 1.1754944e-38, %v2518_v25  ;;  %vm2517_vm12 = vcmp.eq.f32.partialorder %v2516_v26, 8.507059e+37  ;;  %v9084_v25 = vld [vmem:[#allocation2 + $0x620] sm:$0xff] }
0x11fb   :  { %v7840_v10 = vpop.eup %7839  ;;  %10781 = vst [vmem:[#allocation19_spill] sm:$0xff] %v9084_v25  ;;  %v9090_v26 = vld [vmem:[#allocation2 + $0x8a0] sm:$0xff] }
0x11fc   :  { %v2525_v40 = vadd.f32 1.0, %v7840_v10  ;;  %v2557_v10 = vand.u32 2147483648, %v8984_v39  ;;  %2685 = vmatpush.msrb.mxu0 %v9090_v26 }
0x11fe   :  { %v7842_v48 = vpop.eup %7841  ;;  %7845 = vrcp.f32 %v2525_v40  ;;  %v2537_v12 = vand.u32 2147483648, %v2525_v40  ;;  %v2535_v38 = vand.u32 2147483647, %v2525_v40  ;;  %vm2531_vm11 = vweird.f32 %v2525_v40 }
0x11ff   :  { %v2508_v5 = vmul.f32 %v7842_v48, %v2506_v36  ;;  %v9003_v11 = vpop.eup %7843  ;;  %vm2513_vm7 = vweird.f32 %v7842_v48  ;;  %7847 = vtanh.f32 %v2501_v13  ;;  %v9072_v13 = vld [vmem:[#allocation2 + $0x6a0] sm:$0xff] }
0x1200   :  { %v2547_v28 = vmul.f32 %v9003_v11, %v8984_v39  ;;  %vm9014_vm9 = vmor %vm2512_vm8, %vm2513_vm7  ;;  %v2538_v50 = vor.u32 1.1754944e-38, %v2537_v12  ;;  %vm2536_vm14 = vcmp.eq.f32.partialorder %v2535_v38, 8.507059e+37  ;;  %vm2552_vm15 = vweird.f32 %v9003_v11  ;;  %10777 = vst [vmem:[#allocation15_spill] sm:$0xff] %v9072_v13  ;;  %v9092_v12 = vld [vmem:[#allocation2 + $0x880] sm:$0xff] }
0x1201   :  { %v2509_v34 = vsub.f32 1.0, %v2508_v5  ;;  %vm2553_vm6 = vmor %vm2551_vm2, %vm2552_vm15  ;;  %v9051_v5 = vld [vmem:[#allocation2 + $0x420] sm:$0xff]  ;;  %vm2556_vm7 = vcmp.eq.f32.partialorder %v2555_v44, 8.507059e+37  ;;  %2686 = vmatpush.msrb.mxu0 %v9092_v12 }
0x1202   :  { %v2548_v14 = vsub.f32 1.0, %v2547_v28  ;;  %v9081_v28 = vld [vmem:[#allocation2 + $0x640] sm:$0xff] }
0x1203   :  { %v2510_v56 = vmul.f32 %v7842_v48, %v2509_v34  ;;  %v2558_v34 = vor.u32 1.1754944e-38, %v2557_v10  ;;  %10780 = vst [vmem:[#allocation18_spill] sm:$0xff] %v9081_v28  ;;  %2687 = vmatpush.msrb.mxu0 %v9095_v22  ;;  %v2269_v38 = vld [vmem:[#allocation2 + $0x3e0] ss:$8 sm:$0x3] }
0x1204   :  { %v7846_v57 = vpop.eup %7845  ;;  %v2549_v59 = vmul.f32 %v9003_v11, %v2548_v14  ;;  %v9101_v14 = vld [vmem:[#allocation2 + $0x820] sm:$0xff] }
0x1205   :  { %v2527_v17 = vmul.f32 %v7846_v57, %v2525_v40  ;;  %v2511_v18 = vadd.f32 %v7842_v48, %v2510_v56  ;;  %vm2532_vm10 = vweird.f32 %v7846_v57  ;;  %v7848_v54 = vpop.eup %7847  ;;  %v9047_v40 = vld [vmem:[#allocation2 + $0x440] sm:$0xff] }
0x1206   :  { %vm2533_vm13 = vmor %vm2531_vm11, %vm2532_vm10  ;;  %v2550_v36 = vadd.f32 %v9003_v11, %v2549_v59  ;;  %2648 = vmatpush.msrb.mxu3 %v9047_v40  ;;  %v9113_v59 = vperm.slane %v2269_v38, 1  ;;  %vm2631_vm10 = vcmask 523264   ;;  %v9132_v44 = vld [vmem:[#allocation2 + $0x800] sm:$0xff] }
0x1207   :  { %v2528_v24 = vsub.f32 1.0, %v2527_v17  ;;  %v2515_v30 = vsel %vm9014_vm9, %v7842_v48, %v2511_v18  ;;  %v9074_v17 = vld [vmem:[#allocation2 + $0x680] sm:$0xff] }
0x1208   :  { %v2520_v51 = vsel %vm2517_vm12, %v2519_v63, %v2515_v30  ;;  %v2554_v48 = vsel %vm2553_vm6, %v9003_v11, %v2550_v36  ;;  %2649 = vmatpush.msrb.mxu3 %v9051_v5  ;;  %v9069_v11 = vld [vmem:[#allocation2 + $0x6c0] sm:$0xff]  ;;  %10778 = vst [vmem:[#allocation16_spill] sm:$0xff] %v9074_v17 }
0x1209   :  { %v2529_v16 = vmul.f32 %v7846_v57, %v2528_v24  ;;  %v2562_v1 = vmul.f32 %v7848_v54, %v2520_v51  ;;  %v2559_v56 = vsel %vm2556_vm7, %v2558_v34, %v2554_v48  ;;  %10776 = vst [vmem:[#allocation14_spill] sm:$0xff] %v9069_v11  ;;  %v9078_v18 = vld [vmem:[#allocation2 + $0x660] sm:$0xff] }
0x120a   :  { %2650 = vmatpush.msrb.mxu3 %v9054_v58  ;;  %10779 = vst [vmem:[#allocation17_spill] sm:$0xff] %v9078_v18  ;;  %v9086_v24 = vld [vmem:[#allocation2 + $0x600] sm:$0xff] }
0x120b   :  { %v2530_v46 = vadd.f32 %v7846_v57, %v2529_v16  ;;  %10782 = vst [vmem:[#allocation20_spill] sm:$0xff] %v9086_v24  ;;  %v2267_v16 = vld [vmem:[#allocation2 + $0x3c0] ss:$8 sm:$0x3] }
0x120c   :  { %v9098_v30 = vld [vmem:[#allocation2 + $0x840] sm:$0xff]  ;;  %v9103_v63 = vperm.slane %v2267_v16, 0  ;;  %v9111_v54 = vperm.slane %v2267_v16, 1  ;;  %10783 = vst [vmem:[#allocation21_spill] sm:$0xff] %v9113_v59 }
0x120d   :  { %v2534_v7 = vsel %vm2533_vm13, %v7846_v57, %v2530_v46  ;;  %v9059_v57 = vld [vmem:[#allocation2 + $0x6e0] sm:$0xff]  ;;  %2688 = vmatpush.msrb.mxu0 %v9098_v30  ;;  %v9106_v46 = vperm.slane %v2269_v38, 0 }
0x120e   :  { %v2539_v42 = vsel %vm2536_vm14, %v2538_v50, %v2534_v7  ;;  %10775 = vst [vmem:[#allocation13_spill] sm:$0xff] %v9059_v57  ;;  %2663 = vmatpush.msra.mxu3 %v9059_v57  ;;  %v9134_v48 = vld [vmem:[#allocation2 + $0x7e0] sm:$0xff] }
0x120f   :  { %v2561_v0 = vmul.f32 0.0, %v2539_v42  ;;  %2689 = vmatpush.msrb.mxu0 %v9101_v14  ;;  %v9137_v34 = vld [vmem:[#allocation2 + $0x7c0] sm:$0xff] }
0x1210   :  { %2664 = vmatpush.msra.mxu3 %v9069_v11  ;;  %v9147_v16 = vld [vmem:[#allocation2 + $0x760] sm:$0xff] }
0x1211   :  { %v9035_v35 = vadd.f32 %v2562_v1, %v2561_v0  ;;  %2690 = vmatpush.msrb.mxu0 %v9132_v44  ;;  %v9150_v38 = vld [vmem:[#allocation2 + $0x740] sm:$0xff] }
0x1212   :  { %2665 = vmatpush.msra.mxu3 %v9072_v13 }
0x1213   :  { %7849 = vtanh.f32 %v9035_v35  ;;  %2691 = vmatpush.msrb.mxu0 %v9134_v48 }
0x1214   :  { %2666 = vmatpush.msra.mxu3 %v9074_v17 }
0x1215   :  { %2692 = vmatpush.msrb.mxu0 %v9137_v34 }
0x1216   :  { %2667 = vmatpush.msra.mxu3 %v9078_v18 }
0x1218   :  { %2668 = vmatpush.msra.mxu3 %v9081_v28 }
0x1219   :  { %v7850_v60 = vpop.eup %7849 }
0x121a   :  { %v9057_v39 = vmul.f32 %v7850_v60, %v2559_v56  ;;  %2669 = vmatpush.msra.mxu3 %v9084_v25  ;;  %v9140_v60 = vld [vmem:[#allocation2 + $0x7a0] sm:$0xff] }
0x121b   :  { %2693 = vmatpush.msrb.mxu0 %v9140_v60  ;;  %v9144_v56 = vld [vmem:[#allocation2 + $0x780] sm:$0xff] }
0x121c   :  { %7392 = vmatmul.msk.f32.vlgmr.msra.gmra.mxu0 %vm210_vm4, %v9057_v39  ;;  %7394 = vmatmul.msk.f32.vlgmr.msrb.gmra.mxu2 %vm210_vm4, %v9057_v39 }
0x121d   :  { %7399 = vmatpush.msk.msrb.mxu2 %vm71_vm0, %v8913_v2  ;;  %2670 = vmatpush.msra.mxu3 %v9086_v24 }
0x121e   :  { %2694 = vmatpush.msrb.mxu0 %v9144_v56 }
0x1220   :  { %2695 = vmatpush.msrb.mxu0 %v9147_v16 }
0x1222   :  { %2696 = vmatpush.msrb.mxu0 %v9150_v38 }
0x1224   :  { %7407 = vmatpush.msk.msra.mxu0 %vm235_vm3, %v8929_v29 }
0x1299   :  { %v2597_v50 = vpop.f32.mrf.mxu0 }
0x129a   :  { %v2598_v51 = vadd.f32 %v2597_v50, %v9103_v63  ;;  %v2709_v50 = vld [vmem:[%s10645_s2] sm:$0xff] }
0x129b   :  { %2712 = vrot.lane.b32.xlu0 %v2709_v50, %s8278_s19  ;;  %2728 = vrot.lane.b32.xlu1 %v2709_v50, %s8279_s20 }
0x129c   :  { %vm2620_vm8 = vcmp.ge.f32.partialorder %v2598_v51, 0.0  ;;  %v2627_v7 = vmul.f32 %v9106_v46, %v2598_v51 }
0x129e   :  { %v2629_v42 = vsel %vm2620_vm8, %v2598_v51, %v2627_v7  ;;  %v9160_v7 = vld [vmem:[#allocation2 + $0x700] ss:$0 sm:$0xff] }
0x129f   :  { %v2617_v0 = vpop.f32.mrf.mxu2  ;;  %2651 = vmatmul.f32.vlgmr.msrb.gmra.mxu3 %v2629_v42  ;;  %10784 = vst [vmem:[#allocation22_spill] sm:$0xff] %v9160_v7 }
0x12a0   :  { %v2618_v1 = vadd.f32 %v2617_v0, %v9111_v54  ;;  %7411 = vmatpush.msk.msrb.mxu3 %vm235_vm3, %v8937_v53  ;;  %v9163_v0 = vld [vmem:[#allocation2 + $0x720] ss:$0 sm:$0xff] }
0x12a1   :  { %10785 = vst [vmem:[#allocation23_spill] sm:$0xff] %v9163_v0 }
0x12a2   :  { %v2628_v36 = vmul.f32 %v9113_v59, %v2618_v1  ;;  %vm2621_vm9 = vcmp.ge.f32.partialorder %v2618_v1, 0.0 }
0x12a4   :  { %v2630_v10 = vsel %vm2621_vm9, %v2618_v1, %v2628_v36 }
0x12a7   :  { %7395 = vmatmul.msk.f32.vlgmr.msra.gmra.mxu3 %vm2631_vm10, %v2630_v10 }
0x12a8   :  { %3068 = vmatpush.msra.mxu3 %v9059_v57 }
0x12aa   :  { %3069 = vmatpush.msra.mxu3 %v9069_v11 }
0x12ac   :  { %3070 = vmatpush.msra.mxu3 %v9072_v13 }
0x12ae   :  { %3071 = vmatpush.msra.mxu3 %v9074_v17 }
0x12af   :  { %7412 = vmatmul.msk.f32.vlgmr.msrb.gmra.mxu3 %vm210_vm4, %v9057_v39 }
0x12b0   :  { %3072 = vmatpush.msra.mxu3 %v9078_v18 }
0x12b2   :  { %3073 = vmatpush.msra.mxu3 %v9081_v28 }
0x12b4   :  { %3074 = vmatpush.msra.mxu3 %v9084_v25 }
0x12b6   :  { %3075 = vmatpush.msra.mxu3 %v9086_v24 }
0x12b8   :  { %7426 = vmatpush.msk.msrb.mxu3 %vm71_vm0, %v8917_v15 }
0x130d   :  { %v2713_v13 = vpop.permute.xlu0 %2712 }
0x1322   :  { %v2652_v51 = vpop.f32.mrf.mxu3 }
0x1323   :  { %v2653_v42 = vadd.f32 %v2652_v51, %v9160_v7  ;;  %v9173_v51 = vld [vmem:[#allocation2 + $0x8c0] ss:$0 sm:$0xff] }
0x1324   :  { %10786 = vst [vmem:[#allocation24_spill] sm:$0xff] %v9173_v51 }
0x132a   :  { %v2672_v1 = vpop.f32.mrf.mxu3 }
0x132b   :  { %v2673_v36 = vadd.f32 %v2672_v1, %v2653_v42 }
0x132d   :  { %vm2675_vm11 = vcmp.ge.f32.partialorder %v2673_v36, 0.0  ;;  %v2676_v10 = vmul.f32 %v2673_v36, %v9163_v0 }
0x132f   :  { %v2677_v15 = vsel %vm2675_vm11, %v2673_v36, %v2676_v10  ;;  %v10677_v36 = vmov 4  }
0x1330   :  { %7396 = vmatmul.msk.f32.vlgmr.msrb.gmra.mxu0 %vm1702_vm5, %v2677_v15  ;;  %7683 = vset.pattern.permute.xlu0 %v10677_v36 }
0x1331   :  { %7418 = vmatpush.msk.msrb.mxu0 %vm235_vm3, %v8976_v32  ;;  %7687 = vset.pattern.permute.xlu1 %v10677_v36 }
0x1338   :  { %7408 = vmatmul.msk.f32.vlgmr.msra.gmra.mxu0 %vm210_vm4, %v9057_v39 }
0x1339   :  { %7422 = vmatpush.msk.msra.mxu0 %vm71_vm0, %v8915_v23  ;;  %v10674_v23 = vmov 0  }
0x133a   :  { %7682 = vset.pattern.permute.xlu2 %v10674_v23 }
0x133b   :  { %2734 = vperm.xlu2 %7682, %v2709_v50  }
0x1343   :  { %7685 = vset.pattern.permute.xlu2 %v10677_v36  ;;  %v2309_v36 = vlaneseq }
0x1345   :  { %v9185_v59 = vand.u32 127, %v2309_v36 }
0x1347   :  { %vm2710_vm14 = vcmp.eq.s32.totalorder %v9185_v59, 0 }
0x13ad   :  { %v2698_v7 = vpop.f32.mrf.mxu0 }
0x13ae   :  { %v2699_v42 = vadd.f32 %v2698_v7, %v9173_v51 }
0x13b0   :  { %2701 = vst.msk [vmem:[%s10647_s4] sm:$0xff] %vm210_vm4, %v2699_v42  ;;  %7851 = vtanh.f32 %v2699_v42 }
0x13b6   :  { %v7852_v15 = vpop.eup %7851 }
0x13b7   :  { %v2705_v1 = vmul.f32 %v7852_v15, %v7852_v15  ;;  %v2715_v50 = vmul.f32 %v7852_v15, %v2713_v13 }
0x13b9   :  { %v2706_v10 = vsub.f32 1.0, %v2705_v1  ;;  %v2729_v1 = vpop.permute.xlu1 %2728 }
0x13bb   :  { %v2707_v32 = vmax.f32 %v2706_v10, 1e-05 }
0x13bd   :  { %v2708_v7 = vmin.f32 %v2707_v32, 1.0 }
0x13bf   :  { %7853 = vrsqrt.f32 %v2708_v7  ;;  %vm2723_vm12 = vcmp.eq.f32.partialorder %v2708_v7, inf  ;;  %v2726_v11 = vand.u32 2147483648, %v2708_v7  ;;  %vm2725_vm13 = vcmp.eq.f32.partialorder %v2708_v7, 0.0 }
0x13c5   :  { %v7854_v51 = vpop.eup %7853 }
0x13c6   :  { %v2717_v0 = vmul.f32 %v7854_v51, %v2708_v7 }
0x13c8   :  { %v2718_v24 = vmul.f32 %v7854_v51, %v2717_v0 }
0x13ca   :  { %v2719_v25 = vmul.f32 0.5, %v2718_v24  ;;  %v2735_v24 = vpop.permute.xlu2 %2734 }
0x13cc   :  { %v2720_v28 = vsub.f32 1.5, %v2719_v25 }
0x13ce   :  { %v2721_v18 = vmul.f32 %v7854_v51, %v2720_v28 }
0x13d0   :  { %v2722_v17 = vmul.f32 %v2721_v18, %v2708_v7 }
0x13d2   :  { %v2724_v57 = vsel %vm2723_vm12, %v2708_v7, %v2722_v17 }
0x13d3   :  { %v2727_v23 = vsel %vm2725_vm13, %v2726_v11, %v2724_v57  ;;  %v2702_v57 = vmul.f32 1.442695, %v2699_v42 }
0x13d4   :  { %v2731_v10 = vmul.f32 %v2729_v1, %v2727_v23 }
0x13d5   :  { %7855 = vpow2.f32 %v2702_v57  ;;  %v2918_v57 = vpop.f32.mrf.mxu3 }
0x13d6   :  { %v2732_v32 = vadd.f32 %v2731_v10, %v2715_v50  ;;  %v2878_v50 = vpop.f32.mrf.mxu0 }
0x13d8   :  { %2739 = vperm.xlu0 %7683, %v2732_v32  }
0x13db   :  { %v7856_v23 = vpop.eup %7855 }
0x13e0   :  { %7684 = vset.pattern.permute.xlu0 %v10787_v6 }
0x144a   :  { %v2740_v18 = vpop.permute.xlu0 %2739 }
0x144b   :  { %v2742_v28 = vsel %vm2710_vm14, %v2735_v24, %v2740_v18 }
0x144c   :  { %2744 = vrot.lane.b32.xlu2 %v2742_v28, %s8282_s23 }
0x14a6   :  { %v2745_v11 = vpop.permute.xlu2 %2744 }
0x14a7   :  { %v2747_v13 = vmul.f32 %v7856_v23, %v2745_v11 }
0x14a9   :  { %2749 = vrot.lane.b32.xlu1 %v2747_v13, %s8283_s24 }
0x151b   :  { %v2750_v17 = vpop.permute.xlu1 %2749 }
0x151c   :  { %v2752_v25 = vadd.f32 %v2750_v17, %v2699_v42 }
0x151e   :  { %2753 = vst.msk [vmem:[%s10648_s5 + $0x8] sm:$0xff] %vm46_vm1, %v2752_v25  ;;  %7398 = vmatmul.msk.f32.vlgmr.msra.gmra.mxu2 %vm46_vm1, %v2752_v25  ;;  %7402 = vmatmul.msk.f32.vlgmr.msra.gmra.mxu1 %vm46_vm1, %v2752_v25 }
0x151f   :  { %7403 = vmatpush.msk.msra.mxu2 %vm71_vm0, %v8923_v27  ;;  %7416 = vmatpush.msk.msra.mxu1 %vm235_vm3, %v8974_v49 }
0x1526   :  { %7400 = vmatmul.msk.f32.vlgmr.msrb.gmra.mxu2 %vm46_vm1, %v2752_v25  ;;  %7406 = vmatmul.msk.f32.vlgmr.msrb.gmra.mxu1 %vm210_vm4, %v9057_v39 }
0x1527   :  { %7409 = vmatpush.msk.msrb.mxu2 %vm235_vm3, %v8935_v19  ;;  %3090 = vmatpush.msrb.mxu1 %v9090_v26 }
0x1529   :  { %3091 = vmatpush.msrb.mxu1 %v9092_v12 }
0x152b   :  { %3092 = vmatpush.msrb.mxu1 %v9095_v22 }
0x152d   :  { %3093 = vmatpush.msrb.mxu1 %v9098_v30 }
0x152e   :  { %7404 = vmatmul.msk.f32.vlgmr.msra.gmra.mxu2 %vm46_vm1, %v2752_v25 }
0x152f   :  { %3040 = vmatpush.msra.mxu2 %v8986_v47  ;;  %3094 = vmatpush.msrb.mxu1 %v9101_v14 }
0x1531   :  { %3041 = vmatpush.msra.mxu2 %v8988_v41  ;;  %3095 = vmatpush.msrb.mxu1 %v9132_v44 }
0x1533   :  { %3042 = vmatpush.msra.mxu2 %v8992_v33  ;;  %3096 = vmatpush.msrb.mxu1 %v9134_v48 }
0x1535   :  { %3043 = vmatpush.msra.mxu2 %v8997_v55  ;;  %3097 = vmatpush.msrb.mxu1 %v9137_v34 }
0x1536   :  { %7410 = vmatmul.msk.f32.vlgmr.msrb.gmra.mxu2 %vm210_vm4, %v9057_v39 }
0x1537   :  { %3044 = vmatpush.msra.mxu2 %v9001_v31  ;;  %3098 = vmatpush.msrb.mxu1 %v9140_v60 }
0x1539   :  { %3045 = vmatpush.msra.mxu2 %v9006_v3  ;;  %3099 = vmatpush.msrb.mxu1 %v9144_v56 }
0x153b   :  { %3046 = vmatpush.msra.mxu2 %v9011_v21  ;;  %3100 = vmatpush.msrb.mxu1 %v9147_v16 }
0x153d   :  { %3047 = vmatpush.msra.mxu2 %v9018_v4  ;;  %3101 = vmatpush.msrb.mxu1 %v9150_v38 }
0x153f   :  { %3048 = vmatpush.msra.mxu2 %v9023_v43 }
0x1541   :  { %3049 = vmatpush.msra.mxu2 %v9026_v61 }
0x1543   :  { %3050 = vmatpush.msra.mxu2 %v9030_v62 }
0x1545   :  { %3051 = vmatpush.msra.mxu2 %v9033_v20 }
0x1547   :  { %3052 = vmatpush.msra.mxu2 %v9040_v37 }
0x1549   :  { %3053 = vmatpush.msra.mxu2 %v9047_v40 }
0x154b   :  { %3054 = vmatpush.msra.mxu2 %v9051_v5 }
0x154d   :  { %3055 = vmatpush.msra.mxu2 %v9054_v58 }
0x154f   :  { %7436 = vmatpush.msk.msrb.mxu2 %vm235_vm3, %v8937_v53 }
0x159b   :  { %v2814_v39 = vpop.f32.mrf.mxu1 }
0x15a1   :  { %v2774_v0 = vpop.f32.mrf.mxu2 }
0x15a2   :  { %v2837_v51 = vadd.f32 %v2774_v0, %v8965_v45 }
0x15a3   :  { %v2858_v42 = vpop.f32.mrf.mxu1 }
0x15a4   :  { %v2921_v15 = vadd.f32 %v2858_v42, %v2837_v51  ;;  %v2839_v42 = vadd.f32 %v2814_v39, %v8995_v52 }
0x15a6   :  { %v7413_v36 = vmul.f32 -1.442695, %v2921_v15 }
0x15a8   :  { %7857 = vpow2.f32 %v7413_v36 }
0x15a9   :  { %v2794_v7 = vpop.f32.mrf.mxu2 }
0x15aa   :  { %v2838_v1 = vadd.f32 %v2794_v7, %v8971_v9 }
0x15ac   :  { %v2922_v10 = vadd.f32 %v2878_v50, %v2838_v1 }
0x15ae   :  { %v7858_v32 = vpop.eup %7857  ;;  %v7414_v24 = vmul.f32 -1.442695, %v2922_v10 }
0x15af   :  { %v2928_v18 = vadd.f32 1.0, %v7858_v32 }
0x15b0   :  { %7859 = vpow2.f32 %v7414_v24 }
0x15b1   :  { %7861 = vrcp.f32 %v2928_v18  ;;  %v2834_v28 = vpop.f32.mrf.mxu2  ;;  %vm2934_vm2 = vweird.f32 %v2928_v18 }
0x15b2   :  { %v2840_v53 = vadd.f32 %v2834_v28, %v8967_v8  ;;  %v2940_v28 = vand.u32 2147483648, %v2928_v18 }
0x15b4   :  { %v2924_v23 = vadd.f32 %v2918_v57, %v2840_v53  ;;  %v2938_v57 = vand.u32 2147483647, %v2928_v18 }
0x15b6   :  { %v7860_v11 = vpop.eup %7859  ;;  %v7415_v13 = vmul.f32 -1.442695, %v2924_v23  ;;  %vm2939_vm9 = vcmp.eq.f32.partialorder %v2938_v57, 8.507059e+37 }
0x15b7   :  { %v7862_v17 = vpop.eup %7861  ;;  %v2947_v25 = vadd.f32 1.0, %v7860_v11 }
0x15b8   :  { %v2930_v0 = vmul.f32 %v7862_v17, %v2928_v18  ;;  %7863 = vpow2.f32 %v7415_v13  ;;  %vm2935_vm15 = vweird.f32 %v7862_v17 }
0x15b9   :  { %7865 = vrcp.f32 %v2947_v25  ;;  %v2898_v51 = vpop.f32.mrf.mxu2  ;;  %v2959_v23 = vand.u32 2147483648, %v2947_v25  ;;  %vm2936_vm6 = vmor %vm2934_vm2, %vm2935_vm15  ;;  %v2957_v39 = vand.u32 2147483647, %v2947_v25  ;;  %vm2953_vm8 = vweird.f32 %v2947_v25 }
0x15ba   :  { %v2931_v15 = vsub.f32 1.0, %v2930_v0  ;;  %v2923_v36 = vadd.f32 %v2898_v51, %v2839_v42  ;;  %v2941_v0 = vor.u32 1.1754944e-38, %v2940_v28 }
0x15bb   :  { %vm2958_vm12 = vcmp.eq.f32.partialorder %v2957_v39, 8.507059e+37 }
0x15bc   :  { %v2932_v7 = vmul.f32 %v7862_v17, %v2931_v15  ;;  %7867 = vtanh.f32 %v2923_v36  ;;  %v2960_v36 = vor.u32 1.1754944e-38, %v2959_v23 }
0x15be   :  { %v7864_v1 = vpop.eup %7863  ;;  %v2933_v24 = vadd.f32 %v7862_v17, %v2932_v7 }
0x15bf   :  { %v7866_v50 = vpop.eup %7865  ;;  %v2967_v10 = vadd.f32 1.0, %v7864_v1 }
0x15c0   :  { %v2949_v32 = vmul.f32 %v7866_v50, %v2947_v25  ;;  %v2937_v13 = vsel %vm2936_vm6, %v7862_v17, %v2933_v24  ;;  %vm2954_vm7 = vweird.f32 %v7866_v50 }
0x15c1   :  { %7869 = vrcp.f32 %v2967_v10  ;;  %v2942_v7 = vsel %vm2939_vm9, %v2941_v0, %v2937_v13  ;;  %vm2955_vm11 = vmor %vm2953_vm8, %vm2954_vm7  ;;  %v2979_v25 = vand.u32 2147483648, %v2967_v10  ;;  %vm2973_vm15 = vweird.f32 %v2967_v10 }
0x15c2   :  { %v2950_v53 = vsub.f32 1.0, %v2949_v32  ;;  %v7868_v51 = vpop.eup %7867  ;;  %v2977_v57 = vand.u32 2147483647, %v2967_v10 }
0x15c4   :  { %v2951_v11 = vmul.f32 %v7866_v50, %v2950_v53  ;;  %v2984_v53 = vmul.f32 %v7868_v51, %v2942_v7  ;;  %vm2978_vm6 = vcmp.eq.f32.partialorder %v2977_v57, 8.507059e+37  ;;  %v10788_v51 = vld [vmem:[#allocation21_spill] sm:$0xff]  ;;  %v3114_v57 = vld [vmem:[%s10645_s2 + $0x8] sm:$0xff] }
0x15c5   :  { %3116 = vrot.lane.b32.xlu2 %v3114_v57, %s8278_s19  ;;  %3132 = vrot.lane.b32.xlu1 %v3114_v57, %s8279_s20 }
0x15c6   :  { %v2952_v42 = vadd.f32 %v7866_v50, %v2951_v11  ;;  %v2980_v11 = vor.u32 1.1754944e-38, %v2979_v25  ;;  %v10798_v25 = vld [vmem:[#allocation6_spill] sm:$0xff]  ;;  %3138 = vperm.xlu0 %7684, %v3114_v57  }
0x15c7   :  { %v7870_v15 = vpop.eup %7869 }
0x15c8   :  { %v2969_v1 = vmul.f32 %v7870_v15, %v2967_v10  ;;  %v2956_v52 = vsel %vm2955_vm11, %v7866_v50, %v2952_v42  ;;  %vm2974_vm13 = vweird.f32 %v7870_v15 }
0x15c9   :  { %v2961_v32 = vsel %vm2958_vm12, %v2960_v36, %v2956_v52  ;;  %vm2975_vm2 = vmor %vm2973_vm15, %vm2974_vm13  ;;  %v10791_v36 = vld [vmem:[#allocation14_spill] sm:$0xff] }
0x15ca   :  { %v2970_v18 = vsub.f32 1.0, %v2969_v1  ;;  %v2983_v8 = vmul.f32 %v2961_v32, %v9035_v35  ;;  %v10792_v1 = vld [vmem:[#allocation15_spill] sm:$0xff]  ;;  %v10793_v32 = vld [vmem:[#allocation16_spill] sm:$0xff] }
0x15cc   :  { %v2971_v17 = vmul.f32 %v7870_v15, %v2970_v18  ;;  %v9245_v24 = vadd.f32 %v2984_v53, %v2983_v8  ;;  %v10794_v18 = vld [vmem:[#allocation17_spill] sm:$0xff]  ;;  %v10795_v53 = vld [vmem:[#allocation18_spill] sm:$0xff] }
0x15ce   :  { %v2972_v28 = vadd.f32 %v7870_v15, %v2971_v17  ;;  %7871 = vtanh.f32 %v9245_v24  ;;  %v10796_v17 = vld [vmem:[#allocation19_spill] sm:$0xff] }
0x15d0   :  { %v2976_v23 = vsel %vm2975_vm2, %v7870_v15, %v2972_v28  ;;  %v10797_v28 = vld [vmem:[#allocation20_spill] sm:$0xff] }
0x15d1   :  { %v2981_v52 = vsel %vm2978_vm6, %v2980_v11, %v2976_v23  ;;  %v10799_v23 = vmov 4  }
0x15d2   :  { %7688 = vset.pattern.permute.xlu0 %v10799_v23 }
0x15d4   :  { %v7872_v50 = vpop.eup %7871 }
0x15d5   :  { %v9248_v13 = vmul.f32 %v7872_v50, %v2981_v52  ;;  %v10800_v50 = vld [vmem:[#allocation22_spill] sm:$0xff] }
0x15d7   :  { %7417 = vmatmul.msk.f32.vlgmr.msra.gmra.mxu1 %vm210_vm4, %v9248_v13  ;;  %7419 = vmatmul.msk.f32.vlgmr.msrb.gmra.mxu0 %vm210_vm4, %v9248_v13 }
0x15d8   :  { %7432 = vmatpush.msk.msra.mxu1 %vm235_vm3, %v8929_v29  ;;  %7424 = vmatpush.msk.msrb.mxu0 %vm71_vm0, %v8913_v2  ;;  %v10789_v29 = vld [vmem:[#allocation7_spill] sm:$0xff]  ;;  %v10790_v2 = vld [vmem:[#allocation13_spill] sm:$0xff] }
0x1654   :  { %v3008_v8 = vpop.f32.mrf.mxu1  ;;  %v3028_v35 = vpop.f32.mrf.mxu0 }
0x1655   :  { %v3009_v10 = vadd.f32 %v3008_v8, %v9103_v63  ;;  %v3029_v39 = vadd.f32 %v3028_v35, %v9111_v54 }
0x1657   :  { %vm3031_vm7 = vcmp.ge.f32.partialorder %v3009_v10, 0.0  ;;  %v3033_v0 = vmul.f32 %v3009_v10, %v9106_v46  ;;  %vm3032_vm8 = vcmp.ge.f32.partialorder %v3029_v39, 0.0  ;;  %v3034_v42 = vmul.f32 %v3029_v39, %v10788_v51 }
0x1659   :  { %v3036_v15 = vsel %vm3032_vm8, %v3029_v39, %v3034_v42  ;;  %v3035_v7 = vsel %vm3031_vm7, %v3009_v10, %v3033_v0  ;;  %v10801_v10 = vld [vmem:[#allocation23_spill] sm:$0xff] }
0x165a   :  { %3056 = vmatmul.f32.vlgmr.msra.gmra.mxu2 %v3035_v7  ;;  %7420 = vmatmul.msk.f32.vlgmr.msra.gmra.mxu3 %vm2631_vm10, %v3036_v15  ;;  %v10802_v42 = vld [vmem:[#allocation11_spill] sm:$0xff]  ;;  %v10803_v15 = vld [vmem:[#allocation5_spill] sm:$0xff] }
0x165b   :  { %7430 = vmatpush.msk.msra.mxu3 %vm235_vm3, %v10789_v29  ;;  %3472 = vmatpush.msra.mxu2 %v10790_v2  ;;  %v10804_v29 = vld [vmem:[#allocation24_spill] sm:$0xff] }
0x165d   :  { %3473 = vmatpush.msra.mxu2 %v10791_v36 }
0x165f   :  { %3474 = vmatpush.msra.mxu2 %v10792_v1 }
0x1661   :  { %3475 = vmatpush.msra.mxu2 %v10793_v32 }
0x1662   :  { %7437 = vmatmul.msk.f32.vlgmr.msrb.gmra.mxu2 %vm210_vm4, %v9248_v13 }
0x1663   :  { %3476 = vmatpush.msra.mxu2 %v10794_v18 }
0x1665   :  { %3477 = vmatpush.msra.mxu2 %v10795_v53 }
0x1667   :  { %3478 = vmatpush.msra.mxu2 %v10796_v17 }
0x1669   :  { %3479 = vmatpush.msra.mxu2 %v10797_v28  ;;  %v3133_v28 = vpop.permute.xlu1 %3132 }
0x166b   :  { %7451 = vmatpush.msk.msrb.mxu2 %vm71_vm0, %v10798_v25 }
0x16dd   :  { %v3057_v11 = vpop.f32.mrf.mxu2  ;;  %v3077_v8 = vpop.f32.mrf.mxu3 }
0x16de   :  { %v3058_v52 = vadd.f32 %v3057_v11, %v10800_v50 }
0x16e0   :  { %v3078_v35 = vadd.f32 %v3077_v8, %v3058_v52 }
0x16e2   :  { %vm3080_vm9 = vcmp.ge.f32.partialorder %v3078_v35, 0.0  ;;  %v3081_v39 = vmul.f32 %v3078_v35, %v10801_v10 }
0x16e4   :  { %v3082_v0 = vsel %vm3080_vm9, %v3078_v35, %v3081_v39 }
0x16e5   :  { %7421 = vmatmul.msk.f32.vlgmr.msrb.gmra.mxu1 %vm1702_vm5, %v3082_v0 }
0x16e6   :  { %7443 = vmatpush.msk.msrb.mxu1 %vm235_vm3, %v10802_v42 }
0x16ed   :  { %7433 = vmatmul.msk.f32.vlgmr.msra.gmra.mxu1 %vm210_vm4, %v9248_v13 }
0x16ee   :  { %7447 = vmatpush.msk.msra.mxu1 %vm71_vm0, %v10803_v15 }
0x1762   :  { %v3103_v7 = vpop.f32.mrf.mxu1 }
0x1763   :  { %v3104_v25 = vadd.f32 %v3103_v7, %v10804_v29  ;;  %v3117_v7 = vpop.permute.xlu2 %3116 }
0x1765   :  { %3106 = vst.msk [vmem:[%s10647_s4 + $0x8] sm:$0xff] %vm210_vm4, %v3104_v25  ;;  %7873 = vtanh.f32 %v3104_v25 }
0x176b   :  { %v7874_v57 = vpop.eup %7873 }
0x176c   :  { %v3110_v23 = vmul.f32 %v7874_v57, %v7874_v57  ;;  %v3119_v18 = vmul.f32 %v7874_v57, %v3117_v7 }
0x176e   :  { %v3111_v11 = vsub.f32 1.0, %v3110_v23 }
0x1770   :  { %v3112_v52 = vmax.f32 %v3111_v11, 1e-05  ;;  %v3139_v11 = vpop.permute.xlu0 %3138 }
0x1772   :  { %v3113_v8 = vmin.f32 %v3112_v52, 1.0 }
0x1774   :  { %7875 = vrsqrt.f32 %v3113_v8  ;;  %vm3127_vm11 = vcmp.eq.f32.partialorder %v3113_v8, inf  ;;  %v3130_v29 = vand.u32 2147483648, %v3113_v8  ;;  %vm3129_vm12 = vcmp.eq.f32.partialorder %v3113_v8, 0.0 }
0x177a   :  { %v7876_v35 = vpop.eup %7875 }
0x177b   :  { %v3121_v39 = vmul.f32 %v7876_v35, %v3113_v8 }
0x177d   :  { %v3122_v0 = vmul.f32 %v7876_v35, %v3121_v39 }
0x177f   :  { %v3123_v42 = vmul.f32 0.5, %v3122_v0 }
0x1781   :  { %v3124_v15 = vsub.f32 1.5, %v3123_v42 }
0x1783   :  { %v3125_v10 = vmul.f32 %v7876_v35, %v3124_v15 }
0x1785   :  { %v3126_v50 = vmul.f32 %v3125_v10, %v3113_v8  ;;  %v3107_v10 = vmul.f32 1.442695, %v3104_v25 }
0x1787   :  { %v3128_v17 = vsel %vm3127_vm11, %v3113_v8, %v3126_v50  ;;  %7877 = vpow2.f32 %v3107_v10 }
0x1788   :  { %v3131_v53 = vsel %vm3129_vm12, %v3130_v29, %v3128_v17 }
0x1789   :  { %v3135_v32 = vmul.f32 %v3133_v28, %v3131_v53 }
0x178b   :  { %v3136_v23 = vadd.f32 %v3135_v32, %v3119_v18 }
0x178d   :  { %3143 = vperm.xlu2 %7685, %v3136_v23   ;;  %v7878_v35 = vpop.eup %7877 }
0x1795   :  { %7686 = vset.pattern.permute.xlu2 %v10787_v6 }
0x17e7   :  { %v3144_v52 = vpop.permute.xlu2 %3143 }
0x17e8   :  { %v3146_v39 = vsel %vm2710_vm14, %v3139_v11, %v3144_v52 }
0x17e9   :  { %3148 = vrot.lane.b32.xlu1 %v3146_v39, %s8282_s23 }
0x185b   :  { %v3149_v0 = vpop.permute.xlu1 %3148 }
0x185c   :  { %v3151_v50 = vmul.f32 %v7878_v35, %v3149_v0 }
0x185e   :  { %3153 = vrot.lane.b32.xlu2 %v3151_v50, %s8283_s24 }
0x18b8   :  { %v3154_v17 = vpop.permute.xlu2 %3153 }
0x18b9   :  { %v3156_v53 = vadd.f32 %v3154_v17, %v3104_v25 }
0x18bb   :  { %3157 = vst.msk [vmem:[%s10648_s5 + $0x10] sm:$0xff] %vm46_vm1, %v3156_v53  ;;  %7423 = vmatmul.msk.f32.vlgmr.msra.gmra.mxu0 %vm46_vm1, %v3156_v53  ;;  %7427 = vmatmul.msk.f32.vlgmr.msrb.gmra.mxu3 %vm46_vm1, %v3156_v53 }
0x18bc   :  { %7428 = vmatpush.msk.msra.mxu0 %vm71_vm0, %v8923_v27  ;;  %7441 = vmatpush.msk.msrb.mxu3 %vm235_vm3, %v8974_v49  ;;  %v9348_v27 = vld [vmem:[#allocation2 + $0x378] sm:$0x1f] }
0x18bd   :  { %10805 = vst [vmem:[#allocation21_spill] sm:$0xff] %v9348_v27 }
0x18c3   :  { %7425 = vmatmul.msk.f32.vlgmr.msrb.gmra.mxu0 %vm46_vm1, %v3156_v53  ;;  %7431 = vmatmul.msk.f32.vlgmr.msra.gmra.mxu3 %vm210_vm4, %v9248_v13 }
0x18c4   :  { %7434 = vmatpush.msk.msrb.mxu0 %vm235_vm3, %v8935_v19  ;;  %3494 = vmatpush.msra.mxu3 %v9090_v26 }
0x18c6   :  { %3495 = vmatpush.msra.mxu3 %v9092_v12 }
0x18c8   :  { %3496 = vmatpush.msra.mxu3 %v9095_v22 }
0x18ca   :  { %3497 = vmatpush.msra.mxu3 %v9098_v30 }
0x18cb   :  { %7429 = vmatmul.msk.f32.vlgmr.msra.gmra.mxu0 %vm46_vm1, %v3156_v53 }
0x18cc   :  { %3444 = vmatpush.msra.mxu0 %v8986_v47  ;;  %3498 = vmatpush.msra.mxu3 %v9101_v14 }
0x18ce   :  { %3445 = vmatpush.msra.mxu0 %v8988_v41  ;;  %3499 = vmatpush.msra.mxu3 %v9132_v44  ;;  %v3282_v41 = vpop.f32.mrf.mxu1 }
0x18d0   :  { %3446 = vmatpush.msra.mxu0 %v8992_v33  ;;  %3500 = vmatpush.msra.mxu3 %v9134_v48 }
0x18d2   :  { %3447 = vmatpush.msra.mxu0 %v8997_v55  ;;  %3501 = vmatpush.msra.mxu3 %v9137_v34  ;;  %v10807_v34 = vld [vmem:[#allocation12_spill] sm:$0xff] }
0x18d3   :  { %7435 = vmatmul.msk.f32.vlgmr.msrb.gmra.mxu0 %vm210_vm4, %v9248_v13 }
0x18d4   :  { %3448 = vmatpush.msra.mxu0 %v9001_v31  ;;  %3502 = vmatpush.msra.mxu3 %v9140_v60 }
0x18d6   :  { %3449 = vmatpush.msra.mxu0 %v9006_v3  ;;  %3503 = vmatpush.msra.mxu3 %v9144_v56 }
0x18d8   :  { %3450 = vmatpush.msra.mxu0 %v9011_v21  ;;  %3504 = vmatpush.msra.mxu3 %v9147_v16 }
0x18da   :  { %3451 = vmatpush.msra.mxu0 %v9018_v4  ;;  %3505 = vmatpush.msra.mxu3 %v9150_v38 }
0x18dc   :  { %3452 = vmatpush.msra.mxu0 %v9023_v43 }
0x18de   :  { %3453 = vmatpush.msra.mxu0 %v9026_v61  ;;  %v10806_v61 = vld [vmem:[#allocation9_spill] sm:$0xff] }
0x18e0   :  { %3454 = vmatpush.msra.mxu0 %v9030_v62 }
0x18e2   :  { %3455 = vmatpush.msra.mxu0 %v9033_v20  ;;  %v3322_v20 = vpop.f32.mrf.mxu2 }
0x18e4   :  { %3456 = vmatpush.msra.mxu0 %v9040_v37 }
0x18e6   :  { %3457 = vmatpush.msra.mxu0 %v9047_v40 }
0x18e8   :  { %3458 = vmatpush.msra.mxu0 %v9051_v5 }
0x18ea   :  { %3459 = vmatpush.msra.mxu0 %v9054_v58 }
0x18ec   :  { %7461 = vmatpush.msk.msrb.mxu0 %vm235_vm3, %v9348_v27 }
0x1938   :  { %v3178_v6 = vpop.f32.mrf.mxu0 }
0x1939   :  { %v3241_v55 = vadd.f32 %v3178_v6, %v8965_v45 }
0x193e   :  { %v3218_v19 = vpop.f32.mrf.mxu3 }
0x193f   :  { %v3243_v60 = vadd.f32 %v3218_v19, %v10807_v34 }
0x1940   :  { %v3198_v49 = vpop.f32.mrf.mxu0 }
0x1941   :  { %v3242_v47 = vadd.f32 %v3198_v49, %v8971_v9 }
0x1943   :  { %v3326_v33 = vadd.f32 %v3282_v41, %v3242_v47 }
0x1945   :  { %v7439_v31 = vmul.f32 -1.442695, %v3326_v33 }
0x1946   :  { %v3262_v3 = vpop.f32.mrf.mxu3 }
0x1947   :  { %7879 = vpow2.f32 %v7439_v31  ;;  %v3325_v21 = vadd.f32 %v3262_v3, %v3241_v55 }
0x1948   :  { %v3238_v4 = vpop.f32.mrf.mxu0 }
0x1949   :  { %v7438_v43 = vmul.f32 -1.442695, %v3325_v21  ;;  %v3244_v62 = vadd.f32 %v3238_v4, %v10806_v61 }
0x194b   :  { %7881 = vpow2.f32 %v7438_v43  ;;  %v3328_v37 = vadd.f32 %v3322_v20, %v3244_v62  ;;  %v9370_v43 = vld [vmem:[#allocation2 + $0x348] sm:$0x3] }
0x194d   :  { %v7880_v40 = vpop.eup %7879  ;;  %v7440_v5 = vmul.f32 -1.442695, %v3328_v37 }
0x194e   :  { %v3351_v58 = vadd.f32 1.0, %v7880_v40 }
0x194f   :  { %7883 = vpow2.f32 %v7440_v5 }
0x1950   :  { %7885 = vrcp.f32 %v3351_v58  ;;  %v3302_v48 = vpop.f32.mrf.mxu0  ;;  %v3363_v18 = vand.u32 2147483648, %v3351_v58  ;;  %vm3357_vm15 = vweird.f32 %v3351_v58  ;;  %v3361_v25 = vand.u32 2147483647, %v3351_v58 }
0x1951   :  { %v7882_v26 = vpop.eup %7881  ;;  %v3327_v38 = vadd.f32 %v3302_v48, %v3243_v60  ;;  %v10811_v48 = vld [vmem:[#allocation19_spill] sm:$0xff]  ;;  %v10812_v60 = vld [vmem:[#allocation20_spill] sm:$0xff] }
0x1952   :  { %v3332_v12 = vadd.f32 1.0, %v7882_v26  ;;  %v3364_v11 = vor.u32 1.1754944e-38, %v3363_v18  ;;  %vm3362_vm8 = vcmp.eq.f32.partialorder %v3361_v25, 8.507059e+37  ;;  %v9378_v26 = vld [vmem:[#allocation2 + $0x360] sm:$0x1f] }
0x1953   :  { %v9411_v25 = vld [vmem:[#allocation2 + $0x340] sm:$0x3] }
0x1954   :  { %7887 = vrcp.f32 %v3332_v12  ;;  %v3342_v8 = vand.u32 2147483647, %v3332_v12  ;;  %v3344_v42 = vand.u32 2147483648, %v3332_v12  ;;  %vm3338_vm7 = vweird.f32 %v3332_v12  ;;  %10817 = vst [vmem:[#allocation14_spill] sm:$0xff] %v9411_v25 }
0x1955   :  { %v7884_v22 = vpop.eup %7883 }
0x1956   :  { %v7886_v30 = vpop.eup %7885  ;;  %v3371_v14 = vadd.f32 1.0, %v7884_v22  ;;  %v3345_v10 = vor.u32 1.1754944e-38, %v3344_v42  ;;  %vm3343_vm11 = vcmp.eq.f32.partialorder %v3342_v8, 8.507059e+37  ;;  %v10818_v8 = vld [vmem:[#allocation24_spill] sm:$0xff] }
0x1957   :  { %v3353_v44 = vmul.f32 %v7886_v30, %v3351_v58  ;;  %vm3358_vm13 = vweird.f32 %v7886_v30 }
0x1958   :  { %7889 = vrcp.f32 %v3371_v14  ;;  %vm3359_vm2 = vmor %vm3357_vm15, %vm3358_vm13  ;;  %v3383_v41 = vand.u32 2147483648, %v3371_v14  ;;  %vm3377_vm13 = vweird.f32 %v3371_v14  ;;  %v3381_v33 = vand.u32 2147483647, %v3371_v14 }
0x1959   :  { %v3354_v56 = vsub.f32 1.0, %v3353_v44  ;;  %7891 = vtanh.f32 %v3327_v38  ;;  %v10810_v44 = vld [vmem:[#allocation18_spill] sm:$0xff] }
0x195a   :  { %v7888_v16 = vpop.eup %7887  ;;  %v3384_v31 = vor.u32 1.1754944e-38, %v3383_v41 }
0x195b   :  { %v3355_v13 = vmul.f32 %v7886_v30, %v3354_v56  ;;  %v3334_v32 = vmul.f32 %v7888_v16, %v3332_v12  ;;  %vm3339_vm6 = vweird.f32 %v7888_v16  ;;  %v9393_v56 = vld [vmem:[#allocation2 + $0x350] sm:$0x3] }
0x195c   :  { %vm3340_vm9 = vmor %vm3338_vm7, %vm3339_vm6  ;;  %10813 = vst [vmem:[#allocation7_spill] sm:$0xff] %v9393_v56 }
0x195d   :  { %v3335_v28 = vsub.f32 1.0, %v3334_v32  ;;  %v3356_v29 = vadd.f32 %v7886_v30, %v3355_v13  ;;  %v10815_v32 = vld [vmem:[#allocation23_spill] sm:$0xff] }
0x195e   :  { %v7890_v57 = vpop.eup %7889 }
0x195f   :  { %v3373_v15 = vmul.f32 %v7890_v57, %v3371_v14  ;;  %v3336_v7 = vmul.f32 %v7888_v16, %v3335_v28  ;;  %v3360_v23 = vsel %vm3359_vm2, %v7886_v30, %v3356_v29  ;;  %v7892_v50 = vpop.eup %7891  ;;  %vm3378_vm12 = vweird.f32 %v7890_v57  ;;  %v10808_v30 = vld [vmem:[#allocation16_spill] sm:$0xff]  ;;  %v10809_v14 = vld [vmem:[#allocation17_spill] sm:$0xff]  ;;  %v9405_v29 = vld [vmem:[#allocation2 + $0x3a8] sm:$0x1f] }
0x1960   :  { %v3365_v35 = vsel %vm3362_vm8, %v3364_v11, %v3360_v23  ;;  %vm3379_vm15 = vmor %vm3377_vm13, %vm3378_vm12  ;;  %vm3382_vm2 = vcmp.eq.f32.partialorder %v3381_v33, 8.507059e+37  ;;  %10816 = vst [vmem:[#allocation13_spill] sm:$0xff] %v9405_v29 }
0x1961   :  { %v3374_v52 = vsub.f32 1.0, %v3373_v15  ;;  %v3337_v39 = vadd.f32 %v7888_v16, %v3336_v7  ;;  %v3387_v6 = vmul.f32 %v3365_v35, %v9245_v24  ;;  %v9366_v24 = vld [vmem:[#allocation2 + $0x368] sm:$0x1f] }
0x1963   :  { %v3341_v0 = vsel %vm3340_vm9, %v7888_v16, %v3337_v39  ;;  %v3375_v17 = vmul.f32 %v7890_v57, %v3374_v52 }
0x1964   :  { %v3346_v53 = vsel %vm3343_vm11, %v3345_v10, %v3341_v0 }
0x1965   :  { %v3388_v19 = vmul.f32 %v7892_v50, %v3346_v53  ;;  %v3376_v47 = vadd.f32 %v7890_v57, %v3375_v17 }
0x1967   :  { %v9357_v49 = vadd.f32 %v3388_v19, %v3387_v6  ;;  %v3380_v55 = vsel %vm3379_vm15, %v7890_v57, %v3376_v47 }
0x1968   :  { %v3385_v21 = vsel %vm3382_vm2, %v3384_v31, %v3380_v55 }
0x1969   :  { %7893 = vtanh.f32 %v9357_v49 }
0x196f   :  { %v7894_v3 = vpop.eup %7893 }
0x1970   :  { %v9360_v4 = vmul.f32 %v7894_v3, %v3385_v21 }
0x1972   :  { %7442 = vmatmul.msk.f32.vlgmr.msrb.gmra.mxu3 %vm210_vm4, %v9360_v4  ;;  %7444 = vmatmul.msk.f32.vlgmr.msrb.gmra.mxu1 %vm210_vm4, %v9360_v4 }
0x1973   :  { %7457 = vmatpush.msk.msrb.mxu3 %vm235_vm3, %v9366_v24  ;;  %7449 = vmatpush.msk.msrb.mxu1 %vm71_vm0, %v9370_v43 }
0x19ef   :  { %v3432_v62 = vpop.f32.mrf.mxu1 }
0x19f0   :  { %v3433_v20 = vadd.f32 %v3432_v62, %v9111_v54 }
0x19f2   :  { %vm3436_vm6 = vcmp.ge.f32.partialorder %v3433_v20, 0.0  ;;  %v3438_v37 = vmul.f32 %v3433_v20, %v10788_v51 }
0x19f4   :  { %v3440_v40 = vsel %vm3436_vm6, %v3433_v20, %v3438_v37  ;;  %v3922_v37 = vld [vmem:[%s10645_s2 + $0x18] sm:$0xff] }
0x19f5   :  { %v3412_v5 = vpop.f32.mrf.mxu3  ;;  %7445 = vmatmul.msk.f32.vlgmr.msra.gmra.mxu2 %vm2631_vm10, %v3440_v40 }
0x19f6   :  { %v3413_v58 = vadd.f32 %v3412_v5, %v9103_v63  ;;  %7455 = vmatpush.msk.msra.mxu2 %vm235_vm3, %v9378_v26 }
0x19f8   :  { %vm3435_vm7 = vcmp.ge.f32.partialorder %v3413_v58, 0.0  ;;  %v3437_v12 = vmul.f32 %v3413_v58, %v9106_v46 }
0x19fa   :  { %v3439_v22 = vsel %vm3435_vm7, %v3413_v58, %v3437_v12 }
0x19fb   :  { %3460 = vmatmul.f32.vlgmr.msra.gmra.mxu0 %v3439_v22 }
0x19fc   :  { %3876 = vmatpush.msra.mxu0 %v10790_v2  ;;  %v3518_v2 = vld [vmem:[%s10645_s2 + $0x10] sm:$0xff] }
0x19fd   :  { %3520 = vrot.lane.b32.xlu1 %v3518_v2, %s8278_s19  ;;  %3536 = vrot.lane.b32.xlu0 %v3518_v2, %s8279_s20 }
0x19fe   :  { %3877 = vmatpush.msra.mxu0 %v10791_v36  ;;  %3542 = vperm.xlu2 %7686, %v3518_v2   ;;  %v9453_v2 = vld [vmem:[#allocation2 + $0x880] sm:$0xff] }
0x1a00   :  { %3878 = vmatpush.msra.mxu0 %v10792_v1  ;;  %v10814_v1 = vld [vmem:[#allocation22_spill] sm:$0xff] }
0x1a02   :  { %3879 = vmatpush.msra.mxu0 %v10808_v30 }
0x1a03   :  { %7462 = vmatmul.msk.f32.vlgmr.msrb.gmra.mxu0 %vm210_vm4, %v9360_v4 }
0x1a04   :  { %3880 = vmatpush.msra.mxu0 %v10809_v14  ;;  %v9435_v14 = vld [vmem:[#allocation2 + $0x358] sm:$0x3] }
0x1a06   :  { %3881 = vmatpush.msra.mxu0 %v10810_v44  ;;  %v9439_v44 = vld [vmem:[#allocation2 + $0x3a0] sm:$0x1f] }
0x1a08   :  { %3882 = vmatpush.msra.mxu0 %v10811_v48  ;;  %v9446_v48 = vld [vmem:[#allocation2 + $0x370] sm:$0x1f] }
0x1a0a   :  { %3883 = vmatpush.msra.mxu0 %v10812_v60  ;;  %v9450_v60 = vld [vmem:[#allocation2 + $0x8a0] sm:$0xff] }
0x1a0c   :  { %7476 = vmatpush.msk.msrb.mxu0 %vm71_vm0, %v9393_v56 }
0x1a58   :  { %v3543_v21 = vpop.permute.xlu2 %3542 }
0x1a6f   :  { %v3521_v6 = vpop.permute.xlu1 %3520  ;;  %v3537_v47 = vpop.permute.xlu0 %3536 }
0x1a78   :  { %v3461_v36 = vpop.f32.mrf.mxu0  ;;  %v3481_v38 = vpop.f32.mrf.mxu2 }
0x1a79   :  { %v3462_v16 = vadd.f32 %v3461_v36, %v10814_v1  ;;  %v9456_v36 = vld [vmem:[#allocation2 + $0x860] sm:$0xff] }
0x1a7a   :  { %v9459_v1 = vld [vmem:[#allocation2 + $0x840] sm:$0xff] }
0x1a7b   :  { %v3482_v13 = vadd.f32 %v3481_v38, %v3462_v16  ;;  %v9463_v16 = vld [vmem:[#allocation2 + $0x5e0] sm:$0xff] }
0x1a7c   :  { %v9466_v38 = vld [vmem:[#allocation2 + $0x820] sm:$0xff] }
0x1a7d   :  { %vm3484_vm8 = vcmp.ge.f32.partialorder %v3482_v13, 0.0  ;;  %v3485_v18 = vmul.f32 %v3482_v13, %v10815_v32  ;;  %v9472_v32 = vld [vmem:[#allocation2 + $0x800] sm:$0xff] }
0x1a7f   :  { %v3486_v28 = vsel %vm3484_vm8, %v3482_v13, %v3485_v18  ;;  %v9469_v13 = vld [vmem:[#allocation2 + $0x5c0] sm:$0xff] }
0x1a80   :  { %7446 = vmatmul.msk.f32.vlgmr.msra.gmra.mxu3 %vm1702_vm5, %v3486_v28  ;;  %v9475_v18 = vld [vmem:[#allocation2 + $0x5a0] sm:$0xff] }
0x1a81   :  { %7468 = vmatpush.msk.msra.mxu3 %vm235_vm3, %v9405_v29  ;;  %v9478_v28 = vld [vmem:[#allocation2 + $0x7e0] sm:$0xff] }
0x1a88   :  { %7458 = vmatmul.msk.f32.vlgmr.msrb.gmra.mxu3 %vm210_vm4, %v9360_v4 }
0x1a89   :  { %7472 = vmatpush.msk.msrb.mxu3 %vm71_vm0, %v9411_v25 }
0x1b03   :  { %v3507_v57 = vpop.f32.mrf.mxu3 }
0x1b04   :  { %v3508_v42 = vadd.f32 %v3507_v57, %v10818_v8  ;;  %v9481_v57 = vld [vmem:[#allocation2 + $0x580] sm:$0xff] }
0x1b05   :  { %v9484_v8 = vld [vmem:[#allocation2 + $0x7c0] sm:$0xff] }
0x1b06   :  { %3510 = vst.msk [vmem:[%s10647_s4 + $0x10] sm:$0xff] %vm210_vm4, %v3508_v42  ;;  %7895 = vtanh.f32 %v3508_v42  ;;  %v3511_v40 = vmul.f32 1.442695, %v3508_v42 }
0x1b0c   :  { %v7896_v15 = vpop.eup %7895 }
0x1b0d   :  { %v3514_v7 = vmul.f32 %v7896_v15, %v7896_v15  ;;  %v3523_v55 = vmul.f32 %v7896_v15, %v3521_v6  ;;  %v9492_v15 = vld [vmem:[#allocation2 + $0x7a0] sm:$0xff] }
0x1b0e   :  { %v9531_v6 = vld [vmem:[#allocation2 + $0x420] sm:$0xff] }
0x1b0f   :  { %v3515_v23 = vsub.f32 1.0, %v3514_v7  ;;  %v9495_v7 = vld [vmem:[#allocation2 + $0x540] sm:$0xff]  ;;  %10824 = vst [vmem:[#allocation17_spill] sm:$0xff] %v9531_v6 }
0x1b11   :  { %v3516_v11 = vmax.f32 %v3515_v23, 1e-05  ;;  %v9498_v23 = vld [vmem:[#allocation2 + $0x780] sm:$0xff] }
0x1b13   :  { %v3517_v52 = vmin.f32 %v3516_v11, 1.0  ;;  %v9501_v11 = vld [vmem:[#allocation2 + $0x520] sm:$0xff] }
0x1b15   :  { %7897 = vrsqrt.f32 %v3517_v52  ;;  %vm3531_vm9 = vcmp.eq.f32.partialorder %v3517_v52, inf  ;;  %v3534_v19 = vand.u32 2147483648, %v3517_v52  ;;  %vm3533_vm11 = vcmp.eq.f32.partialorder %v3517_v52, 0.0 }
0x1b16   :  { %7899 = vpow2.f32 %v3511_v40 }
0x1b1b   :  { %v7898_v39 = vpop.eup %7897 }
0x1b1c   :  { %v3525_v10 = vmul.f32 %v7898_v39, %v3517_v52  ;;  %v7900_v5 = vpop.eup %7899 }
0x1b1e   :  { %v3526_v35 = vmul.f32 %v7898_v39, %v3525_v10  ;;  %v9513_v10 = vld [vmem:[#allocation2 + $0x4e0] sm:$0xff] }
0x1b20   :  { %v3527_v0 = vmul.f32 0.5, %v3526_v35  ;;  %v9516_v35 = vld [vmem:[#allocation2 + $0x4c0] sm:$0xff] }
0x1b21   :  { %10819 = vst [vmem:[#allocation15_spill] sm:$0xff] %v9516_v35 }
0x1b22   :  { %v3528_v50 = vsub.f32 1.5, %v3527_v0  ;;  %v9519_v0 = vld [vmem:[#allocation2 + $0x4a0] sm:$0xff] }
0x1b23   :  { %10820 = vst [vmem:[#allocation6_spill] sm:$0xff] %v9519_v0 }
0x1b24   :  { %v3529_v17 = vmul.f32 %v7898_v39, %v3528_v50  ;;  %v9510_v39 = vld [vmem:[#allocation2 + $0x740] sm:$0xff] }
0x1b25   :  { %v9522_v50 = vld [vmem:[#allocation2 + $0x480] sm:$0xff] }
0x1b26   :  { %v3530_v53 = vmul.f32 %v3529_v17, %v3517_v52  ;;  %10821 = vst [vmem:[#allocation11_spill] sm:$0xff] %v9522_v50  ;;  %v9525_v17 = vld [vmem:[#allocation2 + $0x460] sm:$0xff] }
0x1b27   :  { %10822 = vst [vmem:[#allocation5_spill] sm:$0xff] %v9525_v17 }
0x1b28   :  { %v3532_v41 = vsel %vm3531_vm9, %v3517_v52, %v3530_v53  ;;  %v9507_v52 = vld [vmem:[#allocation2 + $0x500] sm:$0xff] }
0x1b29   :  { %v3535_v33 = vsel %vm3533_vm11, %v3534_v19, %v3532_v41  ;;  %v9528_v53 = vld [vmem:[#allocation2 + $0x440] sm:$0xff] }
0x1b2a   :  { %v3539_v31 = vmul.f32 %v3537_v47, %v3535_v33  ;;  %10823 = vst [vmem:[#allocation16_spill] sm:$0xff] %v9528_v53  ;;  %v9534_v19 = vld [vmem:[#allocation2 + $0x400] sm:$0xff] }
0x1b2b   :  { %10825 = vst [vmem:[#allocation18_spill] sm:$0xff] %v9534_v19 }
0x1b2c   :  { %v3540_v3 = vadd.f32 %v3539_v31, %v3523_v55  ;;  %v3686_v31 = vpop.f32.mrf.mxu3 }
0x1b2e   :  { %3547 = vperm.xlu1 %7687, %v3540_v3  }
0x1b36   :  { %3924 = vrot.lane.b32.xlu1 %v3922_v37, %s8278_s19 }
0x1ba0   :  { %v3548_v62 = vpop.permute.xlu1 %3547 }
0x1ba1   :  { %v3550_v20 = vsel %vm2710_vm14, %v3543_v21, %v3548_v62 }
0x1ba2   :  { %3552 = vrot.lane.b32.xlu0 %v3550_v20, %s8282_s23 }
0x1baa   :  { %3940 = vrot.lane.b32.xlu0 %v3922_v37, %s8279_s20 }
0x1c14   :  { %v3553_v58 = vpop.permute.xlu0 %3552 }
0x1c15   :  { %v3555_v12 = vmul.f32 %v7900_v5, %v3553_v58 }
0x1c17   :  { %3557 = vrot.lane.b32.xlu2 %v3555_v12, %s8283_s24  ;;  %v3726_v12 = vpop.f32.mrf.mxu0 }
0x1c1f   :  { %3946 = vperm.xlu2 %7686, %v3922_v37  }
0x1c71   :  { %v3558_v22 = vpop.permute.xlu2 %3557 }
0x1c72   :  { %v3560_v30 = vadd.f32 %v3558_v22, %v3508_v42  ;;  %v9489_v42 = vld [vmem:[#allocation2 + $0x560] sm:$0xff] }
0x1c74   :  { %3561 = vst.msk [vmem:[%s10648_s5 + $0x18] sm:$0xff] %vm46_vm1, %v3560_v30  ;;  %7448 = vmatmul.msk.f32.vlgmr.msra.gmra.mxu1 %vm46_vm1, %v3560_v30  ;;  %7452 = vmatmul.msk.f32.vlgmr.msrb.gmra.mxu2 %vm46_vm1, %v3560_v30 }
0x1c75   :  { %7453 = vmatpush.msk.msra.mxu1 %vm71_vm0, %v9435_v14  ;;  %7466 = vmatpush.msk.msrb.mxu2 %vm235_vm3, %v9439_v44 }
0x1c7c   :  { %7450 = vmatmul.msk.f32.vlgmr.msrb.gmra.mxu1 %vm46_vm1, %v3560_v30  ;;  %7456 = vmatmul.msk.f32.vlgmr.msra.gmra.mxu2 %vm210_vm4, %v9360_v4 }
0x1c7d   :  { %7459 = vmatpush.msk.msrb.mxu1 %vm235_vm3, %v9446_v48  ;;  %3898 = vmatpush.msra.mxu2 %v9450_v60 }
0x1c7f   :  { %3899 = vmatpush.msra.mxu2 %v9453_v2 }
0x1c81   :  { %3900 = vmatpush.msra.mxu2 %v9456_v36 }
0x1c83   :  { %3901 = vmatpush.msra.mxu2 %v9459_v1 }
0x1c84   :  { %7454 = vmatmul.msk.f32.vlgmr.msra.gmra.mxu1 %vm46_vm1, %v3560_v30 }
0x1c85   :  { %3848 = vmatpush.msra.mxu1 %v9463_v16  ;;  %3902 = vmatpush.msra.mxu2 %v9466_v38 }
0x1c87   :  { %3849 = vmatpush.msra.mxu1 %v9469_v13  ;;  %3903 = vmatpush.msra.mxu2 %v9472_v32 }
0x1c89   :  { %3850 = vmatpush.msra.mxu1 %v9475_v18  ;;  %3904 = vmatpush.msra.mxu2 %v9478_v28 }
0x1c8b   :  { %3851 = vmatpush.msra.mxu1 %v9481_v57  ;;  %3905 = vmatpush.msra.mxu2 %v9484_v8 }
0x1c8c   :  { %7460 = vmatmul.msk.f32.vlgmr.msrb.gmra.mxu1 %vm210_vm4, %v9360_v4  ;;  %v9504_v4 = vld [vmem:[#allocation2 + $0x760] sm:$0xff] }
0x1c8d   :  { %3852 = vmatpush.msra.mxu1 %v9489_v42  ;;  %3906 = vmatpush.msra.mxu2 %v9492_v15 }
0x1c8f   :  { %3853 = vmatpush.msra.mxu1 %v9495_v7  ;;  %3907 = vmatpush.msra.mxu2 %v9498_v23 }
0x1c91   :  { %3854 = vmatpush.msra.mxu1 %v9501_v11  ;;  %3908 = vmatpush.msra.mxu2 %v9504_v4 }
0x1c93   :  { %3855 = vmatpush.msra.mxu1 %v9507_v52  ;;  %3909 = vmatpush.msra.mxu2 %v9510_v39 }
0x1c95   :  { %3856 = vmatpush.msra.mxu1 %v9513_v10 }
0x1c97   :  { %3857 = vmatpush.msra.mxu1 %v9516_v35 }
0x1c99   :  { %3858 = vmatpush.msra.mxu1 %v9519_v0 }
0x1c9b   :  { %3859 = vmatpush.msra.mxu1 %v9522_v50 }
0x1c9d   :  { %3860 = vmatpush.msra.mxu1 %v9525_v17 }
0x1c9f   :  { %3861 = vmatpush.msra.mxu1 %v9528_v53 }
0x1ca1   :  { %3862 = vmatpush.msra.mxu1 %v9531_v6 }
0x1ca3   :  { %3863 = vmatpush.msra.mxu1 %v9534_v19 }
0x1ca5   :  { %7486 = vmatpush.msk.msrb.mxu1 %vm235_vm3, %v9348_v27 }
0x1cf1   :  { %v3582_v47 = vpop.f32.mrf.mxu1 }
0x1cf2   :  { %v3645_v21 = vadd.f32 %v3582_v47, %v8965_v45 }
0x1cf7   :  { %v3622_v41 = vpop.f32.mrf.mxu2 }
0x1cf9   :  { %v3602_v33 = vpop.f32.mrf.mxu1 }
0x1cfa   :  { %v3646_v55 = vadd.f32 %v3602_v33, %v8971_v9 }
0x1cfc   :  { %v3730_v3 = vadd.f32 %v3686_v31, %v3646_v55 }
0x1cfe   :  { %v7464_v62 = vmul.f32 -1.442695, %v3730_v3 }
0x1cff   :  { %v3666_v20 = vpop.f32.mrf.mxu2 }
0x1d00   :  { %7901 = vpow2.f32 %v7464_v62  ;;  %v3729_v37 = vadd.f32 %v3666_v20, %v3645_v21  ;;  %v3647_v20 = vadd.f32 %v3622_v41, %v10807_v34 }
0x1d01   :  { %v3642_v40 = vpop.f32.mrf.mxu1 }
0x1d02   :  { %v7463_v5 = vmul.f32 -1.442695, %v3729_v37  ;;  %v3648_v58 = vadd.f32 %v3642_v40, %v10806_v61 }
0x1d04   :  { %7903 = vpow2.f32 %v7463_v5  ;;  %v3732_v22 = vadd.f32 %v3726_v12, %v3648_v58 }
0x1d06   :  { %v7902_v30 = vpop.eup %7901  ;;  %v7465_v27 = vmul.f32 -1.442695, %v3732_v22 }
0x1d07   :  { %v3755_v19 = vadd.f32 1.0, %v7902_v30 }
0x1d08   :  { %7905 = vpow2.f32 %v7465_v27 }
0x1d09   :  { %7907 = vrcp.f32 %v3755_v19  ;;  %v3706_v21 = vpop.f32.mrf.mxu1  ;;  %v3767_v22 = vand.u32 2147483648, %v3755_v19  ;;  %vm3761_vm13 = vweird.f32 %v3755_v19 }
0x1d0a   :  { %v7904_v33 = vpop.eup %7903  ;;  %v3731_v5 = vadd.f32 %v3706_v21, %v3647_v20 }
0x1d0b   :  { %v3736_v55 = vadd.f32 1.0, %v7904_v33  ;;  %v3765_v33 = vand.u32 2147483647, %v3755_v19 }
0x1d0d   :  { %7909 = vrcp.f32 %v3736_v55  ;;  %v3746_v9 = vand.u32 2147483647, %v3736_v55  ;;  %v3748_v45 = vand.u32 2147483648, %v3736_v55  ;;  %vm3742_vm6 = vweird.f32 %v3736_v55 }
0x1d0e   :  { %v7906_v47 = vpop.eup %7905  ;;  %vm3766_vm7 = vcmp.eq.f32.partialorder %v3765_v33, 8.507059e+37 }
0x1d0f   :  { %v7908_v31 = vpop.eup %7907  ;;  %v3775_v3 = vadd.f32 1.0, %v7906_v47  ;;  %v3749_v20 = vor.u32 1.1754944e-38, %v3748_v45  ;;  %vm3747_vm9 = vcmp.eq.f32.partialorder %v3746_v9, 8.507059e+37 }
0x1d10   :  { %v3757_v62 = vmul.f32 %v7908_v31, %v3755_v19  ;;  %vm3762_vm12 = vweird.f32 %v7908_v31 }
0x1d11   :  { %7911 = vrcp.f32 %v3775_v3  ;;  %vm3763_vm15 = vmor %vm3761_vm13, %vm3762_vm12  ;;  %vm3781_vm12 = vweird.f32 %v3775_v3 }
0x1d12   :  { %v3758_v37 = vsub.f32 1.0, %v3757_v62  ;;  %7913 = vtanh.f32 %v3731_v5  ;;  %v3768_v62 = vor.u32 1.1754944e-38, %v3767_v22 }
0x1d13   :  { %v7910_v40 = vpop.eup %7909 }
0x1d14   :  { %v3759_v58 = vmul.f32 %v7908_v31, %v3758_v37  ;;  %v3738_v12 = vmul.f32 %v7910_v40, %v3736_v55  ;;  %vm3743_vm2 = vweird.f32 %v7910_v40 }
0x1d15   :  { %vm3744_vm8 = vmor %vm3742_vm6, %vm3743_vm2 }
0x1d16   :  { %v3739_v27 = vsub.f32 1.0, %v3738_v12  ;;  %v3760_v30 = vadd.f32 %v7908_v31, %v3759_v58 }
0x1d17   :  { %v7912_v61 = vpop.eup %7911 }
0x1d18   :  { %v3777_v47 = vmul.f32 %v7912_v61, %v3775_v3  ;;  %v3740_v6 = vmul.f32 %v7910_v40, %v3739_v27  ;;  %v3764_v41 = vsel %vm3763_vm15, %v7908_v31, %v3760_v30  ;;  %v7914_v19 = vpop.eup %7913  ;;  %vm3782_vm11 = vweird.f32 %v7912_v61 }
0x1d19   :  { %v3769_v37 = vsel %vm3766_vm7, %v3768_v62, %v3764_v41  ;;  %v3787_v31 = vand.u32 2147483648, %v3775_v3  ;;  %vm3783_vm13 = vmor %vm3781_vm12, %vm3782_vm11  ;;  %v9567_v41 = vld [vmem:[#allocation2 + $0x6c0] sm:$0xff] }
0x1d1a   :  { %v3778_v34 = vsub.f32 1.0, %v3777_v47  ;;  %v3741_v21 = vadd.f32 %v7910_v40, %v3740_v6  ;;  %v3791_v17 = vmul.f32 %v3769_v37, %v9357_v49  ;;  %v3785_v6 = vand.u32 2147483647, %v3775_v3  ;;  %v9564_v47 = vld [vmem:[#allocation2 + $0x6e0] sm:$0xff] }
0x1d1b   :  { %v3788_v55 = vor.u32 1.1754944e-38, %v3787_v31  ;;  %v9570_v62 = vld [vmem:[#allocation2 + $0x6a0] sm:$0xff] }
0x1d1c   :  { %v3745_v12 = vsel %vm3744_vm8, %v7910_v40, %v3741_v21  ;;  %v3779_v58 = vmul.f32 %v7912_v61, %v3778_v34  ;;  %vm3786_vm15 = vcmp.eq.f32.partialorder %v3785_v6, 8.507059e+37  ;;  %v9573_v21 = vld [vmem:[#allocation2 + $0x680] sm:$0xff] }
0x1d1d   :  { %v3750_v53 = vsel %vm3747_vm9, %v3749_v20, %v3745_v12  ;;  %v9578_v20 = vld [vmem:[#allocation2 + $0x660] sm:$0xff] }
0x1d1e   :  { %v3792_v5 = vmul.f32 %v7914_v19, %v3750_v53  ;;  %v3780_v27 = vadd.f32 %v7912_v61, %v3779_v58  ;;  %v9581_v37 = vld [vmem:[#allocation2 + $0x640] sm:$0xff] }
0x1d1f   :  { %v9584_v12 = vld [vmem:[#allocation2 + $0x620] sm:$0xff] }
0x1d20   :  { %v9544_v50 = vadd.f32 %v3792_v5, %v3791_v17  ;;  %v3784_v45 = vsel %vm3783_vm13, %v7912_v61, %v3780_v27  ;;  %v9587_v19 = vld [vmem:[#allocation2 + $0x600] sm:$0xff] }
0x1d21   :  { %v3789_v40 = vsel %vm3786_vm15, %v3788_v55, %v3784_v45  ;;  %v9592_v5 = vld [vmem:[#allocation2 + $0x700] ss:$0 sm:$0xff] }
0x1d22   :  { %7915 = vtanh.f32 %v9544_v50  ;;  %10826 = vst [vmem:[#allocation19_spill] sm:$0xff] %v9592_v5  ;;  %v9595_v45 = vld [vmem:[#allocation2 + $0x720] ss:$0 sm:$0xff] }
0x1d23   :  { %10827 = vst [vmem:[#allocation20_spill] sm:$0xff] %v9595_v45 }
0x1d28   :  { %v7916_v9 = vpop.eup %7915 }
0x1d29   :  { %v9547_v34 = vmul.f32 %v7916_v9, %v3789_v40 }
0x1d2b   :  { %7467 = vmatmul.msk.f32.vlgmr.msrb.gmra.mxu2 %vm210_vm4, %v9547_v34  ;;  %7469 = vmatmul.msk.f32.vlgmr.msra.gmra.mxu3 %vm210_vm4, %v9547_v34 }
0x1d2c   :  { %7482 = vmatpush.msk.msrb.mxu2 %vm235_vm3, %v9366_v24  ;;  %7474 = vmatpush.msk.msra.mxu3 %vm71_vm0, %v9370_v43 }
0x1dae   :  { %v3816_v49 = vpop.f32.mrf.mxu2  ;;  %v3836_v61 = vpop.f32.mrf.mxu3 }
0x1daf   :  { %v3817_v17 = vadd.f32 %v3816_v49, %v9103_v63  ;;  %v3837_v53 = vadd.f32 %v3836_v61, %v9111_v54  ;;  %v9605_v49 = vld [vmem:[#allocation2 + $0x8c0] ss:$0 sm:$0xff] }
0x1db0   :  { %10828 = vst [vmem:[#allocation22_spill] sm:$0xff] %v9605_v49 }
0x1db1   :  { %vm3839_vm2 = vcmp.ge.f32.partialorder %v3817_v17, 0.0  ;;  %v3841_v3 = vmul.f32 %v3817_v17, %v9106_v46  ;;  %vm3840_vm6 = vcmp.ge.f32.partialorder %v3837_v53, 0.0  ;;  %v3842_v22 = vmul.f32 %v3837_v53, %v10788_v51 }
0x1db3   :  { %v3844_v30 = vsel %vm3840_vm6, %v3837_v53, %v3842_v22  ;;  %v3843_v33 = vsel %vm3839_vm2, %v3817_v17, %v3841_v3 }
0x1db4   :  { %3864 = vmatmul.f32.vlgmr.msra.gmra.mxu1 %v3843_v33  ;;  %7470 = vmatmul.msk.f32.vlgmr.msra.gmra.mxu0 %vm2631_vm10, %v3844_v30 }
0x1db5   :  { %7480 = vmatpush.msk.msra.mxu0 %vm235_vm3, %v9378_v26  ;;  %4280 = vmatpush.msra.mxu1 %v9564_v47 }
0x1db7   :  { %4281 = vmatpush.msra.mxu1 %v9567_v41 }
0x1db9   :  { %4282 = vmatpush.msra.mxu1 %v9570_v62 }
0x1dbb   :  { %4283 = vmatpush.msra.mxu1 %v9573_v21 }
0x1dbc   :  { %7487 = vmatmul.msk.f32.vlgmr.msrb.gmra.mxu1 %vm210_vm4, %v9547_v34 }
0x1dbd   :  { %4284 = vmatpush.msra.mxu1 %v9578_v20 }
0x1dbf   :  { %4285 = vmatpush.msra.mxu1 %v9581_v37 }
0x1dc1   :  { %4286 = vmatpush.msra.mxu1 %v9584_v12 }
0x1dc3   :  { %4287 = vmatpush.msra.mxu1 %v9587_v19 }
0x1dc5   :  { %7501 = vmatpush.msk.msrb.mxu1 %vm71_vm0, %v9393_v56 }
0x1e31   :  { %v3865_v58 = vpop.f32.mrf.mxu1  ;;  %v3885_v31 = vpop.f32.mrf.mxu0 }
0x1e32   :  { %v3866_v27 = vadd.f32 %v9592_v5, %v3865_v58 }
0x1e34   :  { %v3886_v6 = vadd.f32 %v3885_v31, %v3866_v27 }
0x1e36   :  { %vm3888_vm7 = vcmp.ge.f32.partialorder %v3886_v6, 0.0  ;;  %v3889_v55 = vmul.f32 %v9595_v45, %v3886_v6 }
0x1e38   :  { %v3890_v9 = vsel %vm3888_vm7, %v3886_v6, %v3889_v55 }
0x1e39   :  { %7471 = vmatmul.msk.f32.vlgmr.msra.gmra.mxu2 %vm1702_vm5, %v3890_v9 }
0x1e3a   :  { %7493 = vmatpush.msk.msra.mxu2 %vm235_vm3, %v9405_v29 }
0x1e41   :  { %7483 = vmatmul.msk.f32.vlgmr.msrb.gmra.mxu2 %vm210_vm4, %v9547_v34 }
0x1e42   :  { %7497 = vmatpush.msk.msrb.mxu2 %vm71_vm0, %v9411_v25  ;;  %v3941_v25 = vpop.permute.xlu0 %3940 }
0x1ebc   :  { %v3911_v40 = vpop.f32.mrf.mxu2 }
0x1ebd   :  { %v3912_v61 = vadd.f32 %v9605_v49, %v3911_v40  ;;  %v3925_v40 = vpop.permute.xlu1 %3924 }
0x1ebf   :  { %3914 = vst.msk [vmem:[%s10647_s4 + $0x18] sm:$0xff] %vm210_vm4, %v3912_v61  ;;  %7917 = vtanh.f32 %v3912_v61 }
0x1ec5   :  { %v7918_v17 = vpop.eup %7917 }
0x1ec6   :  { %v3918_v53 = vmul.f32 %v7918_v17, %v7918_v17  ;;  %v3927_v5 = vmul.f32 %v7918_v17, %v3925_v40  ;;  %v10831_v17 = vld [vmem:[#allocation16_spill] sm:$0xff] }
0x1ec8   :  { %v3919_v3 = vsub.f32 1.0, %v3918_v53 }
0x1eca   :  { %v3920_v22 = vmax.f32 %v3919_v3, 1e-05  ;;  %v3947_v3 = vpop.permute.xlu2 %3946 }
0x1ecc   :  { %v3921_v30 = vmin.f32 %v3920_v22, 1.0 }
0x1ece   :  { %7919 = vrsqrt.f32 %v3921_v30  ;;  %vm3935_vm8 = vcmp.eq.f32.partialorder %v3921_v30, inf  ;;  %v3938_v49 = vand.u32 2147483648, %v3921_v30  ;;  %vm3937_vm9 = vcmp.eq.f32.partialorder %v3921_v30, 0.0 }
0x1ed4   :  { %v7920_v33 = vpop.eup %7919 }
0x1ed5   :  { %v3929_v58 = vmul.f32 %v7920_v33, %v3921_v30 }
0x1ed7   :  { %v3930_v27 = vmul.f32 %v7920_v33, %v3929_v58 }
0x1ed9   :  { %v3931_v31 = vmul.f32 0.5, %v3930_v27  ;;  %v10833_v27 = vld [vmem:[#allocation18_spill] sm:$0xff] }
0x1edb   :  { %v3932_v6 = vsub.f32 1.5, %v3931_v31  ;;  %v10834_v31 = vld [vmem:[#allocation21_spill] sm:$0xff] }
0x1edd   :  { %v3933_v55 = vmul.f32 %v7920_v33, %v3932_v6  ;;  %v4326_v33 = vld [vmem:[%s10645_s2 + $0x20] sm:$0xff] }
0x1edf   :  { %v3934_v9 = vmul.f32 %v3933_v55, %v3921_v30 }
0x1ee1   :  { %v3936_v29 = vsel %vm3935_vm8, %v3921_v30, %v3934_v9  ;;  %v10832_v30 = vld [vmem:[#allocation17_spill] sm:$0xff]  ;;  %v10835_v9 = vld [vmem:[#allocation8_spill] sm:$0xff] }
0x1ee2   :  { %v3939_v45 = vsel %vm3937_vm9, %v3938_v49, %v3936_v29  ;;  %v3915_v29 = vmul.f32 1.442695, %v3912_v61 }
0x1ee3   :  { %v3943_v56 = vmul.f32 %v3941_v25, %v3939_v45 }
0x1ee4   :  { %7921 = vpow2.f32 %v3915_v29 }
0x1ee5   :  { %v3944_v53 = vadd.f32 %v3943_v56, %v3927_v5 }
0x1ee7   :  { %3951 = vperm.xlu1 %7687, %v3944_v53  }
0x1eea   :  { %v7922_v25 = vpop.eup %7921 }
0x1eef   :  { %4328 = vrot.lane.b32.xlu1 %v4326_v33, %s8278_s19 }
0x1f59   :  { %v3952_v22 = vpop.permute.xlu1 %3951 }
0x1f5a   :  { %v3954_v58 = vsel %vm2710_vm14, %v3947_v3, %v3952_v22 }
0x1f5b   :  { %3956 = vrot.lane.b32.xlu0 %v3954_v58, %s8282_s23 }
0x1f63   :  { %4344 = vrot.lane.b32.xlu0 %v4326_v33, %s8279_s20 }
0x1fcd   :  { %v3957_v56 = vpop.permute.xlu0 %3956 }
0x1fce   :  { %v3959_v5 = vmul.f32 %v7922_v25, %v3957_v56  ;;  %v4090_v25 = vpop.f32.mrf.mxu2 }
0x1fd0   :  { %3961 = vrot.lane.b32.xlu2 %v3959_v5, %s8283_s24 }
0x1fd8   :  { %4350 = vperm.xlu2 %7686, %v4326_v33   ;;  %v10836_v33 = vld [vmem:[#allocation10_spill] sm:$0xff] }
0x202a   :  { %v3962_v45 = vpop.permute.xlu2 %3961 }
0x202b   :  { %v3964_v49 = vadd.f32 %v3962_v45, %v3912_v61  ;;  %v10830_v61 = vld [vmem:[#allocation5_spill] sm:$0xff] }
0x202d   :  { %3965 = vst.msk [vmem:[%s10648_s5 + $0x20] sm:$0xff] %vm46_vm1, %v3964_v49  ;;  %7473 = vmatmul.msk.f32.vlgmr.msrb.gmra.mxu3 %vm46_vm1, %v3964_v49  ;;  %7477 = vmatmul.msk.f32.vlgmr.msrb.gmra.mxu0 %vm46_vm1, %v3964_v49 }
0x202e   :  { %7478 = vmatpush.msk.msrb.mxu3 %vm71_vm0, %v9435_v14  ;;  %7491 = vmatpush.msk.msrb.mxu0 %vm235_vm3, %v9439_v44 }
0x2035   :  { %7475 = vmatmul.msk.f32.vlgmr.msra.gmra.mxu3 %vm46_vm1, %v3964_v49  ;;  %7481 = vmatmul.msk.f32.vlgmr.msra.gmra.mxu0 %vm210_vm4, %v9547_v34 }
0x2036   :  { %7484 = vmatpush.msk.msra.mxu3 %vm235_vm3, %v9446_v48  ;;  %4302 = vmatpush.msra.mxu0 %v9450_v60 }
0x2038   :  { %4303 = vmatpush.msra.mxu0 %v9453_v2 }
0x203a   :  { %4304 = vmatpush.msra.mxu0 %v9456_v36 }
0x203c   :  { %4305 = vmatpush.msra.mxu0 %v9459_v1 }
0x203d   :  { %7479 = vmatmul.msk.f32.vlgmr.msrb.gmra.mxu3 %vm46_vm1, %v3964_v49 }
0x203e   :  { %4252 = vmatpush.msrb.mxu3 %v9463_v16  ;;  %4306 = vmatpush.msra.mxu0 %v9466_v38 }
0x2040   :  { %4253 = vmatpush.msrb.mxu3 %v9469_v13  ;;  %4307 = vmatpush.msra.mxu0 %v9472_v32 }
0x2042   :  { %4254 = vmatpush.msrb.mxu3 %v9475_v18  ;;  %4308 = vmatpush.msra.mxu0 %v9478_v28 }
0x2044   :  { %4255 = vmatpush.msrb.mxu3 %v9481_v57  ;;  %4309 = vmatpush.msra.mxu0 %v9484_v8 }
0x2045   :  { %7485 = vmatmul.msk.f32.vlgmr.msra.gmra.mxu3 %vm210_vm4, %v9547_v34  ;;  %v10829_v34 = vld [vmem:[#allocation11_spill] sm:$0xff] }
0x2046   :  { %4256 = vmatpush.msrb.mxu3 %v9489_v42  ;;  %4310 = vmatpush.msra.mxu0 %v9492_v15 }
0x2048   :  { %4257 = vmatpush.msrb.mxu3 %v9495_v7  ;;  %4311 = vmatpush.msra.mxu0 %v9498_v23 }
0x204a   :  { %4258 = vmatpush.msrb.mxu3 %v9501_v11  ;;  %4312 = vmatpush.msra.mxu0 %v9504_v4 }
0x204c   :  { %4259 = vmatpush.msrb.mxu3 %v9507_v52  ;;  %4313 = vmatpush.msra.mxu0 %v9510_v39 }
0x204e   :  { %4260 = vmatpush.msrb.mxu3 %v9513_v10 }
0x2050   :  { %4261 = vmatpush.msrb.mxu3 %v9516_v35 }
0x2052   :  { %4262 = vmatpush.msrb.mxu3 %v9519_v0 }
0x2054   :  { %4263 = vmatpush.msrb.mxu3 %v10829_v34 }
0x2056   :  { %4264 = vmatpush.msrb.mxu3 %v10830_v61 }
0x2058   :  { %4265 = vmatpush.msrb.mxu3 %v10831_v17  ;;  %v4130_v17 = vpop.f32.mrf.mxu1 }
0x205a   :  { %4266 = vmatpush.msrb.mxu3 %v10832_v30 }
0x205c   :  { %4267 = vmatpush.msrb.mxu3 %v10833_v27 }
0x205e   :  { %7511 = vmatpush.msk.msra.mxu3 %vm235_vm3, %v10834_v31  ;;  %v10837_v31 = vld [vmem:[#allocation9_spill] sm:$0xff] }
0x20aa   :  { %v4026_v6 = vpop.f32.mrf.mxu0 }
0x20b0   :  { %v3986_v55 = vpop.f32.mrf.mxu3 }
0x20b1   :  { %v4049_v40 = vadd.f32 %v3986_v55, %v10835_v9 }
0x20b2   :  { %v4070_v53 = vpop.f32.mrf.mxu0 }
0x20b3   :  { %v4133_v3 = vadd.f32 %v4070_v53, %v4049_v40 }
0x20b5   :  { %v7488_v22 = vmul.f32 -1.442695, %v4133_v3 }
0x20b7   :  { %7923 = vpow2.f32 %v7488_v22 }
0x20b8   :  { %v4006_v58 = vpop.f32.mrf.mxu3 }
0x20b9   :  { %v4050_v29 = vadd.f32 %v4006_v58, %v10836_v33  ;;  %v10838_v58 = vld [vmem:[#allocation12_spill] sm:$0xff] }
0x20bb   :  { %v4134_v56 = vadd.f32 %v4090_v25, %v4050_v29  ;;  %v4051_v29 = vadd.f32 %v4026_v6, %v10838_v58 }
0x20bd   :  { %v7924_v5 = vpop.eup %7923  ;;  %v7489_v45 = vmul.f32 -1.442695, %v4134_v56 }
0x20be   :  { %v4140_v49 = vadd.f32 1.0, %v7924_v5 }
0x20bf   :  { %7925 = vpow2.f32 %v7489_v45 }
0x20c0   :  { %7927 = vrcp.f32 %v4140_v49  ;;  %v4046_v27 = vpop.f32.mrf.mxu3  ;;  %vm4146_vm12 = vweird.f32 %v4140_v49 }
0x20c1   :  { %v4052_v30 = vadd.f32 %v4046_v27, %v10837_v31 }
0x20c3   :  { %v4136_v61 = vadd.f32 %v4130_v17, %v4052_v30  ;;  %v4150_v30 = vand.u32 2147483647, %v4140_v49 }
0x20c5   :  { %v7926_v55 = vpop.eup %7925  ;;  %v7490_v9 = vmul.f32 -1.442695, %v4136_v61  ;;  %v4152_v61 = vand.u32 2147483648, %v4140_v49  ;;  %vm4151_vm2 = vcmp.eq.f32.partialorder %v4150_v30, 8.507059e+37 }
0x20c6   :  { %v7928_v40 = vpop.eup %7927  ;;  %v4159_v53 = vadd.f32 1.0, %v7926_v55 }
0x20c7   :  { %v4142_v3 = vmul.f32 %v7928_v40, %v4140_v49  ;;  %7929 = vpow2.f32 %v7490_v9  ;;  %vm4147_vm11 = vweird.f32 %v7928_v40 }
0x20c8   :  { %7931 = vrcp.f32 %v4159_v53  ;;  %v4110_v22 = vpop.f32.mrf.mxu3  ;;  %vm4148_vm13 = vmor %vm4146_vm12, %vm4147_vm11  ;;  %v4171_v9 = vand.u32 2147483648, %v4159_v53  ;;  %v4169_v6 = vand.u32 2147483647, %v4159_v53  ;;  %vm4165_vm6 = vweird.f32 %v4159_v53 }
0x20c9   :  { %v4143_v25 = vsub.f32 1.0, %v4142_v3  ;;  %v4135_v56 = vadd.f32 %v4110_v22, %v4051_v29  ;;  %v4153_v3 = vor.u32 1.1754944e-38, %v4152_v61 }
0x20ca   :  { %vm4170_vm8 = vcmp.eq.f32.partialorder %v4169_v6, 8.507059e+37 }
0x20cb   :  { %v4144_v5 = vmul.f32 %v7928_v40, %v4143_v25  ;;  %7933 = vtanh.f32 %v4135_v56  ;;  %v4172_v56 = vor.u32 1.1754944e-38, %v4171_v9 }
0x20cd   :  { %v7930_v45 = vpop.eup %7929  ;;  %v4145_v27 = vadd.f32 %v7928_v40, %v4144_v5 }
0x20ce   :  { %v7932_v33 = vpop.eup %7931  ;;  %v4179_v34 = vadd.f32 1.0, %v7930_v45 }
0x20cf   :  { %v4161_v0 = vmul.f32 %v7932_v33, %v4159_v53  ;;  %v4149_v31 = vsel %vm4148_vm13, %v7928_v40, %v4145_v27  ;;  %vm4166_vm15 = vweird.f32 %v7932_v33 }
0x20d0   :  { %7935 = vrcp.f32 %v4179_v34  ;;  %v4154_v5 = vsel %vm4151_vm2, %v4153_v3, %v4149_v31  ;;  %vm4167_vm7 = vmor %vm4165_vm6, %vm4166_vm15  ;;  %v4191_v30 = vand.u32 2147483648, %v4179_v34  ;;  %vm4185_vm11 = vweird.f32 %v4179_v34 }
0x20d1   :  { %v4162_v17 = vsub.f32 1.0, %v4161_v0  ;;  %v7934_v22 = vpop.eup %7933  ;;  %v4189_v31 = vand.u32 2147483647, %v4179_v34 }
0x20d2   :  { %v4192_v9 = vor.u32 1.1754944e-38, %v4191_v30 }
0x20d3   :  { %v4163_v55 = vmul.f32 %v7932_v33, %v4162_v17  ;;  %v4196_v17 = vmul.f32 %v7934_v22, %v4154_v5  ;;  %vm4190_vm13 = vcmp.eq.f32.partialorder %v4189_v31, 8.507059e+37  ;;  %v10840_v5 = vld [vmem:[#allocation19_spill] sm:$0xff]  ;;  %v10844_v31 = vld [vmem:[#allocation22_spill] sm:$0xff] }
0x20d5   :  { %v4164_v29 = vadd.f32 %v7932_v33, %v4163_v55 }
0x20d6   :  { %v7936_v25 = vpop.eup %7935 }
0x20d7   :  { %v4181_v45 = vmul.f32 %v7936_v25, %v4179_v34  ;;  %v4168_v58 = vsel %vm4167_vm7, %v7932_v33, %v4164_v29  ;;  %vm4186_vm9 = vweird.f32 %v7936_v25 }
0x20d8   :  { %v4173_v0 = vsel %vm4170_vm8, %v4172_v56, %v4168_v58  ;;  %vm4187_vm12 = vmor %vm4185_vm11, %vm4186_vm9 }
0x20d9   :  { %v4182_v49 = vsub.f32 1.0, %v4181_v45  ;;  %v4195_v35 = vmul.f32 %v4173_v0, %v9544_v50  ;;  %v10841_v0 = vld [vmem:[#allocation20_spill] sm:$0xff] }
0x20db   :  { %v4183_v40 = vmul.f32 %v7936_v25, %v4182_v49  ;;  %v9674_v27 = vadd.f32 %v4196_v17, %v4195_v35 }
0x20dd   :  { %v4184_v61 = vadd.f32 %v7936_v25, %v4183_v40  ;;  %7937 = vtanh.f32 %v9674_v27  ;;  %v10842_v40 = vld [vmem:[#allocation13_spill] sm:$0xff] }
0x20df   :  { %v4188_v53 = vsel %vm4187_vm12, %v7936_v25, %v4184_v61  ;;  %v10843_v61 = vld [vmem:[#allocation14_spill] sm:$0xff] }
0x20e0   :  { %v4193_v58 = vsel %vm4190_vm13, %v4192_v9, %v4188_v53 }
0x20e3   :  { %v7938_v33 = vpop.eup %7937 }
0x20e4   :  { %v9677_v55 = vmul.f32 %v7938_v33, %v4193_v58 }
0x20e6   :  { %7492 = vmatmul.msk.f32.vlgmr.msrb.gmra.mxu0 %vm210_vm4, %v9677_v55  ;;  %7494 = vmatmul.msk.f32.vlgmr.msra.gmra.mxu2 %vm210_vm4, %v9677_v55 }
0x20e7   :  { %7507 = vmatpush.msk.msrb.mxu0 %vm235_vm3, %v9366_v24  ;;  %7499 = vmatpush.msk.msra.mxu2 %vm71_vm0, %v9370_v43  ;;  %v10839_v43 = vld [vmem:[#allocation7_spill] sm:$0xff] }
0x2163   :  { %v4220_v35 = vpop.f32.mrf.mxu0 }
0x2164   :  { %v4221_v50 = vadd.f32 %v4220_v35, %v9103_v63 }
0x2166   :  { %vm4243_vm15 = vcmp.ge.f32.partialorder %v4221_v50, 0.0  ;;  %v4245_v34 = vmul.f32 %v4221_v50, %v9106_v46 }
0x2168   :  { %v4247_v6 = vsel %vm4243_vm15, %v4221_v50, %v4245_v34 }
0x2169   :  { %v4240_v3 = vpop.f32.mrf.mxu2  ;;  %4268 = vmatmul.f32.vlgmr.msrb.gmra.mxu3 %v4247_v6 }
0x216a   :  { %v4241_v22 = vadd.f32 %v4240_v3, %v9111_v54  ;;  %4684 = vmatpush.msrb.mxu3 %v9564_v47 }
0x216c   :  { %vm4244_vm2 = vcmp.ge.f32.partialorder %v4241_v22, 0.0  ;;  %v4246_v29 = vmul.f32 %v4241_v22, %v10788_v51  ;;  %4685 = vmatpush.msrb.mxu3 %v9567_v41 }
0x216e   :  { %v4248_v24 = vsel %vm4244_vm2, %v4241_v22, %v4246_v29  ;;  %4686 = vmatpush.msrb.mxu3 %v9570_v62 }
0x216f   :  { %7495 = vmatmul.msk.f32.vlgmr.msra.gmra.mxu1 %vm2631_vm10, %v4248_v24 }
0x2170   :  { %7505 = vmatpush.msk.msra.mxu1 %vm235_vm3, %v9378_v26  ;;  %4687 = vmatpush.msrb.mxu3 %v9573_v21 }
0x2171   :  { %7512 = vmatmul.msk.f32.vlgmr.msra.gmra.mxu3 %vm210_vm4, %v9677_v55 }
0x2172   :  { %4688 = vmatpush.msrb.mxu3 %v9578_v20 }
0x2174   :  { %4689 = vmatpush.msrb.mxu3 %v9581_v37 }
0x2176   :  { %4690 = vmatpush.msrb.mxu3 %v9584_v12 }
0x2178   :  { %4691 = vmatpush.msrb.mxu3 %v9587_v19 }
0x217a   :  { %7526 = vmatpush.msk.msra.mxu3 %vm71_vm0, %v10839_v43 }
0x21ec   :  { %v4269_v25 = vpop.f32.mrf.mxu3  ;;  %v4289_v26 = vpop.f32.mrf.mxu1 }
0x21ed   :  { %v4270_v56 = vadd.f32 %v10840_v5, %v4269_v25  ;;  %v4329_v25 = vpop.permute.xlu1 %4328 }
0x21ef   :  { %v4290_v45 = vadd.f32 %v4289_v26, %v4270_v56  ;;  %v4345_v26 = vpop.permute.xlu0 %4344 }
0x21f1   :  { %vm4292_vm6 = vcmp.ge.f32.partialorder %v4290_v45, 0.0  ;;  %v4293_v49 = vmul.f32 %v10841_v0, %v4290_v45 }
0x21f3   :  { %v4294_v17 = vsel %vm4292_vm6, %v4290_v45, %v4293_v49 }
0x21f4   :  { %7496 = vmatmul.msk.f32.vlgmr.msra.gmra.mxu0 %vm1702_vm5, %v4294_v17 }
0x21f5   :  { %7518 = vmatpush.msk.msra.mxu0 %vm235_vm3, %v10842_v40 }
0x21fc   :  { %7508 = vmatmul.msk.f32.vlgmr.msrb.gmra.mxu0 %vm210_vm4, %v9677_v55 }
0x21fd   :  { %7522 = vmatpush.msk.msrb.mxu0 %vm71_vm0, %v10843_v61 }
0x2271   :  { %v4315_v30 = vpop.f32.mrf.mxu0 }
0x2272   :  { %v4316_v53 = vadd.f32 %v10844_v31, %v4315_v30  ;;  %v4351_v30 = vpop.permute.xlu2 %4350 }
0x2274   :  { %4318 = vst.msk [vmem:[%s10647_s4 + $0x20] sm:$0xff] %vm210_vm4, %v4316_v53  ;;  %7939 = vtanh.f32 %v4316_v53 }
0x227a   :  { %v7940_v9 = vpop.eup %7939 }
0x227b   :  { %v4322_v33 = vmul.f32 %v7940_v9, %v7940_v9  ;;  %v4331_v17 = vmul.f32 %v7940_v9, %v4329_v25 }
0x227d   :  { %v4323_v58 = vsub.f32 1.0, %v4322_v33 }
0x227f   :  { %v4324_v35 = vmax.f32 %v4323_v58, 1e-05 }
0x2281   :  { %v4325_v50 = vmin.f32 %v4324_v35, 1.0  ;;  %v4730_v35 = vld [vmem:[%s10645_s2 + $0x28] sm:$0xff] }
0x2283   :  { %7941 = vrsqrt.f32 %v4325_v50  ;;  %vm4339_vm7 = vcmp.eq.f32.partialorder %v4325_v50, inf  ;;  %v4342_v56 = vand.u32 2147483648, %v4325_v50  ;;  %vm4341_vm8 = vcmp.eq.f32.partialorder %v4325_v50, 0.0 }
0x2289   :  { %v7942_v34 = vpop.eup %7941 }
0x228a   :  { %v4333_v6 = vmul.f32 %v7942_v34, %v4325_v50 }
0x228c   :  { %v4334_v3 = vmul.f32 %v7942_v34, %v4333_v6 }
0x228e   :  { %v4335_v22 = vmul.f32 0.5, %v4334_v3 }
0x2290   :  { %v4336_v29 = vsub.f32 1.5, %v4335_v22 }
0x2292   :  { %v4337_v24 = vmul.f32 %v7942_v34, %v4336_v29  ;;  %v4534_v29 = vpop.f32.mrf.mxu3 }
0x2294   :  { %v4338_v43 = vmul.f32 %v4337_v24, %v4325_v50 }
0x2296   :  { %v4340_v45 = vsel %vm4339_vm7, %v4325_v50, %v4338_v43  ;;  %v4319_v50 = vmul.f32 1.442695, %v4316_v53 }
0x2297   :  { %v4343_v49 = vsel %vm4341_vm8, %v4342_v56, %v4340_v45 }
0x2298   :  { %v4347_v40 = vmul.f32 %v4345_v26, %v4343_v49  ;;  %7943 = vpow2.f32 %v4319_v50 }
0x229a   :  { %v4348_v61 = vadd.f32 %v4347_v40, %v4331_v17  ;;  %v10856_v17 = vld [vmem:[#allocation12_spill] sm:$0xff] }
0x229c   :  { %4355 = vperm.xlu1 %7687, %v4348_v61  }
0x229e   :  { %v7944_v9 = vpop.eup %7943 }
0x22a4   :  { %4732 = vrot.lane.b32.xlu1 %v4730_v35, %s8278_s19 }
0x230e   :  { %v4356_v33 = vpop.permute.xlu1 %4355 }
0x230f   :  { %v4358_v58 = vsel %vm2710_vm14, %v4351_v30, %v4356_v33 }
0x2310   :  { %4360 = vrot.lane.b32.xlu0 %v4358_v58, %s8282_s23 }
0x2318   :  { %4748 = vrot.lane.b32.xlu0 %v4730_v35, %s8279_s20 }
0x2382   :  { %v4361_v34 = vpop.permute.xlu0 %4360 }
0x2383   :  { %v4363_v6 = vmul.f32 %v7944_v9, %v4361_v34 }
0x2385   :  { %4365 = vrot.lane.b32.xlu2 %v4363_v6, %s8283_s24 }
0x238d   :  { %4754 = vperm.xlu2 %7686, %v4730_v35  }
0x23df   :  { %v4366_v3 = vpop.permute.xlu2 %4365 }
0x23e0   :  { %v4368_v22 = vadd.f32 %v4366_v3, %v4316_v53 }
0x23e2   :  { %4369 = vst.msk [vmem:[%s10648_s5 + $0x28] sm:$0xff] %vm46_vm1, %v4368_v22  ;;  %7498 = vmatmul.msk.f32.vlgmr.msrb.gmra.mxu2 %vm46_vm1, %v4368_v22  ;;  %7502 = vmatmul.msk.f32.vlgmr.msrb.gmra.mxu1 %vm46_vm1, %v4368_v22 }
0x23e3   :  { %7503 = vmatpush.msk.msrb.mxu2 %vm71_vm0, %v9435_v14  ;;  %7516 = vmatpush.msk.msrb.mxu1 %vm235_vm3, %v9439_v44  ;;  %v10845_v14 = vld [vmem:[#allocation15_spill] sm:$0xff]  ;;  %v10846_v44 = vld [vmem:[#allocation6_spill] sm:$0xff] }
0x23ea   :  { %7500 = vmatmul.msk.f32.vlgmr.msra.gmra.mxu2 %vm46_vm1, %v4368_v22  ;;  %7506 = vmatmul.msk.f32.vlgmr.msra.gmra.mxu1 %vm210_vm4, %v9677_v55 }
0x23eb   :  { %7509 = vmatpush.msk.msra.mxu2 %vm235_vm3, %v9446_v48  ;;  %4706 = vmatpush.msra.mxu1 %v9450_v60  ;;  %v10847_v48 = vld [vmem:[#allocation11_spill] sm:$0xff]  ;;  %v10848_v60 = vld [vmem:[#allocation5_spill] sm:$0xff] }
0x23ed   :  { %4707 = vmatpush.msra.mxu1 %v9453_v2  ;;  %v10849_v2 = vld [vmem:[#allocation16_spill] sm:$0xff] }
0x23ef   :  { %4708 = vmatpush.msra.mxu1 %v9456_v36  ;;  %v10850_v36 = vld [vmem:[#allocation17_spill] sm:$0xff] }
0x23f1   :  { %4709 = vmatpush.msra.mxu1 %v9459_v1  ;;  %v10851_v1 = vld [vmem:[#allocation18_spill] sm:$0xff] }
0x23f2   :  { %7504 = vmatmul.msk.f32.vlgmr.msrb.gmra.mxu2 %vm46_vm1, %v4368_v22 }
0x23f3   :  { %4656 = vmatpush.msrb.mxu2 %v9463_v16  ;;  %4710 = vmatpush.msra.mxu1 %v9466_v38  ;;  %v9775_v16 = vld [vmem:[#allocation2 + $0x378] sm:$0x1f] }
0x23f4   :  { %10852 = vst [vmem:[#allocation23_spill] sm:$0xff] %v9775_v16 }
0x23f5   :  { %4657 = vmatpush.msrb.mxu2 %v9469_v13  ;;  %4711 = vmatpush.msra.mxu1 %v9472_v32  ;;  %v10853_v32 = vld [vmem:[#allocation8_spill] sm:$0xff] }
0x23f7   :  { %4658 = vmatpush.msrb.mxu2 %v9475_v18  ;;  %4712 = vmatpush.msra.mxu1 %v9478_v28 }
0x23f9   :  { %4659 = vmatpush.msrb.mxu2 %v9481_v57  ;;  %4713 = vmatpush.msra.mxu1 %v9484_v8 }
0x23fa   :  { %7510 = vmatmul.msk.f32.vlgmr.msra.gmra.mxu2 %vm210_vm4, %v9677_v55  ;;  %v10855_v55 = vld [vmem:[#allocation9_spill] sm:$0xff] }
0x23fb   :  { %4660 = vmatpush.msrb.mxu2 %v9489_v42  ;;  %4714 = vmatpush.msra.mxu1 %v9492_v15  ;;  %v10854_v15 = vld [vmem:[#allocation10_spill] sm:$0xff] }
0x23fd   :  { %4661 = vmatpush.msrb.mxu2 %v9495_v7  ;;  %4715 = vmatpush.msra.mxu1 %v9498_v23  ;;  %v4494_v23 = vpop.f32.mrf.mxu0 }
0x23ff   :  { %4662 = vmatpush.msrb.mxu2 %v9501_v11  ;;  %4716 = vmatpush.msra.mxu1 %v9504_v4 }
0x2401   :  { %4663 = vmatpush.msrb.mxu2 %v9507_v52  ;;  %4717 = vmatpush.msra.mxu1 %v9510_v39 }
0x2403   :  { %4664 = vmatpush.msrb.mxu2 %v9513_v10 }
0x2405   :  { %4665 = vmatpush.msrb.mxu2 %v10845_v14 }
0x2407   :  { %4666 = vmatpush.msrb.mxu2 %v10846_v44 }
0x2409   :  { %4667 = vmatpush.msrb.mxu2 %v10847_v48 }
0x240b   :  { %4668 = vmatpush.msrb.mxu2 %v10848_v60 }
0x240d   :  { %4669 = vmatpush.msrb.mxu2 %v10849_v2 }
0x240f   :  { %4670 = vmatpush.msrb.mxu2 %v10850_v36 }
0x2411   :  { %4671 = vmatpush.msrb.mxu2 %v10851_v1 }
0x2413   :  { %7536 = vmatpush.msk.msra.mxu2 %vm235_vm3, %v9775_v16 }
0x245f   :  { %v4430_v38 = vpop.f32.mrf.mxu1 }
0x2460   :  { %v4455_v40 = vadd.f32 %v4430_v38, %v10856_v17 }
0x2465   :  { %v4390_v13 = vpop.f32.mrf.mxu2 }
0x2466   :  { %v4453_v18 = vadd.f32 %v4390_v13, %v10853_v32 }
0x2467   :  { %v4474_v28 = vpop.f32.mrf.mxu1 }
0x2468   :  { %v4537_v57 = vadd.f32 %v4474_v28, %v4453_v18 }
0x246a   :  { %v7513_v8 = vmul.f32 -1.442695, %v4537_v57 }
0x246c   :  { %7945 = vpow2.f32 %v7513_v8 }
0x246d   :  { %v4410_v42 = vpop.f32.mrf.mxu2 }
0x246e   :  { %v4454_v7 = vadd.f32 %v4410_v42, %v10854_v15 }
0x2470   :  { %v4538_v11 = vadd.f32 %v4494_v23, %v4454_v7 }
0x2472   :  { %v7946_v4 = vpop.eup %7945  ;;  %v7514_v52 = vmul.f32 -1.442695, %v4538_v11 }
0x2473   :  { %v4544_v39 = vadd.f32 1.0, %v7946_v4 }
0x2474   :  { %7947 = vpow2.f32 %v7514_v52 }
0x2475   :  { %7949 = vrcp.f32 %v4544_v39  ;;  %v4450_v10 = vpop.f32.mrf.mxu2  ;;  %v4556_v6 = vand.u32 2147483648, %v4544_v39  ;;  %vm4550_vm11 = vweird.f32 %v4544_v39  ;;  %v4554_v22 = vand.u32 2147483647, %v4544_v39 }
0x2476   :  { %v4456_v53 = vadd.f32 %v4450_v10, %v10855_v55 }
0x2477   :  { %v4557_v2 = vor.u32 1.1754944e-38, %v4556_v6  ;;  %vm4555_vm2 = vcmp.eq.f32.partialorder %v4554_v22, 8.507059e+37 }
0x2478   :  { %v4540_v24 = vadd.f32 %v4534_v29, %v4456_v53 }
0x247a   :  { %v7948_v43 = vpop.eup %7947  ;;  %v7515_v25 = vmul.f32 -1.442695, %v4540_v24 }
0x247b   :  { %v7950_v56 = vpop.eup %7949  ;;  %v4563_v26 = vadd.f32 1.0, %v7948_v43 }
0x247c   :  { %v4546_v45 = vmul.f32 %v7950_v56, %v4544_v39  ;;  %7951 = vpow2.f32 %v7515_v25  ;;  %vm4551_vm9 = vweird.f32 %v7950_v56 }
0x247d   :  { %7953 = vrcp.f32 %v4563_v26  ;;  %v4514_v49 = vpop.f32.mrf.mxu2  ;;  %v4575_v14 = vand.u32 2147483648, %v4563_v26  ;;  %vm4552_vm12 = vmor %vm4550_vm11, %vm4551_vm9  ;;  %v4573_v60 = vand.u32 2147483647, %v4563_v26  ;;  %vm4569_vm15 = vweird.f32 %v4563_v26 }
0x247e   :  { %v4547_v61 = vsub.f32 1.0, %v4546_v45  ;;  %v4539_v30 = vadd.f32 %v4514_v49, %v4455_v40 }
0x247f   :  { %v4576_v18 = vor.u32 1.1754944e-38, %v4575_v14  ;;  %vm4574_vm7 = vcmp.eq.f32.partialorder %v4573_v60, 8.507059e+37 }
0x2480   :  { %v4548_v33 = vmul.f32 %v7950_v56, %v4547_v61  ;;  %7955 = vtanh.f32 %v4539_v30 }
0x2482   :  { %v7952_v58 = vpop.eup %7951  ;;  %v4549_v34 = vadd.f32 %v7950_v56, %v4548_v33 }
0x2483   :  { %v7954_v35 = vpop.eup %7953  ;;  %v4583_v50 = vadd.f32 1.0, %v7952_v58 }
0x2484   :  { %v4565_v9 = vmul.f32 %v7954_v35, %v4563_v26  ;;  %v4553_v48 = vsel %vm4552_vm12, %v7950_v56, %v4549_v34  ;;  %vm4570_vm13 = vweird.f32 %v7954_v35  ;;  %v9797_v56 = vld [vmem:[#allocation2 + $0x348] sm:$0x3] }
0x2485   :  { %7957 = vrcp.f32 %v4583_v50  ;;  %v4558_v13 = vsel %vm4555_vm2, %v4557_v2, %v4553_v48  ;;  %vm4571_vm6 = vmor %vm4569_vm15, %vm4570_vm13  ;;  %v4595_v39 = vand.u32 2147483648, %v4583_v50  ;;  %vm4589_vm9 = vweird.f32 %v4583_v50 }
0x2486   :  { %v4566_v3 = vsub.f32 1.0, %v4565_v9  ;;  %v7956_v36 = vpop.eup %7955  ;;  %v4593_v10 = vand.u32 2147483647, %v4583_v50 }
0x2487   :  { %v4600_v23 = vmul.f32 %v7956_v36, %v4558_v13  ;;  %v4596_v29 = vor.u32 1.1754944e-38, %v4595_v39  ;;  %v4749_v13 = vpop.permute.xlu0 %4748 }
0x2488   :  { %v4567_v44 = vmul.f32 %v7954_v35, %v4566_v3  ;;  %vm4594_vm12 = vcmp.eq.f32.partialorder %v4593_v10, 8.507059e+37 }
0x248a   :  { %v4568_v1 = vadd.f32 %v7954_v35, %v4567_v44 }
0x248b   :  { %v7958_v38 = vpop.eup %7957 }
0x248c   :  { %v4585_v28 = vmul.f32 %v7958_v38, %v4583_v50  ;;  %v4572_v57 = vsel %vm4571_vm6, %v7954_v35, %v4568_v1  ;;  %vm4590_vm8 = vweird.f32 %v7958_v38  ;;  %v9806_v35 = vld [vmem:[#allocation2 + $0x360] sm:$0x1f]  ;;  %v9820_v50 = vld [vmem:[#allocation2 + $0x350] sm:$0x3] }
0x248d   :  { %v4577_v8 = vsel %vm4574_vm7, %v4576_v18, %v4572_v57  ;;  %vm4591_vm11 = vmor %vm4589_vm9, %vm4590_vm8  ;;  %10857 = vst [vmem:[#allocation24_spill] sm:$0xff] %v9820_v50 }
0x248e   :  { %v4586_v42 = vsub.f32 1.0, %v4585_v28  ;;  %v4599_v7 = vmul.f32 %v4577_v8, %v9674_v27  ;;  %v9793_v27 = vld [vmem:[#allocation2 + $0x368] sm:$0x1f] }
0x2490   :  { %v4587_v11 = vmul.f32 %v7958_v38, %v4586_v42  ;;  %v9784_v4 = vadd.f32 %v4600_v23, %v4599_v7  ;;  %v4755_v7 = vpop.permute.xlu2 %4754 }
0x2492   :  { %v4588_v52 = vadd.f32 %v7958_v38, %v4587_v11  ;;  %7959 = vtanh.f32 %v9784_v4 }
0x2494   :  { %v4592_v53 = vsel %vm4591_vm11, %v7958_v38, %v4588_v52  ;;  %v5134_v52 = vld [vmem:[%s10645_s2 + $0x30] sm:$0xff] }
0x2495   :  { %v4597_v43 = vsel %vm4594_vm12, %v4596_v29, %v4592_v53 }
0x2498   :  { %v7960_v24 = vpop.eup %7959 }
0x2499   :  { %v9787_v25 = vmul.f32 %v7960_v24, %v4597_v43 }
0x249b   :  { %7517 = vmatmul.msk.f32.vlgmr.msrb.gmra.mxu1 %vm210_vm4, %v9787_v25  ;;  %7519 = vmatmul.msk.f32.vlgmr.msra.gmra.mxu0 %vm210_vm4, %v9787_v25 }
0x249c   :  { %7532 = vmatpush.msk.msrb.mxu1 %vm235_vm3, %v9793_v27  ;;  %7524 = vmatpush.msk.msra.mxu0 %vm71_vm0, %v9797_v56 }
0x2518   :  { %v4624_v26 = vpop.f32.mrf.mxu1  ;;  %v4644_v45 = vpop.f32.mrf.mxu0 }
0x2519   :  { %v4625_v49 = vadd.f32 %v4624_v26, %v9103_v63  ;;  %v4645_v40 = vadd.f32 %v4644_v45, %v9111_v54  ;;  %v9857_v26 = vld [vmem:[#allocation2 + $0x358] sm:$0x3]  ;;  %v9861_v45 = vld [vmem:[#allocation2 + $0x3a0] sm:$0x1f] }
0x251b   :  { %vm4647_vm13 = vcmp.ge.f32.partialorder %v4625_v49, 0.0  ;;  %v4649_v61 = vmul.f32 %v4625_v49, %v9106_v46  ;;  %vm4648_vm15 = vcmp.ge.f32.partialorder %v4645_v40, 0.0  ;;  %v4650_v30 = vmul.f32 %v4645_v40, %v10788_v51 }
0x251d   :  { %v4651_v33 = vsel %vm4647_vm13, %v4625_v49, %v4649_v61  ;;  %v4652_v58 = vsel %vm4648_vm15, %v4645_v40, %v4650_v30  ;;  %v9868_v49 = vld [vmem:[#allocation2 + $0x370] sm:$0x1f]  ;;  %v9872_v40 = vld [vmem:[#allocation2 + $0x8a0] sm:$0xff] }
0x251e   :  { %4672 = vmatmul.f32.vlgmr.msrb.gmra.mxu2 %v4651_v33  ;;  %7520 = vmatmul.msk.f32.vlgmr.msrb.gmra.mxu3 %vm2631_vm10, %v4652_v58  ;;  %v9875_v61 = vld [vmem:[#allocation2 + $0x880] sm:$0xff] }
0x251f   :  { %7530 = vmatpush.msk.msrb.mxu3 %vm235_vm3, %v9806_v35  ;;  %5088 = vmatpush.msrb.mxu2 %v9564_v47  ;;  %v9878_v30 = vld [vmem:[#allocation2 + $0x860] sm:$0xff] }
0x2520   :  { %v9881_v33 = vld [vmem:[#allocation2 + $0x840] sm:$0xff] }
0x2521   :  { %5089 = vmatpush.msrb.mxu2 %v9567_v41  ;;  %v9885_v58 = vld [vmem:[#allocation2 + $0x5e0] sm:$0xff] }
0x2523   :  { %5090 = vmatpush.msrb.mxu2 %v9570_v62 }
0x2525   :  { %5091 = vmatpush.msrb.mxu2 %v9573_v21 }
0x2526   :  { %7537 = vmatmul.msk.f32.vlgmr.msra.gmra.mxu2 %vm210_vm4, %v9787_v25 }
0x2527   :  { %5092 = vmatpush.msrb.mxu2 %v9578_v20 }
0x2529   :  { %5093 = vmatpush.msrb.mxu2 %v9581_v37  ;;  %v9827_v37 = vld [vmem:[#allocation2 + $0x3a8] sm:$0x1f] }
0x252a   :  { %10858 = vst [vmem:[#allocation21_spill] sm:$0xff] %v9827_v37 }
0x252b   :  { %5094 = vmatpush.msrb.mxu2 %v9584_v12  ;;  %v9833_v12 = vld [vmem:[#allocation2 + $0x340] sm:$0x3] }
0x252c   :  { %10859 = vst [vmem:[#allocation7_spill] sm:$0xff] %v9833_v12 }
0x252d   :  { %5095 = vmatpush.msrb.mxu2 %v9587_v19 }
0x252f   :  { %7551 = vmatpush.msk.msra.mxu2 %vm71_vm0, %v9820_v50 }
0x25a1   :  { %v4673_v47 = vpop.f32.mrf.mxu2  ;;  %v4693_v62 = vpop.f32.mrf.mxu3 }
0x25a2   :  { %v4674_v41 = vadd.f32 %v10840_v5, %v4673_v47  ;;  %v9888_v47 = vld [vmem:[#allocation2 + $0x820] sm:$0xff] }
0x25a4   :  { %v4694_v21 = vadd.f32 %v4693_v62, %v4674_v41  ;;  %v9891_v41 = vld [vmem:[#allocation2 + $0x5c0] sm:$0xff] }
0x25a5   :  { %v9894_v62 = vld [vmem:[#allocation2 + $0x800] sm:$0xff] }
0x25a6   :  { %vm4696_vm2 = vcmp.ge.f32.partialorder %v4694_v21, 0.0  ;;  %v4697_v9 = vmul.f32 %v10841_v0, %v4694_v21 }
0x25a8   :  { %v4698_v20 = vsel %vm4696_vm2, %v4694_v21, %v4697_v9  ;;  %v9897_v21 = vld [vmem:[#allocation2 + $0x5a0] sm:$0xff] }
0x25a9   :  { %7521 = vmatmul.msk.f32.vlgmr.msra.gmra.mxu1 %vm1702_vm5, %v4698_v20  ;;  %v9900_v9 = vld [vmem:[#allocation2 + $0x7e0] sm:$0xff] }
0x25aa   :  { %7543 = vmatpush.msk.msra.mxu1 %vm235_vm3, %v9827_v37  ;;  %v9903_v20 = vld [vmem:[#allocation2 + $0x580] sm:$0xff] }
0x25b1   :  { %7533 = vmatmul.msk.f32.vlgmr.msrb.gmra.mxu1 %vm210_vm4, %v9787_v25 }
0x25b2   :  { %7547 = vmatpush.msk.msrb.mxu1 %vm71_vm0, %v9833_v12 }
0x2626   :  { %v4719_v19 = vpop.f32.mrf.mxu1 }
0x2627   :  { %v4720_v5 = vadd.f32 %v10844_v31, %v4719_v19  ;;  %v4733_v31 = vpop.permute.xlu1 %4732  ;;  %v9906_v19 = vld [vmem:[#allocation2 + $0x7c0] sm:$0xff] }
0x2629   :  { %4722 = vst.msk [vmem:[%s10647_s4 + $0x28] sm:$0xff] %vm210_vm4, %v4720_v5  ;;  %7961 = vtanh.f32 %v4720_v5  ;;  %v4723_v39 = vmul.f32 1.442695, %v4720_v5 }
0x262f   :  { %v7962_v0 = vpop.eup %7961 }
0x2630   :  { %v4726_v34 = vmul.f32 %v7962_v0, %v7962_v0  ;;  %v4735_v57 = vmul.f32 %v7962_v0, %v4733_v31  ;;  %v9914_v0 = vld [vmem:[#allocation2 + $0x7a0] sm:$0xff] }
0x2631   :  { %v9953_v31 = vld [vmem:[#allocation2 + $0x420] sm:$0xff] }
0x2632   :  { %v4727_v6 = vsub.f32 1.0, %v4726_v34  ;;  %v9917_v34 = vld [vmem:[#allocation2 + $0x540] sm:$0xff]  ;;  %10868 = vst [vmem:[#allocation5_spill] sm:$0xff] %v9953_v31 }
0x2634   :  { %v4728_v3 = vmax.f32 %v4727_v6, 1e-05  ;;  %v9920_v6 = vld [vmem:[#allocation2 + $0x780] sm:$0xff] }
0x2636   :  { %v4729_v22 = vmin.f32 %v4728_v3, 1.0  ;;  %v9923_v3 = vld [vmem:[#allocation2 + $0x520] sm:$0xff] }
0x2638   :  { %7963 = vrsqrt.f32 %v4729_v22  ;;  %vm4743_vm6 = vcmp.eq.f32.partialorder %v4729_v22, inf  ;;  %v4746_v38 = vand.u32 2147483648, %v4729_v22  ;;  %vm4745_vm7 = vcmp.eq.f32.partialorder %v4729_v22, 0.0 }
0x2639   :  { %7965 = vpow2.f32 %v4723_v39 }
0x263e   :  { %v7964_v14 = vpop.eup %7963 }
0x263f   :  { %v4737_v44 = vmul.f32 %v7964_v14, %v4729_v22  ;;  %v7966_v10 = vpop.eup %7965 }
0x2641   :  { %v4738_v48 = vmul.f32 %v7964_v14, %v4737_v44  ;;  %v9935_v44 = vld [vmem:[#allocation2 + $0x4e0] sm:$0xff] }
0x2642   :  { %10862 = vst [vmem:[#allocation13_spill] sm:$0xff] %v9935_v44 }
0x2643   :  { %v4739_v60 = vmul.f32 0.5, %v4738_v48  ;;  %v9938_v48 = vld [vmem:[#allocation2 + $0x4c0] sm:$0xff] }
0x2644   :  { %10863 = vst [vmem:[#allocation14_spill] sm:$0xff] %v9938_v48 }
0x2645   :  { %v4740_v2 = vsub.f32 1.5, %v4739_v60  ;;  %v9941_v60 = vld [vmem:[#allocation2 + $0x4a0] sm:$0xff] }
0x2646   :  { %10864 = vst [vmem:[#allocation22_spill] sm:$0xff] %v9941_v60 }
0x2647   :  { %v4741_v36 = vmul.f32 %v7964_v14, %v4740_v2  ;;  %v9932_v14 = vld [vmem:[#allocation2 + $0x740] sm:$0xff] }
0x2648   :  { %10861 = vst [vmem:[#allocation20_spill] sm:$0xff] %v9932_v14  ;;  %v9944_v2 = vld [vmem:[#allocation2 + $0x480] sm:$0xff] }
0x2649   :  { %v4742_v1 = vmul.f32 %v4741_v36, %v4729_v22  ;;  %10865 = vst [vmem:[#allocation15_spill] sm:$0xff] %v9944_v2  ;;  %v9947_v36 = vld [vmem:[#allocation2 + $0x460] sm:$0xff] }
0x264a   :  { %10866 = vst [vmem:[#allocation6_spill] sm:$0xff] %v9947_v36 }
0x264b   :  { %v4744_v18 = vsel %vm4743_vm6, %v4729_v22, %v4742_v1  ;;  %v9929_v22 = vld [vmem:[#allocation2 + $0x500] sm:$0xff] }
0x264c   :  { %v4747_v28 = vsel %vm4745_vm7, %v4746_v38, %v4744_v18  ;;  %10860 = vst [vmem:[#allocation19_spill] sm:$0xff] %v9929_v22  ;;  %v9950_v1 = vld [vmem:[#allocation2 + $0x440] sm:$0xff] }
0x264d   :  { %v4751_v8 = vmul.f32 %v4749_v13, %v4747_v28  ;;  %10867 = vst [vmem:[#allocation11_spill] sm:$0xff] %v9950_v1  ;;  %v9956_v38 = vld [vmem:[#allocation2 + $0x400] sm:$0xff] }
0x264e   :  { %10869 = vst [vmem:[#allocation16_spill] sm:$0xff] %v9956_v38 }
0x264f   :  { %v4752_v42 = vadd.f32 %v4751_v8, %v4735_v57  ;;  %v4898_v8 = vpop.f32.mrf.mxu1 }
0x2651   :  { %4759 = vperm.xlu1 %7687, %v4752_v42  }
0x2659   :  { %5136 = vrot.lane.b32.xlu1 %v5134_v52, %s8278_s19 }
0x26c3   :  { %v4760_v23 = vpop.permute.xlu1 %4759 }
0x26c4   :  { %v4762_v11 = vsel %vm2710_vm14, %v4755_v7, %v4760_v23 }
0x26c5   :  { %4764 = vrot.lane.b32.xlu0 %v4762_v11, %s8282_s23 }
0x26cd   :  { %5152 = vrot.lane.b32.xlu0 %v5134_v52, %s8279_s20 }
0x2737   :  { %v4765_v53 = vpop.permute.xlu0 %4764 }
0x2738   :  { %v4767_v29 = vmul.f32 %v7966_v10, %v4765_v53 }
0x273a   :  { %4769 = vrot.lane.b32.xlu2 %v4767_v29, %s8283_s24  ;;  %v4938_v29 = vpop.f32.mrf.mxu2 }
0x2742   :  { %5158 = vperm.xlu2 %7686, %v5134_v52  }
0x2794   :  { %v4770_v24 = vpop.permute.xlu2 %4769 }
0x2795   :  { %v4772_v43 = vadd.f32 %v4770_v24, %v4720_v5  ;;  %v9911_v5 = vld [vmem:[#allocation2 + $0x560] sm:$0xff] }
0x2797   :  { %4773 = vst.msk [vmem:[%s10648_s5 + $0x30] sm:$0xff] %vm46_vm1, %v4772_v43  ;;  %7523 = vmatmul.msk.f32.vlgmr.msrb.gmra.mxu0 %vm46_vm1, %v4772_v43  ;;  %7527 = vmatmul.msk.f32.vlgmr.msra.gmra.mxu3 %vm46_vm1, %v4772_v43 }
0x2798   :  { %7528 = vmatpush.msk.msrb.mxu0 %vm71_vm0, %v9857_v26  ;;  %7541 = vmatpush.msk.msra.mxu3 %vm235_vm3, %v9861_v45 }
0x279f   :  { %7525 = vmatmul.msk.f32.vlgmr.msra.gmra.mxu0 %vm46_vm1, %v4772_v43  ;;  %7531 = vmatmul.msk.f32.vlgmr.msrb.gmra.mxu3 %vm210_vm4, %v9787_v25 }
0x27a0   :  { %7534 = vmatpush.msk.msra.mxu0 %vm235_vm3, %v9868_v49  ;;  %5110 = vmatpush.msrb.mxu3 %v9872_v40 }
0x27a2   :  { %5111 = vmatpush.msrb.mxu3 %v9875_v61 }
0x27a4   :  { %5112 = vmatpush.msrb.mxu3 %v9878_v30 }
0x27a6   :  { %5113 = vmatpush.msrb.mxu3 %v9881_v33 }
0x27a7   :  { %7529 = vmatmul.msk.f32.vlgmr.msrb.gmra.mxu0 %vm46_vm1, %v4772_v43 }
0x27a8   :  { %5060 = vmatpush.msrb.mxu0 %v9885_v58  ;;  %5114 = vmatpush.msrb.mxu3 %v9888_v47 }
0x27aa   :  { %5061 = vmatpush.msrb.mxu0 %v9891_v41  ;;  %5115 = vmatpush.msrb.mxu3 %v9894_v62 }
0x27ac   :  { %5062 = vmatpush.msrb.mxu0 %v9897_v21  ;;  %5116 = vmatpush.msrb.mxu3 %v9900_v9 }
0x27ae   :  { %5063 = vmatpush.msrb.mxu0 %v9903_v20  ;;  %5117 = vmatpush.msrb.mxu3 %v9906_v19 }
0x27af   :  { %7535 = vmatmul.msk.f32.vlgmr.msra.gmra.mxu0 %vm210_vm4, %v9787_v25  ;;  %v9926_v25 = vld [vmem:[#allocation2 + $0x760] sm:$0xff] }
0x27b0   :  { %5064 = vmatpush.msrb.mxu0 %v9911_v5  ;;  %5118 = vmatpush.msrb.mxu3 %v9914_v0 }
0x27b2   :  { %5065 = vmatpush.msrb.mxu0 %v9917_v34  ;;  %5119 = vmatpush.msrb.mxu3 %v9920_v6 }
0x27b4   :  { %5066 = vmatpush.msrb.mxu0 %v9923_v3  ;;  %5120 = vmatpush.msrb.mxu3 %v9926_v25 }
0x27b6   :  { %5067 = vmatpush.msrb.mxu0 %v9929_v22  ;;  %5121 = vmatpush.msrb.mxu3 %v9932_v14 }
0x27b8   :  { %5068 = vmatpush.msrb.mxu0 %v9935_v44 }
0x27ba   :  { %5069 = vmatpush.msrb.mxu0 %v9938_v48 }
0x27bc   :  { %5070 = vmatpush.msrb.mxu0 %v9941_v60 }
0x27be   :  { %5071 = vmatpush.msrb.mxu0 %v9944_v2 }
0x27c0   :  { %5072 = vmatpush.msrb.mxu0 %v9947_v36 }
0x27c2   :  { %5073 = vmatpush.msrb.mxu0 %v9950_v1 }
0x27c4   :  { %5074 = vmatpush.msrb.mxu0 %v9953_v31 }
0x27c6   :  { %5075 = vmatpush.msrb.mxu0 %v9956_v38 }
0x27c8   :  { %7561 = vmatpush.msk.msra.mxu0 %vm235_vm3, %v9775_v16 }
0x2814   :  { %v4794_v13 = vpop.f32.mrf.mxu0 }
0x2815   :  { %v4857_v7 = vadd.f32 %v4794_v13, %v10853_v32 }
0x281a   :  { %v4834_v18 = vpop.f32.mrf.mxu3 }
0x281c   :  { %v4814_v28 = vpop.f32.mrf.mxu0 }
0x281d   :  { %v4858_v57 = vadd.f32 %v4814_v28, %v10854_v15 }
0x281f   :  { %v4942_v42 = vadd.f32 %v4898_v8, %v4858_v57 }
0x2821   :  { %v7539_v23 = vmul.f32 -1.442695, %v4942_v42 }
0x2822   :  { %v4878_v11 = vpop.f32.mrf.mxu3 }
0x2823   :  { %7967 = vpow2.f32 %v7539_v23  ;;  %v4941_v52 = vadd.f32 %v4878_v11, %v4857_v7  ;;  %v4859_v11 = vadd.f32 %v4834_v18, %v10856_v17 }
0x2824   :  { %v4854_v39 = vpop.f32.mrf.mxu0 }
0x2825   :  { %v7538_v10 = vmul.f32 -1.442695, %v4941_v52  ;;  %v4860_v53 = vadd.f32 %v4854_v39, %v10855_v55 }
0x2827   :  { %7969 = vpow2.f32 %v7538_v10  ;;  %v4944_v24 = vadd.f32 %v4938_v29, %v4860_v53 }
0x2829   :  { %v7968_v43 = vpop.eup %7967  ;;  %v7540_v16 = vmul.f32 -1.442695, %v4944_v24 }
0x282a   :  { %v4967_v38 = vadd.f32 1.0, %v7968_v43 }
0x282b   :  { %7971 = vpow2.f32 %v7540_v16 }
0x282c   :  { %7973 = vrcp.f32 %v4967_v38  ;;  %v4918_v7 = vpop.f32.mrf.mxu0  ;;  %v4979_v24 = vand.u32 2147483648, %v4967_v38  ;;  %vm4973_vm9 = vweird.f32 %v4967_v38 }
0x282d   :  { %v7970_v28 = vpop.eup %7969  ;;  %v4943_v10 = vadd.f32 %v4918_v7, %v4859_v11 }
0x282e   :  { %v4948_v57 = vadd.f32 1.0, %v7970_v28  ;;  %v4977_v28 = vand.u32 2147483647, %v4967_v38 }
0x2830   :  { %7975 = vrcp.f32 %v4948_v57  ;;  %v4958_v32 = vand.u32 2147483647, %v4948_v57  ;;  %v4960_v15 = vand.u32 2147483648, %v4948_v57  ;;  %vm4954_vm13 = vweird.f32 %v4948_v57 }
0x2831   :  { %v7972_v13 = vpop.eup %7971  ;;  %vm4978_vm15 = vcmp.eq.f32.partialorder %v4977_v28, 8.507059e+37 }
0x2832   :  { %v7974_v8 = vpop.eup %7973  ;;  %v4987_v42 = vadd.f32 1.0, %v7972_v13  ;;  %v4961_v11 = vor.u32 1.1754944e-38, %v4960_v15  ;;  %vm4959_vm6 = vcmp.eq.f32.partialorder %v4958_v32, 8.507059e+37 }
0x2833   :  { %v4969_v23 = vmul.f32 %v7974_v8, %v4967_v38  ;;  %vm4974_vm8 = vweird.f32 %v7974_v8 }
0x2834   :  { %7977 = vrcp.f32 %v4987_v42  ;;  %vm4975_vm11 = vmor %vm4973_vm9, %vm4974_vm8  ;;  %vm4993_vm8 = vweird.f32 %v4987_v42 }
0x2835   :  { %v4970_v52 = vsub.f32 1.0, %v4969_v23  ;;  %7979 = vtanh.f32 %v4943_v10  ;;  %v4980_v23 = vor.u32 1.1754944e-38, %v4979_v24 }
0x2836   :  { %v7976_v39 = vpop.eup %7975 }
0x2837   :  { %v4971_v53 = vmul.f32 %v7974_v8, %v4970_v52  ;;  %v4950_v29 = vmul.f32 %v7976_v39, %v4948_v57  ;;  %vm4955_vm12 = vweird.f32 %v7976_v39 }
0x2838   :  { %vm4956_vm2 = vmor %vm4954_vm13, %vm4955_vm12 }
0x2839   :  { %v4951_v16 = vsub.f32 1.0, %v4950_v29  ;;  %v4972_v43 = vadd.f32 %v7974_v8, %v4971_v53 }
0x283a   :  { %v7978_v55 = vpop.eup %7977 }
0x283b   :  { %v4989_v13 = vmul.f32 %v7978_v55, %v4987_v42  ;;  %v4952_v31 = vmul.f32 %v7976_v39, %v4951_v16  ;;  %v4976_v18 = vsel %vm4975_vm11, %v7974_v8, %v4972_v43  ;;  %v7980_v38 = vpop.eup %7979  ;;  %vm4994_vm7 = vweird.f32 %v7978_v55 }
0x283c   :  { %v4981_v52 = vsel %vm4978_vm15, %v4980_v23, %v4976_v18  ;;  %v4999_v8 = vand.u32 2147483648, %v4987_v42  ;;  %vm4995_vm9 = vmor %vm4993_vm8, %vm4994_vm7  ;;  %v9989_v18 = vld [vmem:[#allocation2 + $0x6c0] sm:$0xff] }
0x283d   :  { %v4990_v17 = vsub.f32 1.0, %v4989_v13  ;;  %v4953_v7 = vadd.f32 %v7976_v39, %v4952_v31  ;;  %v5003_v36 = vmul.f32 %v4981_v52, %v9784_v4  ;;  %v4997_v31 = vand.u32 2147483647, %v4987_v42  ;;  %v9986_v13 = vld [vmem:[#allocation2 + $0x6e0] sm:$0xff] }
0x283e   :  { %v5000_v57 = vor.u32 1.1754944e-38, %v4999_v8  ;;  %v9992_v23 = vld [vmem:[#allocation2 + $0x6a0] sm:$0xff] }
0x283f   :  { %v4957_v29 = vsel %vm4956_vm2, %v7976_v39, %v4953_v7  ;;  %v4991_v53 = vmul.f32 %v7978_v55, %v4990_v17  ;;  %vm4998_vm11 = vcmp.eq.f32.partialorder %v4997_v31, 8.507059e+37  ;;  %v9995_v7 = vld [vmem:[#allocation2 + $0x680] sm:$0xff] }
0x2840   :  { %v4962_v1 = vsel %vm4959_vm6, %v4961_v11, %v4957_v29  ;;  %v10000_v11 = vld [vmem:[#allocation2 + $0x660] sm:$0xff] }
0x2841   :  { %v5004_v10 = vmul.f32 %v7980_v38, %v4962_v1  ;;  %v4992_v16 = vadd.f32 %v7978_v55, %v4991_v53  ;;  %v10003_v52 = vld [vmem:[#allocation2 + $0x640] sm:$0xff] }
0x2842   :  { %v10006_v29 = vld [vmem:[#allocation2 + $0x620] sm:$0xff] }
0x2843   :  { %v9966_v2 = vadd.f32 %v5004_v10, %v5003_v36  ;;  %v4996_v15 = vsel %vm4995_vm9, %v7978_v55, %v4992_v16  ;;  %v10009_v38 = vld [vmem:[#allocation2 + $0x600] sm:$0xff] }
0x2844   :  { %v5001_v39 = vsel %vm4998_vm11, %v5000_v57, %v4996_v15  ;;  %v10014_v10 = vld [vmem:[#allocation2 + $0x700] ss:$0 sm:$0xff] }
0x2845   :  { %7981 = vtanh.f32 %v9966_v2  ;;  %10870 = vst [vmem:[#allocation17_spill] sm:$0xff] %v10014_v10  ;;  %v10017_v15 = vld [vmem:[#allocation2 + $0x720] ss:$0 sm:$0xff] }
0x2846   :  { %10871 = vst [vmem:[#allocation18_spill] sm:$0xff] %v10017_v15 }
0x284b   :  { %v7982_v32 = vpop.eup %7981 }
0x284c   :  { %v9969_v17 = vmul.f32 %v7982_v32, %v5001_v39 }
0x284e   :  { %7542 = vmatmul.msk.f32.vlgmr.msra.gmra.mxu3 %vm210_vm4, %v9969_v17  ;;  %7544 = vmatmul.msk.f32.vlgmr.msra.gmra.mxu1 %vm210_vm4, %v9969_v17 }
0x284f   :  { %7557 = vmatpush.msk.msra.mxu3 %vm235_vm3, %v9793_v27  ;;  %7549 = vmatpush.msk.msra.mxu1 %vm71_vm0, %v9797_v56 }
0x28cb   :  { %v5048_v4 = vpop.f32.mrf.mxu1 }
0x28cc   :  { %v5049_v55 = vadd.f32 %v5048_v4, %v9111_v54  ;;  %v10027_v4 = vld [vmem:[#allocation2 + $0x8c0] ss:$0 sm:$0xff] }
0x28cd   :  { %10872 = vst [vmem:[#allocation25_spill] sm:$0xff] %v10027_v4 }
0x28ce   :  { %vm5052_vm12 = vcmp.ge.f32.partialorder %v5049_v55, 0.0  ;;  %v5054_v36 = vmul.f32 %v5049_v55, %v10788_v51 }
0x28d0   :  { %v5056_v1 = vsel %vm5052_vm12, %v5049_v55, %v5054_v36 }
0x28d1   :  { %v5028_v42 = vpop.f32.mrf.mxu3  ;;  %7545 = vmatmul.msk.f32.vlgmr.msrb.gmra.mxu2 %vm2631_vm10, %v5056_v1 }
0x28d2   :  { %v5029_v24 = vadd.f32 %v5028_v42, %v9103_v63  ;;  %7555 = vmatpush.msk.msrb.mxu2 %vm235_vm3, %v9806_v35 }
0x28d4   :  { %vm5051_vm13 = vcmp.ge.f32.partialorder %v5029_v24, 0.0  ;;  %v5053_v43 = vmul.f32 %v5029_v24, %v9106_v46 }
0x28d6   :  { %v5055_v28 = vsel %vm5051_vm13, %v5029_v24, %v5053_v43 }
0x28d7   :  { %5076 = vmatmul.f32.vlgmr.msrb.gmra.mxu0 %v5055_v28 }
0x28d8   :  { %5492 = vmatpush.msrb.mxu0 %v9986_v13 }
0x28da   :  { %5493 = vmatpush.msrb.mxu0 %v9989_v18 }
0x28dc   :  { %5494 = vmatpush.msrb.mxu0 %v9992_v23 }
0x28de   :  { %5495 = vmatpush.msrb.mxu0 %v9995_v7 }
0x28df   :  { %7562 = vmatmul.msk.f32.vlgmr.msra.gmra.mxu0 %vm210_vm4, %v9969_v17 }
0x28e0   :  { %5496 = vmatpush.msrb.mxu0 %v10000_v11 }
0x28e2   :  { %5497 = vmatpush.msrb.mxu0 %v10003_v52 }
0x28e4   :  { %5498 = vmatpush.msrb.mxu0 %v10006_v29 }
0x28e6   :  { %5499 = vmatpush.msrb.mxu0 %v10009_v38 }
0x28e8   :  { %7576 = vmatpush.msk.msra.mxu0 %vm71_vm0, %v9820_v50 }
0x2954   :  { %v5077_v53 = vpop.f32.mrf.mxu0  ;;  %v5097_v8 = vpop.f32.mrf.mxu2 }
0x2955   :  { %v5078_v16 = vadd.f32 %v10014_v10, %v5077_v53 }
0x2957   :  { %v5098_v31 = vadd.f32 %v5097_v8, %v5078_v16 }
0x2959   :  { %vm5100_vm15 = vcmp.ge.f32.partialorder %v5098_v31, 0.0  ;;  %v5101_v57 = vmul.f32 %v10017_v15, %v5098_v31 }
0x295b   :  { %v5102_v32 = vsel %vm5100_vm15, %v5098_v31, %v5101_v57 }
0x295c   :  { %7546 = vmatmul.msk.f32.vlgmr.msrb.gmra.mxu3 %vm1702_vm5, %v5102_v32 }
0x295d   :  { %7568 = vmatpush.msk.msrb.mxu3 %vm235_vm3, %v9827_v37 }
0x2964   :  { %7558 = vmatmul.msk.f32.vlgmr.msra.gmra.mxu3 %vm210_vm4, %v9969_v17 }
0x2965   :  { %7572 = vmatpush.msk.msra.mxu3 %vm71_vm0, %v9833_v12  ;;  %v5153_v12 = vpop.permute.xlu0 %5152 }
0x29df   :  { %v5123_v39 = vpop.f32.mrf.mxu3 }
0x29e0   :  { %v5124_v55 = vadd.f32 %v10027_v4, %v5123_v39  ;;  %v5137_v39 = vpop.permute.xlu1 %5136 }
0x29e2   :  { %5126 = vst.msk [vmem:[%s10647_s4 + $0x30] sm:$0xff] %vm210_vm4, %v5124_v55  ;;  %7983 = vtanh.f32 %v5124_v55 }
0x29e8   :  { %v7984_v36 = vpop.eup %7983 }
0x29e9   :  { %v5130_v1 = vmul.f32 %v7984_v36, %v7984_v36  ;;  %v5139_v10 = vmul.f32 %v7984_v36, %v5137_v39  ;;  %v10875_v36 = vld [vmem:[#allocation11_spill] sm:$0xff]  ;;  %v10879_v39 = vld [vmem:[#allocation10_spill] sm:$0xff] }
0x29eb   :  { %v5131_v42 = vsub.f32 1.0, %v5130_v1 }
0x29ed   :  { %v5132_v24 = vmax.f32 %v5131_v42, 1e-05  ;;  %v5159_v42 = vpop.permute.xlu2 %5158 }
0x29ef   :  { %v5133_v43 = vmin.f32 %v5132_v24, 1.0 }
0x29f1   :  { %7985 = vrsqrt.f32 %v5133_v43  ;;  %vm5147_vm2 = vcmp.eq.f32.partialorder %v5133_v43, inf  ;;  %v5150_v4 = vand.u32 2147483648, %v5133_v43  ;;  %vm5149_vm6 = vcmp.eq.f32.partialorder %v5133_v43, 0.0 }
0x29f7   :  { %v7986_v28 = vpop.eup %7985 }
0x29f8   :  { %v5141_v53 = vmul.f32 %v7986_v28, %v5133_v43 }
0x29fa   :  { %v5142_v16 = vmul.f32 %v7986_v28, %v5141_v53 }
0x29fc   :  { %v5143_v8 = vmul.f32 0.5, %v5142_v16  ;;  %v10877_v16 = vld [vmem:[#allocation16_spill] sm:$0xff] }
0x29fe   :  { %v5144_v31 = vsub.f32 1.5, %v5143_v8  ;;  %v10878_v8 = vld [vmem:[#allocation23_spill] sm:$0xff] }
0x2a00   :  { %v5145_v57 = vmul.f32 %v7986_v28, %v5144_v31  ;;  %v5538_v28 = vld [vmem:[%s10645_s2 + $0x38] sm:$0xff] }
0x2a02   :  { %v5146_v32 = vmul.f32 %v5145_v57, %v5133_v43 }
0x2a04   :  { %v5148_v37 = vsel %vm5147_vm2, %v5133_v43, %v5146_v32  ;;  %v10876_v43 = vld [vmem:[#allocation5_spill] sm:$0xff] }
0x2a05   :  { %v5151_v15 = vsel %vm5149_vm6, %v5150_v4, %v5148_v37  ;;  %v5127_v37 = vmul.f32 1.442695, %v5124_v55 }
0x2a06   :  { %v5155_v50 = vmul.f32 %v5153_v12, %v5151_v15 }
0x2a07   :  { %7987 = vpow2.f32 %v5127_v37 }
0x2a08   :  { %v5156_v1 = vadd.f32 %v5155_v50, %v5139_v10 }
0x2a0a   :  { %5163 = vperm.xlu1 %7687, %v5156_v1  }
0x2a0d   :  { %v7988_v12 = vpop.eup %7987 }
0x2a12   :  { %5540 = vrot.lane.b32.xlu1 %v5538_v28, %s8278_s19 }
0x2a7c   :  { %v5164_v24 = vpop.permute.xlu1 %5163 }
0x2a7d   :  { %v5166_v53 = vsel %vm2710_vm14, %v5159_v42, %v5164_v24  ;;  %v5302_v42 = vpop.f32.mrf.mxu3 }
0x2a7e   :  { %5168 = vrot.lane.b32.xlu0 %v5166_v53, %s8282_s23  ;;  %v10880_v53 = vld [vmem:[#allocation8_spill] sm:$0xff] }
0x2a86   :  { %5556 = vrot.lane.b32.xlu0 %v5538_v28, %s8279_s20 }
0x2af0   :  { %v5169_v50 = vpop.permute.xlu0 %5168 }
0x2af1   :  { %v5171_v10 = vmul.f32 %v7988_v12, %v5169_v50 }
0x2af3   :  { %5173 = vrot.lane.b32.xlu2 %v5171_v10, %s8283_s24 }
0x2afb   :  { %5562 = vperm.xlu2 %7686, %v5538_v28  }
0x2b4d   :  { %v5174_v15 = vpop.permute.xlu2 %5173 }
0x2b4e   :  { %v5176_v4 = vadd.f32 %v5174_v15, %v5124_v55  ;;  %v10874_v55 = vld [vmem:[#allocation6_spill] sm:$0xff] }
0x2b50   :  { %5177 = vst.msk [vmem:[%s10648_s5 + $0x38] sm:$0xff] %vm46_vm1, %v5176_v4  ;;  %7548 = vmatmul.msk.f32.vlgmr.msrb.gmra.mxu1 %vm46_vm1, %v5176_v4  ;;  %7552 = vmatmul.msk.f32.vlgmr.msra.gmra.mxu2 %vm46_vm1, %v5176_v4 }
0x2b51   :  { %7553 = vmatpush.msk.msrb.mxu1 %vm71_vm0, %v9857_v26  ;;  %7566 = vmatpush.msk.msra.mxu2 %vm235_vm3, %v9861_v45 }
0x2b58   :  { %7550 = vmatmul.msk.f32.vlgmr.msra.gmra.mxu1 %vm46_vm1, %v5176_v4  ;;  %7556 = vmatmul.msk.f32.vlgmr.msrb.gmra.mxu2 %vm210_vm4, %v9969_v17 }
0x2b59   :  { %7559 = vmatpush.msk.msra.mxu1 %vm235_vm3, %v9868_v49  ;;  %5514 = vmatpush.msrb.mxu2 %v9872_v40 }
0x2b5b   :  { %5515 = vmatpush.msrb.mxu2 %v9875_v61 }
0x2b5d   :  { %5516 = vmatpush.msrb.mxu2 %v9878_v30 }
0x2b5f   :  { %5517 = vmatpush.msrb.mxu2 %v9881_v33 }
0x2b60   :  { %7554 = vmatmul.msk.f32.vlgmr.msrb.gmra.mxu1 %vm46_vm1, %v5176_v4  ;;  %v10881_v4 = vld [vmem:[#allocation9_spill] sm:$0xff] }
0x2b61   :  { %5464 = vmatpush.msrb.mxu1 %v9885_v58  ;;  %5518 = vmatpush.msrb.mxu2 %v9888_v47 }
0x2b63   :  { %5465 = vmatpush.msrb.mxu1 %v9891_v41  ;;  %5519 = vmatpush.msrb.mxu2 %v9894_v62 }
0x2b65   :  { %5466 = vmatpush.msrb.mxu1 %v9897_v21  ;;  %5520 = vmatpush.msrb.mxu2 %v9900_v9 }
0x2b67   :  { %5467 = vmatpush.msrb.mxu1 %v9903_v20  ;;  %5521 = vmatpush.msrb.mxu2 %v9906_v19 }
0x2b68   :  { %7560 = vmatmul.msk.f32.vlgmr.msra.gmra.mxu1 %vm210_vm4, %v9969_v17  ;;  %v10873_v17 = vld [vmem:[#allocation15_spill] sm:$0xff] }
0x2b69   :  { %5468 = vmatpush.msrb.mxu1 %v9911_v5  ;;  %5522 = vmatpush.msrb.mxu2 %v9914_v0 }
0x2b6b   :  { %5469 = vmatpush.msrb.mxu1 %v9917_v34  ;;  %5523 = vmatpush.msrb.mxu2 %v9920_v6 }
0x2b6d   :  { %5470 = vmatpush.msrb.mxu1 %v9923_v3  ;;  %5524 = vmatpush.msrb.mxu2 %v9926_v25 }
0x2b6f   :  { %5471 = vmatpush.msrb.mxu1 %v9929_v22  ;;  %5525 = vmatpush.msrb.mxu2 %v9932_v14 }
0x2b71   :  { %5472 = vmatpush.msrb.mxu1 %v9935_v44 }
0x2b73   :  { %5473 = vmatpush.msrb.mxu1 %v9938_v48 }
0x2b75   :  { %5474 = vmatpush.msrb.mxu1 %v9941_v60 }
0x2b77   :  { %5475 = vmatpush.msrb.mxu1 %v10873_v17 }
0x2b79   :  { %5476 = vmatpush.msrb.mxu1 %v10874_v55 }
0x2b7b   :  { %5477 = vmatpush.msrb.mxu1 %v10875_v36 }
0x2b7d   :  { %5478 = vmatpush.msrb.mxu1 %v10876_v43  ;;  %v5342_v43 = vpop.f32.mrf.mxu0 }
0x2b7f   :  { %5479 = vmatpush.msrb.mxu1 %v10877_v16 }
0x2b81   :  { %7586 = vmatpush.msk.msra.mxu1 %vm235_vm3, %v10878_v8 }
0x2bcd   :  { %v5198_v31 = vpop.f32.mrf.mxu1 }
0x2bce   :  { %v5261_v28 = vadd.f32 %v5198_v31, %v10880_v53 }
0x2bd3   :  { %v5238_v57 = vpop.f32.mrf.mxu2 }
0x2bd5   :  { %v5218_v32 = vpop.f32.mrf.mxu1 }
0x2bd6   :  { %v5262_v1 = vadd.f32 %v5218_v32, %v10879_v39 }
0x2bd8   :  { %v5346_v24 = vadd.f32 %v5302_v42, %v5262_v1 }
0x2bda   :  { %v7564_v37 = vmul.f32 -1.442695, %v5346_v24 }
0x2bdb   :  { %v5282_v12 = vpop.f32.mrf.mxu2 }
0x2bdc   :  { %7989 = vpow2.f32 %v7564_v37  ;;  %v5345_v50 = vadd.f32 %v5282_v12, %v5261_v28  ;;  %v10882_v12 = vld [vmem:[#allocation12_spill] sm:$0xff] }
0x2bdd   :  { %v5258_v10 = vpop.f32.mrf.mxu1 }
0x2bde   :  { %v7563_v15 = vmul.f32 -1.442695, %v5345_v50  ;;  %v5264_v16 = vadd.f32 %v5258_v10, %v10881_v4  ;;  %v5263_v50 = vadd.f32 %v5238_v57, %v10882_v12 }
0x2be0   :  { %7991 = vpow2.f32 %v7563_v15  ;;  %v5348_v8 = vadd.f32 %v5342_v43, %v5264_v16 }
0x2be2   :  { %v7990_v36 = vpop.eup %7989  ;;  %v7565_v55 = vmul.f32 -1.442695, %v5348_v8 }
0x2be3   :  { %v5371_v17 = vadd.f32 1.0, %v7990_v36 }
0x2be4   :  { %7993 = vpow2.f32 %v7565_v55 }
0x2be5   :  { %7995 = vrcp.f32 %v5371_v17  ;;  %v5322_v28 = vpop.f32.mrf.mxu1  ;;  %v5383_v36 = vand.u32 2147483648, %v5371_v17  ;;  %vm5377_vm8 = vweird.f32 %v5371_v17 }
0x2be6   :  { %v7992_v32 = vpop.eup %7991  ;;  %v5347_v15 = vadd.f32 %v5322_v28, %v5263_v50 }
0x2be7   :  { %v5352_v1 = vadd.f32 1.0, %v7992_v32  ;;  %v5381_v32 = vand.u32 2147483647, %v5371_v17 }
0x2be9   :  { %7997 = vrcp.f32 %v5352_v1  ;;  %v5362_v53 = vand.u32 2147483647, %v5352_v1  ;;  %v5364_v60 = vand.u32 2147483648, %v5352_v1  ;;  %vm5358_vm12 = vweird.f32 %v5352_v1 }
0x2bea   :  { %v7994_v31 = vpop.eup %7993  ;;  %vm5382_vm13 = vcmp.eq.f32.partialorder %v5381_v32, 8.507059e+37 }
0x2beb   :  { %v7996_v42 = vpop.eup %7995  ;;  %v5391_v24 = vadd.f32 1.0, %v7994_v31  ;;  %v5365_v50 = vor.u32 1.1754944e-38, %v5364_v60  ;;  %vm5363_vm2 = vcmp.eq.f32.partialorder %v5362_v53, 8.507059e+37 }
0x2bec   :  { %v5373_v37 = vmul.f32 %v7996_v42, %v5371_v17  ;;  %vm5378_vm7 = vweird.f32 %v7996_v42 }
0x2bed   :  { %7999 = vrcp.f32 %v5391_v24  ;;  %vm5379_vm9 = vmor %vm5377_vm8, %vm5378_vm7  ;;  %vm5397_vm7 = vweird.f32 %v5391_v24 }
0x2bee   :  { %v5374_v10 = vsub.f32 1.0, %v5373_v37  ;;  %8001 = vtanh.f32 %v5347_v15  ;;  %v5384_v37 = vor.u32 1.1754944e-38, %v5383_v36 }
0x2bef   :  { %v7998_v4 = vpop.eup %7997 }
0x2bf0   :  { %v5375_v43 = vmul.f32 %v7996_v42, %v5374_v10  ;;  %v5354_v16 = vmul.f32 %v7998_v4, %v5352_v1  ;;  %vm5359_vm11 = vweird.f32 %v7998_v4 }
0x2bf1   :  { %vm5360_vm15 = vmor %vm5358_vm12, %vm5359_vm11 }
0x2bf2   :  { %v5355_v55 = vsub.f32 1.0, %v5354_v16  ;;  %v5376_v8 = vadd.f32 %v7996_v42, %v5375_v43 }
0x2bf3   :  { %v8000_v39 = vpop.eup %7999 }
0x2bf4   :  { %v5393_v31 = vmul.f32 %v8000_v39, %v5391_v24  ;;  %v5356_v48 = vmul.f32 %v7998_v4, %v5355_v55  ;;  %v5380_v57 = vsel %vm5379_vm9, %v7996_v42, %v5376_v8  ;;  %v8002_v17 = vpop.eup %8001  ;;  %vm5398_vm6 = vweird.f32 %v8000_v39 }
0x2bf5   :  { %v5385_v10 = vsel %vm5382_vm13, %v5384_v37, %v5380_v57  ;;  %v5403_v42 = vand.u32 2147483648, %v5391_v24  ;;  %vm5399_vm8 = vmor %vm5397_vm7, %vm5398_vm6 }
0x2bf6   :  { %v5394_v12 = vsub.f32 1.0, %v5393_v31  ;;  %v5357_v28 = vadd.f32 %v7998_v4, %v5356_v48  ;;  %v5407_v14 = vmul.f32 %v5385_v10, %v9966_v2  ;;  %v5401_v48 = vand.u32 2147483647, %v5391_v24 }
0x2bf7   :  { %v5404_v1 = vor.u32 1.1754944e-38, %v5403_v42 }
0x2bf8   :  { %v5361_v16 = vsel %vm5360_vm15, %v7998_v4, %v5357_v28  ;;  %v5395_v43 = vmul.f32 %v8000_v39, %v5394_v12  ;;  %vm5402_vm9 = vcmp.eq.f32.partialorder %v5401_v48, 8.507059e+37  ;;  %v10885_v28 = vld [vmem:[#allocation18_spill] sm:$0xff] }
0x2bf9   :  { %v5366_v44 = vsel %vm5363_vm2, %v5365_v50, %v5361_v16  ;;  %v10886_v16 = vld [vmem:[#allocation21_spill] sm:$0xff] }
0x2bfa   :  { %v5408_v15 = vmul.f32 %v8002_v17, %v5366_v44  ;;  %v5396_v55 = vadd.f32 %v8000_v39, %v5395_v43  ;;  %v10887_v17 = vld [vmem:[#allocation7_spill] sm:$0xff] }
0x2bfc   :  { %v10096_v22 = vadd.f32 %v5408_v15, %v5407_v14  ;;  %v5400_v60 = vsel %vm5399_vm8, %v8000_v39, %v5396_v55  ;;  %v10888_v15 = vld [vmem:[#allocation25_spill] sm:$0xff] }
0x2bfd   :  { %v5405_v4 = vsel %vm5402_vm9, %v5404_v1, %v5400_v60 }
0x2bfe   :  { %8003 = vtanh.f32 %v10096_v22 }
0x2c04   :  { %v8004_v53 = vpop.eup %8003 }
0x2c05   :  { %v10099_v12 = vmul.f32 %v8004_v53, %v5405_v4 }
0x2c07   :  { %7567 = vmatmul.msk.f32.vlgmr.msra.gmra.mxu2 %vm210_vm4, %v10099_v12  ;;  %7569 = vmatmul.msk.f32.vlgmr.msrb.gmra.mxu3 %vm210_vm4, %v10099_v12 }
0x2c08   :  { %7582 = vmatpush.msk.msra.mxu2 %vm235_vm3, %v9793_v27  ;;  %7574 = vmatpush.msk.msrb.mxu3 %vm71_vm0, %v9797_v56  ;;  %v10883_v27 = vld [vmem:[#allocation24_spill] sm:$0xff] }
0x2c8a   :  { %v5432_v14 = vpop.f32.mrf.mxu2  ;;  %v5452_v44 = vpop.f32.mrf.mxu3 }
0x2c8b   :  { %v5433_v2 = vadd.f32 %v5432_v14, %v9103_v63  ;;  %v5453_v39 = vadd.f32 %v5452_v44, %v9111_v54 }
0x2c8d   :  { %vm5455_vm11 = vcmp.ge.f32.partialorder %v5433_v2, 0.0  ;;  %v5457_v24 = vmul.f32 %v5433_v2, %v9106_v46  ;;  %vm5456_vm12 = vcmp.ge.f32.partialorder %v5453_v39, 0.0  ;;  %v5458_v36 = vmul.f32 %v5453_v39, %v10788_v51 }
0x2c8f   :  { %v5459_v8 = vsel %vm5455_vm11, %v5433_v2, %v5457_v24  ;;  %v5460_v32 = vsel %vm5456_vm12, %v5453_v39, %v5458_v36 }
0x2c90   :  { %5480 = vmatmul.f32.vlgmr.msrb.gmra.mxu1 %v5459_v8  ;;  %7570 = vmatmul.msk.f32.vlgmr.msrb.gmra.mxu0 %vm2631_vm10, %v5460_v32  ;;  %v5541_v8 = vpop.permute.xlu1 %5540 }
0x2c91   :  { %7580 = vmatpush.msk.msrb.mxu0 %vm235_vm3, %v9806_v35  ;;  %5896 = vmatpush.msrb.mxu1 %v9986_v13  ;;  %v10884_v35 = vld [vmem:[#allocation17_spill] sm:$0xff] }
0x2c93   :  { %5897 = vmatpush.msrb.mxu1 %v9989_v18 }
0x2c95   :  { %5898 = vmatpush.msrb.mxu1 %v9992_v23 }
0x2c97   :  { %5899 = vmatpush.msrb.mxu1 %v9995_v7 }
0x2c98   :  { %7587 = vmatmul.msk.f32.vlgmr.msra.gmra.mxu1 %vm210_vm4, %v10099_v12 }
0x2c99   :  { %5900 = vmatpush.msrb.mxu1 %v10000_v11 }
0x2c9b   :  { %5901 = vmatpush.msrb.mxu1 %v10003_v52 }
0x2c9d   :  { %5902 = vmatpush.msrb.mxu1 %v10006_v29 }
0x2c9f   :  { %5903 = vmatpush.msrb.mxu1 %v10009_v38 }
0x2ca1   :  { %7601 = vmatpush.msk.msra.mxu1 %vm71_vm0, %v10883_v27  ;;  %v5557_v27 = vpop.permute.xlu0 %5556 }
0x2d0d   :  { %v5481_v56 = vpop.f32.mrf.mxu1  ;;  %v5501_v57 = vpop.f32.mrf.mxu0 }
0x2d0e   :  { %v5482_v31 = vadd.f32 %v10884_v35, %v5481_v56 }
0x2d10   :  { %v5502_v37 = vadd.f32 %v5501_v57, %v5482_v31 }
0x2d12   :  { %vm5504_vm13 = vcmp.ge.f32.partialorder %v5502_v37, 0.0  ;;  %v5505_v50 = vmul.f32 %v10885_v28, %v5502_v37 }
0x2d14   :  { %v5506_v10 = vsel %vm5504_vm13, %v5502_v37, %v5505_v50 }
0x2d15   :  { %7571 = vmatmul.msk.f32.vlgmr.msrb.gmra.mxu2 %vm1702_vm5, %v5506_v10  ;;  %v5563_v10 = vpop.permute.xlu2 %5562 }
0x2d16   :  { %7593 = vmatpush.msk.msrb.mxu2 %vm235_vm3, %v10886_v16 }
0x2d1d   :  { %7583 = vmatmul.msk.f32.vlgmr.msra.gmra.mxu2 %vm210_vm4, %v10099_v12 }
0x2d1e   :  { %7597 = vmatpush.msk.msra.mxu2 %vm71_vm0, %v10887_v17 }
0x2d98   :  { %v5527_v43 = vpop.f32.mrf.mxu2 }
0x2d99   :  { %v5528_v55 = vadd.f32 %v10888_v15, %v5527_v43  ;;  %v5942_v43 = vld [vmem:[%s10645_s2 + $0x40] sm:$0xff] }
0x2d9b   :  { %5530 = vst.msk [vmem:[%s10647_s4 + $0x38] sm:$0xff] %vm210_vm4, %v5528_v55  ;;  %8005 = vtanh.f32 %v5528_v55 }
0x2da1   :  { %v8006_v42 = vpop.eup %8005 }
0x2da2   :  { %v5534_v48 = vmul.f32 %v8006_v42, %v8006_v42  ;;  %v5543_v57 = vmul.f32 %v8006_v42, %v5541_v8  ;;  %v5746_v8 = vpop.f32.mrf.mxu1 }
0x2da4   :  { %v5535_v60 = vsub.f32 1.0, %v5534_v48  ;;  %v5531_v48 = vmul.f32 1.442695, %v5528_v55 }
0x2da6   :  { %v5536_v1 = vmax.f32 %v5535_v60, 1e-05 }
0x2da8   :  { %v5537_v53 = vmin.f32 %v5536_v1, 1.0 }
0x2daa   :  { %8007 = vrsqrt.f32 %v5537_v53  ;;  %vm5551_vm15 = vcmp.eq.f32.partialorder %v5537_v53, inf  ;;  %v5554_v32 = vand.u32 2147483648, %v5537_v53  ;;  %vm5553_vm2 = vcmp.eq.f32.partialorder %v5537_v53, 0.0 }
0x2dab   :  { %8009 = vpow2.f32 %v5531_v48 }
0x2db0   :  { %v8008_v4 = vpop.eup %8007 }
0x2db1   :  { %v5545_v14 = vmul.f32 %v8008_v4, %v5537_v53  ;;  %v8010_v42 = vpop.eup %8009 }
0x2db3   :  { %v5546_v44 = vmul.f32 %v8008_v4, %v5545_v14 }
0x2db5   :  { %v5547_v2 = vmul.f32 0.5, %v5546_v44 }
0x2db7   :  { %v5548_v39 = vsub.f32 1.5, %v5547_v2 }
0x2db9   :  { %v5549_v24 = vmul.f32 %v8008_v4, %v5548_v39 }
0x2dbb   :  { %v5550_v36 = vmul.f32 %v5549_v24, %v5537_v53  ;;  %v10902_v24 = vld [vmem:[#allocation9_spill] sm:$0xff] }
0x2dbd   :  { %v5552_v56 = vsel %vm5551_vm15, %v5537_v53, %v5550_v36 }
0x2dbe   :  { %v5555_v31 = vsel %vm5553_vm2, %v5554_v32, %v5552_v56 }
0x2dbf   :  { %v5559_v37 = vmul.f32 %v5557_v27, %v5555_v31 }
0x2dc1   :  { %v5560_v50 = vadd.f32 %v5559_v37, %v5543_v57 }
0x2dc3   :  { %5567 = vperm.xlu1 %7687, %v5560_v50  }
0x2dcb   :  { %5944 = vrot.lane.b32.xlu1 %v5942_v43, %s8278_s19 }
0x2e35   :  { %v5568_v16 = vpop.permute.xlu1 %5567 }
0x2e36   :  { %v5570_v17 = vsel %vm2710_vm14, %v5563_v10, %v5568_v16  ;;  %v10903_v10 = vld [vmem:[#allocation12_spill] sm:$0xff] }
0x2e37   :  { %5572 = vrot.lane.b32.xlu0 %v5570_v17, %s8282_s23 }
0x2e3f   :  { %5960 = vrot.lane.b32.xlu0 %v5942_v43, %s8279_s20 }
0x2ea9   :  { %v5573_v60 = vpop.permute.xlu0 %5572 }
0x2eaa   :  { %v5575_v1 = vmul.f32 %v8010_v42, %v5573_v60 }
0x2eac   :  { %5577 = vrot.lane.b32.xlu2 %v5575_v1, %s8283_s24 }
0x2eb4   :  { %5966 = vperm.xlu2 %7686, %v5942_v43  }
0x2f06   :  { %v5578_v53 = vpop.permute.xlu2 %5577 }
0x2f07   :  { %v5580_v4 = vadd.f32 %v5578_v53, %v5528_v55 }
0x2f09   :  { %5581 = vst.msk [vmem:[%s10648_s5 + $0x40] sm:$0xff] %vm46_vm1, %v5580_v4  ;;  %7573 = vmatmul.msk.f32.vlgmr.msra.gmra.mxu3 %vm46_vm1, %v5580_v4  ;;  %7577 = vmatmul.msk.f32.vlgmr.msra.gmra.mxu0 %vm46_vm1, %v5580_v4 }
0x2f0a   :  { %7578 = vmatpush.msk.msra.mxu3 %vm71_vm0, %v9857_v26  ;;  %7591 = vmatpush.msk.msra.mxu0 %vm235_vm3, %v9861_v45  ;;  %v10889_v26 = vld [vmem:[#allocation19_spill] sm:$0xff]  ;;  %v10890_v45 = vld [vmem:[#allocation20_spill] sm:$0xff] }
0x2f11   :  { %7575 = vmatmul.msk.f32.vlgmr.msrb.gmra.mxu3 %vm46_vm1, %v5580_v4  ;;  %7581 = vmatmul.msk.f32.vlgmr.msrb.gmra.mxu0 %vm210_vm4, %v10099_v12 }
0x2f12   :  { %7584 = vmatpush.msk.msrb.mxu3 %vm235_vm3, %v9868_v49  ;;  %5918 = vmatpush.msrb.mxu0 %v9872_v40  ;;  %v10891_v49 = vld [vmem:[#allocation13_spill] sm:$0xff]  ;;  %v10892_v40 = vld [vmem:[#allocation14_spill] sm:$0xff] }
0x2f14   :  { %5919 = vmatpush.msrb.mxu0 %v9875_v61  ;;  %v10893_v61 = vld [vmem:[#allocation22_spill] sm:$0xff] }
0x2f16   :  { %5920 = vmatpush.msrb.mxu0 %v9878_v30  ;;  %v10894_v30 = vld [vmem:[#allocation15_spill] sm:$0xff] }
0x2f18   :  { %5921 = vmatpush.msrb.mxu0 %v9881_v33  ;;  %v10895_v33 = vld [vmem:[#allocation6_spill] sm:$0xff] }
0x2f19   :  { %7579 = vmatmul.msk.f32.vlgmr.msra.gmra.mxu3 %vm46_vm1, %v5580_v4 }
0x2f1a   :  { %5868 = vmatpush.msra.mxu3 %v9885_v58  ;;  %5922 = vmatpush.msrb.mxu0 %v9888_v47  ;;  %v10896_v58 = vld [vmem:[#allocation11_spill] sm:$0xff]  ;;  %v10897_v47 = vld [vmem:[#allocation5_spill] sm:$0xff] }
0x2f1c   :  { %5869 = vmatpush.msra.mxu3 %v9891_v41  ;;  %5923 = vmatpush.msrb.mxu0 %v9894_v62  ;;  %v10898_v41 = vld [vmem:[#allocation16_spill] sm:$0xff] }
0x2f1d   :  { %v10197_v62 = vld [vmem:[#allocation2 + $0x378] sm:$0x1f] }
0x2f1e   :  { %5870 = vmatpush.msra.mxu3 %v9897_v21  ;;  %5924 = vmatpush.msrb.mxu0 %v9900_v9  ;;  %10899 = vst [vmem:[#allocation23_spill] sm:$0xff] %v10197_v62 }
0x2f20   :  { %5871 = vmatpush.msra.mxu3 %v9903_v20  ;;  %5925 = vmatpush.msrb.mxu0 %v9906_v19  ;;  %v10900_v20 = vld [vmem:[#allocation8_spill] sm:$0xff] }
0x2f21   :  { %7585 = vmatmul.msk.f32.vlgmr.msrb.gmra.mxu3 %vm210_vm4, %v10099_v12  ;;  %v5706_v12 = vpop.f32.mrf.mxu2 }
0x2f22   :  { %5872 = vmatpush.msra.mxu3 %v9911_v5  ;;  %5926 = vmatpush.msrb.mxu0 %v9914_v0 }
0x2f24   :  { %5873 = vmatpush.msra.mxu3 %v9917_v34  ;;  %5927 = vmatpush.msrb.mxu0 %v9920_v6 }
0x2f26   :  { %5874 = vmatpush.msra.mxu3 %v9923_v3  ;;  %5928 = vmatpush.msrb.mxu0 %v9926_v25  ;;  %v10901_v3 = vld [vmem:[#allocation10_spill] sm:$0xff] }
0x2f28   :  { %5875 = vmatpush.msra.mxu3 %v10889_v26  ;;  %5929 = vmatpush.msrb.mxu0 %v10890_v45 }
0x2f2a   :  { %5876 = vmatpush.msra.mxu3 %v10891_v49 }
0x2f2c   :  { %5877 = vmatpush.msra.mxu3 %v10892_v40 }
0x2f2e   :  { %5878 = vmatpush.msra.mxu3 %v10893_v61 }
0x2f30   :  { %5879 = vmatpush.msra.mxu3 %v10894_v30 }
0x2f32   :  { %5880 = vmatpush.msra.mxu3 %v10895_v33 }
0x2f34   :  { %5881 = vmatpush.msra.mxu3 %v10896_v58 }
0x2f36   :  { %5882 = vmatpush.msra.mxu3 %v10897_v47 }
0x2f38   :  { %5883 = vmatpush.msra.mxu3 %v10898_v41 }
0x2f3a   :  { %7611 = vmatpush.msk.msrb.mxu3 %vm235_vm3, %v10197_v62 }
0x2f86   :  { %v5642_v21 = vpop.f32.mrf.mxu0 }
0x2f87   :  { %v5667_v16 = vadd.f32 %v5642_v21, %v10903_v10 }
0x2f8c   :  { %v5602_v9 = vpop.f32.mrf.mxu3 }
0x2f8d   :  { %v5665_v19 = vadd.f32 %v5602_v9, %v10900_v20 }
0x2f8e   :  { %v5686_v5 = vpop.f32.mrf.mxu0 }
0x2f8f   :  { %v5749_v0 = vadd.f32 %v5686_v5, %v5665_v19 }
0x2f91   :  { %v7588_v34 = vmul.f32 -1.442695, %v5749_v0 }
0x2f93   :  { %8011 = vpow2.f32 %v7588_v34 }
0x2f94   :  { %v5622_v6 = vpop.f32.mrf.mxu3 }
0x2f95   :  { %v5666_v25 = vadd.f32 %v5622_v6, %v10901_v3 }
0x2f97   :  { %v5750_v55 = vadd.f32 %v5706_v12, %v5666_v25 }
0x2f99   :  { %v8012_v14 = vpop.eup %8011  ;;  %v7589_v44 = vmul.f32 -1.442695, %v5750_v55 }
0x2f9a   :  { %v5756_v2 = vadd.f32 1.0, %v8012_v14 }
0x2f9b   :  { %8013 = vpow2.f32 %v7589_v44 }
0x2f9c   :  { %8015 = vrcp.f32 %v5756_v2  ;;  %v5662_v39 = vpop.f32.mrf.mxu3  ;;  %v5768_v26 = vand.u32 2147483648, %v5756_v2  ;;  %vm5762_vm7 = vweird.f32 %v5756_v2  ;;  %v5766_v49 = vand.u32 2147483647, %v5756_v2 }
0x2f9d   :  { %v5668_v36 = vadd.f32 %v5662_v39, %v10902_v24 }
0x2f9e   :  { %v5769_v58 = vor.u32 1.1754944e-38, %v5768_v26  ;;  %vm5767_vm12 = vcmp.eq.f32.partialorder %v5766_v49, 8.507059e+37 }
0x2f9f   :  { %v5752_v32 = vadd.f32 %v5746_v8, %v5668_v36 }
0x2fa1   :  { %v8014_v27 = vpop.eup %8013  ;;  %v7590_v56 = vmul.f32 -1.442695, %v5752_v32 }
0x2fa2   :  { %v8016_v31 = vpop.eup %8015  ;;  %v5775_v57 = vadd.f32 1.0, %v8014_v27 }
0x2fa3   :  { %v5758_v37 = vmul.f32 %v8016_v31, %v5756_v2  ;;  %8017 = vpow2.f32 %v7590_v56  ;;  %vm5763_vm6 = vweird.f32 %v8016_v31 }
0x2fa4   :  { %8019 = vrcp.f32 %v5775_v57  ;;  %v5726_v50 = vpop.f32.mrf.mxu3  ;;  %v5787_v40 = vand.u32 2147483648, %v5775_v57  ;;  %vm5764_vm8 = vmor %vm5762_vm7, %vm5763_vm6  ;;  %v5785_v33 = vand.u32 2147483647, %v5775_v57  ;;  %vm5781_vm11 = vweird.f32 %v5775_v57 }
0x2fa5   :  { %v5759_v17 = vsub.f32 1.0, %v5758_v37  ;;  %v5751_v43 = vadd.f32 %v5726_v50, %v5667_v16 }
0x2fa6   :  { %v5788_v19 = vor.u32 1.1754944e-38, %v5787_v40  ;;  %vm5786_vm15 = vcmp.eq.f32.partialorder %v5785_v33, 8.507059e+37 }
0x2fa7   :  { %v5760_v48 = vmul.f32 %v8016_v31, %v5759_v17  ;;  %8021 = vtanh.f32 %v5751_v43 }
0x2fa9   :  { %v8018_v42 = vpop.eup %8017  ;;  %v5761_v4 = vadd.f32 %v8016_v31, %v5760_v48 }
0x2faa   :  { %v8020_v60 = vpop.eup %8019  ;;  %v5795_v1 = vadd.f32 1.0, %v8018_v42 }
0x2fab   :  { %v5777_v53 = vmul.f32 %v8020_v60, %v5775_v57  ;;  %v5765_v30 = vsel %vm5764_vm8, %v8016_v31, %v5761_v4  ;;  %vm5782_vm9 = vweird.f32 %v8020_v60  ;;  %v10219_v31 = vld [vmem:[#allocation2 + $0x348] sm:$0x3] }
0x2fac   :  { %8023 = vrcp.f32 %v5795_v1  ;;  %v5770_v9 = vsel %vm5767_vm12, %v5769_v58, %v5765_v30  ;;  %vm5783_vm13 = vmor %vm5781_vm11, %vm5782_vm9  ;;  %v5807_v2 = vand.u32 2147483648, %v5795_v1  ;;  %vm5801_vm6 = vweird.f32 %v5795_v1 }
0x2fad   :  { %v5778_v45 = vsub.f32 1.0, %v5777_v53  ;;  %v8022_v47 = vpop.eup %8021  ;;  %v5805_v39 = vand.u32 2147483647, %v5795_v1 }
0x2fae   :  { %v5812_v12 = vmul.f32 %v8022_v47, %v5770_v9  ;;  %v5808_v8 = vor.u32 1.1754944e-38, %v5807_v2  ;;  %v5961_v9 = vpop.permute.xlu0 %5960 }
0x2faf   :  { %v5779_v61 = vmul.f32 %v8020_v60, %v5778_v45  ;;  %vm5806_vm8 = vcmp.eq.f32.partialorder %v5805_v39, 8.507059e+37 }
0x2fb1   :  { %v5780_v41 = vadd.f32 %v8020_v60, %v5779_v61 }
0x2fb2   :  { %v8024_v21 = vpop.eup %8023 }
0x2fb3   :  { %v5797_v5 = vmul.f32 %v8024_v21, %v5795_v1  ;;  %v5784_v0 = vsel %vm5783_vm13, %v8020_v60, %v5780_v41  ;;  %vm5802_vm2 = vweird.f32 %v8024_v21  ;;  %v10231_v60 = vld [vmem:[#allocation2 + $0x360] sm:$0x1f] }
0x2fb4   :  { %v5789_v34 = vsel %vm5786_vm15, %v5788_v19, %v5784_v0  ;;  %vm5803_vm7 = vmor %vm5801_vm6, %vm5802_vm2 }
0x2fb5   :  { %v5798_v6 = vsub.f32 1.0, %v5797_v5  ;;  %v5811_v25 = vmul.f32 %v5789_v34, %v10096_v22  ;;  %v10215_v22 = vld [vmem:[#allocation2 + $0x368] sm:$0x1f] }
0x2fb7   :  { %v5799_v55 = vmul.f32 %v8024_v21, %v5798_v6  ;;  %v10206_v14 = vadd.f32 %v5812_v12, %v5811_v25  ;;  %v5967_v25 = vpop.permute.xlu2 %5966 }
0x2fb9   :  { %v5800_v44 = vadd.f32 %v8024_v21, %v5799_v55  ;;  %8025 = vtanh.f32 %v10206_v14 }
0x2fbb   :  { %v5804_v36 = vsel %vm5803_vm7, %v8024_v21, %v5800_v44  ;;  %v6346_v44 = vld [vmem:[%s10645_s2 + $0x48] sm:$0xff] }
0x2fbc   :  { %v5809_v27 = vsel %vm5806_vm8, %v5808_v8, %v5804_v36 }
0x2fbf   :  { %v8026_v32 = vpop.eup %8025 }
0x2fc0   :  { %v10209_v56 = vmul.f32 %v8026_v32, %v5809_v27 }
0x2fc2   :  { %7592 = vmatmul.msk.f32.vlgmr.msra.gmra.mxu0 %vm210_vm4, %v10209_v56  ;;  %7594 = vmatmul.msk.f32.vlgmr.msrb.gmra.mxu2 %vm210_vm4, %v10209_v56 }
0x2fc3   :  { %7607 = vmatpush.msk.msra.mxu0 %vm235_vm3, %v10215_v22  ;;  %7599 = vmatpush.msk.msrb.mxu2 %vm71_vm0, %v10219_v31 }
0x303f   :  { %v5836_v57 = vpop.f32.mrf.mxu0 }
0x3040   :  { %v5837_v37 = vadd.f32 %v5836_v57, %v9103_v63  ;;  %v10279_v57 = vld [vmem:[#allocation2 + $0x358] sm:$0x3] }
0x3042   :  { %vm5859_vm9 = vcmp.ge.f32.partialorder %v5837_v37, 0.0  ;;  %v5861_v50 = vmul.f32 %v5837_v37, %v9106_v46 }
0x3044   :  { %v5863_v16 = vsel %vm5859_vm9, %v5837_v37, %v5861_v50  ;;  %v10283_v37 = vld [vmem:[#allocation2 + $0x3a0] sm:$0x1f]  ;;  %v10290_v50 = vld [vmem:[#allocation2 + $0x370] sm:$0x1f] }
0x3045   :  { %v5856_v17 = vpop.f32.mrf.mxu2  ;;  %5884 = vmatmul.f32.vlgmr.msra.gmra.mxu3 %v5863_v16  ;;  %v10294_v16 = vld [vmem:[#allocation2 + $0x8a0] sm:$0xff] }
0x3046   :  { %v5857_v43 = vadd.f32 %v5856_v17, %v9111_v54  ;;  %6300 = vmatpush.msra.mxu3 %v9986_v13  ;;  %v10242_v13 = vld [vmem:[#allocation2 + $0x350] sm:$0x3]  ;;  %v10297_v17 = vld [vmem:[#allocation2 + $0x880] sm:$0xff] }
0x3048   :  { %vm5860_vm11 = vcmp.ge.f32.partialorder %v5857_v43, 0.0  ;;  %v5862_v48 = vmul.f32 %v5857_v43, %v10788_v51  ;;  %6301 = vmatpush.msra.mxu3 %v9989_v18 }
0x304a   :  { %v5864_v42 = vsel %vm5860_vm11, %v5857_v43, %v5862_v48  ;;  %6302 = vmatpush.msra.mxu3 %v9992_v23  ;;  %v10300_v43 = vld [vmem:[#allocation2 + $0x860] sm:$0xff] }
0x304b   :  { %7595 = vmatmul.msk.f32.vlgmr.msrb.gmra.mxu1 %vm2631_vm10, %v5864_v42  ;;  %v10303_v48 = vld [vmem:[#allocation2 + $0x840] sm:$0xff] }
0x304c   :  { %7605 = vmatpush.msk.msrb.mxu1 %vm235_vm3, %v10231_v60  ;;  %6303 = vmatpush.msra.mxu3 %v9995_v7  ;;  %v10307_v42 = vld [vmem:[#allocation2 + $0x5e0] sm:$0xff] }
0x304d   :  { %7612 = vmatmul.msk.f32.vlgmr.msrb.gmra.mxu3 %vm210_vm4, %v10209_v56 }
0x304e   :  { %6304 = vmatpush.msra.mxu3 %v10000_v11 }
0x3050   :  { %6305 = vmatpush.msra.mxu3 %v10003_v52  ;;  %v10249_v52 = vld [vmem:[#allocation2 + $0x3a8] sm:$0x1f] }
0x3051   :  { %10904 = vst [vmem:[#allocation24_spill] sm:$0xff] %v10249_v52 }
0x3052   :  { %6306 = vmatpush.msra.mxu3 %v10006_v29  ;;  %v10255_v29 = vld [vmem:[#allocation2 + $0x340] sm:$0x3] }
0x3054   :  { %6307 = vmatpush.msra.mxu3 %v10009_v38 }
0x3056   :  { %7626 = vmatpush.msk.msrb.mxu3 %vm71_vm0, %v10242_v13 }
0x30c8   :  { %v5885_v18 = vpop.f32.mrf.mxu3  ;;  %v5905_v7 = vpop.f32.mrf.mxu1 }
0x30c9   :  { %v5886_v23 = vadd.f32 %v10884_v35, %v5885_v18  ;;  %v10310_v18 = vld [vmem:[#allocation2 + $0x820] sm:$0xff] }
0x30cb   :  { %v5906_v1 = vadd.f32 %v5905_v7, %v5886_v23  ;;  %v10313_v23 = vld [vmem:[#allocation2 + $0x5c0] sm:$0xff] }
0x30cc   :  { %v10316_v7 = vld [vmem:[#allocation2 + $0x800] sm:$0xff] }
0x30cd   :  { %vm5908_vm12 = vcmp.ge.f32.partialorder %v5906_v1, 0.0  ;;  %v5909_v53 = vmul.f32 %v10885_v28, %v5906_v1 }
0x30cf   :  { %v5910_v11 = vsel %vm5908_vm12, %v5906_v1, %v5909_v53  ;;  %v10319_v1 = vld [vmem:[#allocation2 + $0x5a0] sm:$0xff] }
0x30d0   :  { %7596 = vmatmul.msk.f32.vlgmr.msrb.gmra.mxu0 %vm1702_vm5, %v5910_v11  ;;  %v10322_v53 = vld [vmem:[#allocation2 + $0x7e0] sm:$0xff] }
0x30d1   :  { %7618 = vmatpush.msk.msrb.mxu0 %vm235_vm3, %v10249_v52  ;;  %v10325_v11 = vld [vmem:[#allocation2 + $0x580] sm:$0xff] }
0x30d8   :  { %7608 = vmatmul.msk.f32.vlgmr.msra.gmra.mxu0 %vm210_vm4, %v10209_v56 }
0x30d9   :  { %7622 = vmatpush.msk.msra.mxu0 %vm71_vm0, %v10255_v29 }
0x314d   :  { %v5931_v38 = vpop.f32.mrf.mxu0 }
0x314e   :  { %v5932_v35 = vadd.f32 %v10888_v15, %v5931_v38  ;;  %v5945_v15 = vpop.permute.xlu1 %5944  ;;  %v10328_v38 = vld [vmem:[#allocation2 + $0x7c0] sm:$0xff] }
0x3150   :  { %5934 = vst.msk [vmem:[%s10647_s4 + $0x40] sm:$0xff] %vm210_vm4, %v5932_v35  ;;  %8027 = vtanh.f32 %v5932_v35  ;;  %v5935_v2 = vmul.f32 1.442695, %v5932_v35 }
0x3156   :  { %v8028_v28 = vpop.eup %8027 }
0x3157   :  { %v5938_v4 = vmul.f32 %v8028_v28, %v8028_v28  ;;  %v5947_v0 = vmul.f32 %v8028_v28, %v5945_v15  ;;  %v10336_v28 = vld [vmem:[#allocation2 + $0x7a0] sm:$0xff] }
0x3158   :  { %v10375_v15 = vld [vmem:[#allocation2 + $0x420] sm:$0xff] }
0x3159   :  { %v5939_v26 = vsub.f32 1.0, %v5938_v4  ;;  %v10339_v4 = vld [vmem:[#allocation2 + $0x540] sm:$0xff]  ;;  %10910 = vst [vmem:[#allocation19_spill] sm:$0xff] %v10375_v15 }
0x315b   :  { %v5940_v45 = vmax.f32 %v5939_v26, 1e-05  ;;  %v10342_v26 = vld [vmem:[#allocation2 + $0x780] sm:$0xff] }
0x315d   :  { %v5941_v49 = vmin.f32 %v5940_v45, 1.0  ;;  %v10345_v45 = vld [vmem:[#allocation2 + $0x520] sm:$0xff] }
0x315f   :  { %8029 = vrsqrt.f32 %v5941_v49  ;;  %vm5955_vm13 = vcmp.eq.f32.partialorder %v5941_v49, inf  ;;  %v5958_v21 = vand.u32 2147483648, %v5941_v49  ;;  %vm5957_vm15 = vcmp.eq.f32.partialorder %v5941_v49, 0.0 }
0x3160   :  { %8031 = vpow2.f32 %v5935_v2 }
0x3165   :  { %v8030_v40 = vpop.eup %8029 }
0x3166   :  { %v5949_v61 = vmul.f32 %v8030_v40, %v5941_v49  ;;  %v8032_v39 = vpop.eup %8031 }
0x3168   :  { %v5950_v30 = vmul.f32 %v8030_v40, %v5949_v61  ;;  %v10357_v61 = vld [vmem:[#allocation2 + $0x4e0] sm:$0xff] }
0x316a   :  { %v5951_v33 = vmul.f32 0.5, %v5950_v30  ;;  %v10360_v30 = vld [vmem:[#allocation2 + $0x4c0] sm:$0xff] }
0x316b   :  { %10905 = vst [vmem:[#allocation17_spill] sm:$0xff] %v10360_v30 }
0x316c   :  { %v5952_v58 = vsub.f32 1.5, %v5951_v33  ;;  %v10363_v33 = vld [vmem:[#allocation2 + $0x4a0] sm:$0xff] }
0x316d   :  { %10906 = vst [vmem:[#allocation18_spill] sm:$0xff] %v10363_v33 }
0x316e   :  { %v5953_v47 = vmul.f32 %v8030_v40, %v5952_v58  ;;  %v10354_v40 = vld [vmem:[#allocation2 + $0x740] sm:$0xff] }
0x316f   :  { %v10366_v58 = vld [vmem:[#allocation2 + $0x480] sm:$0xff] }
0x3170   :  { %v5954_v41 = vmul.f32 %v5953_v47, %v5941_v49  ;;  %10907 = vst [vmem:[#allocation21_spill] sm:$0xff] %v10366_v58  ;;  %v10369_v47 = vld [vmem:[#allocation2 + $0x460] sm:$0xff] }
0x3171   :  { %10908 = vst [vmem:[#allocation7_spill] sm:$0xff] %v10369_v47 }
0x3172   :  { %v5956_v19 = vsel %vm5955_vm13, %v5941_v49, %v5954_v41  ;;  %v10351_v49 = vld [vmem:[#allocation2 + $0x500] sm:$0xff] }
0x3173   :  { %v5959_v5 = vsel %vm5957_vm15, %v5958_v21, %v5956_v19  ;;  %v10372_v41 = vld [vmem:[#allocation2 + $0x440] sm:$0xff] }
0x3174   :  { %v5963_v34 = vmul.f32 %v5961_v9, %v5959_v5  ;;  %10909 = vst [vmem:[#allocation25_spill] sm:$0xff] %v10372_v41  ;;  %v10378_v21 = vld [vmem:[#allocation2 + $0x400] sm:$0xff] }
0x3175   :  { %10911 = vst [vmem:[#allocation20_spill] sm:$0xff] %v10378_v21 }
0x3176   :  { %v5964_v6 = vadd.f32 %v5963_v34, %v5947_v0 }
0x3178   :  { %5971 = vperm.xlu1 %7687, %v5964_v6  }
0x3180   :  { %6348 = vrot.lane.b32.xlu1 %v6346_v44, %s8278_s19 }
0x31ea   :  { %v5972_v12 = vpop.permute.xlu1 %5971 }
0x31eb   :  { %v5974_v55 = vsel %vm2710_vm14, %v5967_v25, %v5972_v12 }
0x31ec   :  { %5976 = vrot.lane.b32.xlu0 %v5974_v55, %s8282_s23  ;;  %v6110_v55 = vpop.f32.mrf.mxu0 }
0x31f4   :  { %6364 = vrot.lane.b32.xlu0 %v6346_v44, %s8279_s20 }
0x325e   :  { %v5977_v36 = vpop.permute.xlu0 %5976 }
0x325f   :  { %v5979_v8 = vmul.f32 %v8032_v39, %v5977_v36 }
0x3261   :  { %5981 = vrot.lane.b32.xlu2 %v5979_v8, %s8283_s24 }
0x3269   :  { %6370 = vperm.xlu2 %7686, %v6346_v44  }
0x32bb   :  { %v5982_v32 = vpop.permute.xlu2 %5981 }
0x32bc   :  { %v5984_v27 = vadd.f32 %v5982_v32, %v5932_v35  ;;  %v10333_v35 = vld [vmem:[#allocation2 + $0x560] sm:$0xff] }
0x32be   :  { %5985 = vst.msk [vmem:[%s10648_s5 + $0x48] sm:$0xff] %vm46_vm1, %v5984_v27  ;;  %7598 = vmatmul.msk.f32.vlgmr.msra.gmra.mxu2 %vm46_vm1, %v5984_v27  ;;  %7602 = vmatmul.msk.f32.vlgmr.msra.gmra.mxu1 %vm46_vm1, %v5984_v27 }
0x32bf   :  { %7603 = vmatpush.msk.msra.mxu2 %vm71_vm0, %v10279_v57  ;;  %7616 = vmatpush.msk.msra.mxu1 %vm235_vm3, %v10283_v37 }
0x32c6   :  { %7600 = vmatmul.msk.f32.vlgmr.msrb.gmra.mxu2 %vm46_vm1, %v5984_v27  ;;  %7606 = vmatmul.msk.f32.vlgmr.msrb.gmra.mxu1 %vm210_vm4, %v10209_v56 }
0x32c7   :  { %7609 = vmatpush.msk.msrb.mxu2 %vm235_vm3, %v10290_v50  ;;  %6322 = vmatpush.msrb.mxu1 %v10294_v16 }
0x32c9   :  { %6323 = vmatpush.msrb.mxu1 %v10297_v17 }
0x32cb   :  { %6324 = vmatpush.msrb.mxu1 %v10300_v43 }
0x32cd   :  { %6325 = vmatpush.msrb.mxu1 %v10303_v48 }
0x32ce   :  { %7604 = vmatmul.msk.f32.vlgmr.msra.gmra.mxu2 %vm46_vm1, %v5984_v27  ;;  %v6150_v27 = vpop.f32.mrf.mxu3 }
0x32cf   :  { %6272 = vmatpush.msra.mxu2 %v10307_v42  ;;  %6326 = vmatpush.msrb.mxu1 %v10310_v18 }
0x32d1   :  { %6273 = vmatpush.msra.mxu2 %v10313_v23  ;;  %6327 = vmatpush.msrb.mxu1 %v10316_v7 }
0x32d3   :  { %6274 = vmatpush.msra.mxu2 %v10319_v1  ;;  %6328 = vmatpush.msrb.mxu1 %v10322_v53 }
0x32d5   :  { %6275 = vmatpush.msra.mxu2 %v10325_v11  ;;  %6329 = vmatpush.msrb.mxu1 %v10328_v38 }
0x32d6   :  { %7610 = vmatmul.msk.f32.vlgmr.msrb.gmra.mxu2 %vm210_vm4, %v10209_v56  ;;  %v10348_v56 = vld [vmem:[#allocation2 + $0x760] sm:$0xff] }
0x32d7   :  { %6276 = vmatpush.msra.mxu2 %v10333_v35  ;;  %6330 = vmatpush.msrb.mxu1 %v10336_v28 }
0x32d9   :  { %6277 = vmatpush.msra.mxu2 %v10339_v4  ;;  %6331 = vmatpush.msrb.mxu1 %v10342_v26 }
0x32db   :  { %6278 = vmatpush.msra.mxu2 %v10345_v45  ;;  %6332 = vmatpush.msrb.mxu1 %v10348_v56 }
0x32dd   :  { %6279 = vmatpush.msra.mxu2 %v10351_v49  ;;  %6333 = vmatpush.msrb.mxu1 %v10354_v40 }
0x32df   :  { %6280 = vmatpush.msra.mxu2 %v10357_v61 }
0x32e1   :  { %6281 = vmatpush.msra.mxu2 %v10360_v30 }
0x32e3   :  { %6282 = vmatpush.msra.mxu2 %v10363_v33 }
0x32e5   :  { %6283 = vmatpush.msra.mxu2 %v10366_v58 }
0x32e7   :  { %6284 = vmatpush.msra.mxu2 %v10369_v47 }
0x32e9   :  { %6285 = vmatpush.msra.mxu2 %v10372_v41 }
0x32eb   :  { %6286 = vmatpush.msra.mxu2 %v10375_v15 }
0x32ed   :  { %6287 = vmatpush.msra.mxu2 %v10378_v21 }
0x32ef   :  { %7636 = vmatpush.msk.msrb.mxu2 %vm235_vm3, %v10197_v62 }
0x333b   :  { %v6046_v9 = vpop.f32.mrf.mxu1 }
0x3341   :  { %v6006_v19 = vpop.f32.mrf.mxu2 }
0x3342   :  { %v6069_v5 = vadd.f32 %v6006_v19, %v10900_v20 }
0x3343   :  { %v6090_v0 = vpop.f32.mrf.mxu1 }
0x3344   :  { %v6153_v34 = vadd.f32 %v6090_v0, %v6069_v5 }
0x3346   :  { %v7613_v6 = vmul.f32 -1.442695, %v6153_v34 }
0x3348   :  { %8033 = vpow2.f32 %v7613_v6 }
0x3349   :  { %v6026_v25 = vpop.f32.mrf.mxu2 }
0x334a   :  { %v6070_v12 = vadd.f32 %v6026_v25, %v10901_v3  ;;  %v6071_v25 = vadd.f32 %v6046_v9, %v10903_v10 }
0x334c   :  { %v6154_v44 = vadd.f32 %v6110_v55, %v6070_v12 }
0x334e   :  { %v8034_v2 = vpop.eup %8033  ;;  %v7614_v39 = vmul.f32 -1.442695, %v6154_v44 }
0x334f   :  { %v6160_v36 = vadd.f32 1.0, %v8034_v2 }
0x3350   :  { %8035 = vpow2.f32 %v7614_v39 }
0x3351   :  { %8037 = vrcp.f32 %v6160_v36  ;;  %v6066_v8 = vpop.f32.mrf.mxu2  ;;  %vm6166_vm6 = vweird.f32 %v6160_v36 }
0x3352   :  { %v6072_v32 = vadd.f32 %v6066_v8, %v10902_v24 }
0x3354   :  { %v6156_v62 = vadd.f32 %v6150_v27, %v6072_v32  ;;  %v6170_v27 = vand.u32 2147483647, %v6160_v36 }
0x3356   :  { %v8036_v19 = vpop.eup %8035  ;;  %v7615_v20 = vmul.f32 -1.442695, %v6156_v62  ;;  %v6172_v62 = vand.u32 2147483648, %v6160_v36  ;;  %vm6171_vm11 = vcmp.eq.f32.partialorder %v6170_v27, 8.507059e+37 }
0x3357   :  { %v8038_v5 = vpop.eup %8037  ;;  %v6179_v0 = vadd.f32 1.0, %v8036_v19 }
0x3358   :  { %v6162_v34 = vmul.f32 %v8038_v5, %v6160_v36  ;;  %8039 = vpow2.f32 %v7615_v20  ;;  %vm6167_vm2 = vweird.f32 %v8038_v5 }
0x3359   :  { %8041 = vrcp.f32 %v6179_v0  ;;  %v6130_v6 = vpop.f32.mrf.mxu2  ;;  %v6191_v20 = vand.u32 2147483648, %v6179_v0  ;;  %vm6168_vm7 = vmor %vm6166_vm6, %vm6167_vm2  ;;  %v6189_v9 = vand.u32 2147483647, %v6179_v0  ;;  %vm6185_vm9 = vweird.f32 %v6179_v0 }
0x335a   :  { %v6163_v12 = vsub.f32 1.0, %v6162_v34  ;;  %v6155_v55 = vadd.f32 %v6130_v6, %v6071_v25  ;;  %v6173_v34 = vor.u32 1.1754944e-38, %v6172_v62 }
0x335b   :  { %vm6190_vm13 = vcmp.eq.f32.partialorder %v6189_v9, 8.507059e+37 }
0x335c   :  { %v6164_v44 = vmul.f32 %v8038_v5, %v6163_v12  ;;  %8043 = vtanh.f32 %v6155_v55  ;;  %v6192_v55 = vor.u32 1.1754944e-38, %v6191_v20 }
0x335e   :  { %v8040_v2 = vpop.eup %8039  ;;  %v6165_v8 = vadd.f32 %v8038_v5, %v6164_v44 }
0x335f   :  { %v8042_v39 = vpop.eup %8041  ;;  %v6199_v3 = vadd.f32 1.0, %v8040_v2 }
0x3360   :  { %v6181_v21 = vmul.f32 %v8042_v39, %v6179_v0  ;;  %v6169_v24 = vsel %vm6168_vm7, %v8038_v5, %v6165_v8  ;;  %vm6186_vm8 = vweird.f32 %v8042_v39 }
0x3361   :  { %8045 = vrcp.f32 %v6199_v3  ;;  %v6174_v44 = vsel %vm6171_vm11, %v6173_v34, %v6169_v24  ;;  %vm6187_vm12 = vmor %vm6185_vm9, %vm6186_vm8  ;;  %v6211_v0 = vand.u32 2147483648, %v6199_v3  ;;  %vm6205_vm2 = vweird.f32 %v6199_v3 }
0x3362   :  { %v6182_v32 = vsub.f32 1.0, %v6181_v21  ;;  %v8044_v6 = vpop.eup %8043  ;;  %v6209_v24 = vand.u32 2147483647, %v6199_v3 }
0x3363   :  { %v6212_v20 = vor.u32 1.1754944e-38, %v6211_v0 }
0x3364   :  { %v6183_v19 = vmul.f32 %v8042_v39, %v6182_v32  ;;  %v6216_v32 = vmul.f32 %v8044_v6, %v6174_v44  ;;  %vm6210_vm7 = vcmp.eq.f32.partialorder %v6209_v24, 8.507059e+37  ;;  %v10408_v44 = vld [vmem:[#allocation2 + $0x6e0] sm:$0xff] }
0x3365   :  { %v10436_v24 = vld [vmem:[#allocation2 + $0x700] ss:$0 sm:$0xff] }
0x3366   :  { %v6184_v25 = vadd.f32 %v8042_v39, %v6183_v19  ;;  %10915 = vst [vmem:[#allocation15_spill] sm:$0xff] %v10436_v24 }
0x3367   :  { %v8046_v12 = vpop.eup %8045 }
0x3368   :  { %v6201_v2 = vmul.f32 %v8046_v12, %v6199_v3  ;;  %v6188_v10 = vsel %vm6187_vm12, %v8042_v39, %v6184_v25  ;;  %vm6206_vm15 = vweird.f32 %v8046_v12 }
0x3369   :  { %v6193_v21 = vsel %vm6190_vm13, %v6192_v55, %v6188_v10  ;;  %vm6207_vm6 = vmor %vm6205_vm2, %vm6206_vm15  ;;  %v10411_v55 = vld [vmem:[#allocation2 + $0x6c0] sm:$0xff] }
0x336a   :  { %v6202_v36 = vsub.f32 1.0, %v6201_v2  ;;  %v6215_v15 = vmul.f32 %v6193_v21, %v10206_v14  ;;  %v10414_v2 = vld [vmem:[#allocation2 + $0x6a0] sm:$0xff] }
0x336b   :  { %v10417_v21 = vld [vmem:[#allocation2 + $0x680] sm:$0xff] }
0x336c   :  { %v6203_v5 = vmul.f32 %v8046_v12, %v6202_v36  ;;  %v10388_v8 = vadd.f32 %v6216_v32, %v6215_v15  ;;  %v10422_v36 = vld [vmem:[#allocation2 + $0x660] sm:$0xff] }
0x336d   :  { %v10425_v32 = vld [vmem:[#allocation2 + $0x640] sm:$0xff] }
0x336e   :  { %v6204_v62 = vadd.f32 %v8046_v12, %v6203_v5  ;;  %8047 = vtanh.f32 %v10388_v8  ;;  %10912 = vst [vmem:[#allocation13_spill] sm:$0xff] %v10425_v32  ;;  %v10428_v5 = vld [vmem:[#allocation2 + $0x620] sm:$0xff] }
0x336f   :  { %10913 = vst [vmem:[#allocation14_spill] sm:$0xff] %v10428_v5 }
0x3370   :  { %v6208_v27 = vsel %vm6207_vm6, %v8046_v12, %v6204_v62  ;;  %v10431_v62 = vld [vmem:[#allocation2 + $0x600] sm:$0xff] }
0x3371   :  { %v6213_v10 = vsel %vm6210_vm7, %v6212_v20, %v6208_v27  ;;  %10914 = vst [vmem:[#allocation22_spill] sm:$0xff] %v10431_v62 }
0x3374   :  { %v8048_v39 = vpop.eup %8047 }
0x3375   :  { %v10391_v19 = vmul.f32 %v8048_v39, %v6213_v10  ;;  %v10439_v10 = vld [vmem:[#allocation2 + $0x720] ss:$0 sm:$0xff] }
0x3376   :  { %10916 = vst [vmem:[#allocation6_spill] sm:$0xff] %v10439_v10 }
0x3377   :  { %7617 = vmatmul.msk.f32.vlgmr.msra.gmra.mxu1 %vm210_vm4, %v10391_v19  ;;  %7619 = vmatmul.msk.f32.vlgmr.msrb.gmra.mxu0 %vm210_vm4, %v10391_v19 }
0x3378   :  { %7632 = vmatpush.msk.msra.mxu1 %vm235_vm3, %v10215_v22  ;;  %7624 = vmatpush.msk.msrb.mxu0 %vm71_vm0, %v10219_v31 }
0x33f4   :  { %v6240_v3 = vpop.f32.mrf.mxu1  ;;  %v6260_v14 = vpop.f32.mrf.mxu0 }
0x33f5   :  { %v6241_v15 = vadd.f32 %v6240_v3, %v9103_v63  ;;  %v6261_v9 = vadd.f32 %v6260_v14, %v9111_v54 }
0x33f7   :  { %vm6263_vm8 = vcmp.ge.f32.partialorder %v6241_v15, 0.0  ;;  %v6265_v34 = vmul.f32 %v6241_v15, %v9106_v46  ;;  %vm6264_vm9 = vcmp.ge.f32.partialorder %v6261_v9, 0.0  ;;  %v6266_v6 = vmul.f32 %v6261_v9, %v10788_v51 }
0x33f9   :  { %v6267_v25 = vsel %vm6263_vm8, %v6241_v15, %v6265_v34  ;;  %v6268_v12 = vsel %vm6264_vm9, %v6261_v9, %v6266_v6  ;;  %v10449_v15 = vld [vmem:[#allocation2 + $0x8c0] ss:$0 sm:$0xff] }
0x33fa   :  { %6288 = vmatmul.f32.vlgmr.msra.gmra.mxu2 %v6267_v25  ;;  %7620 = vmatmul.msk.f32.vlgmr.msra.gmra.mxu3 %vm2631_vm10, %v6268_v12  ;;  %10917 = vst [vmem:[#allocation11_spill] sm:$0xff] %v10449_v15 }
0x33fb   :  { %7630 = vmatpush.msk.msra.mxu3 %vm235_vm3, %v10231_v60  ;;  %6704 = vmatpush.msra.mxu2 %v10408_v44 }
0x33fd   :  { %6705 = vmatpush.msra.mxu2 %v10411_v55 }
0x33ff   :  { %6706 = vmatpush.msra.mxu2 %v10414_v2 }
0x3401   :  { %6707 = vmatpush.msra.mxu2 %v10417_v21 }
0x3402   :  { %7637 = vmatmul.msk.f32.vlgmr.msrb.gmra.mxu2 %vm210_vm4, %v10391_v19 }
0x3403   :  { %6708 = vmatpush.msra.mxu2 %v10422_v36 }
0x3405   :  { %6709 = vmatpush.msra.mxu2 %v10425_v32 }
0x3407   :  { %6710 = vmatpush.msra.mxu2 %v10428_v5 }
0x3409   :  { %6711 = vmatpush.msra.mxu2 %v10431_v62 }
0x340b   :  { %7651 = vmatpush.msk.msrb.mxu2 %vm71_vm0, %v10242_v13 }
0x347d   :  { %v6289_v0 = vpop.f32.mrf.mxu2  ;;  %v6309_v20 = vpop.f32.mrf.mxu3 }
0x347e   :  { %v6290_v27 = vadd.f32 %v10436_v24, %v6289_v0 }
0x3480   :  { %v6310_v39 = vadd.f32 %v6309_v20, %v6290_v27 }
0x3482   :  { %vm6312_vm11 = vcmp.ge.f32.partialorder %v6310_v39, 0.0  ;;  %v6313_v3 = vmul.f32 %v10439_v10, %v6310_v39  ;;  %v6365_v10 = vpop.permute.xlu0 %6364 }
0x3484   :  { %v6314_v14 = vsel %vm6312_vm11, %v6310_v39, %v6313_v3 }
0x3485   :  { %7621 = vmatmul.msk.f32.vlgmr.msrb.gmra.mxu1 %vm1702_vm5, %v6314_v14 }
0x3486   :  { %7643 = vmatpush.msk.msrb.mxu1 %vm235_vm3, %v10249_v52 }
0x348d   :  { %7633 = vmatmul.msk.f32.vlgmr.msra.gmra.mxu1 %vm210_vm4, %v10391_v19 }
0x348e   :  { %7647 = vmatpush.msk.msra.mxu1 %vm71_vm0, %v10255_v29 }
0x3502   :  { %v6335_v13 = vpop.f32.mrf.mxu1 }
0x3503   :  { %v6336_v9 = vadd.f32 %v10449_v15, %v6335_v13  ;;  %v6349_v13 = vpop.permute.xlu1 %6348 }
0x3505   :  { %6338 = vst.msk [vmem:[%s10647_s4 + $0x48] sm:$0xff] %vm210_vm4, %v6336_v9  ;;  %8049 = vtanh.f32 %v6336_v9 }
0x350b   :  { %v8050_v34 = vpop.eup %8049 }
0x350c   :  { %v6342_v6 = vmul.f32 %v8050_v34, %v8050_v34  ;;  %v6351_v5 = vmul.f32 %v8050_v34, %v6349_v13 }
0x350e   :  { %v6343_v25 = vsub.f32 1.0, %v6342_v6 }
0x3510   :  { %v6344_v12 = vmax.f32 %v6343_v25, 1e-05  ;;  %v6371_v25 = vpop.permute.xlu2 %6370 }
0x3512   :  { %v6345_v0 = vmin.f32 %v6344_v12, 1.0 }
0x3514   :  { %8051 = vrsqrt.f32 %v6345_v0  ;;  %vm6359_vm12 = vcmp.eq.f32.partialorder %v6345_v0, inf  ;;  %v6362_v15 = vand.u32 2147483648, %v6345_v0  ;;  %vm6361_vm13 = vcmp.eq.f32.partialorder %v6345_v0, 0.0 }
0x351a   :  { %v8052_v27 = vpop.eup %8051 }
0x351b   :  { %v6353_v20 = vmul.f32 %v8052_v27, %v6345_v0 }
0x351d   :  { %v6354_v29 = vmul.f32 %v8052_v27, %v6353_v20 }
0x351f   :  { %v6355_v39 = vmul.f32 0.5, %v6354_v29 }
0x3521   :  { %v6356_v3 = vsub.f32 1.5, %v6355_v39  ;;  %v10921_v39 = vld [vmem:[#allocation10_spill] sm:$0xff] }
0x3523   :  { %v6357_v14 = vmul.f32 %v8052_v27, %v6356_v3  ;;  %v6750_v27 = vld [vmem:[%s10645_s2 + $0x50] sm:$0xff] }
0x3525   :  { %v6358_v52 = vmul.f32 %v6357_v14, %v6345_v0  ;;  %v6514_v14 = vpop.f32.mrf.mxu1 }
0x3527   :  { %v6360_v24 = vsel %vm6359_vm12, %v6345_v0, %v6358_v52  ;;  %v6339_v52 = vmul.f32 1.442695, %v6336_v9 }
0x3528   :  { %v6363_v62 = vsel %vm6361_vm13, %v6362_v15, %v6360_v24  ;;  %v10919_v15 = vld [vmem:[#allocation20_spill] sm:$0xff] }
0x3529   :  { %v6367_v32 = vmul.f32 %v6365_v10, %v6363_v62  ;;  %8053 = vpow2.f32 %v6339_v52 }
0x352b   :  { %v6368_v6 = vadd.f32 %v6367_v32, %v6351_v5 }
0x352d   :  { %6375 = vperm.xlu1 %7687, %v6368_v6   ;;  %v10922_v6 = vld [vmem:[#allocation8_spill] sm:$0xff] }
0x352f   :  { %v8054_v62 = vpop.eup %8053 }
0x3535   :  { %6752 = vrot.lane.b32.xlu1 %v6750_v27, %s8278_s19 }
0x359f   :  { %v6376_v12 = vpop.permute.xlu1 %6375 }
0x35a0   :  { %v6378_v20 = vsel %vm2710_vm14, %v6371_v25, %v6376_v12 }
0x35a1   :  { %6380 = vrot.lane.b32.xlu0 %v6378_v20, %s8282_s23 }
0x35a9   :  { %6768 = vrot.lane.b32.xlu0 %v6750_v27, %s8279_s20 }
0x3613   :  { %v6381_v32 = vpop.permute.xlu0 %6380 }
0x3614   :  { %v6383_v5 = vmul.f32 %v8054_v62, %v6381_v32  ;;  %v10923_v32 = vld [vmem:[#allocation9_spill] sm:$0xff] }
0x3616   :  { %6385 = vrot.lane.b32.xlu2 %v6383_v5, %s8283_s24 }
0x361e   :  { %6774 = vperm.xlu2 %7686, %v6750_v27  }
0x3670   :  { %v6386_v24 = vpop.permute.xlu2 %6385 }
0x3671   :  { %v6388_v10 = vadd.f32 %v6386_v24, %v6336_v9  ;;  %v10920_v9 = vld [vmem:[#allocation23_spill] sm:$0xff]  ;;  %v6554_v24 = vpop.f32.mrf.mxu2 }
0x3673   :  { %6389 = vst.msk [vmem:[%s10648_s5 + $0x50] sm:$0xff] %vm46_vm1, %v6388_v10  ;;  %7623 = vmatmul.msk.f32.vlgmr.msra.gmra.mxu0 %vm46_vm1, %v6388_v10  ;;  %7627 = vmatmul.msk.f32.vlgmr.msrb.gmra.mxu3 %vm46_vm1, %v6388_v10 }
0x3674   :  { %7628 = vmatpush.msk.msra.mxu0 %vm71_vm0, %v10279_v57  ;;  %7641 = vmatpush.msk.msrb.mxu3 %vm235_vm3, %v10283_v37 }
0x367b   :  { %7625 = vmatmul.msk.f32.vlgmr.msrb.gmra.mxu0 %vm46_vm1, %v6388_v10  ;;  %7631 = vmatmul.msk.f32.vlgmr.msra.gmra.mxu3 %vm210_vm4, %v10391_v19 }
0x367c   :  { %7634 = vmatpush.msk.msrb.mxu0 %vm235_vm3, %v10290_v50  ;;  %6726 = vmatpush.msra.mxu3 %v10294_v16 }
0x367e   :  { %6727 = vmatpush.msra.mxu3 %v10297_v17 }
0x3680   :  { %6728 = vmatpush.msra.mxu3 %v10300_v43 }
0x3682   :  { %6729 = vmatpush.msra.mxu3 %v10303_v48 }
0x3683   :  { %7629 = vmatmul.msk.f32.vlgmr.msra.gmra.mxu0 %vm46_vm1, %v6388_v10 }
0x3684   :  { %6676 = vmatpush.msra.mxu0 %v10307_v42  ;;  %6730 = vmatpush.msra.mxu3 %v10310_v18 }
0x3686   :  { %6677 = vmatpush.msra.mxu0 %v10313_v23  ;;  %6731 = vmatpush.msra.mxu3 %v10316_v7 }
0x3688   :  { %6678 = vmatpush.msra.mxu0 %v10319_v1  ;;  %6732 = vmatpush.msra.mxu3 %v10322_v53 }
0x368a   :  { %6679 = vmatpush.msra.mxu0 %v10325_v11  ;;  %6733 = vmatpush.msra.mxu3 %v10328_v38 }
0x368b   :  { %7635 = vmatmul.msk.f32.vlgmr.msrb.gmra.mxu0 %vm210_vm4, %v10391_v19  ;;  %v10918_v19 = vld [vmem:[#allocation19_spill] sm:$0xff] }
0x368c   :  { %6680 = vmatpush.msra.mxu0 %v10333_v35  ;;  %6734 = vmatpush.msra.mxu3 %v10336_v28 }
0x368e   :  { %6681 = vmatpush.msra.mxu0 %v10339_v4  ;;  %6735 = vmatpush.msra.mxu3 %v10342_v26 }
0x3690   :  { %6682 = vmatpush.msra.mxu0 %v10345_v45  ;;  %6736 = vmatpush.msra.mxu3 %v10348_v56 }
0x3692   :  { %6683 = vmatpush.msra.mxu0 %v10351_v49  ;;  %6737 = vmatpush.msra.mxu3 %v10354_v40 }
0x3694   :  { %6684 = vmatpush.msra.mxu0 %v10357_v61 }
0x3696   :  { %6685 = vmatpush.msra.mxu0 %v10360_v30 }
0x3698   :  { %6686 = vmatpush.msra.mxu0 %v10363_v33 }
0x369a   :  { %6687 = vmatpush.msra.mxu0 %v10366_v58 }
0x369c   :  { %6688 = vmatpush.msra.mxu0 %v10369_v47 }
0x369e   :  { %6689 = vmatpush.msra.mxu0 %v10372_v41 }
0x36a0   :  { %6690 = vmatpush.msra.mxu0 %v10918_v19 }
0x36a2   :  { %6691 = vmatpush.msra.mxu0 %v10919_v15 }
0x36a4   :  { %7661 = vmatpush.msk.msrb.mxu0 %vm235_vm3, %v10920_v9 }
0x36f0   :  { %v6410_v34 = vpop.f32.mrf.mxu0 }
0x36f1   :  { %v6473_v25 = vadd.f32 %v6410_v34, %v10922_v6 }
0x36f6   :  { %v6450_v0 = vpop.f32.mrf.mxu3 }
0x36f8   :  { %v6430_v29 = vpop.f32.mrf.mxu0 }
0x36f9   :  { %v6474_v3 = vadd.f32 %v6430_v29, %v10921_v39 }
0x36fb   :  { %v6558_v13 = vadd.f32 %v6514_v14, %v6474_v3 }
0x36fd   :  { %v7639_v12 = vmul.f32 -1.442695, %v6558_v13 }
0x36fe   :  { %v6494_v20 = vpop.f32.mrf.mxu3 }
0x36ff   :  { %8055 = vpow2.f32 %v7639_v12  ;;  %v6557_v27 = vadd.f32 %v6494_v20, %v6473_v25  ;;  %v10924_v20 = vld [vmem:[#allocation12_spill] sm:$0xff] }
0x3700   :  { %v6470_v52 = vpop.f32.mrf.mxu0 }
0x3701   :  { %v7638_v62 = vmul.f32 -1.442695, %v6557_v27  ;;  %v6476_v5 = vadd.f32 %v6470_v52, %v10923_v32  ;;  %v6475_v27 = vadd.f32 %v6450_v0, %v10924_v20 }
0x3703   :  { %8057 = vpow2.f32 %v7638_v62  ;;  %v6560_v10 = vadd.f32 %v6554_v24, %v6476_v5 }
0x3705   :  { %v8056_v9 = vpop.eup %8055  ;;  %v7640_v15 = vmul.f32 -1.442695, %v6560_v10 }
0x3706   :  { %v6583_v19 = vadd.f32 1.0, %v8056_v9 }
0x3707   :  { %8059 = vpow2.f32 %v7640_v15 }
0x3708   :  { %8061 = vrcp.f32 %v6583_v19  ;;  %v6534_v25 = vpop.f32.mrf.mxu0  ;;  %v6595_v10 = vand.u32 2147483648, %v6583_v19  ;;  %vm6589_vm2 = vweird.f32 %v6583_v19 }
0x3709   :  { %v8058_v29 = vpop.eup %8057  ;;  %v6559_v62 = vadd.f32 %v6534_v25, %v6475_v27 }
0x370a   :  { %v6564_v3 = vadd.f32 1.0, %v8058_v29  ;;  %v6593_v29 = vand.u32 2147483647, %v6583_v19 }
0x370c   :  { %8063 = vrcp.f32 %v6564_v3  ;;  %v6574_v39 = vand.u32 2147483647, %v6564_v3  ;;  %v6576_v41 = vand.u32 2147483648, %v6564_v3  ;;  %vm6570_vm8 = vweird.f32 %v6564_v3 }
0x370d   :  { %v8060_v34 = vpop.eup %8059  ;;  %vm6594_vm9 = vcmp.eq.f32.partialorder %v6593_v29, 8.507059e+37  ;;  %v10927_v29 = vld [vmem:[#allocation22_spill] sm:$0xff] }
0x370e   :  { %v8062_v14 = vpop.eup %8061  ;;  %v6603_v13 = vadd.f32 1.0, %v8060_v34  ;;  %v6577_v27 = vor.u32 1.1754944e-38, %v6576_v41  ;;  %vm6575_vm12 = vcmp.eq.f32.partialorder %v6574_v39, 8.507059e+37 }
0x370f   :  { %v6585_v12 = vmul.f32 %v8062_v14, %v6583_v19  ;;  %vm6590_vm15 = vweird.f32 %v8062_v14 }
0x3710   :  { %8065 = vrcp.f32 %v6603_v13  ;;  %vm6591_vm6 = vmor %vm6589_vm2, %vm6590_vm15  ;;  %vm6609_vm15 = vweird.f32 %v6603_v13 }
0x3711   :  { %v6586_v52 = vsub.f32 1.0, %v6585_v12  ;;  %8067 = vtanh.f32 %v6559_v62  ;;  %v6596_v12 = vor.u32 1.1754944e-38, %v6595_v10 }
0x3712   :  { %v8064_v32 = vpop.eup %8063 }
0x3713   :  { %v6587_v5 = vmul.f32 %v8062_v14, %v6586_v52  ;;  %v6566_v24 = vmul.f32 %v8064_v32, %v6564_v3  ;;  %vm6571_vm7 = vweird.f32 %v8064_v32 }
0x3714   :  { %vm6572_vm11 = vmor %vm6570_vm8, %vm6571_vm7 }
0x3715   :  { %v6567_v15 = vsub.f32 1.0, %v6566_v24  ;;  %v6588_v9 = vadd.f32 %v8062_v14, %v6587_v5 }
0x3716   :  { %v8066_v6 = vpop.eup %8065 }
0x3717   :  { %v6605_v34 = vmul.f32 %v8066_v6, %v6603_v13  ;;  %v6568_v47 = vmul.f32 %v8064_v32, %v6567_v15  ;;  %v6592_v0 = vsel %vm6591_vm6, %v8062_v14, %v6588_v9  ;;  %v8068_v19 = vpop.eup %8067  ;;  %vm6610_vm13 = vweird.f32 %v8066_v6 }
0x3718   :  { %v6597_v52 = vsel %vm6594_vm9, %v6596_v12, %v6592_v0  ;;  %v6615_v14 = vand.u32 2147483648, %v6603_v13  ;;  %vm6611_vm2 = vmor %vm6609_vm15, %vm6610_vm13  ;;  %v10928_v0 = vld [vmem:[#allocation15_spill] sm:$0xff] }
0x3719   :  { %v6606_v20 = vsub.f32 1.0, %v6605_v34  ;;  %v6569_v25 = vadd.f32 %v8064_v32, %v6568_v47  ;;  %v6619_v33 = vmul.f32 %v6597_v52, %v10388_v8  ;;  %v6613_v47 = vand.u32 2147483647, %v6603_v13  ;;  %v10931_v52 = vld [vmem:[#allocation11_spill] sm:$0xff] }
0x371a   :  { %v6616_v3 = vor.u32 1.1754944e-38, %v6615_v14 }
0x371b   :  { %v6573_v24 = vsel %vm6572_vm11, %v8064_v32, %v6569_v25  ;;  %v6607_v5 = vmul.f32 %v8066_v6, %v6606_v20  ;;  %vm6614_vm6 = vcmp.eq.f32.partialorder %v6613_v47, 8.507059e+37 }
0x371c   :  { %v6578_v58 = vsel %vm6575_vm12, %v6577_v27, %v6573_v24  ;;  %v10930_v27 = vld [vmem:[#allocation24_spill] sm:$0xff] }
0x371d   :  { %v6620_v62 = vmul.f32 %v8068_v19, %v6578_v58  ;;  %v6608_v15 = vadd.f32 %v8066_v6, %v6607_v5 }
0x371f   :  { %v10518_v30 = vadd.f32 %v6620_v62, %v6619_v33  ;;  %v6612_v41 = vsel %vm6611_vm2, %v8066_v6, %v6608_v15 }
0x3720   :  { %v6617_v32 = vsel %vm6614_vm6, %v6616_v3, %v6612_v41 }
0x3721   :  { %8069 = vtanh.f32 %v10518_v30 }
0x3727   :  { %v8070_v39 = vpop.eup %8069 }
0x3728   :  { %v10521_v20 = vmul.f32 %v8070_v39, %v6617_v32 }
0x372a   :  { %7642 = vmatmul.msk.f32.vlgmr.msrb.gmra.mxu3 %vm210_vm4, %v10521_v20  ;;  %7644 = vmatmul.msk.f32.vlgmr.msrb.gmra.mxu1 %vm210_vm4, %v10521_v20 }
0x372b   :  { %7657 = vmatpush.msk.msrb.mxu3 %vm235_vm3, %v10215_v22  ;;  %7649 = vmatpush.msk.msrb.mxu1 %vm71_vm0, %v10219_v31  ;;  %v10925_v31 = vld [vmem:[#allocation13_spill] sm:$0xff] }
0x37a7   :  { %v6664_v33 = vpop.f32.mrf.mxu1 }
0x37a8   :  { %v6665_v58 = vadd.f32 %v6664_v33, %v9111_v54 }
0x37aa   :  { %vm6668_vm7 = vcmp.ge.f32.partialorder %v6665_v58, 0.0  ;;  %v6670_v8 = vmul.f32 %v6665_v58, %v10788_v51 }
0x37ac   :  { %v6672_v6 = vsel %vm6668_vm7, %v6665_v58, %v6670_v8  ;;  %v6753_v8 = vpop.permute.xlu1 %6752 }
0x37ad   :  { %v6644_v13 = vpop.f32.mrf.mxu3  ;;  %7645 = vmatmul.msk.f32.vlgmr.msra.gmra.mxu2 %vm2631_vm10, %v6672_v6 }
0x37ae   :  { %v6645_v10 = vadd.f32 %v6644_v13, %v9103_v63  ;;  %7655 = vmatpush.msk.msra.mxu2 %vm235_vm3, %v10231_v60  ;;  %v10926_v60 = vld [vmem:[#allocation14_spill] sm:$0xff]  ;;  %v6769_v13 = vpop.permute.xlu0 %6768 }
0x37b0   :  { %vm6667_vm8 = vcmp.ge.f32.partialorder %v6645_v10, 0.0  ;;  %v6669_v22 = vmul.f32 %v6645_v10, %v9106_v46 }
0x37b2   :  { %v6671_v9 = vsel %vm6667_vm8, %v6645_v10, %v6669_v22 }
0x37b3   :  { %6692 = vmatmul.f32.vlgmr.msra.gmra.mxu0 %v6671_v9 }
0x37b4   :  { %7108 = vmatpush.msra.mxu0 %v10408_v44 }
0x37b6   :  { %7109 = vmatpush.msra.mxu0 %v10411_v55 }
0x37b8   :  { %7110 = vmatpush.msra.mxu0 %v10414_v2  ;;  %v10929_v2 = vld [vmem:[#allocation6_spill] sm:$0xff] }
0x37ba   :  { %7111 = vmatpush.msra.mxu0 %v10417_v21 }
0x37bb   :  { %7662 = vmatmul.msk.f32.vlgmr.msrb.gmra.mxu0 %vm210_vm4, %v10521_v20 }
0x37bc   :  { %7112 = vmatpush.msra.mxu0 %v10422_v36 }
0x37be   :  { %7113 = vmatpush.msra.mxu0 %v10925_v31 }
0x37c0   :  { %7114 = vmatpush.msra.mxu0 %v10926_v60 }
0x37c2   :  { %7115 = vmatpush.msra.mxu0 %v10927_v29  ;;  %v6775_v29 = vpop.permute.xlu2 %6774 }
0x3830   :  { %v6693_v34 = vpop.f32.mrf.mxu0  ;;  %v6713_v12 = vpop.f32.mrf.mxu2 }
0x3831   :  { %v6694_v44 = vadd.f32 %v10928_v0, %v6693_v34 }
0x3833   :  { %v6714_v55 = vadd.f32 %v6713_v12, %v6694_v44  ;;  %v7154_v12 = vld [vmem:[%s10645_s2 + $0x58] sm:$0xff] }
0x3835   :  { %vm6716_vm9 = vcmp.ge.f32.partialorder %v6714_v55, 0.0  ;;  %v6717_v25 = vmul.f32 %v10929_v2, %v6714_v55 }
0x3837   :  { %v6718_v21 = vsel %vm6716_vm9, %v6714_v55, %v6717_v25 }
0x3838   :  { %7646 = vmatmul.msk.f32.vlgmr.msra.gmra.mxu3 %vm1702_vm5, %v6718_v21 }
0x3839   :  { %7668 = vmatpush.msk.msra.mxu3 %vm235_vm3, %v10930_v27 }
0x3840   :  { %7658 = vmatmul.msk.f32.vlgmr.msrb.gmra.mxu3 %vm210_vm4, %v10521_v20 }
0x38bb   :  { %v6739_v36 = vpop.f32.mrf.mxu3 }
0x38bc   :  { %v6740_v24 = vadd.f32 %v10931_v52, %v6739_v36 }
0x38be   :  { %6742 = vst.msk [vmem:[%s10647_s4 + $0x50] sm:$0xff] %vm210_vm4, %v6740_v24  ;;  %8071 = vtanh.f32 %v6740_v24  ;;  %v6743_v55 = vmul.f32 1.442695, %v6740_v24 }
0x38c4   :  { %v8072_v19 = vpop.eup %8071 }
0x38c5   :  { %v6746_v5 = vmul.f32 %v8072_v19, %v8072_v19  ;;  %v6755_v9 = vmul.f32 %v8072_v19, %v6753_v8 }
0x38c7   :  { %v6747_v62 = vsub.f32 1.0, %v6746_v5 }
0x38c9   :  { %v6748_v15 = vmax.f32 %v6747_v62, 1e-05 }
0x38cb   :  { %v6749_v14 = vmin.f32 %v6748_v15, 1.0 }
0x38cd   :  { %8073 = vrsqrt.f32 %v6749_v14  ;;  %vm6763_vm11 = vcmp.eq.f32.partialorder %v6749_v14, inf  ;;  %v6766_v6 = vand.u32 2147483648, %v6749_v14  ;;  %vm6765_vm12 = vcmp.eq.f32.partialorder %v6749_v14, 0.0 }
0x38ce   :  { %8075 = vpow2.f32 %v6743_v55 }
0x38d3   :  { %v8074_v47 = vpop.eup %8073 }
0x38d4   :  { %v6757_v41 = vmul.f32 %v8074_v47, %v6749_v14  ;;  %v8076_v25 = vpop.eup %8075 }
0x38d6   :  { %v6758_v3 = vmul.f32 %v8074_v47, %v6757_v41 }
0x38d8   :  { %v6759_v39 = vmul.f32 0.5, %v6758_v3 }
0x38da   :  { %v6760_v32 = vsub.f32 1.5, %v6759_v39 }
0x38dc   :  { %v6761_v33 = vmul.f32 %v8074_v47, %v6760_v32 }
0x38de   :  { %v6762_v58 = vmul.f32 %v6761_v33, %v6749_v14  ;;  %v10942_v33 = vld [vmem:[#allocation12_spill] sm:$0xff] }
0x38e0   :  { %v6764_v10 = vsel %vm6763_vm11, %v6749_v14, %v6762_v58 }
0x38e1   :  { %v6767_v22 = vsel %vm6765_vm12, %v6766_v6, %v6764_v10 }
0x38e2   :  { %v6771_v31 = vmul.f32 %v6769_v13, %v6767_v22 }
0x38e4   :  { %v6772_v60 = vadd.f32 %v6771_v31, %v6755_v9 }
0x38e6   :  { %6779 = vperm.xlu1 %7687, %v6772_v60  }
0x38ee   :  { %7156 = vrot.lane.b32.xlu1 %v7154_v12, %s8278_s19 }
0x3958   :  { %v6780_v34 = vpop.permute.xlu1 %6779 }
0x3959   :  { %v6782_v44 = vsel %vm2710_vm14, %v6775_v29, %v6780_v34 }
0x395a   :  { %6784 = vrot.lane.b32.xlu0 %v6782_v44, %s8282_s23 }
0x3962   :  { %7172 = vrot.lane.b32.xlu0 %v7154_v12, %s8279_s20 }
0x39cc   :  { %v6785_v21 = vpop.permute.xlu0 %6784 }
0x39cd   :  { %v6787_v27 = vmul.f32 %v8076_v25, %v6785_v21 }
0x39cf   :  { %6789 = vrot.lane.b32.xlu2 %v6787_v27, %s8283_s24 }
0x39d7   :  { %7178 = vperm.xlu2 %7686, %v7154_v12  }
0x3a29   :  { %v6790_v36 = vpop.permute.xlu2 %6789 }
0x3a2a   :  { %v6792_v19 = vadd.f32 %v6790_v36, %v6740_v24 }
0x3a2c   :  { %6793 = vst.msk [vmem:[%s10648_s5 + $0x58] sm:$0xff] %vm46_vm1, %v6792_v19  ;;  %7648 = vmatmul.msk.f32.vlgmr.msra.gmra.mxu1 %vm46_vm1, %v6792_v19  ;;  %7652 = vmatmul.msk.f32.vlgmr.msrb.gmra.mxu2 %vm46_vm1, %v6792_v19 }
0x3a2d   :  { %7653 = vmatpush.msk.msra.mxu1 %vm71_vm0, %v10279_v57  ;;  %7666 = vmatpush.msk.msrb.mxu2 %vm235_vm3, %v10283_v37  ;;  %v10932_v57 = vld [vmem:[#allocation17_spill] sm:$0xff]  ;;  %v10933_v37 = vld [vmem:[#allocation18_spill] sm:$0xff] }
0x3a34   :  { %7650 = vmatmul.msk.f32.vlgmr.msrb.gmra.mxu1 %vm46_vm1, %v6792_v19  ;;  %7656 = vmatmul.msk.f32.vlgmr.msra.gmra.mxu2 %vm210_vm4, %v10521_v20 }
0x3a35   :  { %7659 = vmatpush.msk.msrb.mxu1 %vm235_vm3, %v10290_v50  ;;  %7130 = vmatpush.msra.mxu2 %v10294_v16  ;;  %v10934_v50 = vld [vmem:[#allocation21_spill] sm:$0xff]  ;;  %v10935_v16 = vld [vmem:[#allocation7_spill] sm:$0xff] }
0x3a37   :  { %7131 = vmatpush.msra.mxu2 %v10297_v17  ;;  %v10936_v17 = vld [vmem:[#allocation25_spill] sm:$0xff] }
0x3a39   :  { %7132 = vmatpush.msra.mxu2 %v10300_v43  ;;  %v10937_v43 = vld [vmem:[#allocation19_spill] sm:$0xff] }
0x3a3b   :  { %7133 = vmatpush.msra.mxu2 %v10303_v48  ;;  %v10938_v48 = vld [vmem:[#allocation20_spill] sm:$0xff] }
0x3a3c   :  { %7654 = vmatmul.msk.f32.vlgmr.msra.gmra.mxu1 %vm46_vm1, %v6792_v19 }
0x3a3d   :  { %7080 = vmatpush.msra.mxu1 %v10307_v42  ;;  %7134 = vmatpush.msra.mxu2 %v10310_v18 }
0x3a3f   :  { %7081 = vmatpush.msra.mxu1 %v10313_v23  ;;  %7135 = vmatpush.msra.mxu2 %v10316_v7  ;;  %v10939_v7 = vld [vmem:[#allocation10_spill] sm:$0xff] }
0x3a41   :  { %7082 = vmatpush.msra.mxu1 %v10319_v1  ;;  %7136 = vmatpush.msra.mxu2 %v10322_v53  ;;  %v6918_v53 = vpop.f32.mrf.mxu3 }
0x3a43   :  { %7083 = vmatpush.msra.mxu1 %v10325_v11  ;;  %7137 = vmatpush.msra.mxu2 %v10328_v38  ;;  %v10940_v38 = vld [vmem:[#allocation8_spill] sm:$0xff] }
0x3a44   :  { %7660 = vmatmul.msk.f32.vlgmr.msrb.gmra.mxu1 %vm210_vm4, %v10521_v20 }
0x3a45   :  { %7084 = vmatpush.msra.mxu1 %v10333_v35  ;;  %7138 = vmatpush.msra.mxu2 %v10336_v28 }
0x3a47   :  { %7085 = vmatpush.msra.mxu1 %v10339_v4  ;;  %7139 = vmatpush.msra.mxu2 %v10342_v26 }
0x3a49   :  { %7086 = vmatpush.msra.mxu1 %v10345_v45  ;;  %7140 = vmatpush.msra.mxu2 %v10348_v56 }
0x3a4b   :  { %7087 = vmatpush.msra.mxu1 %v10351_v49  ;;  %7141 = vmatpush.msra.mxu2 %v10354_v40  ;;  %v10941_v49 = vld [vmem:[#allocation9_spill] sm:$0xff] }
0x3a4d   :  { %7088 = vmatpush.msra.mxu1 %v10357_v61  ;;  %v6958_v61 = vpop.f32.mrf.mxu0 }
0x3a4f   :  { %7089 = vmatpush.msra.mxu1 %v10932_v57 }
0x3a51   :  { %7090 = vmatpush.msra.mxu1 %v10933_v37 }
0x3a53   :  { %7091 = vmatpush.msra.mxu1 %v10934_v50 }
0x3a55   :  { %7092 = vmatpush.msra.mxu1 %v10935_v16 }
0x3a57   :  { %7093 = vmatpush.msra.mxu1 %v10936_v17 }
0x3a59   :  { %7094 = vmatpush.msra.mxu1 %v10937_v43 }
0x3a5b   :  { %7095 = vmatpush.msra.mxu1 %v10938_v48 }
0x3aa9   :  { %v6814_v42 = vpop.f32.mrf.mxu1 }
0x3aaa   :  { %v6877_v35 = vadd.f32 %v6814_v42, %v10940_v38 }
0x3aaf   :  { %v6854_v18 = vpop.f32.mrf.mxu2 }
0x3ab0   :  { %v6879_v58 = vadd.f32 %v6854_v18, %v10942_v33 }
0x3ab1   :  { %v6834_v23 = vpop.f32.mrf.mxu1 }
0x3ab2   :  { %v6878_v1 = vadd.f32 %v6834_v23, %v10939_v7 }
0x3ab4   :  { %v6962_v11 = vadd.f32 %v6918_v53, %v6878_v1 }
0x3ab6   :  { %v7664_v28 = vmul.f32 -1.442695, %v6962_v11 }
0x3ab7   :  { %v6898_v4 = vpop.f32.mrf.mxu2 }
0x3ab8   :  { %8077 = vpow2.f32 %v7664_v28  ;;  %v6961_v26 = vadd.f32 %v6898_v4, %v6877_v35 }
0x3ab9   :  { %v6874_v45 = vpop.f32.mrf.mxu1 }
0x3aba   :  { %v7663_v56 = vmul.f32 -1.442695, %v6961_v26  ;;  %v6880_v40 = vadd.f32 %v6874_v45, %v10941_v49 }
0x3abc   :  { %8079 = vpow2.f32 %v7663_v56  ;;  %v6964_v20 = vadd.f32 %v6958_v61, %v6880_v40 }
0x3abe   :  { %v8078_v24 = vpop.eup %8077  ;;  %v7665_v5 = vmul.f32 -1.442695, %v6964_v20 }
0x3abf   :  { %v6987_v62 = vadd.f32 1.0, %v8078_v24 }
0x3ac0   :  { %8081 = vpow2.f32 %v7665_v5 }
0x3ac1   :  { %8083 = vrcp.f32 %v6987_v62  ;;  %v6938_v32 = vpop.f32.mrf.mxu1  ;;  %v6999_v9 = vand.u32 2147483648, %v6987_v62  ;;  %vm6993_vm3 = vweird.f32 %v6987_v62  ;;  %v6997_v29 = vand.u32 2147483647, %v6987_v62 }
0x3ac2   :  { %v8080_v15 = vpop.eup %8079  ;;  %v6963_v13 = vadd.f32 %v6938_v32, %v6879_v58 }
0x3ac3   :  { %v6968_v14 = vadd.f32 1.0, %v8080_v15  ;;  %v7000_v27 = vor.u32 1.1754944e-38, %v6999_v9  ;;  %vm6998_vm6 = vcmp.eq.f32.partialorder %v6997_v29, 8.507059e+37  ;;  %v7179_v29 = vpop.permute.xlu2 %7178 }
0x3ac5   :  { %8085 = vrcp.f32 %v6968_v14  ;;  %v6978_v44 = vand.u32 2147483647, %v6968_v14  ;;  %v6980_v12 = vand.u32 2147483648, %v6968_v14  ;;  %vm6974_vm2 = vweird.f32 %v6968_v14 }
0x3ac6   :  { %v8082_v47 = vpop.eup %8081 }
0x3ac7   :  { %v8084_v41 = vpop.eup %8083  ;;  %v7007_v3 = vadd.f32 1.0, %v8082_v47  ;;  %v6981_v57 = vor.u32 1.1754944e-38, %v6980_v12  ;;  %vm6979_vm8 = vcmp.eq.f32.partialorder %v6978_v44, 8.507059e+37 }
0x3ac8   :  { %v6989_v39 = vmul.f32 %v8084_v41, %v6987_v62  ;;  %vm6994_vm0 = vweird.f32 %v8084_v41 }
0x3ac9   :  { %8087 = vrcp.f32 %v7007_v3  ;;  %vm6995_vm13 = vmor %vm6993_vm3, %vm6994_vm0  ;;  %v7019_v7 = vand.u32 2147483648, %v7007_v3  ;;  %vm7013_vm11 = vweird.f32 %v7007_v3  ;;  %v7017_v1 = vand.u32 2147483647, %v7007_v3 }
0x3aca   :  { %v6990_v8 = vsub.f32 1.0, %v6989_v39  ;;  %8089 = vtanh.f32 %v6963_v13  ;;  %v7173_v13 = vpop.permute.xlu0 %7172 }
0x3acb   :  { %v8086_v6 = vpop.eup %8085  ;;  %v7020_v11 = vor.u32 1.1754944e-38, %v7019_v7  ;;  %vm7018_vm0 = vcmp.eq.f32.partialorder %v7017_v1, 8.507059e+37 }
0x3acc   :  { %v6991_v10 = vmul.f32 %v8084_v41, %v6990_v8  ;;  %v6970_v22 = vmul.f32 %v8086_v6, %v6968_v14  ;;  %vm6975_vm15 = vweird.f32 %v8086_v6 }
0x3acd   :  { %vm6976_vm7 = vmor %vm6974_vm2, %vm6975_vm15 }
0x3ace   :  { %v6971_v31 = vsub.f32 1.0, %v6970_v22  ;;  %v6992_v60 = vadd.f32 %v8084_v41, %v6991_v10 }
0x3acf   :  { %v8088_v34 = vpop.eup %8087 }
0x3ad0   :  { %v7009_v55 = vmul.f32 %v8088_v34, %v7007_v3  ;;  %v6972_v25 = vmul.f32 %v8086_v6, %v6971_v31  ;;  %v6996_v21 = vsel %vm6995_vm13, %v8084_v41, %v6992_v60  ;;  %v8090_v16 = vpop.eup %8089  ;;  %vm7014_vm9 = vweird.f32 %v8088_v34 }
0x3ad1   :  { %v7001_v37 = vsel %vm6998_vm6, %v7000_v27, %v6996_v21  ;;  %vm7015_vm12 = vmor %vm7013_vm11, %vm7014_vm9 }
0x3ad2   :  { %v7010_v36 = vsub.f32 1.0, %v7009_v55  ;;  %v6973_v19 = vadd.f32 %v8086_v6, %v6972_v25  ;;  %v7023_v48 = vmul.f32 %v7001_v37, %v10518_v30 }
0x3ad4   :  { %v6977_v50 = vsel %vm6976_vm7, %v8086_v6, %v6973_v19  ;;  %v7011_v17 = vmul.f32 %v8088_v34, %v7010_v36 }
0x3ad5   :  { %v6982_v43 = vsel %vm6979_vm8, %v6981_v57, %v6977_v50 }
0x3ad6   :  { %v7024_v42 = vmul.f32 %v8090_v16, %v6982_v43  ;;  %v7012_v23 = vadd.f32 %v8088_v34, %v7011_v17 }
0x3ad8   :  { %v7025_v18 = vadd.f32 %v7024_v42, %v7023_v48  ;;  %v7016_v53 = vsel %vm7015_vm12, %v8088_v34, %v7012_v23 }
0x3ad9   :  { %v7021_v35 = vsel %vm7018_vm0, %v7020_v11, %v7016_v53 }
0x3ada   :  { %8091 = vtanh.f32 %v7025_v18 }
0x3ae0   :  { %v8092_v38 = vpop.eup %8091 }
0x3ae1   :  { %v7027_v28 = vmul.f32 %v8092_v38, %v7021_v35 }
0x3ae3   :  { %7667 = vmatmul.msk.f32.vlgmr.msrb.gmra.mxu2 %vm210_vm4, %v7027_v28  ;;  %7669 = vmatmul.msk.f32.vlgmr.msra.gmra.mxu3 %vm210_vm4, %v7027_v28 }
0x3b66   :  { %v7048_v30 = vpop.f32.mrf.mxu2  ;;  %v7068_v4 = vpop.f32.mrf.mxu3 }
0x3b67   :  { %v7049_v26 = vadd.f32 %v7048_v30, %v9103_v63  ;;  %v7069_v45 = vadd.f32 %v7068_v4, %v9111_v54 }
0x3b69   :  { %vm7071_vm3 = vcmp.ge.f32.partialorder %v7049_v26, 0.0  ;;  %v7073_v56 = vmul.f32 %v7049_v26, %v9106_v46  ;;  %vm7072_vm13 = vcmp.ge.f32.partialorder %v7069_v45, 0.0  ;;  %v7074_v49 = vmul.f32 %v7069_v45, %v10788_v51 }
0x3b6b   :  { %v7075_v40 = vsel %vm7071_vm3, %v7049_v26, %v7073_v56  ;;  %v7076_v61 = vsel %vm7072_vm13, %v7069_v45, %v7074_v49 }
0x3b6c   :  { %7096 = vmatmul.f32.vlgmr.msra.gmra.mxu1 %v7075_v40  ;;  %7670 = vmatmul.msk.f32.vlgmr.msra.gmra.mxu0 %vm2631_vm10, %v7076_v61 }
0x3be9   :  { %v7097_v20 = vpop.f32.mrf.mxu1  ;;  %v7117_v5 = vpop.f32.mrf.mxu0 }
0x3bea   :  { %v7098_v24 = vadd.f32 %v10928_v0, %v7097_v20 }
0x3bec   :  { %v7118_v62 = vadd.f32 %v7117_v5, %v7098_v24 }
0x3bee   :  { %vm7120_vm15 = vcmp.ge.f32.partialorder %v7118_v62, 0.0  ;;  %v7121_v63 = vmul.f32 %v10929_v2, %v7118_v62 }
0x3bf0   :  { %v7122_v54 = vsel %vm7120_vm15, %v7118_v62, %v7121_v63 }
0x3bf1   :  { %7671 = vmatmul.msk.f32.vlgmr.msra.gmra.mxu2 %vm1702_vm5, %v7122_v54 }
0x3c74   :  { %v7143_v46 = vpop.f32.mrf.mxu2 }
0x3c75   :  { %v7144_v15 = vadd.f32 %v10931_v52, %v7143_v46  ;;  %v7157_v52 = vpop.permute.xlu1 %7156 }
0x3c77   :  { %7146 = vst.msk [vmem:[%s10647_s4 + $0x58] sm:$0xff] %vm210_vm4, %v7144_v15  ;;  %8093 = vtanh.f32 %v7144_v15  ;;  %v7147_v12 = vmul.f32 1.442695, %v7144_v15 }
0x3c7d   :  { %v8094_v51 = vpop.eup %8093 }
0x3c7e   :  { %v7150_v14 = vmul.f32 %v8094_v51, %v8094_v51  ;;  %v7159_v9 = vmul.f32 %v8094_v51, %v7157_v52 }
0x3c80   :  { %v7151_v0 = vsub.f32 1.0, %v7150_v14 }
0x3c82   :  { %v7152_v47 = vmax.f32 %v7151_v0, 1e-05 }
0x3c84   :  { %v7153_v41 = vmin.f32 %v7152_v47, 1.0 }
0x3c86   :  { %8095 = vrsqrt.f32 %v7153_v41  ;;  %vm7167_vm5 = vcmp.eq.f32.partialorder %v7153_v41, inf  ;;  %v7170_v6 = vand.u32 2147483648, %v7153_v41  ;;  %vm7169_vm4 = vcmp.eq.f32.partialorder %v7153_v41, 0.0 }
0x3c87   :  { %8097 = vpow2.f32 %v7147_v12 }
0x3c8c   :  { %v8096_v3 = vpop.eup %8095 }
0x3c8d   :  { %v7161_v2 = vmul.f32 %v8096_v3, %v7153_v41  ;;  %v8098_v55 = vpop.eup %8097 }
0x3c8f   :  { %v7162_v39 = vmul.f32 %v8096_v3, %v7161_v2 }
0x3c91   :  { %v7163_v32 = vmul.f32 0.5, %v7162_v39 }
0x3c93   :  { %v7164_v33 = vsub.f32 1.5, %v7163_v32 }
0x3c95   :  { %v7165_v58 = vmul.f32 %v8096_v3, %v7164_v33 }
0x3c97   :  { %v7166_v8 = vmul.f32 %v7165_v58, %v7153_v41 }
0x3c99   :  { %v7168_v10 = vsel %vm7167_vm5, %v7153_v41, %v7166_v8 }
0x3c9a   :  { %v7171_v22 = vsel %vm7169_vm4, %v7170_v6, %v7168_v10 }
0x3c9b   :  { %v7175_v31 = vmul.f32 %v7173_v13, %v7171_v22 }
0x3c9d   :  { %v7176_v60 = vadd.f32 %v7175_v31, %v7159_v9 }
0x3c9f   :  { %7183 = vperm.xlu1 %7687, %v7176_v60  }
0x3d11   :  { %v7184_v34 = vpop.permute.xlu1 %7183 }
0x3d12   :  { %v7186_v44 = vsel %vm2710_vm14, %v7179_v29, %v7184_v34 }
0x3d13   :  { %7188 = vrot.lane.b32.xlu0 %v7186_v44, %s8282_s23 }
0x3d85   :  { %v7189_v25 = vpop.permute.xlu0 %7188 }
0x3d86   :  { %v7191_v21 = vmul.f32 %v8098_v55, %v7189_v25 }
0x3d88   :  { %7193 = vrot.lane.b32.xlu2 %v7191_v21, %s8283_s24 }
0x3de2   :  { %v7194_v27 = vpop.permute.xlu2 %7193 }
0x3de3   :  { %v7196_v36 = vadd.f32 %v7194_v27, %v7144_v15 }
0x3de5   :  { %7197 = vst.msk [vmem:[%s10648_s5 + $0x60] sm:$0xff] %vm46_vm1, %v7196_v36 }
0x3de6   :  { %7206 = vsyncpa [#allocation3], 1 }

</bundles_post_ra>
